<compile_context>
chip_gen: v5e
topology: v5e:2x2
jax: 0.10.0
libtpu: 0.0.40
codegen_flags: <defaults>
</compile_context>

<pallas_src>
import functools

import jax
import jax.numpy as jnp
from jax import lax
from jax.experimental import pallas as pl
from jax.experimental.pallas import tpu as pltpu

LANE = 128


def _round_up(x, m):
    return (x + m - 1) // m * m


def _pick_chunk_rows(H, W_p, target_flat_rows=160):
    """Largest image-row count dividing H with chunk <= target flat rows."""
    best = 1
    for ch in range(1, H + 1):
        if H % ch == 0 and ch * W_p <= target_flat_rows:
            best = ch
    return best


def _basic_block_kernel(mask_ref, x_ref, w1_ref, b1_ref, w2_ref, b2_ref,
                        out_ref, h_ref, *, H, W, CH):
    """Fused out = relu(conv2(relu(conv1(x)*s1+b1))*s2+b2 + x) for one image.

    Layouts (per batch element, Cp = channels padded to 128):
      mask_ref: (H*W_p, 1)   f32 0/1 interior-column mask (wrapper-built).
      x_ref   : (H_p*W_p+2, Cp) bf16 zero-padded image (1-px spatial halo),
                row-major flattened over (H_p, W_p), plus one extra zero row
                at each end so every 3x3 tap is an in-bounds flat row offset.
      w*_ref  : (9, Cp, Cp) bf16 per-tap weights, BN scale already folded.
      b*_ref  : (1, Cp)     f32 folded BN bias.
      out_ref : (H*W_p, Cp) f32 result on padded-grid rows 1..H (padding
                columns sliced off by the wrapper).
      h_ref   : scratch, same extended layout as x_ref, bf16 — VMEM-resident
                intermediate relu(bn1(conv1(x))).
    """
    W_p = W + 2
    n_rows = H * W_p                       # computed flat positions
    halo = W_p + 1                         # extended-layout offset of row 1
    Cp = out_ref.shape[-1]
    CM = CH * W_p                          # flat rows per M-chunk (static)
    n_chunks = H // CH
    # Read-window start (in the extended flat layout) for tap (dy, dx).
    starts = [halo + (dy - 1) * W_p + (dx - 1)
              for dy in range(3) for dx in range(3)]

    # Scratch persists across grid steps: re-zero the halo rows of the
    # intermediate (cheap; intentionally NOT guarded by program_id == 0).
    h_ref[pl.ds(0, halo), :] = jnp.zeros((halo, Cp), h_ref.dtype)
    h_ref[pl.ds(halo + n_rows, halo), :] = jnp.zeros((halo, Cp), h_ref.dtype)

    b1 = b1_ref[...]                       # (1, Cp) f32
    b2 = b2_ref[...]                       # (1, Cp) f32

    # ---- conv1 (+ folded BN1) + ReLU -> bf16 intermediate in VMEM -----------
    # Fused SSA accumulation per chunk: partials stay in vregs / MXU result
    # buffer; exactly one VMEM store per chunk.
    for c in range(n_chunks):
        r0 = c * CM                                            # static offset
        acc = jnp.broadcast_to(b1, (CM, Cp))
        for t in range(9):
            acc = acc + jnp.dot(x_ref[pl.ds(starts[t] + r0, CM), :],
                                w1_ref[t],
                                preferred_element_type=jnp.float32)
        # ReLU (f32) and zero the spatial-padding columns so conv2 sees a
        # properly zero-padded intermediate (relu >= 0, so multiply == select).
        hv = jnp.maximum(acc, 0.0) * mask_ref[pl.ds(r0, CM), :]
        h_ref[pl.ds(halo + r0, CM), :] = hv.astype(h_ref.dtype)

    # ---- conv2 (+ folded BN2) + residual + ReLU -> out ----------------------
    for c in range(n_chunks):
        r0 = c * CM
        identity = x_ref[pl.ds(halo + r0, CM), :].astype(jnp.float32)
        acc = jnp.broadcast_to(b2, (CM, Cp)) + identity
        for t in range(9):
            acc = acc + jnp.dot(h_ref[pl.ds(starts[t] + r0, CM), :],
                                w2_ref[t],
                                preferred_element_type=jnp.float32)
        out_ref[pl.ds(r0, CM), :] = jnp.maximum(acc, 0.0).astype(out_ref.dtype)


def _fold_bn(gamma, beta, mean, var, eps=1e-5):
    scale = gamma / jnp.sqrt(var + eps)
    bias = beta - mean * scale
    return scale.astype(jnp.float32), bias.astype(jnp.float32)


def _prep_weights(w_hwio, scale, C, Cp):
    # Fold BN scale into the conv weights in f32 (output-channel axis of HWIO),
    # zero-pad channels to the lane-dense width, flatten the 3x3 taps, then
    # cast to bf16 for the MXU.
    w = w_hwio.astype(jnp.float32) * scale.reshape(1, 1, 1, -1)
    w = jnp.pad(w, ((0, 0), (0, 0), (0, Cp - C), (0, Cp - C)))
    return w.reshape(9, Cp, Cp).astype(jnp.bfloat16)


def basic_block_forward(x_nchw, params):
    """BasicBlock forward (inference).  x_nchw: (N, C, H, W) float32."""
    N, C, H, W = x_nchw.shape
    Cp = _round_up(C, LANE)
    H_p, W_p = H + 2, W + 2
    n_rows = H * W_p
    n_ext = H_p * W_p + 2
    CH = _pick_chunk_rows(H, W_p)

    s1, b1 = _fold_bn(params["bn1_gamma"], params["bn1_beta"],
                      params["bn1_mean"], params["bn1_var"])
    s2, b2 = _fold_bn(params["bn2_gamma"], params["bn2_beta"],
                      params["bn2_mean"], params["bn2_var"])
    w1 = _prep_weights(params["w1_hwio"], s1, C, Cp)
    w2 = _prep_weights(params["w2_hwio"], s2, C, Cp)
    b1 = jnp.pad(b1.reshape(1, -1), ((0, 0), (0, Cp - C)))
    b2 = jnp.pad(b2.reshape(1, -1), ((0, 0), (0, Cp - C)))

    # Single layout-prep pass: NCHW -> NHWC, 1-px spatial zero halo, channel
    # pad to 128 lanes, flatten (H_p, W_p), add one extra zero row per end so
    # all nine taps are in-bounds flat row offsets, and cast to bf16 (halves
    # the HBM DMA bytes for the activation stream).
    x_nhwc = jnp.transpose(x_nchw, (0, 2, 3, 1))
    xp = jnp.pad(x_nhwc, ((0, 0), (1, 1), (1, 1), (0, Cp - C)))
    xe = jnp.pad(xp.reshape(N, H_p * W_p, Cp), ((0, 0), (1, 1), (0, 0)))
    xe = xe.astype(jnp.bfloat16)

    # Wrapper-precomputed interior-column (non-padding) mask per flat row.
    col = jnp.arange(n_rows, dtype=jnp.int32) % W_p
    mask = ((col > 0) & (col < W_p - 1)).astype(jnp.float32).reshape(n_rows, 1)

    kernel = functools.partial(_basic_block_kernel, H=H, W=W, CH=CH)
    out_flat = pl.pallas_call(
        kernel,
        out_shape=jax.ShapeDtypeStruct((N, n_rows, Cp), jnp.float32),
        grid_spec=pltpu.PrefetchScalarGridSpec(
            num_scalar_prefetch=0,
            grid=(N,),
            in_specs=[
                pl.BlockSpec((n_rows, 1), lambda n: (0, 0)),        # mask
                pl.BlockSpec((None, n_ext, Cp), lambda n: (n, 0, 0)),  # x
                pl.BlockSpec((9, Cp, Cp), lambda n: (0, 0, 0)),     # w1 (bf16)
                pl.BlockSpec((1, Cp), lambda n: (0, 0)),            # b1
                pl.BlockSpec((9, Cp, Cp), lambda n: (0, 0, 0)),     # w2 (bf16)
                pl.BlockSpec((1, Cp), lambda n: (0, 0)),            # b2
            ],
            out_specs=pl.BlockSpec((None, n_rows, Cp), lambda n: (n, 0, 0)),
            scratch_shapes=[
                pltpu.VMEM((n_ext, Cp), jnp.bfloat16),  # VMEM intermediate h
            ],
        ),
        compiler_params=pltpu.CompilerParams(
            dimension_semantics=("parallel",),          # batch -> both TCs
            vmem_limit_bytes=32 * 1024 * 1024,
        ),
    )(mask, xe, w1, b1, w2, b2)

    # Drop padding columns / padded channels, back to NCHW.
    out = out_flat.reshape(N, H, W_p, Cp)[:, :, 1:W + 1, :C]
    return jnp.transpose(out, (0, 3, 1, 2))


def _reference_forward(x_nchw, params):
    """Pure-JAX f32 reference (lax conv, faithful BasicBlock eval semantics)."""
    x = jnp.transpose(x_nchw, (0, 2, 3, 1))
    dn = ("NHWC", "HWIO", "NHWC")

    def conv(v, w):
        return lax.conv_general_dilated(v, w, window_strides=(1, 1),
                                        padding="SAME", dimension_numbers=dn)

    s1, b1 = _fold_bn(params["bn1_gamma"], params["bn1_beta"],
                      params["bn1_mean"], params["bn1_var"])
    s2, b2 = _fold_bn(params["bn2_gamma"], params["bn2_beta"],
                      params["bn2_mean"], params["bn2_var"])
    out = jnp.maximum(conv(x, params["w1_hwio"]) * s1 + b1, 0.0)
    out = conv(out, params["w2_hwio"]) * s2 + b2
    out = jnp.maximum(out + x, 0.0)
    return jnp.transpose(out, (0, 3, 1, 2))


def make_params(key, inplanes, planes):
    ks = jax.random.split(key, 10)
    # Conv weights in HWIO (3, 3, Cin, Cout); synthetic deterministic params.
    w1 = jax.random.normal(ks[0], (3, 3, inplanes, planes), jnp.float32) * 0.1
    w2 = jax.random.normal(ks[1], (3, 3, planes, planes), jnp.float32) * 0.1
    return {
        "w1_hwio": w1,
        "w2_hwio": w2,
        "bn1_gamma": 1.0 + 0.1 * jax.random.normal(ks[2], (planes,), jnp.float32),
        "bn1_beta": 0.1 * jax.random.normal(ks[3], (planes,), jnp.float32),
        "bn1_mean": 0.1 * jax.random.normal(ks[4], (planes,), jnp.float32),
        "bn1_var": jnp.abs(jax.random.normal(ks[5], (planes,), jnp.float32)) + 0.5,
        "bn2_gamma": 1.0 + 0.1 * jax.random.normal(ks[6], (planes,), jnp.float32),
        "bn2_beta": 0.1 * jax.random.normal(ks[7], (planes,), jnp.float32),
        "bn2_mean": 0.1 * jax.random.normal(ks[8], (planes,), jnp.float32),
        "bn2_var": jnp.abs(jax.random.normal(ks[9], (planes,), jnp.float32)) + 0.5,
    }


if __name__ == "__main__":
    key = jax.random.PRNGKey(0)
    k_x, k_p = jax.random.split(key)

    N, C, H, W = 2, 8, 16, 16            # inplanes == planes (identity shortcut)
    x = jax.random.normal(k_x, (N, C, H, W), jnp.float32)
    params = make_params(k_p, inplanes=C, planes=C)

    out = jax.jit(basic_block_forward)(x, params)
    out = jax.block_until_ready(out)

    ref = _reference_forward(x, params)
    assert out.shape == (N, C, H, W)
    # Tolerance loosened vs the pure-f32 version: MXU operands are bf16 now.
    assert jnp.allclose(out, ref, rtol=5e-2, atol=5e-2), "mismatch vs reference"

    print("KERNEL_OK")
</pallas_src>

<mosaic_0001>
module attributes {stable_mosaic.version = 11 : i64} {
  func.func @_basic_block_kernel(%arg0: i32, %arg1: memref<288x1xf32, #tpu.memory_space<vmem>>, %arg2: memref<1x326x128xbf16, #tpu.memory_space<vmem>>, %arg3: memref<9x128x128xbf16, #tpu.memory_space<vmem>>, %arg4: memref<1x128xf32, #tpu.memory_space<vmem>>, %arg5: memref<9x128x128xbf16, #tpu.memory_space<vmem>>, %arg6: memref<1x128xf32, #tpu.memory_space<vmem>>, %arg7: memref<1x288x128xf32, #tpu.memory_space<vmem>>, %arg8: memref<326x128xbf16, #tpu.memory_space<vmem>>) attributes {dimension_semantics = [#tpu.dimension_semantics<parallel>], iteration_bounds = array<i64: 2>, scalar_prefetch = 0 : i64, scratch_operands = 1 : i64, tpu.core_type = #tpu.core_type<tc>, window_params = [{pipeline_mode = #tpu.pipeline_mode<synchronous>, transform_indices = @transform_0, window_bounds = array<i64: 288, 1>}, {transform_indices = @transform_1, window_bounds = array<i64: 1, 326, 128>}, {pipeline_mode = #tpu.pipeline_mode<synchronous>, transform_indices = @transform_2, window_bounds = array<i64: 9, 128, 128>}, {pipeline_mode = #tpu.pipeline_mode<synchronous>, transform_indices = @transform_3, window_bounds = array<i64: 1, 128>}, {pipeline_mode = #tpu.pipeline_mode<synchronous>, transform_indices = @transform_4, window_bounds = array<i64: 9, 128, 128>}, {pipeline_mode = #tpu.pipeline_mode<synchronous>, transform_indices = @transform_5, window_bounds = array<i64: 1, 128>}, {transform_indices = @transform_6, window_bounds = array<i64: 1, 288, 128>}]} {
    %cst = arith.constant 0.000000e+00 : bf16
    %0 = vector.broadcast %cst : bf16 to vector<19x128xbf16>
    %c0 = arith.constant 0 : index
    %c0_0 = arith.constant 0 : index
    %1 = vector.load %arg8[%c0, %c0_0] : memref<326x128xbf16, #tpu.memory_space<vmem>>, vector<19x128xbf16>
    tpu.vector_store %arg8[%c0, %c0_0], %0 {strides = array<i32>} : memref<326x128xbf16, #tpu.memory_space<vmem>>, vector<19x128xbf16>,
    %cst_1 = arith.constant 0.000000e+00 : bf16
    %2 = vector.broadcast %cst_1 : bf16 to vector<19x128xbf16>
    %c307 = arith.constant 307 : index
    %c0_2 = arith.constant 0 : index
    %3 = vector.load %arg8[%c307, %c0_2] : memref<326x128xbf16, #tpu.memory_space<vmem>>, vector<19x128xbf16>
    tpu.vector_store %arg8[%c307, %c0_2], %2 {strides = array<i32>} : memref<326x128xbf16, #tpu.memory_space<vmem>>, vector<19x128xbf16>,
    %c0_3 = arith.constant 0 : index
    %c0_4 = arith.constant 0 : index
    %4 = vector.load %arg4[%c0_3, %c0_4] : memref<1x128xf32, #tpu.memory_space<vmem>>, vector<1x128xf32>
    %c0_5 = arith.constant 0 : index
    %c0_6 = arith.constant 0 : index
    %5 = vector.load %arg6[%c0_5, %c0_6] : memref<1x128xf32, #tpu.memory_space<vmem>>, vector<1x128xf32>
    %6 = vector.shape_cast %4 : vector<1x128xf32> to vector<1x128xf32>
    %7 = vector.broadcast %6 : vector<1x128xf32> to vector<144x128xf32>
    %c0_7 = arith.constant 0 : index
    %c0_8 = arith.constant 0 : index
    %c0_9 = arith.constant 0 : index
    %8 = vector.load %arg2[%c0_7, %c0_8, %c0_9] : memref<1x326x128xbf16, #tpu.memory_space<vmem>>, vector<1x144x128xbf16>
    %9 = vector.shape_cast %8 : vector<1x144x128xbf16> to vector<144x128xbf16>
    %c0_10 = arith.constant 0 : index
    %c0_11 = arith.constant 0 : index
    %c0_12 = arith.constant 0 : index
    %10 = vector.load %arg3[%c0_10, %c0_11, %c0_12] : memref<9x128x128xbf16, #tpu.memory_space<vmem>>, vector<1x128x128xbf16>
    %11 = vector.shape_cast %10 : vector<1x128x128xbf16> to vector<128x128xbf16>
    %cst_13 = arith.constant dense<0.000000e+00> : vector<144x128xf32>
    %12 = tpu.matmul %9, %11, %cst_13 {dimension_numbers = #tpu.dot_dimension_numbers<[1], [0], [0], [1], [0, 0, 1, 1], [], []>} : vector<144x128xbf16>, vector<128x128xbf16>, vector<144x128xf32> -> vector<144x128xf32>
    %13 = arith.addf %7, %12 : vector<144x128xf32>
    %c0_14 = arith.constant 0 : index
    %c1 = arith.constant 1 : index
    %c0_15 = arith.constant 0 : index
    %14 = vector.load %arg2[%c0_14, %c1, %c0_15] : memref<1x326x128xbf16, #tpu.memory_space<vmem>>, vector<1x144x128xbf16>
    %15 = vector.shape_cast %14 : vector<1x144x128xbf16> to vector<144x128xbf16>
    %c1_16 = arith.constant 1 : index
    %c0_17 = arith.constant 0 : index
    %c0_18 = arith.constant 0 : index
    %16 = vector.load %arg3[%c1_16, %c0_17, %c0_18] : memref<9x128x128xbf16, #tpu.memory_space<vmem>>, vector<1x128x128xbf16>
    %17 = vector.shape_cast %16 : vector<1x128x128xbf16> to vector<128x128xbf16>
    %cst_19 = arith.constant dense<0.000000e+00> : vector<144x128xf32>
    %18 = tpu.matmul %15, %17, %cst_19 {dimension_numbers = #tpu.dot_dimension_numbers<[1], [0], [0], [1], [0, 0, 1, 1], [], []>} : vector<144x128xbf16>, vector<128x128xbf16>, vector<144x128xf32> -> vector<144x128xf32>
    %19 = arith.addf %13, %18 : vector<144x128xf32>
    %c0_20 = arith.constant 0 : index
    %c2 = arith.constant 2 : index
    %c0_21 = arith.constant 0 : index
    %20 = vector.load %arg2[%c0_20, %c2, %c0_21] : memref<1x326x128xbf16, #tpu.memory_space<vmem>>, vector<1x144x128xbf16>
    %21 = vector.shape_cast %20 : vector<1x144x128xbf16> to vector<144x128xbf16>
    %c2_22 = arith.constant 2 : index
    %c0_23 = arith.constant 0 : index
    %c0_24 = arith.constant 0 : index
    %22 = vector.load %arg3[%c2_22, %c0_23, %c0_24] : memref<9x128x128xbf16, #tpu.memory_space<vmem>>, vector<1x128x128xbf16>
    %23 = vector.shape_cast %22 : vector<1x128x128xbf16> to vector<128x128xbf16>
    %cst_25 = arith.constant dense<0.000000e+00> : vector<144x128xf32>
    %24 = tpu.matmul %21, %23, %cst_25 {dimension_numbers = #tpu.dot_dimension_numbers<[1], [0], [0], [1], [0, 0, 1, 1], [], []>} : vector<144x128xbf16>, vector<128x128xbf16>, vector<144x128xf32> -> vector<144x128xf32>
    %25 = arith.addf %19, %24 : vector<144x128xf32>
    %c0_26 = arith.constant 0 : index
    %c18 = arith.constant 18 : index
    %c0_27 = arith.constant 0 : index
    %26 = vector.load %arg2[%c0_26, %c18, %c0_27] : memref<1x326x128xbf16, #tpu.memory_space<vmem>>, vector<1x144x128xbf16>
    %27 = vector.shape_cast %26 : vector<1x144x128xbf16> to vector<144x128xbf16>
    %c3 = arith.constant 3 : index
    %c0_28 = arith.constant 0 : index
    %c0_29 = arith.constant 0 : index
    %28 = vector.load %arg3[%c3, %c0_28, %c0_29] : memref<9x128x128xbf16, #tpu.memory_space<vmem>>, vector<1x128x128xbf16>
    %29 = vector.shape_cast %28 : vector<1x128x128xbf16> to vector<128x128xbf16>
    %cst_30 = arith.constant dense<0.000000e+00> : vector<144x128xf32>
    %30 = tpu.matmul %27, %29, %cst_30 {dimension_numbers = #tpu.dot_dimension_numbers<[1], [0], [0], [1], [0, 0, 1, 1], [], []>} : vector<144x128xbf16>, vector<128x128xbf16>, vector<144x128xf32> -> vector<144x128xf32>
    %31 = arith.addf %25, %30 : vector<144x128xf32>
    %c0_31 = arith.constant 0 : index
    %c19 = arith.constant 19 : index
    %c0_32 = arith.constant 0 : index
    %32 = vector.load %arg2[%c0_31, %c19, %c0_32] : memref<1x326x128xbf16, #tpu.memory_space<vmem>>, vector<1x144x128xbf16>
    %33 = vector.shape_cast %32 : vector<1x144x128xbf16> to vector<144x128xbf16>
    %c4 = arith.constant 4 : index
    %c0_33 = arith.constant 0 : index
    %c0_34 = arith.constant 0 : index
    %34 = vector.load %arg3[%c4, %c0_33, %c0_34] : memref<9x128x128xbf16, #tpu.memory_space<vmem>>, vector<1x128x128xbf16>
    %35 = vector.shape_cast %34 : vector<1x128x128xbf16> to vector<128x128xbf16>
    %cst_35 = arith.constant dense<0.000000e+00> : vector<144x128xf32>
    %36 = tpu.matmul %33, %35, %cst_35 {dimension_numbers = #tpu.dot_dimension_numbers<[1], [0], [0], [1], [0, 0, 1, 1], [], []>} : vector<144x128xbf16>, vector<128x128xbf16>, vector<144x128xf32> -> vector<144x128xf32>
    %37 = arith.addf %31, %36 : vector<144x128xf32>
    %c0_36 = arith.constant 0 : index
    %c20 = arith.constant 20 : index
    %c0_37 = arith.constant 0 : index
    %38 = vector.load %arg2[%c0_36, %c20, %c0_37] : memref<1x326x128xbf16, #tpu.memory_space<vmem>>, vector<1x144x128xbf16>
    %39 = vector.shape_cast %38 : vector<1x144x128xbf16> to vector<144x128xbf16>
    %c5 = arith.constant 5 : index
    %c0_38 = arith.constant 0 : index
    %c0_39 = arith.constant 0 : index
    %40 = vector.load %arg3[%c5, %c0_38, %c0_39] : memref<9x128x128xbf16, #tpu.memory_space<vmem>>, vector<1x128x128xbf16>
    %41 = vector.shape_cast %40 : vector<1x128x128xbf16> to vector<128x128xbf16>
    %cst_40 = arith.constant dense<0.000000e+00> : vector<144x128xf32>
    %42 = tpu.matmul %39, %41, %cst_40 {dimension_numbers = #tpu.dot_dimension_numbers<[1], [0], [0], [1], [0, 0, 1, 1], [], []>} : vector<144x128xbf16>, vector<128x128xbf16>, vector<144x128xf32> -> vector<144x128xf32>
    %43 = arith.addf %37, %42 : vector<144x128xf32>
    %c0_41 = arith.constant 0 : index
    %c36 = arith.constant 36 : index
    %c0_42 = arith.constant 0 : index
    %44 = vector.load %arg2[%c0_41, %c36, %c0_42] : memref<1x326x128xbf16, #tpu.memory_space<vmem>>, vector<1x144x128xbf16>
    %45 = vector.shape_cast %44 : vector<1x144x128xbf16> to vector<144x128xbf16>
    %c6 = arith.constant 6 : index
    %c0_43 = arith.constant 0 : index
    %c0_44 = arith.constant 0 : index
    %46 = vector.load %arg3[%c6, %c0_43, %c0_44] : memref<9x128x128xbf16, #tpu.memory_space<vmem>>, vector<1x128x128xbf16>
    %47 = vector.shape_cast %46 : vector<1x128x128xbf16> to vector<128x128xbf16>
    %cst_45 = arith.constant dense<0.000000e+00> : vector<144x128xf32>
    %48 = tpu.matmul %45, %47, %cst_45 {dimension_numbers = #tpu.dot_dimension_numbers<[1], [0], [0], [1], [0, 0, 1, 1], [], []>} : vector<144x128xbf16>, vector<128x128xbf16>, vector<144x128xf32> -> vector<144x128xf32>
    %49 = arith.addf %43, %48 : vector<144x128xf32>
    %c0_46 = arith.constant 0 : index
    %c37 = arith.constant 37 : index
    %c0_47 = arith.constant 0 : index
    %50 = vector.load %arg2[%c0_46, %c37, %c0_47] : memref<1x326x128xbf16, #tpu.memory_space<vmem>>, vector<1x144x128xbf16>
    %51 = vector.shape_cast %50 : vector<1x144x128xbf16> to vector<144x128xbf16>
    %c7 = arith.constant 7 : index
    %c0_48 = arith.constant 0 : index
    %c0_49 = arith.constant 0 : index
    %52 = vector.load %arg3[%c7, %c0_48, %c0_49] : memref<9x128x128xbf16, #tpu.memory_space<vmem>>, vector<1x128x128xbf16>
    %53 = vector.shape_cast %52 : vector<1x128x128xbf16> to vector<128x128xbf16>
    %cst_50 = arith.constant dense<0.000000e+00> : vector<144x128xf32>
    %54 = tpu.matmul %51, %53, %cst_50 {dimension_numbers = #tpu.dot_dimension_numbers<[1], [0], [0], [1], [0, 0, 1, 1], [], []>} : vector<144x128xbf16>, vector<128x128xbf16>, vector<144x128xf32> -> vector<144x128xf32>
    %55 = arith.addf %49, %54 : vector<144x128xf32>
    %c0_51 = arith.constant 0 : index
    %c38 = arith.constant 38 : index
    %c0_52 = arith.constant 0 : index
    %56 = vector.load %arg2[%c0_51, %c38, %c0_52] : memref<1x326x128xbf16, #tpu.memory_space<vmem>>, vector<1x144x128xbf16>
    %57 = vector.shape_cast %56 : vector<1x144x128xbf16> to vector<144x128xbf16>
    %c8 = arith.constant 8 : index
    %c0_53 = arith.constant 0 : index
    %c0_54 = arith.constant 0 : index
    %58 = vector.load %arg3[%c8, %c0_53, %c0_54] : memref<9x128x128xbf16, #tpu.memory_space<vmem>>, vector<1x128x128xbf16>
    %59 = vector.shape_cast %58 : vector<1x128x128xbf16> to vector<128x128xbf16>
    %cst_55 = arith.constant dense<0.000000e+00> : vector<144x128xf32>
    %60 = tpu.matmul %57, %59, %cst_55 {dimension_numbers = #tpu.dot_dimension_numbers<[1], [0], [0], [1], [0, 0, 1, 1], [], []>} : vector<144x128xbf16>, vector<128x128xbf16>, vector<144x128xf32> -> vector<144x128xf32>
    %61 = arith.addf %55, %60 : vector<144x128xf32>
    %cst_56 = arith.constant 0.000000e+00 : f32
    %62 = vector.broadcast %cst_56 : f32 to vector<144x128xf32>
    %63 = arith.maximumf %61, %62 : vector<144x128xf32>
    %c0_57 = arith.constant 0 : index
    %c0_58 = arith.constant 0 : index
    %64 = vector.load %arg1[%c0_57, %c0_58] : memref<288x1xf32, #tpu.memory_space<vmem>>, vector<144x1xf32>
    %65 = vector.broadcast %64 : vector<144x1xf32> to vector<144x128xf32>
    %66 = arith.mulf %63, %65 : vector<144x128xf32>
    %67 = arith.truncf %66 : vector<144x128xf32> to vector<144x128xbf16>
    %c19_59 = arith.constant 19 : index
    %c0_60 = arith.constant 0 : index
    %68 = vector.load %arg8[%c19_59, %c0_60] : memref<326x128xbf16, #tpu.memory_space<vmem>>, vector<144x128xbf16>
    tpu.vector_store %arg8[%c19_59, %c0_60], %67 {strides = array<i32>} : memref<326x128xbf16, #tpu.memory_space<vmem>>, vector<144x128xbf16>,
    %69 = vector.shape_cast %4 : vector<1x128xf32> to vector<1x128xf32>
    %70 = vector.broadcast %69 : vector<1x128xf32> to vector<144x128xf32>
    %c0_61 = arith.constant 0 : index
    %c144 = arith.constant 144 : index
    %c0_62 = arith.constant 0 : index
    %71 = vector.load %arg2[%c0_61, %c144, %c0_62] : memref<1x326x128xbf16, #tpu.memory_space<vmem>>, vector<1x144x128xbf16>
    %72 = vector.shape_cast %71 : vector<1x144x128xbf16> to vector<144x128xbf16>
    %c0_63 = arith.constant 0 : index
    %c0_64 = arith.constant 0 : index
    %c0_65 = arith.constant 0 : index
    %73 = vector.load %arg3[%c0_63, %c0_64, %c0_65] : memref<9x128x128xbf16, #tpu.memory_space<vmem>>, vector<1x128x128xbf16>
    %74 = vector.shape_cast %73 : vector<1x128x128xbf16> to vector<128x128xbf16>
    %cst_66 = arith.constant dense<0.000000e+00> : vector<144x128xf32>
    %75 = tpu.matmul %72, %74, %cst_66 {dimension_numbers = #tpu.dot_dimension_numbers<[1], [0], [0], [1], [0, 0, 1, 1], [], []>} : vector<144x128xbf16>, vector<128x128xbf16>, vector<144x128xf32> -> vector<144x128xf32>
    %76 = arith.addf %70, %75 : vector<144x128xf32>
    %c0_67 = arith.constant 0 : index
    %c145 = arith.constant 145 : index
    %c0_68 = arith.constant 0 : index
    %77 = vector.load %arg2[%c0_67, %c145, %c0_68] : memref<1x326x128xbf16, #tpu.memory_space<vmem>>, vector<1x144x128xbf16>
    %78 = vector.shape_cast %77 : vector<1x144x128xbf16> to vector<144x128xbf16>
    %c1_69 = arith.constant 1 : index
    %c0_70 = arith.constant 0 : index
    %c0_71 = arith.constant 0 : index
    %79 = vector.load %arg3[%c1_69, %c0_70, %c0_71] : memref<9x128x128xbf16, #tpu.memory_space<vmem>>, vector<1x128x128xbf16>
    %80 = vector.shape_cast %79 : vector<1x128x128xbf16> to vector<128x128xbf16>
    %cst_72 = arith.constant dense<0.000000e+00> : vector<144x128xf32>
    %81 = tpu.matmul %78, %80, %cst_72 {dimension_numbers = #tpu.dot_dimension_numbers<[1], [0], [0], [1], [0, 0, 1, 1], [], []>} : vector<144x128xbf16>, vector<128x128xbf16>, vector<144x128xf32> -> vector<144x128xf32>
    %82 = arith.addf %76, %81 : vector<144x128xf32>
    %c0_73 = arith.constant 0 : index
    %c146 = arith.constant 146 : index
    %c0_74 = arith.constant 0 : index
    %83 = vector.load %arg2[%c0_73, %c146, %c0_74] : memref<1x326x128xbf16, #tpu.memory_space<vmem>>, vector<1x144x128xbf16>
    %84 = vector.shape_cast %83 : vector<1x144x128xbf16> to vector<144x128xbf16>
    %c2_75 = arith.constant 2 : index
    %c0_76 = arith.constant 0 : index
    %c0_77 = arith.constant 0 : index
    %85 = vector.load %arg3[%c2_75, %c0_76, %c0_77] : memref<9x128x128xbf16, #tpu.memory_space<vmem>>, vector<1x128x128xbf16>
    %86 = vector.shape_cast %85 : vector<1x128x128xbf16> to vector<128x128xbf16>
    %cst_78 = arith.constant dense<0.000000e+00> : vector<144x128xf32>
    %87 = tpu.matmul %84, %86, %cst_78 {dimension_numbers = #tpu.dot_dimension_numbers<[1], [0], [0], [1], [0, 0, 1, 1], [], []>} : vector<144x128xbf16>, vector<128x128xbf16>, vector<144x128xf32> -> vector<144x128xf32>
    %88 = arith.addf %82, %87 : vector<144x128xf32>
    %c0_79 = arith.constant 0 : index
    %c162 = arith.constant 162 : index
    %c0_80 = arith.constant 0 : index
    %89 = vector.load %arg2[%c0_79, %c162, %c0_80] : memref<1x326x128xbf16, #tpu.memory_space<vmem>>, vector<1x144x128xbf16>
    %90 = vector.shape_cast %89 : vector<1x144x128xbf16> to vector<144x128xbf16>
    %c3_81 = arith.constant 3 : index
    %c0_82 = arith.constant 0 : index
    %c0_83 = arith.constant 0 : index
    %91 = vector.load %arg3[%c3_81, %c0_82, %c0_83] : memref<9x128x128xbf16, #tpu.memory_space<vmem>>, vector<1x128x128xbf16>
    %92 = vector.shape_cast %91 : vector<1x128x128xbf16> to vector<128x128xbf16>
    %cst_84 = arith.constant dense<0.000000e+00> : vector<144x128xf32>
    %93 = tpu.matmul %90, %92, %cst_84 {dimension_numbers = #tpu.dot_dimension_numbers<[1], [0], [0], [1], [0, 0, 1, 1], [], []>} : vector<144x128xbf16>, vector<128x128xbf16>, vector<144x128xf32> -> vector<144x128xf32>
    %94 = arith.addf %88, %93 : vector<144x128xf32>
    %c0_85 = arith.constant 0 : index
    %c163 = arith.constant 163 : index
    %c0_86 = arith.constant 0 : index
    %95 = vector.load %arg2[%c0_85, %c163, %c0_86] : memref<1x326x128xbf16, #tpu.memory_space<vmem>>, vector<1x144x128xbf16>
    %96 = vector.shape_cast %95 : vector<1x144x128xbf16> to vector<144x128xbf16>
    %c4_87 = arith.constant 4 : index
    %c0_88 = arith.constant 0 : index
    %c0_89 = arith.constant 0 : index
    %97 = vector.load %arg3[%c4_87, %c0_88, %c0_89] : memref<9x128x128xbf16, #tpu.memory_space<vmem>>, vector<1x128x128xbf16>
    %98 = vector.shape_cast %97 : vector<1x128x128xbf16> to vector<128x128xbf16>
    %cst_90 = arith.constant dense<0.000000e+00> : vector<144x128xf32>
    %99 = tpu.matmul %96, %98, %cst_90 {dimension_numbers = #tpu.dot_dimension_numbers<[1], [0], [0], [1], [0, 0, 1, 1], [], []>} : vector<144x128xbf16>, vector<128x128xbf16>, vector<144x128xf32> -> vector<144x128xf32>
    %100 = arith.addf %94, %99 : vector<144x128xf32>
    %c0_91 = arith.constant 0 : index
    %c164 = arith.constant 164 : index
    %c0_92 = arith.constant 0 : index
    %101 = vector.load %arg2[%c0_91, %c164, %c0_92] : memref<1x326x128xbf16, #tpu.memory_space<vmem>>, vector<1x144x128xbf16>
    %102 = vector.shape_cast %101 : vector<1x144x128xbf16> to vector<144x128xbf16>
    %c5_93 = arith.constant 5 : index
    %c0_94 = arith.constant 0 : index
    %c0_95 = arith.constant 0 : index
    %103 = vector.load %arg3[%c5_93, %c0_94, %c0_95] : memref<9x128x128xbf16, #tpu.memory_space<vmem>>, vector<1x128x128xbf16>
    %104 = vector.shape_cast %103 : vector<1x128x128xbf16> to vector<128x128xbf16>
    %cst_96 = arith.constant dense<0.000000e+00> : vector<144x128xf32>
    %105 = tpu.matmul %102, %104, %cst_96 {dimension_numbers = #tpu.dot_dimension_numbers<[1], [0], [0], [1], [0, 0, 1, 1], [], []>} : vector<144x128xbf16>, vector<128x128xbf16>, vector<144x128xf32> -> vector<144x128xf32>
    %106 = arith.addf %100, %105 : vector<144x128xf32>
    %c0_97 = arith.constant 0 : index
    %c180 = arith.constant 180 : index
    %c0_98 = arith.constant 0 : index
    %107 = vector.load %arg2[%c0_97, %c180, %c0_98] : memref<1x326x128xbf16, #tpu.memory_space<vmem>>, vector<1x144x128xbf16>
    %108 = vector.shape_cast %107 : vector<1x144x128xbf16> to vector<144x128xbf16>
    %c6_99 = arith.constant 6 : index
    %c0_100 = arith.constant 0 : index
    %c0_101 = arith.constant 0 : index
    %109 = vector.load %arg3[%c6_99, %c0_100, %c0_101] : memref<9x128x128xbf16, #tpu.memory_space<vmem>>, vector<1x128x128xbf16>
    %110 = vector.shape_cast %109 : vector<1x128x128xbf16> to vector<128x128xbf16>
    %cst_102 = arith.constant dense<0.000000e+00> : vector<144x128xf32>
    %111 = tpu.matmul %108, %110, %cst_102 {dimension_numbers = #tpu.dot_dimension_numbers<[1], [0], [0], [1], [0, 0, 1, 1], [], []>} : vector<144x128xbf16>, vector<128x128xbf16>, vector<144x128xf32> -> vector<144x128xf32>
    %112 = arith.addf %106, %111 : vector<144x128xf32>
    %c0_103 = arith.constant 0 : index
    %c181 = arith.constant 181 : index
    %c0_104 = arith.constant 0 : index
    %113 = vector.load %arg2[%c0_103, %c181, %c0_104] : memref<1x326x128xbf16, #tpu.memory_space<vmem>>, vector<1x144x128xbf16>
    %114 = vector.shape_cast %113 : vector<1x144x128xbf16> to vector<144x128xbf16>
    %c7_105 = arith.constant 7 : index
    %c0_106 = arith.constant 0 : index
    %c0_107 = arith.constant 0 : index
    %115 = vector.load %arg3[%c7_105, %c0_106, %c0_107] : memref<9x128x128xbf16, #tpu.memory_space<vmem>>, vector<1x128x128xbf16>
    %116 = vector.shape_cast %115 : vector<1x128x128xbf16> to vector<128x128xbf16>
    %cst_108 = arith.constant dense<0.000000e+00> : vector<144x128xf32>
    %117 = tpu.matmul %114, %116, %cst_108 {dimension_numbers = #tpu.dot_dimension_numbers<[1], [0], [0], [1], [0, 0, 1, 1], [], []>} : vector<144x128xbf16>, vector<128x128xbf16>, vector<144x128xf32> -> vector<144x128xf32>
    %118 = arith.addf %112, %117 : vector<144x128xf32>
    %c0_109 = arith.constant 0 : index
    %c182 = arith.constant 182 : index
    %c0_110 = arith.constant 0 : index
    %119 = vector.load %arg2[%c0_109, %c182, %c0_110] : memref<1x326x128xbf16, #tpu.memory_space<vmem>>, vector<1x144x128xbf16>
    %120 = vector.shape_cast %119 : vector<1x144x128xbf16> to vector<144x128xbf16>
    %c8_111 = arith.constant 8 : index
    %c0_112 = arith.constant 0 : index
    %c0_113 = arith.constant 0 : index
    %121 = vector.load %arg3[%c8_111, %c0_112, %c0_113] : memref<9x128x128xbf16, #tpu.memory_space<vmem>>, vector<1x128x128xbf16>
    %122 = vector.shape_cast %121 : vector<1x128x128xbf16> to vector<128x128xbf16>
    %cst_114 = arith.constant dense<0.000000e+00> : vector<144x128xf32>
    %123 = tpu.matmul %120, %122, %cst_114 {dimension_numbers = #tpu.dot_dimension_numbers<[1], [0], [0], [1], [0, 0, 1, 1], [], []>} : vector<144x128xbf16>, vector<128x128xbf16>, vector<144x128xf32> -> vector<144x128xf32>
    %124 = arith.addf %118, %123 : vector<144x128xf32>
    %cst_115 = arith.constant 0.000000e+00 : f32
    %125 = vector.broadcast %cst_115 : f32 to vector<144x128xf32>
    %126 = arith.maximumf %124, %125 : vector<144x128xf32>
    %c144_116 = arith.constant 144 : index
    %c0_117 = arith.constant 0 : index
    %127 = vector.load %arg1[%c144_116, %c0_117] : memref<288x1xf32, #tpu.memory_space<vmem>>, vector<144x1xf32>
    %128 = vector.broadcast %127 : vector<144x1xf32> to vector<144x128xf32>
    %129 = arith.mulf %126, %128 : vector<144x128xf32>
    %130 = arith.truncf %129 : vector<144x128xf32> to vector<144x128xbf16>
    %c163_118 = arith.constant 163 : index
    %c0_119 = arith.constant 0 : index
    %131 = vector.load %arg8[%c163_118, %c0_119] : memref<326x128xbf16, #tpu.memory_space<vmem>>, vector<144x128xbf16>
    tpu.vector_store %arg8[%c163_118, %c0_119], %130 {strides = array<i32>} : memref<326x128xbf16, #tpu.memory_space<vmem>>, vector<144x128xbf16>,
    %c0_120 = arith.constant 0 : index
    %c19_121 = arith.constant 19 : index
    %c0_122 = arith.constant 0 : index
    %132 = vector.load %arg2[%c0_120, %c19_121, %c0_122] : memref<1x326x128xbf16, #tpu.memory_space<vmem>>, vector<1x144x128xbf16>
    %133 = vector.shape_cast %132 : vector<1x144x128xbf16> to vector<144x128xbf16>
    %134 = arith.extf %133 : vector<144x128xbf16> to vector<144x128xf32>
    %135 = vector.shape_cast %5 : vector<1x128xf32> to vector<1x128xf32>
    %136 = vector.broadcast %135 : vector<1x128xf32> to vector<144x128xf32>
    %137 = arith.addf %136, %134 : vector<144x128xf32>
    %c0_123 = arith.constant 0 : index
    %c0_124 = arith.constant 0 : index
    %138 = vector.load %arg8[%c0_123, %c0_124] : memref<326x128xbf16, #tpu.memory_space<vmem>>, vector<144x128xbf16>
    %c0_125 = arith.constant 0 : index
    %c0_126 = arith.constant 0 : index
    %c0_127 = arith.constant 0 : index
    %139 = vector.load %arg5[%c0_125, %c0_126, %c0_127] : memref<9x128x128xbf16, #tpu.memory_space<vmem>>, vector<1x128x128xbf16>
    %140 = vector.shape_cast %139 : vector<1x128x128xbf16> to vector<128x128xbf16>
    %cst_128 = arith.constant dense<0.000000e+00> : vector<144x128xf32>
    %141 = tpu.matmul %138, %140, %cst_128 {dimension_numbers = #tpu.dot_dimension_numbers<[1], [0], [0], [1], [0, 0, 1, 1], [], []>} : vector<144x128xbf16>, vector<128x128xbf16>, vector<144x128xf32> -> vector<144x128xf32>
    %142 = arith.addf %137, %141 : vector<144x128xf32>
    %c1_129 = arith.constant 1 : index
    %c0_130 = arith.constant 0 : index
    %143 = vector.load %arg8[%c1_129, %c0_130] : memref<326x128xbf16, #tpu.memory_space<vmem>>, vector<144x128xbf16>
    %c1_131 = arith.constant 1 : index
    %c0_132 = arith.constant 0 : index
    %c0_133 = arith.constant 0 : index
    %144 = vector.load %arg5[%c1_131, %c0_132, %c0_133] : memref<9x128x128xbf16, #tpu.memory_space<vmem>>, vector<1x128x128xbf16>
    %145 = vector.shape_cast %144 : vector<1x128x128xbf16> to vector<128x128xbf16>
    %cst_134 = arith.constant dense<0.000000e+00> : vector<144x128xf32>
    %146 = tpu.matmul %143, %145, %cst_134 {dimension_numbers = #tpu.dot_dimension_numbers<[1], [0], [0], [1], [0, 0, 1, 1], [], []>} : vector<144x128xbf16>, vector<128x128xbf16>, vector<144x128xf32> -> vector<144x128xf32>
    %147 = arith.addf %142, %146 : vector<144x128xf32>
    %c2_135 = arith.constant 2 : index
    %c0_136 = arith.constant 0 : index
    %148 = vector.load %arg8[%c2_135, %c0_136] : memref<326x128xbf16, #tpu.memory_space<vmem>>, vector<144x128xbf16>
    %c2_137 = arith.constant 2 : index
    %c0_138 = arith.constant 0 : index
    %c0_139 = arith.constant 0 : index
    %149 = vector.load %arg5[%c2_137, %c0_138, %c0_139] : memref<9x128x128xbf16, #tpu.memory_space<vmem>>, vector<1x128x128xbf16>
    %150 = vector.shape_cast %149 : vector<1x128x128xbf16> to vector<128x128xbf16>
    %cst_140 = arith.constant dense<0.000000e+00> : vector<144x128xf32>
    %151 = tpu.matmul %148, %150, %cst_140 {dimension_numbers = #tpu.dot_dimension_numbers<[1], [0], [0], [1], [0, 0, 1, 1], [], []>} : vector<144x128xbf16>, vector<128x128xbf16>, vector<144x128xf32> -> vector<144x128xf32>
    %152 = arith.addf %147, %151 : vector<144x128xf32>
    %c18_141 = arith.constant 18 : index
    %c0_142 = arith.constant 0 : index
    %153 = vector.load %arg8[%c18_141, %c0_142] : memref<326x128xbf16, #tpu.memory_space<vmem>>, vector<144x128xbf16>
    %c3_143 = arith.constant 3 : index
    %c0_144 = arith.constant 0 : index
    %c0_145 = arith.constant 0 : index
    %154 = vector.load %arg5[%c3_143, %c0_144, %c0_145] : memref<9x128x128xbf16, #tpu.memory_space<vmem>>, vector<1x128x128xbf16>
    %155 = vector.shape_cast %154 : vector<1x128x128xbf16> to vector<128x128xbf16>
    %cst_146 = arith.constant dense<0.000000e+00> : vector<144x128xf32>
    %156 = tpu.matmul %153, %155, %cst_146 {dimension_numbers = #tpu.dot_dimension_numbers<[1], [0], [0], [1], [0, 0, 1, 1], [], []>} : vector<144x128xbf16>, vector<128x128xbf16>, vector<144x128xf32> -> vector<144x128xf32>
    %157 = arith.addf %152, %156 : vector<144x128xf32>
    %c19_147 = arith.constant 19 : index
    %c0_148 = arith.constant 0 : index
    %158 = vector.load %arg8[%c19_147, %c0_148] : memref<326x128xbf16, #tpu.memory_space<vmem>>, vector<144x128xbf16>
    %c4_149 = arith.constant 4 : index
    %c0_150 = arith.constant 0 : index
    %c0_151 = arith.constant 0 : index
    %159 = vector.load %arg5[%c4_149, %c0_150, %c0_151] : memref<9x128x128xbf16, #tpu.memory_space<vmem>>, vector<1x128x128xbf16>
    %160 = vector.shape_cast %159 : vector<1x128x128xbf16> to vector<128x128xbf16>
    %cst_152 = arith.constant dense<0.000000e+00> : vector<144x128xf32>
    %161 = tpu.matmul %158, %160, %cst_152 {dimension_numbers = #tpu.dot_dimension_numbers<[1], [0], [0], [1], [0, 0, 1, 1], [], []>} : vector<144x128xbf16>, vector<128x128xbf16>, vector<144x128xf32> -> vector<144x128xf32>
    %162 = arith.addf %157, %161 : vector<144x128xf32>
    %c20_153 = arith.constant 20 : index
    %c0_154 = arith.constant 0 : index
    %163 = vector.load %arg8[%c20_153, %c0_154] : memref<326x128xbf16, #tpu.memory_space<vmem>>, vector<144x128xbf16>
    %c5_155 = arith.constant 5 : index
    %c0_156 = arith.constant 0 : index
    %c0_157 = arith.constant 0 : index
    %164 = vector.load %arg5[%c5_155, %c0_156, %c0_157] : memref<9x128x128xbf16, #tpu.memory_space<vmem>>, vector<1x128x128xbf16>
    %165 = vector.shape_cast %164 : vector<1x128x128xbf16> to vector<128x128xbf16>
    %cst_158 = arith.constant dense<0.000000e+00> : vector<144x128xf32>
    %166 = tpu.matmul %163, %165, %cst_158 {dimension_numbers = #tpu.dot_dimension_numbers<[1], [0], [0], [1], [0, 0, 1, 1], [], []>} : vector<144x128xbf16>, vector<128x128xbf16>, vector<144x128xf32> -> vector<144x128xf32>
    %167 = arith.addf %162, %166 : vector<144x128xf32>
    %c36_159 = arith.constant 36 : index
    %c0_160 = arith.constant 0 : index
    %168 = vector.load %arg8[%c36_159, %c0_160] : memref<326x128xbf16, #tpu.memory_space<vmem>>, vector<144x128xbf16>
    %c6_161 = arith.constant 6 : index
    %c0_162 = arith.constant 0 : index
    %c0_163 = arith.constant 0 : index
    %169 = vector.load %arg5[%c6_161, %c0_162, %c0_163] : memref<9x128x128xbf16, #tpu.memory_space<vmem>>, vector<1x128x128xbf16>
    %170 = vector.shape_cast %169 : vector<1x128x128xbf16> to vector<128x128xbf16>
    %cst_164 = arith.constant dense<0.000000e+00> : vector<144x128xf32>
    %171 = tpu.matmul %168, %170, %cst_164 {dimension_numbers = #tpu.dot_dimension_numbers<[1], [0], [0], [1], [0, 0, 1, 1], [], []>} : vector<144x128xbf16>, vector<128x128xbf16>, vector<144x128xf32> -> vector<144x128xf32>
    %172 = arith.addf %167, %171 : vector<144x128xf32>
    %c37_165 = arith.constant 37 : index
    %c0_166 = arith.constant 0 : index
    %173 = vector.load %arg8[%c37_165, %c0_166] : memref<326x128xbf16, #tpu.memory_space<vmem>>, vector<144x128xbf16>
    %c7_167 = arith.constant 7 : index
    %c0_168 = arith.constant 0 : index
    %c0_169 = arith.constant 0 : index
    %174 = vector.load %arg5[%c7_167, %c0_168, %c0_169] : memref<9x128x128xbf16, #tpu.memory_space<vmem>>, vector<1x128x128xbf16>
    %175 = vector.shape_cast %174 : vector<1x128x128xbf16> to vector<128x128xbf16>
    %cst_170 = arith.constant dense<0.000000e+00> : vector<144x128xf32>
    %176 = tpu.matmul %173, %175, %cst_170 {dimension_numbers = #tpu.dot_dimension_numbers<[1], [0], [0], [1], [0, 0, 1, 1], [], []>} : vector<144x128xbf16>, vector<128x128xbf16>, vector<144x128xf32> -> vector<144x128xf32>
    %177 = arith.addf %172, %176 : vector<144x128xf32>
    %c38_171 = arith.constant 38 : index
    %c0_172 = arith.constant 0 : index
    %178 = vector.load %arg8[%c38_171, %c0_172] : memref<326x128xbf16, #tpu.memory_space<vmem>>, vector<144x128xbf16>
    %c8_173 = arith.constant 8 : index
    %c0_174 = arith.constant 0 : index
    %c0_175 = arith.constant 0 : index
    %179 = vector.load %arg5[%c8_173, %c0_174, %c0_175] : memref<9x128x128xbf16, #tpu.memory_space<vmem>>, vector<1x128x128xbf16>
    %180 = vector.shape_cast %179 : vector<1x128x128xbf16> to vector<128x128xbf16>
    %cst_176 = arith.constant dense<0.000000e+00> : vector<144x128xf32>
    %181 = tpu.matmul %178, %180, %cst_176 {dimension_numbers = #tpu.dot_dimension_numbers<[1], [0], [0], [1], [0, 0, 1, 1], [], []>} : vector<144x128xbf16>, vector<128x128xbf16>, vector<144x128xf32> -> vector<144x128xf32>
    %182 = arith.addf %177, %181 : vector<144x128xf32>
    %cst_177 = arith.constant 0.000000e+00 : f32
    %183 = vector.broadcast %cst_177 : f32 to vector<144x128xf32>
    %184 = arith.maximumf %182, %183 : vector<144x128xf32>
    %c0_178 = arith.constant 0 : index
    %c0_179 = arith.constant 0 : index
    %c0_180 = arith.constant 0 : index
    %185 = vector.load %arg7[%c0_178, %c0_179, %c0_180] : memref<1x288x128xf32, #tpu.memory_space<vmem>>, vector<1x144x128xf32>
    %186 = vector.shape_cast %185 : vector<1x144x128xf32> to vector<144x128xf32>
    %187 = vector.shape_cast %184 : vector<144x128xf32> to vector<1x144x128xf32>
    tpu.vector_store %arg7[%c0_178, %c0_179, %c0_180], %187 {strides = array<i32>} : memref<1x288x128xf32, #tpu.memory_space<vmem>>, vector<1x144x128xf32>,
    %c0_181 = arith.constant 0 : index
    %c163_182 = arith.constant 163 : index
    %c0_183 = arith.constant 0 : index
    %188 = vector.load %arg2[%c0_181, %c163_182, %c0_183] : memref<1x326x128xbf16, #tpu.memory_space<vmem>>, vector<1x144x128xbf16>
    %189 = vector.shape_cast %188 : vector<1x144x128xbf16> to vector<144x128xbf16>
    %190 = arith.extf %189 : vector<144x128xbf16> to vector<144x128xf32>
    %191 = vector.shape_cast %5 : vector<1x128xf32> to vector<1x128xf32>
    %192 = vector.broadcast %191 : vector<1x128xf32> to vector<144x128xf32>
    %193 = arith.addf %192, %190 : vector<144x128xf32>
    %c144_184 = arith.constant 144 : index
    %c0_185 = arith.constant 0 : index
    %194 = vector.load %arg8[%c144_184, %c0_185] : memref<326x128xbf16, #tpu.memory_space<vmem>>, vector<144x128xbf16>
    %c0_186 = arith.constant 0 : index
    %c0_187 = arith.constant 0 : index
    %c0_188 = arith.constant 0 : index
    %195 = vector.load %arg5[%c0_186, %c0_187, %c0_188] : memref<9x128x128xbf16, #tpu.memory_space<vmem>>, vector<1x128x128xbf16>
    %196 = vector.shape_cast %195 : vector<1x128x128xbf16> to vector<128x128xbf16>
    %cst_189 = arith.constant dense<0.000000e+00> : vector<144x128xf32>
    %197 = tpu.matmul %194, %196, %cst_189 {dimension_numbers = #tpu.dot_dimension_numbers<[1], [0], [0], [1], [0, 0, 1, 1], [], []>} : vector<144x128xbf16>, vector<128x128xbf16>, vector<144x128xf32> -> vector<144x128xf32>
    %198 = arith.addf %193, %197 : vector<144x128xf32>
    %c145_190 = arith.constant 145 : index
    %c0_191 = arith.constant 0 : index
    %199 = vector.load %arg8[%c145_190, %c0_191] : memref<326x128xbf16, #tpu.memory_space<vmem>>, vector<144x128xbf16>
    %c1_192 = arith.constant 1 : index
    %c0_193 = arith.constant 0 : index
    %c0_194 = arith.constant 0 : index
    %200 = vector.load %arg5[%c1_192, %c0_193, %c0_194] : memref<9x128x128xbf16, #tpu.memory_space<vmem>>, vector<1x128x128xbf16>
    %201 = vector.shape_cast %200 : vector<1x128x128xbf16> to vector<128x128xbf16>
    %cst_195 = arith.constant dense<0.000000e+00> : vector<144x128xf32>
    %202 = tpu.matmul %199, %201, %cst_195 {dimension_numbers = #tpu.dot_dimension_numbers<[1], [0], [0], [1], [0, 0, 1, 1], [], []>} : vector<144x128xbf16>, vector<128x128xbf16>, vector<144x128xf32> -> vector<144x128xf32>
    %203 = arith.addf %198, %202 : vector<144x128xf32>
    %c146_196 = arith.constant 146 : index
    %c0_197 = arith.constant 0 : index
    %204 = vector.load %arg8[%c146_196, %c0_197] : memref<326x128xbf16, #tpu.memory_space<vmem>>, vector<144x128xbf16>
    %c2_198 = arith.constant 2 : index
    %c0_199 = arith.constant 0 : index
    %c0_200 = arith.constant 0 : index
    %205 = vector.load %arg5[%c2_198, %c0_199, %c0_200] : memref<9x128x128xbf16, #tpu.memory_space<vmem>>, vector<1x128x128xbf16>
    %206 = vector.shape_cast %205 : vector<1x128x128xbf16> to vector<128x128xbf16>
    %cst_201 = arith.constant dense<0.000000e+00> : vector<144x128xf32>
    %207 = tpu.matmul %204, %206, %cst_201 {dimension_numbers = #tpu.dot_dimension_numbers<[1], [0], [0], [1], [0, 0, 1, 1], [], []>} : vector<144x128xbf16>, vector<128x128xbf16>, vector<144x128xf32> -> vector<144x128xf32>
    %208 = arith.addf %203, %207 : vector<144x128xf32>
    %c162_202 = arith.constant 162 : index
    %c0_203 = arith.constant 0 : index
    %209 = vector.load %arg8[%c162_202, %c0_203] : memref<326x128xbf16, #tpu.memory_space<vmem>>, vector<144x128xbf16>
    %c3_204 = arith.constant 3 : index
    %c0_205 = arith.constant 0 : index
    %c0_206 = arith.constant 0 : index
    %210 = vector.load %arg5[%c3_204, %c0_205, %c0_206] : memref<9x128x128xbf16, #tpu.memory_space<vmem>>, vector<1x128x128xbf16>
    %211 = vector.shape_cast %210 : vector<1x128x128xbf16> to vector<128x128xbf16>
    %cst_207 = arith.constant dense<0.000000e+00> : vector<144x128xf32>
    %212 = tpu.matmul %209, %211, %cst_207 {dimension_numbers = #tpu.dot_dimension_numbers<[1], [0], [0], [1], [0, 0, 1, 1], [], []>} : vector<144x128xbf16>, vector<128x128xbf16>, vector<144x128xf32> -> vector<144x128xf32>
    %213 = arith.addf %208, %212 : vector<144x128xf32>
    %c163_208 = arith.constant 163 : index
    %c0_209 = arith.constant 0 : index
    %214 = vector.load %arg8[%c163_208, %c0_209] : memref<326x128xbf16, #tpu.memory_space<vmem>>, vector<144x128xbf16>
    %c4_210 = arith.constant 4 : index
    %c0_211 = arith.constant 0 : index
    %c0_212 = arith.constant 0 : index
    %215 = vector.load %arg5[%c4_210, %c0_211, %c0_212] : memref<9x128x128xbf16, #tpu.memory_space<vmem>>, vector<1x128x128xbf16>
    %216 = vector.shape_cast %215 : vector<1x128x128xbf16> to vector<128x128xbf16>
    %cst_213 = arith.constant dense<0.000000e+00> : vector<144x128xf32>
    %217 = tpu.matmul %214, %216, %cst_213 {dimension_numbers = #tpu.dot_dimension_numbers<[1], [0], [0], [1], [0, 0, 1, 1], [], []>} : vector<144x128xbf16>, vector<128x128xbf16>, vector<144x128xf32> -> vector<144x128xf32>
    %218 = arith.addf %213, %217 : vector<144x128xf32>
    %c164_214 = arith.constant 164 : index
    %c0_215 = arith.constant 0 : index
    %219 = vector.load %arg8[%c164_214, %c0_215] : memref<326x128xbf16, #tpu.memory_space<vmem>>, vector<144x128xbf16>
    %c5_216 = arith.constant 5 : index
    %c0_217 = arith.constant 0 : index
    %c0_218 = arith.constant 0 : index
    %220 = vector.load %arg5[%c5_216, %c0_217, %c0_218] : memref<9x128x128xbf16, #tpu.memory_space<vmem>>, vector<1x128x128xbf16>
    %221 = vector.shape_cast %220 : vector<1x128x128xbf16> to vector<128x128xbf16>
    %cst_219 = arith.constant dense<0.000000e+00> : vector<144x128xf32>
    %222 = tpu.matmul %219, %221, %cst_219 {dimension_numbers = #tpu.dot_dimension_numbers<[1], [0], [0], [1], [0, 0, 1, 1], [], []>} : vector<144x128xbf16>, vector<128x128xbf16>, vector<144x128xf32> -> vector<144x128xf32>
    %223 = arith.addf %218, %222 : vector<144x128xf32>
    %c180_220 = arith.constant 180 : index
    %c0_221 = arith.constant 0 : index
    %224 = vector.load %arg8[%c180_220, %c0_221] : memref<326x128xbf16, #tpu.memory_space<vmem>>, vector<144x128xbf16>
    %c6_222 = arith.constant 6 : index
    %c0_223 = arith.constant 0 : index
    %c0_224 = arith.constant 0 : index
    %225 = vector.load %arg5[%c6_222, %c0_223, %c0_224] : memref<9x128x128xbf16, #tpu.memory_space<vmem>>, vector<1x128x128xbf16>
    %226 = vector.shape_cast %225 : vector<1x128x128xbf16> to vector<128x128xbf16>
    %cst_225 = arith.constant dense<0.000000e+00> : vector<144x128xf32>
    %227 = tpu.matmul %224, %226, %cst_225 {dimension_numbers = #tpu.dot_dimension_numbers<[1], [0], [0], [1], [0, 0, 1, 1], [], []>} : vector<144x128xbf16>, vector<128x128xbf16>, vector<144x128xf32> -> vector<144x128xf32>
    %228 = arith.addf %223, %227 : vector<144x128xf32>
    %c181_226 = arith.constant 181 : index
    %c0_227 = arith.constant 0 : index
    %229 = vector.load %arg8[%c181_226, %c0_227] : memref<326x128xbf16, #tpu.memory_space<vmem>>, vector<144x128xbf16>
    %c7_228 = arith.constant 7 : index
    %c0_229 = arith.constant 0 : index
    %c0_230 = arith.constant 0 : index
    %230 = vector.load %arg5[%c7_228, %c0_229, %c0_230] : memref<9x128x128xbf16, #tpu.memory_space<vmem>>, vector<1x128x128xbf16>
    %231 = vector.shape_cast %230 : vector<1x128x128xbf16> to vector<128x128xbf16>
    %cst_231 = arith.constant dense<0.000000e+00> : vector<144x128xf32>
    %232 = tpu.matmul %229, %231, %cst_231 {dimension_numbers = #tpu.dot_dimension_numbers<[1], [0], [0], [1], [0, 0, 1, 1], [], []>} : vector<144x128xbf16>, vector<128x128xbf16>, vector<144x128xf32> -> vector<144x128xf32>
    %233 = arith.addf %228, %232 : vector<144x128xf32>
    %c182_232 = arith.constant 182 : index
    %c0_233 = arith.constant 0 : index
    %234 = vector.load %arg8[%c182_232, %c0_233] : memref<326x128xbf16, #tpu.memory_space<vmem>>, vector<144x128xbf16>
    %c8_234 = arith.constant 8 : index
    %c0_235 = arith.constant 0 : index
    %c0_236 = arith.constant 0 : index
    %235 = vector.load %arg5[%c8_234, %c0_235, %c0_236] : memref<9x128x128xbf16, #tpu.memory_space<vmem>>, vector<1x128x128xbf16>
    %236 = vector.shape_cast %235 : vector<1x128x128xbf16> to vector<128x128xbf16>
    %cst_237 = arith.constant dense<0.000000e+00> : vector<144x128xf32>
    %237 = tpu.matmul %234, %236, %cst_237 {dimension_numbers = #tpu.dot_dimension_numbers<[1], [0], [0], [1], [0, 0, 1, 1], [], []>} : vector<144x128xbf16>, vector<128x128xbf16>, vector<144x128xf32> -> vector<144x128xf32>
    %238 = arith.addf %233, %237 : vector<144x128xf32>
    %cst_238 = arith.constant 0.000000e+00 : f32
    %239 = vector.broadcast %cst_238 : f32 to vector<144x128xf32>
    %240 = arith.maximumf %238, %239 : vector<144x128xf32>
    %c0_239 = arith.constant 0 : index
    %c144_240 = arith.constant 144 : index
    %c0_241 = arith.constant 0 : index
    %241 = vector.load %arg7[%c0_239, %c144_240, %c0_241] : memref<1x288x128xf32, #tpu.memory_space<vmem>>, vector<1x144x128xf32>
    %242 = vector.shape_cast %241 : vector<1x144x128xf32> to vector<144x128xf32>
    %243 = vector.shape_cast %240 : vector<144x128xf32> to vector<1x144x128xf32>
    tpu.vector_store %arg7[%c0_239, %c144_240, %c0_241], %243 {strides = array<i32>} : memref<1x288x128xf32, #tpu.memory_space<vmem>>, vector<1x144x128xf32>,
    return
  }
  func.func @transform_0(%arg0: i32) -> (i32, i32) {
    %c0_i32 = arith.constant 0 : i32
    %c0_i32_0 = arith.constant 0 : i32
    %c0_i32_1 = arith.constant 0 : i32
    return %c0_i32, %c0_i32_0 : i32, i32
  }
  func.func @transform_1(%arg0: i32) -> (i32, i32, i32) {
    %c0_i32 = arith.constant 0 : i32
    %c0_i32_0 = arith.constant 0 : i32
    %c0_i32_1 = arith.constant 0 : i32
    return %arg0, %c0_i32, %c0_i32_0 : i32, i32, i32
  }
  func.func @transform_2(%arg0: i32) -> (i32, i32, i32) {
    %c0_i32 = arith.constant 0 : i32
    %c0_i32_0 = arith.constant 0 : i32
    %c0_i32_1 = arith.constant 0 : i32
    %c0_i32_2 = arith.constant 0 : i32
    return %c0_i32, %c0_i32_0, %c0_i32_1 : i32, i32, i32
  }
  func.func @transform_3(%arg0: i32) -> (i32, i32) {
    %c0_i32 = arith.constant 0 : i32
    %c0_i32_0 = arith.constant 0 : i32
    %c0_i32_1 = arith.constant 0 : i32
    return %c0_i32, %c0_i32_0 : i32, i32
  }
  func.func @transform_4(%arg0: i32) -> (i32, i32, i32) {
    %c0_i32 = arith.constant 0 : i32
    %c0_i32_0 = arith.constant 0 : i32
    %c0_i32_1 = arith.constant 0 : i32
    %c0_i32_2 = arith.constant 0 : i32
    return %c0_i32, %c0_i32_0, %c0_i32_1 : i32, i32, i32
  }
  func.func @transform_5(%arg0: i32) -> (i32, i32) {
    %c0_i32 = arith.constant 0 : i32
    %c0_i32_0 = arith.constant 0 : i32
    %c0_i32_1 = arith.constant 0 : i32
    return %c0_i32, %c0_i32_0 : i32, i32
  }
  func.func @transform_6(%arg0: i32) -> (i32, i32, i32) {
    %c0_i32 = arith.constant 0 : i32
    %c0_i32_0 = arith.constant 0 : i32
    %c0_i32_1 = arith.constant 0 : i32
    return %arg0, %c0_i32, %c0_i32_0 : i32, i32, i32
  }
}

</mosaic_0001>

<bundles_post_ra>
// kernel: basic_block_forward.1
= control target key start
LH: loop header
LB: loop body
LE: loop exit
PB: predicated region body
PF: predicated region fallthrough
CT: control target
= control target key end

     0   :  { %s13189_s21 = smov 0   ;;  %s16932_s0 = inlined_call_operand.vmem [shape: f32[288,1], index: 0, kind: input, shape index: {}]   ;;  %s16933_s1 = inlined_call_operand.vmem [shape: bf16[2,326,128], index: 1, kind: input, shape index: {}]   ;;  %s16934_s2 = inlined_call_operand.vmem [shape: bf16[9,128,128], index: 2, kind: input, shape index: {}]   ;;  %s16935_s3 = inlined_call_operand.vmem [shape: f32[1,128], index: 3, kind: input, shape index: {}]   ;;  %s16936_s4 = inlined_call_operand.vmem [shape: bf16[9,128,128], index: 4, kind: input, shape index: {}]   ;;  %s16937_s5 = inlined_call_operand.vmem [shape: f32[1,128], index: 5, kind: input, shape index: {}]   ;;  %s16938_s6 = inlined_call_operand.vmem [shape: f32[2,288,128], index: 6, kind: output, shape index: {}]  }
   0x1 LB: > { %s10379_s22 = sadd.s32 4294967295, %s13151_s21   ;;  %p10383_p0 = scmp.ge.s32.totalorder %s13151_s21, 1  ;;  %s13151_s21 = sphi %s13189_s21, %s16_s21  }
   0x2   : > { %p212_p1 = scmp.lt.s32.totalorder %s13151_s21, 3 }
   0x4   : > { %p213_p2 = pnand %p10383_p0, %p212_p1 }
   0x6   : > { %216 = sbr.rel (%p213_p2) target bundleno = 1475 (0x5c3), region = 44 }
   0xb   : > { %v12596_v0 = vld [vmem:[%s16934_s2 + $0x38] sm:$0xff]  ;;  %p242_p3 = scmp.lt.s32.totalorder %s10379_s22, 1  ;;  %v12595_v4 = vld [vmem:[%s16934_s2 + $0x30] sm:$0xff]  ;;  %v12594_v8 = vld [vmem:[%s16934_s2 + $0x28] sm:$0xff]  ;;  %vm566_vm0 = vsmask.f32 7424 }
   0xc   : > { %v12612_v1 = vld [vmem:[%s16934_s2 + $0x78] sm:$0xff]  ;;  %410 = vmatpush.bf16.msra.mxu0 %v12596_v0  ;;  %v12611_v5 = vld [vmem:[%s16934_s2 + $0x70] sm:$0xff]  ;;  %v12610_v9 = vld [vmem:[%s16934_s2 + $0x68] sm:$0xff]  ;;  %vm793_vm1 = vcmask 1046528   ;;  %vm1195_vm2 = vsmask.f32 6400 }
   0xd   : > { %v12620_v2 = vld [vmem:[%s16934_s2 + $0xb8] sm:$0xff]  ;;  %700 = vmatpush.bf16.msra.mxu1 %v12612_v1  ;;  %v12619_v6 = vld [vmem:[%s16934_s2 + $0xb0] sm:$0xff]  ;;  %s16967_s22 = smov (!%p242_p3, %s10379_s22), 1  ;;  %v12618_v10 = vld [vmem:[%s16934_s2 + $0xa8] sm:$0xff]  ;;  %vm1435_vm3 = vcmask 1045504   ;;  %vm2077_vm5 = vcmask 1044480  }
   0xe   : > { %v12636_v3 = vld [vmem:[%s16934_s2 + $0xf8] sm:$0xff]  ;;  %870 = vmatpush.bf16.msra.mxu2 %v12620_v2  ;;  %v12635_v7 = vld [vmem:[%s16934_s2 + $0xf0] sm:$0xff]  ;;  %v12634_v11 = vld [vmem:[%s16934_s2 + $0xe8] sm:$0xff]  ;;  %s13110_s25 = smul.u32 164, %s16967_s22  ;;  %vm1837_vm4 = vsmask.f32 5376 }
   0xf   : > { %1102 = vmatpush.bf16.msra.mxu3 %v12636_v3  ;;  %v12593_v12 = vld [vmem:[%s16934_s2 + $0x20] sm:$0xff]  ;;  %v12592_v16 = vld [vmem:[%s16934_s2 + $0x18] sm:$0xff]  ;;  %v12591_v23 = vld [vmem:[%s16934_s2 + $0x10] sm:$0xff]  ;;  %vm255_vm6 = vcmask 1041408   ;;  %vm256_vm7 = vsmask.f32 1280 }
  0x10   : > { %411 = vmatpush.bf16.msra.mxu0 %v12595_v4  ;;  %v12609_v13 = vld [vmem:[%s16934_s2 + $0x60] sm:$0xff]  ;;  %s13251_s12 = scalar_lea.vmem %s16933_s1, %s13110_s25  ;;  %v12608_v17 = vld [vmem:[%s16934_s2 + $0x58] sm:$0xff]  ;;  %v12607_v24 = vld [vmem:[%s16934_s2 + $0x50] sm:$0xff]  ;;  %vm261_vm8 = vcmask 1043457   ;;  %vm262_vm10 = vsmask.f32 7942 }
  0x11   : > { %701 = vmatpush.bf16.msra.mxu1 %v12611_v5  ;;  %v12617_v14 = vld [vmem:[%s16934_s2 + $0xa0] sm:$0xff]  ;;  %v12616_v18 = vld [vmem:[%s16934_s2 + $0x98] sm:$0xff]  ;;  %v942_v21 = vld [vmem:[%s13251_s12 + $0x8] sm:$0xe]  ;;  %vm2388_vm12 = vsmask.f32 5392 }
  0x12   : > { %871 = vmatpush.bf16.msra.mxu2 %v12619_v6  ;;  %v12633_v15 = vld [vmem:[%s16934_s2 + $0xe0] sm:$0xff]  ;;  %v12632_v19 = vld [vmem:[%s16934_s2 + $0xd8] sm:$0xff]  ;;  %v13268_v22 = vld [vmem:[%s13251_s12 + $0xc] sm:$0xf]  ;;  %v997_v29 = vunpack.c.l.b16 %v942_v21  ;;  %vm5200_vm14 = vcmask 1042432   ;;  %s13111_s16 = smul.u32 288, %s16967_s22 }
  0x13   : > { %1103 = vmatpush.bf16.msra.mxu3 %v12635_v7  ;;  %v13001_v20 = vld [vmem:[%s13251_s12] sm:$0xff]   ;;  %v13277_v25 = vld [vmem:[%s13251_s12 + $0x8] sm:$0xff]  ;;  %v12615_v27 = vld [vmem:[%s16934_s2 + $0x90] sm:$0xff]  ;;  %v998_v30 = vunpack.c.l.b16 %v13268_v22 }
  0x14   : > { %412 = vmatpush.bf16.msra.mxu0 %v12594_v8  ;;  %v570_v26 = vshll.u32 %v13001_v20, 16  ;;  %v12631_v28 = vld [vmem:[%s16934_s2 + $0xd0] sm:$0xff]  ;;  %v13080_v31 = vld [vmem:[%s13251_s12] sm:$0xf0]  ;;  %v13081_v32 = vld [vmem:[%s13251_s12] sm:$0xe]  ;;  %s15988_s20 = scalar_lea.vmem %s16938_s6, %s13111_s16 }
  0x15   : > { %702 = vmatpush.bf16.msra.mxu1 %v12610_v9  ;;  %v12590_v33 = vld [vmem:[%s16934_s2 + $0x8] sm:$0xff]  ;;  %v568_v35 = vshrl.u32 %v13001_v20, 16  ;;  %v575_v37 = vshll.u32 %v13277_v25, 16  ;;  %v13082_v40 = vor.u32 %v13081_v32, %v13080_v31  ;;  %v13302_v41 = vld [vmem:[%s13251_s12 + $0x10] sm:$0xff]  ;;  %v13306_v42 = vpack.c.b16 %v998_v30, %v997_v29  ;;  %v12589_v43 = vld [vmem:[%s16934_s2] sm:$0xff] }
  0x16   : > { %872 = vmatpush.bf16.msra.mxu2 %v12618_v10  ;;  %v12606_v34 = vld [vmem:[%s16934_s2 + $0x48] sm:$0xff]  ;;  %v572_v36 = vrot.slane %v570_v26, 1  ;;  %v12605_v44 = vld [vmem:[%s16934_s2 + $0x40] sm:$0xff]  ;;  %v795_v50 = vrot.slane %v13277_v25, 1  ;;  %v1027_v52 = vrot.slane %v13302_v41, 1  ;;  %v12668_v53 = vld [vmem:[%s16934_s2 + $0x1b8] sm:$0xff] }
  0x17   : > { %1104 = vmatpush.bf16.msra.mxu3 %v12634_v11  ;;  %v12614_v38 = vld [vmem:[%s16934_s2 + $0x88] sm:$0xff]  ;;  %v577_v46 = vrot.slane %v575_v37, 1  ;;  %v12613_v47 = vld [vmem:[%s16934_s2 + $0x80] sm:$0xff]  ;;  %v794_v49 = vrot.slane %v13082_v40, 1  ;;  %v1026_v51 = vrot.slane %v13306_v42, 1  ;;  %v12644_v54 = vld [vmem:[%s16934_s2 + $0x138] sm:$0xff] }
  0x18   : > { %413 = vmatpush.bf16.msra.mxu0 %v12593_v12  ;;  %v12630_v39 = vld [vmem:[%s16934_s2 + $0xc8] sm:$0xff]  ;;  %v573_v45 = vor.u32 %v572_v36, %v568_v35  ;;  %v12629_v48 = vld [vmem:[%s16934_s2 + $0xc0] sm:$0xff]  ;;  %v12676_v59 = vld [vmem:[%s16934_s2 + $0x1f8] sm:$0xff]  ;;  %v579_v4 = vshrl.u32 %v13277_v25, 16 }
  0x19   : > { %703 = vmatpush.bf16.msra.mxu1 %v12609_v13  ;;  %v12580_v55 = vld [vmem:[%s13251_s12] sm:$0xff]  ;;  %v796_v57 = vsel %vm793_vm1, %v794_v49, %v795_v50  ;;  %v1028_v58 = vsel %vm793_vm1, %v1026_v51, %v1027_v52  ;;  %v12652_v60 = vld [vmem:[%s16934_s2 + $0x178] sm:$0xff]  ;;  %v12667_v61 = vld [vmem:[%s16934_s2 + $0x1b0] sm:$0xff] }
  0x1a   : > { %873 = vmatpush.bf16.msra.mxu2 %v12617_v14  ;;  %v578_v56 = vsel %vm566_vm0, %v573_v45, %v577_v46  ;;  %v12643_v62 = vld [vmem:[%s16934_s2 + $0x130] sm:$0xff]  ;;  %v12666_v2 = vld [vmem:[%s16934_s2 + $0x1a8] sm:$0xff]  ;;  %v13360_v6 = vld [vmem:[%s13251_s12 + $0x18] sm:$0xff]  ;;  %v581_v9 = vor.u32 %v579_v4, %v577_v46 }
  0x1b   : > { %1105 = vmatpush.bf16.msra.mxu3 %v12633_v15  ;;  %v12598_v63 = vld [vmem:[%s13251_s12 + $0x10] sm:$0xff]  ;;  %v12642_v3 = vld [vmem:[%s16934_s2 + $0x128] sm:$0xff]  ;;  %v1029_v12 = vrot.slane %v13360_v6, 1  ;;  %v12673_v20 = vld [vmem:[%s16934_s2 + $0x1e0] sm:$0xff] }
  0x1c   : > { %414 = vmatpush.bf16.msra.mxu0 %v12592_v16  ;;  %v12675_v0 = vld [vmem:[%s16934_s2 + $0x1f0] sm:$0xff]  ;;  %v583_v5 = vshll.u32 %v12598_v63, 16  ;;  %v12674_v7 = vld [vmem:[%s16934_s2 + $0x1e8] sm:$0xff]  ;;  %v797_v11 = vrot.slane %v12598_v63, 1  ;;  %v12649_v21 = vld [vmem:[%s16934_s2 + $0x160] sm:$0xff] }
  0x1d   : > { %704 = vmatpush.bf16.msra.mxu1 %v12608_v17  ;;  %v12651_v1 = vld [vmem:[%s16934_s2 + $0x170] sm:$0xff]  ;;  %v12650_v8 = vld [vmem:[%s16934_s2 + $0x168] sm:$0xff]  ;;  %v1030_v16 = vsel %vm793_vm1, %v1027_v52, %v1029_v12  ;;  %v12599_v17 = vld [vmem:[%s13251_s12 + $0x18] sm:$0xff] }
  0x1e   : > { %874 = vmatpush.bf16.msra.mxu2 %v12616_v18  ;;  %v585_v10 = vrot.slane %v583_v5, 1  ;;  %v12581_v13 = vld [vmem:[%s13251_s12 + $0x8] sm:$0xff]  ;;  %v798_v15 = vsel %vm793_vm1, %v795_v50, %v797_v11  ;;  %v12665_v18 = vld [vmem:[%s16934_s2 + $0x1a0] sm:$0xff]  ;;  %v12582_v31 = vld [vmem:[%s13251_s12 + $0x10] sm:$0xff]  ;;  %v595_v40 = vshrl.u32 %v12599_v17, 16 }
  0x1f   : > { %1106 = vmatpush.bf16.msra.mxu3 %v12632_v19  ;;  %v12641_v19 = vld [vmem:[%s16934_s2 + $0x120] sm:$0xff]  ;;  %v12664_v36 = vld [vmem:[%s16934_s2 + $0x198] sm:$0xff]  ;;  %v12602_v5 = vld [vmem:[%s13251_s12 + $0x30] sm:$0xff] }
  0x20   : > { %415 = vmatpush.bf16.msra.mxu0 %v12591_v23  ;;  %v586_v14 = vsel %vm566_vm0, %v581_v9, %v585_v10  ;;  %v587_v23 = vshrl.u32 %v12598_v63, 16  ;;  %v13387_v25 = vld [vmem:[%s13251_s12 + $0x20] sm:$0xff]  ;;  %v12640_v37 = vld [vmem:[%s16934_s2 + $0x118] sm:$0xff]  ;;  %v12670_v9 = vld [vmem:[%s16934_s2 + $0x1c8] sm:$0xff] }
  0x21   : > { %705 = vmatpush.bf16.msra.mxu1 %v12607_v24  ;;  %v591_v24 = vshll.u32 %v12599_v17, 16  ;;  %v1031_v29 = vrot.slane %v13387_v25, 1  ;;  %v12600_v35 = vld [vmem:[%s13251_s12 + $0x20] sm:$0xff]  ;;  %v12583_v49 = vld [vmem:[%s13251_s12 + $0x18] sm:$0xff]  ;;  %vm14076_vm9 = vmand %vm255_vm6, %vm256_vm7 }
  0x22   : > { %875 = vmatpush.bf16.msra.mxu2 %v12615_v27  ;;  %v589_v26 = vor.u32 %v587_v23, %v585_v10  ;;  %v12646_v23 = vld [vmem:[%s16934_s2 + $0x148] sm:$0xff]  ;;  %vm14082_vm11 = vmand %vm261_vm8, %vm262_vm10 }
  0x23   : > { %1107 = vmatpush.bf16.msra.mxu3 %v12631_v28  ;;  %v593_v27 = vrot.slane %v591_v24, 1  ;;  %v799_v28 = vrot.slane %v12599_v17, 1  ;;  %v12585_v17 = vld [vmem:[%s13251_s12 + $0x28] sm:$0xff]  ;;  %v619_v24 = vshrl.u32 %v12602_v5, 16  ;;  %vm14252_vm13 = vmor %vm256_vm7, %vm2388_vm12 }
  0x24   : > { %416 = vmatpush.bf16.msra.mxu0 %v12590_v33 }
  0x25   : > { %706 = vmatpush.bf16.msra.mxu1 %v12606_v34  ;;  %v594_v32 = vsel %vm566_vm0, %v589_v26, %v593_v27  ;;  %v800_v33 = vsel %vm793_vm1, %v797_v11, %v799_v28  ;;  %v1032_v34 = vsel %vm793_vm1, %v1029_v12, %v1031_v29  ;;  %v597_v45 = vor.u32 %v595_v40, %v593_v27  ;;  %v13447_v12 = vld [vmem:[%s13251_s12 + $0x38] sm:$0xff]  ;;  %v13459_v27 = vld [vmem:[%s13251_s12 + $0x40] sm:$0xff] }
  0x26   : > { %876 = vmatpush.bf16.msra.mxu2 %v12614_v38  ;;  %v12672_v38 = vld [vmem:[%s16934_s2 + $0x1d8] sm:$0xff]  ;;  %v615_v11 = vshll.u32 %v12602_v5, 16  ;;  %v12669_v40 = vld [vmem:[%s16934_s2 + $0x1c0] sm:$0xff] }
  0x27   : > { %1108 = vmatpush.bf16.msra.mxu3 %v12630_v39  ;;  %v12648_v39 = vld [vmem:[%s16934_s2 + $0x158] sm:$0xff] }
  0x28   : > { %417 = vmatpush.bf16.msra.mxu0 %v12589_v43  ;;  %v599_v43 = vshll.u32 %v12600_v35, 16 }
  0x29   : > { %707 = vmatpush.bf16.msra.mxu1 %v12605_v44  ;;  %v13408_v44 = vld [vmem:[%s13251_s12 + $0x28] sm:$0xff] }
  0x2a   : > { %877 = vmatpush.bf16.msra.mxu2 %v12613_v47  ;;  %v601_v46 = vrot.slane %v599_v43, 1  ;;  %v801_v47 = vrot.slane %v12600_v35, 1  ;;  %v12645_v43 = vld [vmem:[%s16934_s2 + $0x140] sm:$0xff] }
  0x2b   : > { %1109 = vmatpush.bf16.msra.mxu3 %v12629_v48  ;;  %418 = vmatmul.bf16.vlgmr.msra.gmra.mxu0 %v12580_v55  ;;  %v1033_v48 = vrot.slane %v13408_v44, 1  ;;  %v12639_v55 = vld [vmem:[%s16934_s2 + $0x110] sm:$0xff] }
  0x2c   : > { %1342 = vmatpush.bf16.msrb.mxu0 %v12644_v54  ;;  %708 = vmatmul.bf16.vlgmr.msra.gmra.mxu1 %v578_v56  ;;  %v602_v50 = vsel %vm566_vm0, %v597_v45, %v601_v46  ;;  %v802_v51 = vsel %vm793_vm1, %v799_v28, %v801_v47  ;;  %v12663_v54 = vld [vmem:[%s16934_s2 + $0x190] sm:$0xff] }
  0x2d   : > { %878 = vmatmul.bf16.vlgmr.msra.gmra.mxu2 %v796_v57  ;;  %1512 = vmatpush.bf16.msrb.mxu1 %v12652_v60  ;;  %v1034_v52 = vsel %vm793_vm1, %v1031_v29, %v1033_v48  ;;  %v12671_v56 = vld [vmem:[%s16934_s2 + $0x1d0] sm:$0xff] }
  0x2e   : > { %1744 = vmatpush.bf16.msrb.mxu2 %v12668_v53  ;;  %1110 = vmatmul.bf16.vlgmr.msra.gmra.mxu3 %v1028_v58  ;;  %v12601_v53 = vld [vmem:[%s13251_s12 + $0x28] sm:$0xff]  ;;  %v12647_v57 = vld [vmem:[%s16934_s2 + $0x150] sm:$0xff]  ;;  %v603_v58 = vshrl.u32 %v12600_v35, 16 }
  0x2f   : > { %1984 = vmatpush.bf16.msrb.mxu3 %v12676_v59  ;;  %v607_v59 = vshll.u32 %v12601_v53, 16  ;;  %v13429_v60 = vld [vmem:[%s13251_s12 + $0x30] sm:$0xff]  ;;  %v803_v63 = vrot.slane %v12601_v53, 1  ;;  %v611_v10 = vshrl.u32 %v12601_v53, 16  ;;  %v12587_v53 = vld [vmem:[%s13251_s12 + $0x38] sm:$0xff] }
  0x30   : > { %1343 = vmatpush.bf16.msrb.mxu0 %v12643_v62 }
  0x31   : > { %1513 = vmatpush.bf16.msrb.mxu1 %v12651_v1  ;;  %v609_v62 = vrot.slane %v607_v59, 1  ;;  %v12584_v1 = vld [vmem:[%s13251_s12 + $0x20] sm:$0xff] }
  0x32   : > { %1745 = vmatpush.bf16.msrb.mxu2 %v12667_v61  ;;  %v605_v61 = vor.u32 %v603_v58, %v601_v46  ;;  %v960_v58 = vld [vmem:[%s13251_s12 + $0x50] sm:$0x1] }
  0x33   : > { %1985 = vmatpush.bf16.msrb.mxu3 %v12675_v0  ;;  %v1035_v0 = vrot.slane %v13429_v60, 1 }
  0x34   : > { %1344 = vmatpush.bf16.msrb.mxu0 %v12642_v3  ;;  %v804_v3 = vsel %vm793_vm1, %v801_v47, %v803_v63  ;;  %v13480_v47 = vld [vmem:[%s13251_s12 + $0x48] sm:$0xff] }
  0x35   : > { %1514 = vmatpush.bf16.msrb.mxu1 %v12650_v8  ;;  %v1036_v4 = vsel %vm793_vm1, %v1033_v48, %v1035_v0  ;;  %v12638_v8 = vld [vmem:[%s16934_s2 + $0x108] sm:$0xff] }
  0x36   : > { %1746 = vmatpush.bf16.msrb.mxu2 %v12666_v2  ;;  %v610_v2 = vsel %vm566_vm0, %v605_v61, %v609_v62  ;;  %v12717_v61 = vld [vmem:[%s16934_s2 + $0x78] sm:$0xff] }
  0x37   : > { %1986 = vmatpush.bf16.msrb.mxu3 %v12674_v7  ;;  %v12662_v7 = vld [vmem:[%s16934_s2 + $0x188] sm:$0xff] }
  0x38   : > { %1345 = vmatpush.bf16.msrb.mxu0 %v12641_v19 }
  0x39   : > { %1515 = vmatpush.bf16.msrb.mxu1 %v12649_v21  ;;  %v12603_v21 = vld [vmem:[%s13251_s12 + $0x38] sm:$0xff] }
  0x3a   : > { %1747 = vmatpush.bf16.msrb.mxu2 %v12665_v18  ;;  %v623_v26 = vshll.u32 %v12603_v21, 16  ;;  %v627_v45 = vshrl.u32 %v12603_v21, 16 }
  0x3b   : > { %423 = vmatmul.bf16.gmra.mxu0 %v12581_v13  ;;  %1987 = vmatpush.bf16.msrb.mxu3 %v12673_v20  ;;  %v613_v13 = vor.u32 %v611_v10, %v609_v62  ;;  %v12684_v62 = vld [vmem:[%s16934_s2 + $0x238] sm:$0xff] }
  0x3c   : > { %713 = vmatmul.bf16.gmra.mxu1 %v586_v14  ;;  %1346 = vmatpush.bf16.msrb.mxu0 %v12640_v37  ;;  %v617_v14 = vrot.slane %v615_v11, 1  ;;  %v625_v29 = vrot.slane %v623_v26, 1  ;;  %v12604_v37 = vld [vmem:[%s13251_s12 + $0x40] sm:$0xff]  ;;  %v1414_v26 = vld [vmem:[%s13251_s12 + $0x8] sm:$0xc] }
  0x3d   : > { %883 = vmatmul.bf16.gmra.mxu2 %v798_v15  ;;  %1516 = vmatpush.bf16.msrb.mxu1 %v12648_v39  ;;  %v805_v15 = vrot.slane %v12602_v5, 1  ;;  %v12637_v39 = vld [vmem:[%s16934_s2 + $0x100] sm:$0xff]  ;;  %v631_v46 = vshll.u32 %v12604_v37, 16  ;;  %v13500_v5 = vld [vmem:[%s13251_s12 + $0x14] sm:$0xf] }
  0x3e   : > { %1115 = vmatmul.bf16.gmra.mxu3 %v1030_v16  ;;  %1748 = vmatpush.bf16.msrb.mxu2 %v12664_v36  ;;  %v1037_v16 = vrot.slane %v13447_v12, 1  ;;  %v618_v18 = vsel %vm566_vm0, %v613_v13, %v617_v14  ;;  %v621_v28 = vor.u32 %v619_v24, %v617_v14  ;;  %v629_v48 = vor.u32 %v627_v45, %v625_v29  ;;  %v13509_v13 = vld [vmem:[%s16935_s3] ss:$0 sm:$0xff] }
  0x3f   : > { %1988 = vmatpush.bf16.msrb.mxu3 %v12672_v38  ;;  %v806_v19 = vsel %vm793_vm1, %v803_v63, %v805_v15  ;;  %v12661_v38 = vld [vmem:[%s16934_s2 + $0x180] sm:$0xff]  ;;  %v12725_v63 = vld [vmem:[%s16934_s2 + $0xb8] sm:$0xff]  ;;  %v1640_v11 = vunpack.c.l.b16 %v13500_v5  ;;  %v2245_v5 = vld [vmem:[%s16932_s0 + $0x8] sm:$0xff] }
  0x40   : > { %1347 = vmatpush.bf16.msrb.mxu0 %v12639_v55  ;;  %v1038_v20 = vsel %vm793_vm1, %v1035_v0, %v1037_v16  ;;  %v1015_v0 = vunpack.c.l.b16 %v960_v58 }
  0x41   : > { %1517 = vmatpush.bf16.msrb.mxu1 %v12647_v57 }
  0x42   : > { %1749 = vmatpush.bf16.msrb.mxu2 %v12663_v54 }
  0x43   : > { %1989 = vmatpush.bf16.msrb.mxu3 %v12671_v56 }
  0x44   : > { %1348 = vmatpush.bf16.msrb.mxu0 %v12638_v8 }
  0x45   : > { %1518 = vmatpush.bf16.msrb.mxu1 %v12646_v23 }
  0x46   : > { %1750 = vmatpush.bf16.msrb.mxu2 %v12662_v7  ;;  %v12701_v7 = vld [vmem:[%s16934_s2 + $0x38] sm:$0xff] }
  0x47   : > { %1990 = vmatpush.bf16.msrb.mxu3 %v12670_v9 }
  0x48   : > { %1349 = vmatpush.bf16.msrb.mxu0 %v12637_v39 }
  0x49   : > { %1519 = vmatpush.bf16.msrb.mxu1 %v12645_v43 }
  0x4a   : > { %1751 = vmatpush.bf16.msrb.mxu2 %v12661_v38 }
  0x4b   : > { %428 = vmatmul.bf16.gmra.mxu0 %v12582_v31  ;;  %v807_v31 = vrot.slane %v12603_v21, 1  ;;  %1991 = vmatpush.bf16.msrb.mxu3 %v12669_v40 }
  0x4c   : > { %718 = vmatmul.bf16.gmra.mxu1 %v594_v32  ;;  %v1039_v32 = vrot.slane %v13459_v27, 1  ;;  %2154 = vmatpush.bf16.msra.mxu0 %v12684_v62  ;;  %v12724_v62 = vld [vmem:[%s16934_s2 + $0xb0] sm:$0xff] }
  0x4d   : > { %888 = vmatmul.bf16.gmra.mxu2 %v800_v33  ;;  %v12586_v33 = vld [vmem:[%s13251_s12 + $0x30] sm:$0xff]  ;;  %v808_v35 = vsel %vm793_vm1, %v805_v15, %v807_v31  ;;  %2747 = vmatpush.bf16.msra.mxu1 %v12701_v7 }
  0x4e   : > { %1120 = vmatmul.bf16.gmra.mxu3 %v1032_v34  ;;  %v626_v34 = vsel %vm566_vm0, %v621_v28, %v625_v29  ;;  %v1040_v36 = vsel %vm793_vm1, %v1037_v16, %v1039_v32  ;;  %3035 = vmatpush.bf16.msra.mxu2 %v12717_v61  ;;  %v12588_v16 = vld [vmem:[%s13251_s12 + $0x40] sm:$0xff]  ;;  %v13522_v28 = vld [vmem:[%s13251_s12 + $0x18] sm:$0xff]  ;;  %v1197_v29 = vshrl.u32 %v13306_v42, 16  ;;  %v12683_v61 = vld [vmem:[%s16934_s2 + $0x230] sm:$0xff] }
  0x4f   : > { %3203 = vmatpush.bf16.msra.mxu3 %v12725_v63  ;;  %v1847_v39 = vshrl.u32 %v13522_v28, 16  ;;  %v1850_v40 = vshll.u32 %v13522_v28, 16 }
  0x50   : > { %v1199_v45 = vrot.slane %v1197_v29, 1  ;;  %2155 = vmatpush.bf16.msra.mxu0 %v12683_v61  ;;  %v1217_v29 = vshll.u32 %v13360_v6, 16 }
  0x51   : > { %v1852_v58 = vrot.slane %v1850_v40, 3 }
  0x53   : > { %3204 = vmatpush.bf16.msra.mxu3 %v12724_v62 }
  0x5b   : > { %433 = vmatmul.bf16.gmra.mxu0 %v12583_v49  ;;  %v633_v49 = vrot.slane %v631_v46, 1 }
  0x5c   : > { %723 = vmatmul.bf16.gmra.mxu1 %v602_v50  ;;  %v809_v50 = vrot.slane %v12604_v37, 1 }
  0x5d   : > { %893 = vmatmul.bf16.gmra.mxu2 %v802_v51  ;;  %v1041_v51 = vrot.slane %v13480_v47, 1  ;;  %v634_v54 = vsel %vm566_vm0, %v629_v48, %v633_v49 }
  0x5e   : > { %1125 = vmatmul.bf16.gmra.mxu3 %v1034_v52  ;;  %v500_v52 = vld [vmem:[%s13251_s12 + $0x48] sm:$0x1]  ;;  %v810_v56 = vsel %vm793_vm1, %v807_v31, %v809_v50 }
  0x5f   : > { %v555_v55 = vunpack.c.l.b16 %v500_v52  ;;  %v1042_v57 = vsel %vm793_vm1, %v1039_v32, %v1041_v51  ;;  %v1200_v32 = vshll.u32 %v13306_v42, 16 }
  0x61   : > { %v565_v59 = vpack.c.b16 %v555_v55, %v555_v55  ;;  %v1202_v46 = vrot.slane %v1200_v32, 2 }
  0x63   : > { %v811_v14 = vrot.slane %v565_v59, 1 }
  0x65   : > { %v812_v23 = vsel %vm793_vm1, %v809_v50, %v811_v14 }
  0x6b   : > { %438 = vmatmul.bf16.gmra.mxu0 %v12584_v1  ;;  %v635_v1 = vshrl.u32 %v12604_v37, 16  ;;  %v12716_v37 = vld [vmem:[%s16934_s2 + $0x70] sm:$0xff] }
  0x6c   : > { %728 = vmatmul.bf16.gmra.mxu1 %v610_v2  ;;  %v639_v2 = vshll.u32 %v565_v59, 16  ;;  %3036 = vmatpush.bf16.msra.mxu2 %v12716_v37 }
  0x6d   : > { %898 = vmatmul.bf16.gmra.mxu2 %v804_v3  ;;  %v1025_v3 = vpack.c.b16 %v1015_v0, %v1015_v0  ;;  %v637_v8 = vor.u32 %v635_v1, %v633_v49  ;;  %v1203_v0 = vor.u32 %v1202_v46, %v1199_v45  ;;  %v12715_v46 = vld [vmem:[%s16934_s2 + $0x68] sm:$0xff] }
  0x6e   : > { %1130 = vmatmul.bf16.gmra.mxu3 %v1036_v4  ;;  %v1584_v4 = vld [vmem:[%s13251_s12 + $0x10] sm:$0xc]  ;;  %v641_v9 = vrot.slane %v639_v2, 1  ;;  %v1437_v2 = vrot.slane %v13302_v41, 2 }
  0x6f   : > { %v1639_v10 = vunpack.c.l.b16 %v1584_v4  ;;  %v1043_v15 = vrot.slane %v1025_v3, 1  ;;  %v1669_v4 = vrot.slane %v13522_v28, 2 }
  0x70   : > { %3037 = vmatpush.bf16.msra.mxu2 %v12715_v46 }
  0x71   : > { %v1044_v24 = vsel %vm793_vm1, %v1041_v51, %v1043_v15 }
  0x7b   : > { %443 = vmatmul.bf16.gmra.mxu0 %v12585_v17 }
  0x7c   : > { %733 = vmatmul.bf16.gmra.mxu1 %v618_v18 }
  0x7d   : > { %903 = vmatmul.bf16.gmra.mxu2 %v806_v19  ;;  %v642_v19 = vsel %vm566_vm0, %v637_v8, %v641_v9 }
  0x7e   : > { %1135 = vmatmul.bf16.gmra.mxu3 %v1038_v20  ;;  %v13515_v20 = vpack.c.b16 %v1640_v11, %v1639_v10 }
  0x80   : > { %v1842_v38 = vshll.u32 %v13515_v20, 16  ;;  %v1668_v3 = vrot.slane %v13515_v20, 2 }
  0x8b   : > { %448 = vmatmul.bf16.gmra.mxu0 %v12586_v33  ;;  %v1205_v33 = vshrl.u32 %v13302_v41, 16 }
  0x8c   : > { %738 = vmatmul.bf16.gmra.mxu1 %v626_v34  ;;  %v1208_v34 = vshll.u32 %v13302_v41, 16 }
  0x8d   : > { %908 = vmatmul.bf16.gmra.mxu2 %v808_v35  ;;  %v1433_v35 = vunpack.c.l.b16 %v1414_v26  ;;  %v1207_v48 = vrot.slane %v1205_v33, 1  ;;  %v1214_v26 = vshrl.u32 %v13360_v6, 16 }
  0x8e   : > { %1140 = vmatmul.bf16.gmra.mxu3 %v1040_v36  ;;  %v1839_v36 = vshrl.u32 %v13515_v20, 16  ;;  %v1210_v49 = vrot.slane %v1208_v34, 2 }
  0x90   : > { %v13546_v22 = vor.u32 %v1210_v49, %v1207_v48  ;;  %v12682_v49 = vld [vmem:[%s16934_s2 + $0x228] sm:$0xff] }
  0x91   : > { %2156 = vmatpush.bf16.msra.mxu0 %v12682_v49 }
  0x92   : > { %v1212_v41 = vsel %vm1195_vm2, %v1203_v0, %v13546_v22 }
  0x9b   : > { %453 = vmatmul.bf16.gmra.mxu0 %v12587_v53  ;;  %v1434_v53 = vpack.c.b16 %v998_v30, %v1433_v35  ;;  %v12700_v30 = vld [vmem:[%s16934_s2 + $0x30] sm:$0xff] }
  0x9c   : > { %743 = vmatmul.bf16.gmra.mxu1 %v634_v54  ;;  %v1841_v54 = vrot.slane %v1839_v36, 2 }
  0x9d   : > { %913 = vmatmul.bf16.gmra.mxu2 %v810_v56  ;;  %v1844_v56 = vrot.slane %v1842_v38, 3  ;;  %v1436_v1 = vrot.slane %v1434_v53, 2  ;;  %2748 = vmatpush.bf16.msra.mxu1 %v12700_v30  ;;  %v1216_v38 = vrot.slane %v1214_v26, 1  ;;  %v1439_v53 = vrot.slane %v13360_v6, 2 }
  0x9e   : > { %1145 = vmatmul.bf16.gmra.mxu3 %v1042_v57  ;;  %v1849_v57 = vrot.slane %v1847_v39, 2  ;;  %v1219_v39 = vrot.slane %v1217_v29, 2 }
  0x9f   : > { %v1845_v7 = vor.u32 %v1844_v56, %v1841_v54  ;;  %v1440_v0 = vsel %vm1435_vm3, %v1437_v2, %v1439_v53 }
  0xa0   : > { %v1853_v8 = vor.u32 %v1852_v58, %v1849_v57 }
  0xa2   : > { %v1854_v20 = vsel %vm1837_vm4, %v1845_v7, %v1853_v8 }
  0xa8   : > { %v419_v17 = vpop.f32.mrf.mxu0 }
  0xa9   : > { %v709_v18 = vpop.f32.mrf.mxu1  ;;  %v464_v21 = vadd.f32 %v13509_v13, %v419_v17  ;;  %v1438_v17 = vsel %vm1435_vm3, %v1436_v1, %v1437_v2 }
  0xab   : > { %v754_v31 = vadd.f32 %v709_v18, %v464_v21  ;;  %458 = vmatmul.bf16.gmra.mxu0 %v12588_v16  ;;  %v13561_v21 = vld [vmem:[%s13251_s12 + $0x20] sm:$0xff] }
  0xac   : > { %748 = vmatmul.bf16.gmra.mxu1 %v642_v19  ;;  %v1670_v19 = vsel %vm1435_vm3, %v1668_v3, %v1669_v4  ;;  %v1859_v32 = vshll.u32 %v13561_v21, 16  ;;  %v1671_v54 = vrot.slane %v13561_v21, 2  ;;  %v13593_v3 = vld [vmem:[%s13251_s12 + $0x28] sm:$0xff] }
  0xad   : > { %918 = vmatmul.bf16.gmra.mxu2 %v812_v23  ;;  %v1865_v2 = vshrl.u32 %v13593_v3, 16 }
  0xae   : > { %1150 = vmatmul.bf16.gmra.mxu3 %v1044_v24  ;;  %v1672_v30 = vsel %vm1435_vm3, %v1669_v4, %v1671_v54 }
  0xb0   : > { %v879_v42 = vpop.f32.mrf.mxu2  ;;  %v421_v51 = vpop.f32.mrf.mxu0 }
  0xb1   : > { %v1111_v43 = vpop.f32.mrf.mxu3  ;;  %v924_v50 = vadd.f32 %v879_v42, %v754_v31  ;;  %v711_v52 = vpop.f32.mrf.mxu1  ;;  %v465_v55 = vadd.f32 %v13509_v13, %v421_v51  ;;  %v1856_v31 = vshrl.u32 %v13561_v21, 16  ;;  %v12699_v51 = vld [vmem:[%s16934_s2 + $0x28] sm:$0xff] }
  0xb2   : > { %2749 = vmatpush.bf16.msra.mxu1 %v12699_v51 }
  0xb3   : > { %v13538_v59 = vadd.f32 %v1111_v43, %v924_v50  ;;  %v755_v63 = vadd.f32 %v711_v52, %v465_v55  ;;  %v1858_v42 = vrot.slane %v1856_v31, 2  ;;  %v1861_v43 = vrot.slane %v1859_v32, 3  ;;  %v12723_v50 = vld [vmem:[%s16934_s2 + $0xa8] sm:$0xff]  ;;  %v12714_v31 = vld [vmem:[%s16934_s2 + $0x60] sm:$0xff] }
  0xb4   : > { %v1220_v52 = vor.u32 %v1219_v39, %v1216_v38  ;;  %3205 = vmatpush.bf16.msra.mxu3 %v12723_v50  ;;  %v12681_v32 = vld [vmem:[%s16934_s2 + $0x220] sm:$0xff]  ;;  %3038 = vmatpush.bf16.msra.mxu2 %v12714_v31 }
  0xb5   : > { %v1862_v55 = vor.u32 %v1861_v43, %v1858_v42  ;;  %2157 = vmatpush.bf16.msra.mxu0 %v12681_v32 }
  0xb7   : > { %v1863_v1 = vsel %vm1837_vm4, %v1853_v8, %v1862_v55 }
  0xb8   : > { %v881_v9 = vpop.f32.mrf.mxu2  ;;  %v424_v15 = vpop.f32.mrf.mxu0 }
  0xb9   : > { %v1113_v10 = vpop.f32.mrf.mxu3  ;;  %v925_v14 = vadd.f32 %v881_v9, %v755_v63  ;;  %v714_v16 = vpop.f32.mrf.mxu1  ;;  %v466_v18 = vadd.f32 %v13509_v13, %v424_v15  ;;  %v1221_v63 = vsel %vm1195_vm2, %v13546_v22, %v1220_v52  ;;  %v1226_v22 = vshll.u32 %v13387_v25, 16 }
  0xbb   : > { %v13563_v23 = vadd.f32 %v1113_v10, %v925_v14  ;;  %v756_v24 = vadd.f32 %v714_v16, %v466_v18  ;;  %1350 = vmatmul.bf16.vlgmr.msrb.gmra.mxu0 %v1212_v41  ;;  %v1223_v10 = vshrl.u32 %v13387_v25, 16  ;;  %v1868_v14 = vshll.u32 %v13593_v3, 16 }
  0xbc   : > { %1520 = vmatmul.bf16.vlgmr.msrb.gmra.mxu1 %v1438_v17  ;;  %v1228_v18 = vrot.slane %v1226_v22, 2 }
  0xbd   : > { %1752 = vmatmul.bf16.vlgmr.msrb.gmra.mxu2 %v1670_v19  ;;  %v1225_v17 = vrot.slane %v1223_v10, 1 }
  0xbe   : > { %1992 = vmatmul.bf16.vlgmr.msrb.gmra.mxu3 %v1854_v20  ;;  %v1867_v20 = vrot.slane %v1865_v2, 2 }
  0xc0   : > { %v884_v33 = vpop.f32.mrf.mxu2  ;;  %v426_v36 = vpop.f32.mrf.mxu0 }
  0xc1   : > { %v1116_v34 = vpop.f32.mrf.mxu3  ;;  %v926_v35 = vadd.f32 %v884_v33, %v756_v24  ;;  %v716_v37 = vpop.f32.mrf.mxu1  ;;  %v467_v40 = vadd.f32 %v13509_v13, %v426_v36  ;;  %v1870_v24 = vrot.slane %v1868_v14, 3  ;;  %v12722_v33 = vld [vmem:[%s16934_s2 + $0xa0] sm:$0xff] }
  0xc2   : > { %v12698_v36 = vld [vmem:[%s16934_s2 + $0x20] sm:$0xff]  ;;  %3206 = vmatpush.bf16.msra.mxu3 %v12722_v33 }
  0xc3   : > { %v13570_v45 = vadd.f32 %v1116_v34, %v926_v35  ;;  %v757_v48 = vadd.f32 %v716_v37, %v467_v40  ;;  %v1229_v34 = vor.u32 %v1228_v18, %v1225_v17  ;;  %v1441_v35 = vrot.slane %v13387_v25, 2  ;;  %2750 = vmatpush.bf16.msra.mxu1 %v12698_v36 }
  0xc4   : > { %v1673_v37 = vrot.slane %v13593_v3, 2  ;;  %v1871_v38 = vor.u32 %v1870_v24, %v1867_v20 }
  0xc5   : > { %v1442_v25 = vsel %vm1435_vm3, %v1439_v53, %v1441_v35 }
  0xc6   : > { %v1674_v50 = vsel %vm1435_vm3, %v1671_v54, %v1673_v37  ;;  %v1872_v51 = vsel %vm1837_vm4, %v1862_v55, %v1871_v38 }
  0xc8   : > { %v886_v56 = vpop.f32.mrf.mxu2  ;;  %v429_v61 = vpop.f32.mrf.mxu0 }
  0xc9   : > { %v1118_v57 = vpop.f32.mrf.mxu3  ;;  %v927_v58 = vadd.f32 %v886_v56, %v757_v48  ;;  %v719_v62 = vpop.f32.mrf.mxu1  ;;  %v468_v6 = vadd.f32 %v13509_v13, %v429_v61  ;;  %v1230_v48 = vsel %vm1195_vm2, %v1220_v52, %v1229_v34  ;;  %v13624_v56 = vld [vmem:[%s13251_s12 + $0x30] sm:$0xff]  ;;  %v1232_v61 = vshrl.u32 %v13408_v44, 16 }
  0xca   : > { %v1235_v52 = vshll.u32 %v13408_v44, 16  ;;  %v1874_v53 = vshrl.u32 %v13624_v56, 16  ;;  %v1675_v17 = vrot.slane %v13624_v56, 2 }
  0xcb   : > { %v13595_v7 = vadd.f32 %v1118_v57, %v927_v58  ;;  %v758_v9 = vadd.f32 %v719_v62, %v468_v6  ;;  %1355 = vmatmul.bf16.gmra.mxu0 %v1221_v63  ;;  %v1877_v62 = vshll.u32 %v13624_v56, 16 }
  0xcc   : > { %1525 = vmatmul.bf16.gmra.mxu1 %v1440_v0  ;;  %v1876_v10 = vrot.slane %v1874_v53, 2 }
  0xcd   : > { %1757 = vmatmul.bf16.gmra.mxu2 %v1672_v30  ;;  %v1234_v30 = vrot.slane %v1232_v61, 1  ;;  %v1879_v22 = vrot.slane %v1877_v62, 3 }
  0xce   : > { %1997 = vmatmul.bf16.gmra.mxu3 %v1863_v1  ;;  %v1237_v1 = vrot.slane %v1235_v52, 2 }
  0xcf   : > { %v1880_v18 = vor.u32 %v1879_v22, %v1876_v10 }
  0xd0   : > { %v889_v4 = vpop.f32.mrf.mxu2  ;;  %v431_v16 = vpop.f32.mrf.mxu0 }
  0xd1   : > { %v1121_v15 = vpop.f32.mrf.mxu3  ;;  %v928_v8 = vadd.f32 %v889_v4, %v758_v9  ;;  %v721_v41 = vpop.f32.mrf.mxu1  ;;  %v469_v19 = vadd.f32 %v13509_v13, %v431_v16  ;;  %v12713_v4 = vld [vmem:[%s16934_s2 + $0x58] sm:$0xff]  ;;  %v1238_v16 = vor.u32 %v1237_v1, %v1234_v30 }
  0xd2   : > { %3039 = vmatpush.bf16.msra.mxu2 %v12713_v4 }
  0xd3   : > { %v13602_v26 = vadd.f32 %v1121_v15, %v928_v8  ;;  %v759_v29 = vadd.f32 %v721_v41, %v469_v19  ;;  %v12680_v15 = vld [vmem:[%s16934_s2 + $0x218] sm:$0xff]  ;;  %v1443_v41 = vrot.slane %v13408_v44, 2  ;;  %v1239_v32 = vsel %vm1195_vm2, %v1229_v34, %v1238_v16 }
  0xd4   : > { %v12721_v8 = vld [vmem:[%s16934_s2 + $0x98] sm:$0xff]  ;;  %2158 = vmatpush.bf16.msra.mxu0 %v12680_v15  ;;  %v1676_v44 = vsel %vm1435_vm3, %v1673_v37, %v1675_v17  ;;  %v1241_v34 = vshrl.u32 %v13429_v60, 16 }
  0xd5   : > { %3207 = vmatpush.bf16.msra.mxu3 %v12721_v8  ;;  %v1444_v33 = vsel %vm1435_vm3, %v1441_v35, %v1443_v41  ;;  %v1244_v35 = vshll.u32 %v13429_v60, 16 }
  0xd7   : > { %v1246_v61 = vrot.slane %v1244_v35, 2 }
  0xd8   : > { %v891_v39 = vpop.f32.mrf.mxu2  ;;  %v434_v43 = vpop.f32.mrf.mxu0 }
  0xd9   : > { %v1123_v40 = vpop.f32.mrf.mxu3  ;;  %v929_v42 = vadd.f32 %v891_v39, %v759_v29  ;;  %v724_v46 = vpop.f32.mrf.mxu1  ;;  %v470_v49 = vadd.f32 %v13509_v13, %v434_v43  ;;  %v1881_v39 = vsel %vm1837_vm4, %v1871_v38, %v1880_v18  ;;  %v12697_v43 = vld [vmem:[%s16934_s2 + $0x18] sm:$0xff] }
  0xda   : > { %2751 = vmatpush.bf16.msra.mxu1 %v12697_v43 }
  0xdb   : > { %v13626_v57 = vadd.f32 %v1123_v40, %v929_v42  ;;  %v760_v58 = vadd.f32 %v724_v46, %v470_v49  ;;  %1360 = vmatmul.bf16.gmra.mxu0 %v1230_v48  ;;  %v13652_v40 = vld [vmem:[%s13251_s12 + $0x38] sm:$0xff] }
  0xdc   : > { %1530 = vmatmul.bf16.gmra.mxu1 %v1442_v25  ;;  %v1883_v37 = vshrl.u32 %v13652_v40, 16  ;;  %v1886_v38 = vshll.u32 %v13652_v40, 16  ;;  %v1677_v30 = vrot.slane %v13652_v40, 2 }
  0xdd   : > { %1762 = vmatmul.bf16.gmra.mxu2 %v1674_v50 }
  0xde   : > { %2002 = vmatmul.bf16.gmra.mxu3 %v1872_v51  ;;  %v1885_v53 = vrot.slane %v1883_v37, 2  ;;  %v1888_v62 = vrot.slane %v1886_v38, 3 }
  0xe0   : > { %v894_v54 = vpop.f32.mrf.mxu2  ;;  %v436_v0 = vpop.f32.mrf.mxu0  ;;  %v1889_v1 = vor.u32 %v1888_v62, %v1885_v53 }
  0xe1   : > { %v1126_v63 = vpop.f32.mrf.mxu3  ;;  %v930_v55 = vadd.f32 %v894_v54, %v760_v58  ;;  %v726_v6 = vpop.f32.mrf.mxu1  ;;  %v471_v9 = vadd.f32 %v13509_v13, %v436_v0  ;;  %v1243_v58 = vrot.slane %v1241_v34, 1 }
  0xe3   : > { %v13633_v2 = vadd.f32 %v1126_v63, %v930_v55  ;;  %v761_v14 = vadd.f32 %v726_v6, %v471_v9  ;;  %v12712_v55 = vld [vmem:[%s16934_s2 + $0x50] sm:$0xff]  ;;  %v1247_v0 = vor.u32 %v1246_v61, %v1243_v58  ;;  %v1445_v6 = vrot.slane %v13429_v60, 2  ;;  %v13677_v60 = vld [vmem:[%s13251_s12 + $0x40] sm:$0xff] }
  0xe4   : > { %3040 = vmatpush.bf16.msra.mxu2 %v12712_v55  ;;  %v1447_v58 = vrot.slane %v13447_v12, 2  ;;  %v1679_v61 = vrot.slane %v13677_v60, 2 }
  0xe5   : > { %v1248_v15 = vsel %vm1195_vm2, %v1238_v16, %v1247_v0  ;;  %v1446_v8 = vsel %vm1435_vm3, %v1443_v41, %v1445_v6  ;;  %v12720_v16 = vld [vmem:[%s16934_s2 + $0x90] sm:$0xff] }
  0xe6   : > { %v12696_v41 = vld [vmem:[%s16934_s2 + $0x10] sm:$0xff]  ;;  %3208 = vmatpush.bf16.msra.mxu3 %v12720_v16 }
  0xe7   : > { %2752 = vmatpush.bf16.msra.mxu1 %v12696_v41 }
  0xe8   : > { %v896_v19 = vpop.f32.mrf.mxu2  ;;  %v439_v29 = vpop.f32.mrf.mxu0 }
  0xe9   : > { %v1128_v20 = vpop.f32.mrf.mxu3  ;;  %v931_v24 = vadd.f32 %v896_v19, %v761_v14  ;;  %v729_v31 = vpop.f32.mrf.mxu1  ;;  %v472_v36 = vadd.f32 %v13509_v13, %v439_v29 }
  0xeb   : > { %v13654_v42 = vadd.f32 %v1128_v20, %v931_v24  ;;  %v762_v46 = vadd.f32 %v729_v31, %v472_v36  ;;  %1365 = vmatmul.bf16.gmra.mxu0 %v1239_v32  ;;  %v1678_v20 = vsel %vm1435_vm3, %v1675_v17, %v1677_v30  ;;  %v1890_v24 = vsel %vm1837_vm4, %v1880_v18, %v1889_v1  ;;  %v12679_v31 = vld [vmem:[%s16934_s2 + $0x210] sm:$0xff] }
  0xec   : > { %1535 = vmatmul.bf16.gmra.mxu1 %v1444_v33  ;;  %v1250_v17 = vshrl.u32 %v13447_v12, 16  ;;  %v1253_v18 = vshll.u32 %v13447_v12, 16  ;;  %v1892_v33 = vshrl.u32 %v13677_v60, 16  ;;  %v1895_v36 = vshll.u32 %v13677_v60, 16  ;;  %2159 = vmatpush.bf16.msra.mxu0 %v12679_v31 }
  0xed   : > { %1767 = vmatmul.bf16.gmra.mxu2 %v1676_v44 }
  0xee   : > { %2007 = vmatmul.bf16.gmra.mxu3 %v1881_v39  ;;  %v1252_v35 = vrot.slane %v1250_v17, 1  ;;  %v1255_v37 = vrot.slane %v1253_v18, 2 }
  0xf0   : > { %v899_v48 = vpop.f32.mrf.mxu2  ;;  %v441_v50 = vpop.f32.mrf.mxu0 }
  0xf1   : > { %v1131_v25 = vpop.f32.mrf.mxu3  ;;  %v932_v49 = vadd.f32 %v899_v48, %v762_v46  ;;  %v731_v51 = vpop.f32.mrf.mxu1  ;;  %v473_v52 = vadd.f32 %v13509_v13, %v441_v50  ;;  %v1894_v48 = vrot.slane %v1892_v33, 2 }
  0xf3   : > { %v13664_v54 = vadd.f32 %v1131_v25, %v932_v49  ;;  %v763_v63 = vadd.f32 %v731_v51, %v473_v52  ;;  %v1897_v25 = vrot.slane %v1895_v36, 3  ;;  %v1256_v51 = vor.u32 %v1255_v37, %v1252_v35 }
  0xf5   : > { %v1898_v52 = vor.u32 %v1897_v25, %v1894_v48 }
  0xf8   : > { %v901_v9 = vpop.f32.mrf.mxu2  ;;  %v444_v14 = vpop.f32.mrf.mxu0 }
  0xf9   : > { %v1133_v10 = vpop.f32.mrf.mxu3  ;;  %v933_v22 = vadd.f32 %v901_v9, %v763_v63  ;;  %v734_v4 = vpop.f32.mrf.mxu1  ;;  %v474_v19 = vadd.f32 %v13509_v13, %v444_v14 }
  0xfb   : > { %v13679_v29 = vadd.f32 %v1133_v10, %v933_v22  ;;  %v764_v32 = vadd.f32 %v734_v4, %v474_v19  ;;  %1370 = vmatmul.bf16.gmra.mxu0 %v1248_v15  ;;  %v1257_v10 = vsel %vm1195_vm2, %v1247_v0, %v1256_v51  ;;  %v1448_v22 = vsel %vm1435_vm3, %v1445_v6, %v1447_v58  ;;  %v12711_v19 = vld [vmem:[%s16934_s2 + $0x48] sm:$0xff] }
  0xfc   : > { %1540 = vmatmul.bf16.gmra.mxu1 %v1446_v8  ;;  %v1680_v4 = vsel %vm1435_vm3, %v1677_v30, %v1679_v61  ;;  %v1899_v15 = vsel %vm1837_vm4, %v1889_v1, %v1898_v52  ;;  %v13705_v8 = vld [vmem:[%s13251_s12 + $0x48] sm:$0xff]  ;;  %v1259_v30 = vshrl.u32 %v13459_v27, 16  ;;  %v1262_v1 = vshll.u32 %v13459_v27, 16  ;;  %3041 = vmatpush.bf16.msra.mxu2 %v12711_v19 }
  0xfd   : > { %1772 = vmatmul.bf16.gmra.mxu2 %v1678_v20  ;;  %v12678_v0 = vld [vmem:[%s16934_s2 + $0x208] sm:$0xff]  ;;  %v1901_v31 = vshrl.u32 %v13705_v8, 16  ;;  %v1904_v16 = vshll.u32 %v13705_v8, 16  ;;  %v1681_v48 = vrot.slane %v13705_v8, 2 }
  0xfe   : > { %2012 = vmatmul.bf16.gmra.mxu3 %v1890_v24  ;;  %v12719_v6 = vld [vmem:[%s16934_s2 + $0x88] sm:$0xff]  ;;  %2160 = vmatpush.bf16.msra.mxu0 %v12678_v0  ;;  %v1261_v36 = vrot.slane %v1259_v30, 1  ;;  %v12694_v0 = vld [vmem:[%s16934_s2] sm:$0xff] }
  0xff   : > { %v12695_v24 = vld [vmem:[%s16934_s2 + $0x8] sm:$0xff]  ;;  %3209 = vmatpush.bf16.msra.mxu3 %v12719_v6 }
 0x100   : > { %v904_v44 = vpop.f32.mrf.mxu2  ;;  %v446_v46 = vpop.f32.mrf.mxu0  ;;  %2753 = vmatpush.bf16.msra.mxu1 %v12695_v24 }
 0x101   : > { %v1136_v39 = vpop.f32.mrf.mxu3  ;;  %v934_v43 = vadd.f32 %v904_v44, %v764_v32  ;;  %v736_v34 = vpop.f32.mrf.mxu1  ;;  %v475_v38 = vadd.f32 %v13509_v13, %v446_v46  ;;  %v1264_v44 = vrot.slane %v1262_v1, 2  ;;  %v1906_v46 = vrot.slane %v1904_v16, 3 }
 0x103   : > { %v13695_v49 = vadd.f32 %v1136_v39, %v934_v43  ;;  %v765_v50 = vadd.f32 %v736_v34, %v475_v38  ;;  %v1903_v43 = vrot.slane %v1901_v31, 2  ;;  %v1265_v37 = vor.u32 %v1264_v44, %v1261_v36  ;;  %v1174_v44 = vld [vmem:[%s13251_s12 + $0x50] sm:$0x3] }
 0x104   : > { %v1449_v38 = vrot.slane %v13459_v27, 2  ;;  %2754 = vmatpush.bf16.msra.mxu1 %v12694_v0 }
 0x105   : > { %v1907_v25 = vor.u32 %v1906_v46, %v1903_v43  ;;  %v1816_v43 = vld [vmem:[%s13251_s12 + $0x58] sm:$0x7] }
 0x108   : > { %v906_v53 = vpop.f32.mrf.mxu2  ;;  %v449_v55 = vpop.f32.mrf.mxu0 }
 0x109   : > { %v1138_v62 = vpop.f32.mrf.mxu3  ;;  %v935_v63 = vadd.f32 %v906_v53, %v765_v50  ;;  %v739_v9 = vpop.f32.mrf.mxu1  ;;  %v476_v14 = vadd.f32 %v13509_v13, %v449_v55 }
 0x10b   : > { %v13707_v12 = vadd.f32 %v1138_v62, %v935_v63  ;;  %v766_v20 = vadd.f32 %v739_v9, %v476_v14  ;;  %1375 = vmatmul.bf16.gmra.mxu0 %v1257_v10  ;;  %v1266_v9 = vsel %vm1195_vm2, %v1256_v51, %v1265_v37  ;;  %v1450_v10 = vsel %vm1435_vm3, %v1447_v58, %v1449_v38 }
 0x10c   : > { %1545 = vmatmul.bf16.gmra.mxu1 %v1448_v22  ;;  %v1682_v14 = vsel %vm1435_vm3, %v1679_v61, %v1681_v48  ;;  %v1268_v51 = vshrl.u32 %v13480_v47, 16  ;;  %v1271_v58 = vshll.u32 %v13480_v47, 16  ;;  %v12677_v61 = vld [vmem:[%s16934_s2 + $0x200] sm:$0xff] }
 0x10d   : > { %1777 = vmatmul.bf16.gmra.mxu2 %v1680_v4  ;;  %v1908_v4 = vsel %vm1837_vm4, %v1898_v52, %v1907_v25  ;;  %v12718_v52 = vld [vmem:[%s16934_s2 + $0x80] sm:$0xff]  ;;  %2161 = vmatpush.bf16.msra.mxu0 %v12677_v61 }
 0x10e   : > { %2017 = vmatmul.bf16.gmra.mxu3 %v1899_v15  ;;  %v13736_v15 = vld [vmem:[%s13251_s12 + $0x50] sm:$0xff] }
 0x10f   : > { %v1910_v6 = vshrl.u32 %v13736_v15, 16  ;;  %v1913_v30 = vshll.u32 %v13736_v15, 16  ;;  %3210 = vmatpush.bf16.msra.mxu3 %v12718_v52 }
 0x110   : > { %v909_v32 = vpop.f32.mrf.mxu2  ;;  %v451_v18 = vpop.f32.mrf.mxu0 }
 0x111   : > { %v1141_v41 = vpop.f32.mrf.mxu3  ;;  %v936_v17 = vadd.f32 %v909_v32, %v766_v20  ;;  %v741_v33 = vpop.f32.mrf.mxu1  ;;  %v477_v39 = vadd.f32 %v13509_v13, %v451_v18  ;;  %v12710_v20 = vld [vmem:[%s16934_s2 + $0x40] sm:$0xff]  ;;  %v1915_v36 = vrot.slane %v1913_v30, 3 }
 0x112   : > { %3042 = vmatpush.bf16.msra.mxu2 %v12710_v20 }
 0x113   : > { %v13726_v34 = vadd.f32 %v1141_v41, %v936_v17  ;;  %v767_v35 = vadd.f32 %v741_v33, %v477_v39  ;;  %v1270_v41 = vrot.slane %v1268_v51, 1  ;;  %v1273_v17 = vrot.slane %v1271_v58, 2 }
 0x114   : > { %v1912_v33 = vrot.slane %v1910_v6, 2  ;;  %v1602_v6 = vld [vmem:[%s13251_s12 + $0x58] sm:$0x3] }
 0x118   : > { %v911_v50 = vpop.f32.mrf.mxu2  ;;  %v454_v63 = vpop.f32.mrf.mxu0 }
 0x119   : > { %v1143_v53 = vpop.f32.mrf.mxu3  ;;  %v937_v62 = vadd.f32 %v911_v50, %v767_v35  ;;  %v744_v55 = vpop.f32.mrf.mxu1  ;;  %v478_v22 = vadd.f32 %v13509_v13, %v454_v63  ;;  %v1274_v35 = vor.u32 %v1273_v17, %v1270_v41  ;;  %v1451_v50 = vrot.slane %v13480_v47, 2 }
 0x11a   : > { %v1916_v63 = vor.u32 %v1915_v36, %v1912_v33 }
 0x11b   : > { %v13738_v27 = vadd.f32 %v1143_v53, %v937_v62  ;;  %v768_v19 = vadd.f32 %v744_v55, %v478_v22  ;;  %1380 = vmatmul.bf16.gmra.mxu0 %v1266_v9  ;;  %v1193_v53 = vunpack.c.l.b16 %v1174_v44  ;;  %v1683_v62 = vrot.slane %v13736_v15, 2 }
 0x11c   : > { %1550 = vmatmul.bf16.gmra.mxu1 %v1450_v10  ;;  %v1835_v55 = vunpack.c.l.b16 %v1816_v43  ;;  %v1452_v20 = vsel %vm1435_vm3, %v1449_v38, %v1451_v50  ;;  %v1917_v61 = vsel %vm1837_vm4, %v1907_v25, %v1916_v63  ;;  %v12757_v38 = vld [vmem:[%s16934_s2 + $0x178] sm:$0xff] }
 0x11d   : > { %1782 = vmatmul.bf16.gmra.mxu2 %v1682_v14  ;;  %v1194_v51 = vpack.c.b16 %v1193_v53, %v1193_v53  ;;  %v1684_v47 = vsel %vm1435_vm3, %v1681_v48, %v1683_v62  ;;  %v12741_v48 = vld [vmem:[%s16934_s2 + $0xf8] sm:$0xff] }
 0x11e   : > { %2022 = vmatmul.bf16.gmra.mxu3 %v1908_v4  ;;  %v13768_v52 = vpack.c.b16 %v1835_v55, %v1835_v55  ;;  %v12773_v25 = vld [vmem:[%s16934_s2 + $0x1b8] sm:$0xff]  ;;  %3840 = vmatpush.bf16.msrb.mxu2 %v12757_v38 }
 0x11f   : > { %3434 = vmatpush.bf16.msrb.mxu0 %v12741_v48  ;;  %4071 = vmatpush.bf16.msrb.mxu3 %v12773_v25  ;;  %v2056_v25 = vld [vmem:[%s13251_s12 + $0x10] sm:$0x8] }
 0x120   : > { %v914_v1 = vpop.f32.mrf.mxu2  ;;  %v456_v16 = vpop.f32.mrf.mxu0 }
 0x121   : > { %v1146_v24 = vpop.f32.mrf.mxu3  ;;  %v938_v31 = vadd.f32 %v914_v1, %v768_v19  ;;  %v746_v32 = vpop.f32.mrf.mxu1  ;;  %v479_v18 = vadd.f32 %v13509_v13, %v456_v16  ;;  %v1275_v19 = vsel %vm1195_vm2, %v1265_v37, %v1274_v35  ;;  %v1277_v37 = vshrl.u32 %v1194_v51, 16 }
 0x122   : > { %v1280_v1 = vshll.u32 %v1194_v51, 16  ;;  %v1922_v16 = vshll.u32 %v13768_v52, 16 }
 0x123   : > { %v13758_v39 = vadd.f32 %v1146_v24, %v938_v31  ;;  %v769_v46 = vadd.f32 %v746_v32, %v479_v18  ;;  %v1657_v24 = vunpack.c.l.b16 %v1602_v6  ;;  %v1919_v31 = vshrl.u32 %v13768_v52, 16 }
 0x124   : > { %v1279_v36 = vrot.slane %v1277_v37, 1  ;;  %v1282_v44 = vrot.slane %v1280_v1, 2  ;;  %v1924_v55 = vrot.slane %v1922_v16, 3  ;;  %v13806_v16 = vld [vmem:[%s13251_s12 + $0x50] sm:$0xff] }
 0x125   : > { %v1921_v53 = vrot.slane %v1919_v31, 2  ;;  %v13153_v31 = vmov 0  }
 0x126   : > { %13121 = vset.pattern.permute.xlu0 %v13153_v31  ;;  %253 = vst [vmem:[#allocation2] sm:$0xf] %v13153_v31  ;;  %13122 = vset.pattern.permute.xlu1 %v13153_v31 }
 0x127   : > { %254 = vst [vmem:[#allocation2 + $0x4] sm:$0xf] %v13153_v31  ;;  %13123 = vset.pattern.permute.xlu2 %v13153_v31 }
 0x128   : > { %v916_v9 = vpop.f32.mrf.mxu2  ;;  %v459_v14 = vpop.f32.mrf.mxu0  ;;  %267 = vst [vmem:[#allocation2 + $0x9c] sm:$0xf] %v13153_v31 }
 0x129   : > { %v1148_v10 = vpop.f32.mrf.mxu3  ;;  %v939_v22 = vadd.f32 %v916_v9, %v769_v46  ;;  %v749_v4 = vpop.f32.mrf.mxu1  ;;  %v480_v58 = vadd.f32 %v13509_v13, %v459_v14  ;;  %v1667_v46 = vpack.c.b16 %v1657_v24, %v1657_v24  ;;  %v1283_v14 = vor.u32 %v1282_v44, %v1279_v36  ;;  %268 = vst [vmem:[#allocation2 + $0xa0] sm:$0x7] %v13153_v31 }
 0x12b   : > { %v13770_v0 = vadd.f32 %v1148_v10, %v939_v22  ;;  %v770_v30 = vadd.f32 %v749_v4, %v480_v58  ;;  %1385 = vmatmul.bf16.gmra.mxu0 %v1275_v19  ;;  %v12749_v10 = vld [vmem:[%s16934_s2 + $0x138] sm:$0xff]  ;;  %v1453_v4 = vrot.slane %v1194_v51, 2  ;;  %v1685_v19 = vrot.slane %v1667_v46, 2  ;;  %v13083_v51 = vld [vmem:[%s13251_s12 + $0x48] sm:$0xff]  }
 0x12c   : > { %1555 = vmatmul.bf16.gmra.mxu1 %v1452_v20  ;;  %v1925_v20 = vor.u32 %v1924_v55, %v1921_v53  ;;  %v2903_v46 = vshrl.u32 %v13083_v51, 16 }
 0x12d   : > { %1787 = vmatmul.bf16.gmra.mxu2 %v1684_v47  ;;  %3672 = vmatpush.bf16.msrb.mxu1 %v12749_v10  ;;  %v1454_v37 = vsel %vm1435_vm3, %v1451_v50, %v1453_v4  ;;  %v1686_v38 = vsel %vm1435_vm3, %v1683_v62, %v1685_v19  ;;  %v2075_v50 = vunpack.c.l.b16 %v2056_v25  ;;  %v2905_v62 = vshll.u32 %v13083_v51, 16  ;;  %v12740_v4 = vld [vmem:[%s16934_s2 + $0xf0] sm:$0xff] }
 0x12e   : > { %2027 = vmatmul.bf16.gmra.mxu3 %v1917_v61  ;;  %v1926_v48 = vsel %vm1837_vm4, %v1916_v63, %v1925_v20  ;;  %v12756_v63 = vld [vmem:[%s16934_s2 + $0x170] sm:$0xff]  ;;  %v2910_v10 = vshll.u32 %v13806_v16, 16  ;;  %3435 = vmatpush.bf16.msrb.mxu0 %v12740_v4 }
 0x12f   : > { %3841 = vmatpush.bf16.msrb.mxu2 %v12756_v63  ;;  %v2907_v53 = vrot.slane %v2905_v62, 1  ;;  %v12772_v19 = vld [vmem:[%s16934_s2 + $0x1b0] sm:$0xff]  ;;  %v13841_v63 = vld [vmem:[%s13251_s12 + $0x58] sm:$0xff] }
 0x130   : > { %v919_v32 = vpop.f32.mrf.mxu2  ;;  %v461_v18 = vpop.f32.mrf.mxu0  ;;  %4072 = vmatpush.bf16.msrb.mxu3 %v12772_v19 }
 0x131   : > { %v1151_v41 = vpop.f32.mrf.mxu3  ;;  %v940_v17 = vadd.f32 %v919_v32, %v770_v30  ;;  %v751_v33 = vpop.f32.mrf.mxu1  ;;  %v481_v43 = vadd.f32 %v13509_v13, %v461_v18  ;;  %v1284_v30 = vsel %vm1195_vm2, %v1274_v35, %v1283_v14  ;;  %v2244_v35 = vld [vmem:[%s16932_s0] sm:$0xff]  ;;  %v13084_v32 = vld [vmem:[%s13251_s12 + $0x48] sm:$0xf0] }
 0x132   : > { %2264 = vperm.xlu0 %13121, %v2244_v35  }
 0x133   : > { %v13785_v9 = vadd.f32 %v1151_v41, %v940_v17  ;;  %v771_v22 = vadd.f32 %v751_v33, %v481_v43  ;;  %v13085_v41 = vld [vmem:[%s13251_s12 + $0x48] sm:$0xe]  ;;  %v2076_v43 = vpack.c.b16 %v1640_v11, %v2075_v50  ;;  %v2246_v50 = vld [vmem:[%s16932_s0 + $0x10] sm:$0xff] }
 0x134   : > { %2274 = vperm.xlu1 %13122, %v2246_v50   ;;  %v2922_v50 = vshrl.u32 %v13841_v63, 16 }
 0x135   : > { %v2078_v20 = vrot.slane %v2076_v43, 3 }
 0x138   : > { %v921_v58 = vpop.f32.mrf.mxu2  ;;  %v1351_v61 = vpop.f32.mrf.mxu0 }
 0x139   : > { %v1153_v47 = vpop.f32.mrf.mxu3  ;;  %v941_v13 = vadd.f32 %v921_v58, %v771_v22  ;;  %v1521_v6 = vpop.f32.mrf.mxu1  ;;  %v1396_v1 = vadd.f32 %v1351_v61, %v13538_v59  ;;  %v13086_v22 = vor.u32 %v13085_v41, %v13084_v32  ;;  %v2079_v58 = vrot.slane %v13522_v28, 3 }
 0x13a   : > { %2269 = vperm.xlu0 %13121, %v2245_v5   ;;  %v3130_v5 = vrot.slane %v13841_v63, 1 }
 0x13b   : > { %v13797_v24 = vadd.f32 %v1153_v47, %v941_v13  ;;  %v1566_v59 = vadd.f32 %v1521_v6, %v1396_v1  ;;  %1390 = vmatmul.bf16.gmra.mxu0 %v1284_v30  ;;  %v2908_v47 = vor.u32 %v2907_v53, %v2903_v46  ;;  %v2912_v13 = vrot.slane %v2910_v10, 1  ;;  %v12685_v1 = vld [vmem:[%s13251_s12 + $0x48] sm:$0xff]  ;;  %v2247_v53 = vld [vmem:[%s16932_s0 + $0x18] sm:$0xff] }
 0x13c   : > { %1560 = vmatmul.bf16.gmra.mxu1 %v1454_v37  ;;  %v3127_v61 = vrot.slane %v13086_v22, 1  ;;  %v3128_v6 = vrot.slane %v13806_v16, 1  ;;  %v2080_v51 = vsel %vm2077_vm5, %v2078_v20, %v2079_v58  ;;  %v12755_v46 = vld [vmem:[%s16934_s2 + $0x168] sm:$0xff]  ;;  %v2081_v22 = vrot.slane %v13561_v21, 3  ;;  %2279 = vperm.xlu1 %13122, %v2247_v53   ;;  %v12686_v20 = vld [vmem:[%s13251_s12 + $0x50] sm:$0xff]  ;;  %v12687_v53 = vld [vmem:[%s13251_s12 + $0x58] sm:$0xff] }
 0x13d   : > { %1792 = vmatmul.bf16.gmra.mxu2 %v1686_v38  ;;  %v2913_v31 = vsel %vm566_vm0, %v2908_v47, %v2912_v13  ;;  %v12747_v10 = vld [vmem:[%s16934_s2 + $0x128] sm:$0xff] }
 0x13e   : > { %2032 = vmatmul.bf16.gmra.mxu3 %v1926_v48  ;;  %v3129_v35 = vsel %vm793_vm1, %v3127_v61, %v3128_v6  ;;  %3842 = vmatpush.bf16.msrb.mxu2 %v12755_v46 }
 0x140   : > { %v1753_v17 = vpop.f32.mrf.mxu2  ;;  %v1353_v36 = vpop.f32.mrf.mxu0 }
 0x141   : > { %v1993_v18 = vpop.f32.mrf.mxu3  ;;  %v1798_v33 = vadd.f32 %v1753_v17, %v1566_v59  ;;  %v1523_v44 = vpop.f32.mrf.mxu1  ;;  %v1397_v55 = vadd.f32 %v1353_v36, %v13563_v23  ;;  %v12748_v23 = vld [vmem:[%s16934_s2 + $0x130] sm:$0xff]  ;;  %v2914_v36 = vshrl.u32 %v13806_v16, 16  ;;  %v12771_v16 = vld [vmem:[%s16934_s2 + $0x1a8] sm:$0xff] }
 0x142   : > { %3673 = vmatpush.bf16.msrb.mxu1 %v12748_v23  ;;  %4073 = vmatpush.bf16.msrb.mxu3 %v12771_v16 }
 0x143   : > { %v13814_v14 = vadd.f32 %v1993_v18, %v1798_v33  ;;  %v1567_v11 = vadd.f32 %v1523_v44, %v1397_v55  ;;  %v2918_v44 = vshll.u32 %v13841_v63, 16  ;;  %v2916_v4 = vor.u32 %v2914_v36, %v2912_v13 }
 0x144   : > { %v2083_v63 = vrot.slane %v13593_v3, 3 }
 0x145   : > { %v2920_v19 = vrot.slane %v2918_v44, 1 }
 0x146   : > { %3674 = vmatpush.bf16.msrb.mxu1 %v12747_v10  ;;  %v2084_v3 = vsel %vm2077_vm5, %v2081_v22, %v2083_v63 }
 0x147   : > { %v2921_v13 = vsel %vm566_vm0, %v2916_v4, %v2920_v19 }
 0x148   : > { %v1755_v30 = vpop.f32.mrf.mxu2  ;;  %v1356_v48 = vpop.f32.mrf.mxu0 }
 0x149   : > { %v1995_v37 = vpop.f32.mrf.mxu3  ;;  %v1799_v38 = vadd.f32 %v1755_v30, %v1567_v11  ;;  %v1526_v25 = vpop.f32.mrf.mxu1  ;;  %v1398_v28 = vadd.f32 %v1356_v48, %v13570_v45 }
 0x14b   : > { %v13835_v59 = vadd.f32 %v1995_v37, %v1799_v38  ;;  %v1568_v62 = vadd.f32 %v1526_v25, %v1398_v28  ;;  %2162 = vmatmul.bf16.vlgmr.msra.gmra.mxu0 %v2080_v51  ;;  %v2082_v37 = vsel %vm2077_vm5, %v2079_v58, %v2081_v22  ;;  %v13873_v25 = vld [vmem:[%s13251_s12 + $0x60] sm:$0xff] }
 0x14c   : > { %2755 = vmatmul.bf16.vlgmr.msra.gmra.mxu1 %v12685_v1  ;;  %v3131_v1 = vsel %vm793_vm1, %v3128_v6, %v3130_v5  ;;  %v2926_v6 = vshll.u32 %v13873_v25, 16  ;;  %v3132_v36 = vrot.slane %v13873_v25, 1 }
 0x14d   : > { %3043 = vmatmul.bf16.vlgmr.msra.gmra.mxu2 %v2913_v31 }
 0x14e   : > { %3211 = vmatmul.bf16.vlgmr.msra.gmra.mxu3 %v3129_v35 }
 0x150   : > { %v1758_v32 = vpop.f32.mrf.mxu2  ;;  %v1358_v17 = vpop.f32.mrf.mxu0 }
 0x151   : > { %v1998_v45 = vpop.f32.mrf.mxu3  ;;  %v1800_v41 = vadd.f32 %v1758_v32, %v1568_v62  ;;  %v1528_v18 = vpop.f32.mrf.mxu1  ;;  %v1399_v33 = vadd.f32 %v1358_v17, %v13595_v7  ;;  %v12739_v7 = vld [vmem:[%s16934_s2 + $0xe8] sm:$0xff]  ;;  %v12746_v17 = vld [vmem:[%s16934_s2 + $0x120] sm:$0xff] }
 0x152   : > { %3436 = vmatpush.bf16.msrb.mxu0 %v12739_v7  ;;  %3675 = vmatpush.bf16.msrb.mxu1 %v12746_v17 }
 0x153   : > { %v13846_v43 = vadd.f32 %v1998_v45, %v1800_v41  ;;  %v1569_v55 = vadd.f32 %v1528_v18, %v1399_v33  ;;  %v12754_v45 = vld [vmem:[%s16934_s2 + $0x160] sm:$0xff]  ;;  %v2924_v18 = vor.u32 %v2922_v50, %v2920_v19  ;;  %v2928_v33 = vrot.slane %v2926_v6, 1 }
 0x154   : > { %v12738_v41 = vld [vmem:[%s16934_s2 + $0xe0] sm:$0xff]  ;;  %3843 = vmatpush.bf16.msrb.mxu2 %v12754_v45  ;;  %v3133_v19 = vsel %vm793_vm1, %v3130_v5, %v3132_v36 }
 0x155   : > { %v2929_v4 = vsel %vm566_vm0, %v2924_v18, %v2928_v33  ;;  %v12688_v45 = vld [vmem:[%s13251_s12 + $0x60] sm:$0xff] }
 0x156   : > { %3437 = vmatpush.bf16.msrb.mxu0 %v12738_v41 }
 0x158   : > { %v1760_v11 = vpop.f32.mrf.mxu2  ;;  %v1361_v61 = vpop.f32.mrf.mxu0 }
 0x159   : > { %v2000_v23 = vpop.f32.mrf.mxu3  ;;  %v1801_v47 = vadd.f32 %v1760_v11, %v1569_v55  ;;  %v1531_v30 = vpop.f32.mrf.mxu1  ;;  %v1400_v21 = vadd.f32 %v1361_v61, %v13602_v26 }
 0x15b   : > { %v13870_v38 = vadd.f32 %v2000_v23, %v1801_v47  ;;  %v1570_v48 = vadd.f32 %v1531_v30, %v1400_v21  ;;  %2167 = vmatmul.bf16.gmra.mxu0 %v2082_v37  ;;  %v2250_v23 = vld [vmem:[%s16932_s0 + $0x30] sm:$0xff]  ;;  %v13905_v47 = vld [vmem:[%s13251_s12 + $0x68] sm:$0xff]  ;;  %v2930_v21 = vshrl.u32 %v13873_v25, 16  ;;  %v12737_v25 = vld [vmem:[%s16934_s2 + $0xd8] sm:$0xff] }
 0x15c   : > { %2760 = vmatmul.bf16.gmra.mxu1 %v12686_v20  ;;  %2294 = vperm.xlu0 %13121, %v2250_v23   ;;  %v3134_v50 = vrot.slane %v13905_v47, 1  ;;  %v2938_v23 = vshrl.u32 %v13905_v47, 16 }
 0x15d   : > { %3048 = vmatmul.bf16.gmra.mxu2 %v2921_v13  ;;  %v2934_v13 = vshll.u32 %v13905_v47, 16  ;;  %3438 = vmatpush.bf16.msrb.mxu0 %v12737_v25 }
 0x15e   : > { %3216 = vmatmul.bf16.gmra.mxu3 %v3131_v1 }
 0x160   : > { %v1763_v51 = vpop.f32.mrf.mxu2  ;;  %v1363_v35 = vpop.f32.mrf.mxu0 }
 0x161   : > { %v2003_v28 = vpop.f32.mrf.mxu3  ;;  %v1802_v31 = vadd.f32 %v1763_v51, %v1570_v48  ;;  %v1533_v58 = vpop.f32.mrf.mxu1  ;;  %v1401_v26 = vadd.f32 %v1363_v35, %v13626_v57  ;;  %v12770_v57 = vld [vmem:[%s16934_s2 + $0x1a0] sm:$0xff]  ;;  %v2251_v51 = vld [vmem:[%s16932_s0 + $0x38] sm:$0xff]  ;;  %v2085_v35 = vrot.slane %v13624_v56, 3 }
 0x162   : > { %4074 = vmatpush.bf16.msrb.mxu3 %v12770_v57  ;;  %v2248_v48 = vld [vmem:[%s16932_s0 + $0x20] sm:$0xff]  ;;  %2299 = vperm.xlu1 %13122, %v2251_v51  }
 0x163   : > { %v13878_v62 = vadd.f32 %v2003_v28, %v1802_v31  ;;  %v1571_v32 = vadd.f32 %v1533_v58, %v1401_v26  ;;  %2284 = vperm.xlu2 %13123, %v2248_v48   ;;  %v12769_v31 = vld [vmem:[%s16934_s2 + $0x198] sm:$0xff]  ;;  %v2932_v58 = vor.u32 %v2930_v21, %v2928_v33  ;;  %v2936_v26 = vrot.slane %v2934_v13, 1  ;;  %v12689_v48 = vld [vmem:[%s13251_s12 + $0x68] sm:$0xff] }
 0x164   : > { %v2086_v18 = vsel %vm2077_vm5, %v2083_v63, %v2085_v35  ;;  %v3135_v33 = vsel %vm793_vm1, %v3132_v36, %v3134_v50  ;;  %v2249_v63 = vld [vmem:[%s16932_s0 + $0x28] sm:$0xff]  ;;  %v13946_v36 = vld [vmem:[%s13251_s12 + $0x70] sm:$0xff] }
 0x165   : > { %v2937_v56 = vsel %vm566_vm0, %v2932_v58, %v2936_v26  ;;  %v3136_v47 = vrot.slane %v13946_v36, 1 }
 0x166   : > { %4075 = vmatpush.bf16.msrb.mxu3 %v12769_v31 }
 0x168   : > { %v1765_v44 = vpop.f32.mrf.mxu2  ;;  %v1366_v7 = vpop.f32.mrf.mxu0 }
 0x169   : > { %v2005_v46 = vpop.f32.mrf.mxu3  ;;  %v1803_v55 = vadd.f32 %v1765_v44, %v1571_v32  ;;  %v1536_v16 = vpop.f32.mrf.mxu1  ;;  %v1402_v10 = vadd.f32 %v1366_v7, %v13633_v2 }
 0x16b   : > { %v13899_v11 = vadd.f32 %v2005_v46, %v1803_v55  ;;  %v1572_v20 = vadd.f32 %v1536_v16, %v1402_v10  ;;  %2172 = vmatmul.bf16.gmra.mxu0 %v2084_v3  ;;  %v2253_v46 = vld [vmem:[%s16932_s0 + $0x48] sm:$0xff]  ;;  %v12745_v55 = vld [vmem:[%s16934_s2 + $0x118] sm:$0xff]  ;;  %2289 = vperm.xlu2 %13123, %v2249_v63  }
 0x16c   : > { %2765 = vmatmul.bf16.gmra.mxu1 %v12687_v53  ;;  %2309 = vperm.xlu0 %13121, %v2253_v46   ;;  %v2946_v46 = vshrl.u32 %v13946_v36, 16  ;;  %v2257_v63 = vld [vmem:[%s16932_s0 + $0x68] sm:$0xff] }
 0x16d   : > { %3053 = vmatmul.bf16.gmra.mxu2 %v2929_v4  ;;  %3676 = vmatpush.bf16.msrb.mxu1 %v12745_v55 }
 0x16e   : > { %3221 = vmatmul.bf16.gmra.mxu3 %v3133_v19 }
 0x170   : > { %v1768_v22 = vpop.f32.mrf.mxu2  ;;  %v1368_v30 = vpop.f32.mrf.mxu0 }
 0x171   : > { %v2008_v2 = vpop.f32.mrf.mxu3  ;;  %v1804_v61 = vadd.f32 %v1768_v22, %v1572_v20  ;;  %v1538_v37 = vpop.f32.mrf.mxu1  ;;  %v1403_v5 = vadd.f32 %v1368_v30, %v13654_v42  ;;  %v12753_v42 = vld [vmem:[%s16934_s2 + $0x158] sm:$0xff]  ;;  %v2942_v20 = vshll.u32 %v13946_v36, 16  ;;  %v2256_v22 = vld [vmem:[%s16932_s0 + $0x60] sm:$0xff]  ;;  %v12752_v30 = vld [vmem:[%s16934_s2 + $0x150] sm:$0xff] }
 0x172   : > { %3844 = vmatpush.bf16.msrb.mxu2 %v12753_v42 }
 0x173   : > { %v13910_v1 = vadd.f32 %v2008_v2, %v1804_v61  ;;  %v1573_v28 = vadd.f32 %v1538_v37, %v1403_v5  ;;  %v2087_v37 = vrot.slane %v13652_v40, 3  ;;  %v2940_v5 = vor.u32 %v2938_v23, %v2936_v26  ;;  %v2254_v26 = vld [vmem:[%s16932_s0 + $0x50] sm:$0xff] }
 0x174   : > { %2324 = vperm.xlu0 %13121, %v2256_v22   ;;  %v3137_v40 = vsel %vm793_vm1, %v3134_v50, %v3136_v47  ;;  %2314 = vperm.xlu1 %13122, %v2254_v26  }
 0x175   : > { %v2088_v25 = vsel %vm2077_vm5, %v2085_v35, %v2087_v37  ;;  %v12736_v35 = vld [vmem:[%s16934_s2 + $0xd0] sm:$0xff] }
 0x176   : > { %3845 = vmatpush.bf16.msrb.mxu2 %v12752_v30  ;;  %3439 = vmatpush.bf16.msrb.mxu0 %v12736_v35 }
 0x178   : > { %v1770_v6 = vpop.f32.mrf.mxu2  ;;  %v1371_v57 = vpop.f32.mrf.mxu0 }
 0x179   : > { %v2010_v32 = vpop.f32.mrf.mxu3  ;;  %v1805_v41 = vadd.f32 %v1770_v6, %v1573_v28  ;;  %v1541_v17 = vpop.f32.mrf.mxu1  ;;  %v1404_v44 = vadd.f32 %v1371_v57, %v13664_v54  ;;  %v2259_v6 = vld [vmem:[%s16932_s0 + $0x78] sm:$0xff] }
 0x17b   : > { %v13937_v53 = vadd.f32 %v2010_v32, %v1805_v41  ;;  %v1574_v54 = vadd.f32 %v1541_v17, %v1404_v44  ;;  %2177 = vmatmul.bf16.gmra.mxu0 %v2086_v18  ;;  %v13984_v41 = vld [vmem:[%s13251_s12 + $0x78] sm:$0xff] }
 0x17c   : > { %2770 = vmatmul.bf16.gmra.mxu1 %v12688_v45  ;;  %2339 = vperm.xlu0 %13121, %v2259_v6   ;;  %v12744_v45 = vld [vmem:[%s16934_s2 + $0x110] sm:$0xff]  ;;  %v2950_v55 = vshll.u32 %v13984_v41, 16 }
 0x17d   : > { %3058 = vmatmul.bf16.gmra.mxu2 %v2937_v56  ;;  %3677 = vmatpush.bf16.msrb.mxu1 %v12744_v45  ;;  %v4568_v45 = vld [vmem:[%s16932_s0 + $0x98] sm:$0xff] }
 0x17e   : > { %3226 = vmatmul.bf16.gmra.mxu3 %v3135_v33  ;;  %2329 = vperm.xlu1 %13122, %v2257_v63  }
 0x180   : > { %v1773_v7 = vpop.f32.mrf.mxu2  ;;  %v1373_v10 = vpop.f32.mrf.mxu0 }
 0x181   : > { %v2013_v16 = vpop.f32.mrf.mxu3  ;;  %v1806_v3 = vadd.f32 %v1773_v7, %v1574_v54  ;;  %v1543_v4 = vpop.f32.mrf.mxu1  ;;  %v1405_v19 = vadd.f32 %v1373_v10, %v13679_v29  ;;  %v2944_v29 = vrot.slane %v2942_v20, 1  ;;  %v4567_v54 = vld [vmem:[%s16932_s0 + $0x90] sm:$0xff]  ;;  %v2952_v10 = vrot.slane %v2950_v55, 1  ;;  %v12691_v55 = vld [vmem:[%s13251_s12 + $0x78] sm:$0xff] }
 0x182   : > { %v12690_v20 = vld [vmem:[%s13251_s12 + $0x70] sm:$0xff] }
 0x183   : > { %v13954_v2 = vadd.f32 %v2013_v16, %v1806_v3  ;;  %v1575_v61 = vadd.f32 %v1543_v4, %v1405_v19  ;;  %v2945_v58 = vsel %vm566_vm0, %v2940_v5, %v2944_v29  ;;  %v2089_v16 = vrot.slane %v13677_v60, 3  ;;  %v2260_v60 = vld [vmem:[%s16932_s0 + $0x80] sm:$0xff] }
 0x184   : > { %4587 = vperm.xlu0 %13121, %v4567_v54   ;;  %v2948_v3 = vor.u32 %v2946_v46, %v2944_v29  ;;  %v3138_v4 = vrot.slane %v13984_v41, 1  ;;  %v4570_v29 = vld [vmem:[%s16932_s0 + $0xa8] sm:$0xff] }
 0x185   : > { %v2090_v5 = vsel %vm2077_vm5, %v2087_v37, %v2089_v16  ;;  %v12751_v37 = vld [vmem:[%s16934_s2 + $0x148] sm:$0xff] }
 0x186   : > { %2344 = vperm.xlu1 %13122, %v2260_v60   ;;  %3846 = vmatpush.bf16.msrb.mxu2 %v12751_v37 }
 0x188   : > { %v1775_v21 = vpop.f32.mrf.mxu2  ;;  %v1376_v28 = vpop.f32.mrf.mxu0 }
 0x189   : > { %v2015_v13 = vpop.f32.mrf.mxu3  ;;  %v1807_v51 = vadd.f32 %v1775_v21, %v1575_v61  ;;  %v1546_v42 = vpop.f32.mrf.mxu1  ;;  %v1406_v31 = vadd.f32 %v1376_v28, %v13695_v49  ;;  %v12768_v49 = vld [vmem:[%s16934_s2 + $0x190] sm:$0xff]  ;;  %v12767_v28 = vld [vmem:[%s16934_s2 + $0x188] sm:$0xff] }
 0x18a   : > { %4076 = vmatpush.bf16.msrb.mxu3 %v12768_v49  ;;  %v2954_v49 = vshrl.u32 %v13984_v41, 16 }
 0x18b   : > { %v13972_v32 = vadd.f32 %v2015_v13, %v1807_v51  ;;  %v1576_v50 = vadd.f32 %v1546_v42, %v1406_v31  ;;  %2182 = vmatmul.bf16.gmra.mxu0 %v2088_v25  ;;  %v2953_v13 = vsel %vm566_vm0, %v2948_v3, %v2952_v10  ;;  %v12743_v42 = vld [vmem:[%s16934_s2 + $0x108] sm:$0xff]  ;;  %v14028_v25 = vld [vmem:[%s13251_s12 + $0x80] sm:$0xff] }
 0x18c   : > { %2775 = vmatmul.bf16.gmra.mxu1 %v12689_v48  ;;  %v3139_v48 = vsel %vm793_vm1, %v3136_v47, %v3138_v4  ;;  %4602 = vperm.xlu0 %13121, %v4570_v29   ;;  %v12735_v47 = vld [vmem:[%s16934_s2 + $0xc8] sm:$0xff]  ;;  %v3140_v41 = vrot.slane %v14028_v25, 1  ;;  %v12893_v29 = vld [vmem:[%s16936_s4 + $0x230] sm:$0xff] }
 0x18d   : > { %3063 = vmatmul.bf16.gmra.mxu2 %v2945_v58  ;;  %3440 = vmatpush.bf16.msrb.mxu0 %v12735_v47 }
 0x18e   : > { %3231 = vmatmul.bf16.gmra.mxu3 %v3137_v40  ;;  %3678 = vmatpush.bf16.msrb.mxu1 %v12743_v42 }
 0x18f   : > { %4077 = vmatpush.bf16.msrb.mxu3 %v12767_v28  ;;  %4592 = vperm.xlu1 %13122, %v4568_v45  }
 0x190   : > { %v1778_v57 = vpop.f32.mrf.mxu2  ;;  %v1378_v44 = vpop.f32.mrf.mxu0 }
 0x191   : > { %v2018_v17 = vpop.f32.mrf.mxu3  ;;  %v1808_v18 = vadd.f32 %v1778_v57, %v1576_v50  ;;  %v1548_v56 = vpop.f32.mrf.mxu1  ;;  %v1407_v33 = vadd.f32 %v1378_v44, %v13707_v12  ;;  %v2252_v12 = vld [vmem:[%s16932_s0 + $0x40] sm:$0xff]  ;;  %v2958_v50 = vshll.u32 %v14028_v25, 16  ;;  %v2091_v44 = vrot.slane %v13705_v8, 3 }
 0x192   : > { %2304 = vperm.xlu2 %13123, %v2252_v12   ;;  %v4573_v57 = vld [vmem:[%s16932_s0 + $0xc0] sm:$0xff] }
 0x193   : > { %v13995_v7 = vadd.f32 %v2018_v17, %v1808_v18  ;;  %v1577_v36 = vadd.f32 %v1548_v56, %v1407_v33  ;;  %v2960_v56 = vrot.slane %v2958_v50, 1  ;;  %v4577_v8 = vld [vmem:[%s16932_s0 + $0xe0] sm:$0xff] }
 0x194   : > { %4617 = vperm.xlu0 %13121, %v4573_v57  }
 0x198   : > { %v1780_v19 = vpop.f32.mrf.mxu2  ;;  %v1381_v61 = vpop.f32.mrf.mxu0 }
 0x199   : > { %v2020_v23 = vpop.f32.mrf.mxu3  ;;  %v1809_v22 = vadd.f32 %v1780_v19, %v1577_v36  ;;  %v1551_v30 = vpop.f32.mrf.mxu1  ;;  %v1408_v21 = vadd.f32 %v1381_v61, %v13726_v34  ;;  %v2092_v36 = vsel %vm2077_vm5, %v2089_v16, %v2091_v44  ;;  %v12750_v61 = vld [vmem:[%s16934_s2 + $0x140] sm:$0xff] }
 0x19a   : > { %3847 = vmatpush.bf16.msrb.mxu2 %v12750_v61 }
 0x19b   : > { %v14013_v51 = vadd.f32 %v2020_v23, %v1809_v22  ;;  %v1578_v34 = vadd.f32 %v1551_v30, %v1408_v21  ;;  %2187 = vmatmul.bf16.gmra.mxu0 %v2090_v5  ;;  %v4571_v23 = vld [vmem:[%s16932_s0 + $0xb0] sm:$0xff]  ;;  %v12734_v30 = vld [vmem:[%s16934_s2 + $0xc0] sm:$0xff] }
 0x19c   : > { %2780 = vmatmul.bf16.gmra.mxu1 %v12690_v20  ;;  %v4576_v20 = vld [vmem:[%s16932_s0 + $0xd8] sm:$0xff]  ;;  %4607 = vperm.xlu1 %13122, %v4571_v23   ;;  %v12766_v5 = vld [vmem:[%s16934_s2 + $0x180] sm:$0xff]  ;;  %v12926_v21 = vld [vmem:[%s16936_s4 + $0x70] sm:$0xff] }
 0x19d   : > { %3068 = vmatmul.bf16.gmra.mxu2 %v2953_v13  ;;  %4632 = vperm.xlu0 %13121, %v4576_v20   ;;  %v258_v13 = vld [vmem:[#allocation2 + $0x8] sm:$0x3]  ;;  %v2258_v20 = vld [vmem:[%s16932_s0 + $0x70] sm:$0xff] }
 0x19e   : > { %3236 = vmatmul.bf16.gmra.mxu3 %v3139_v48  ;;  %v264_v48 = vld [vmem:[#allocation2 + $0x98] sm:$0xe]  ;;  %3441 = vmatpush.bf16.msrb.mxu0 %v12734_v30  ;;  %v259_v60 = vsel %vm14076_vm9, 0, %v258_v13  ;;  %v3275_v13 = vld [vmem:[%s13251_s12 + $0x50] sm:$0xe] }
 0x19f   : > { %4078 = vmatpush.bf16.msrb.mxu3 %v12766_v5  ;;  %260 = vst [vmem:[#allocation2 + $0x8] sm:$0x3] %v259_v60  ;;  %v265_v47 = vsel %vm14082_vm11, 0, %v264_v48  ;;  %v14131_v48 = vld [vmem:[%s13251_s12 + $0x54] sm:$0xf]  ;;  %v12806_v60 = vld [vmem:[%s16936_s4 + $0x38] sm:$0xff] }
 0x1a0   : > { %v1783_v31 = vpop.f32.mrf.mxu2  ;;  %v1383_v26 = vpop.f32.mrf.mxu0  ;;  %266 = vst [vmem:[#allocation2 + $0x98] sm:$0xe] %v265_v47  ;;  %5128 = vmatpush.bf16.msra.mxu2 %v12806_v60 }
 0x1a1   : > { %v2023_v58 = vpop.f32.mrf.mxu3  ;;  %v1810_v40 = vadd.f32 %v1783_v31, %v1578_v34  ;;  %v1553_v6 = vpop.f32.mrf.mxu1  ;;  %v1409_v35 = vadd.f32 %v1383_v26, %v13738_v27  ;;  %v2956_v27 = vor.u32 %v2954_v49, %v2952_v10  ;;  %v3141_v10 = vsel %vm793_vm1, %v3138_v4, %v3140_v41  ;;  %v14064_v4 = vld [vmem:[%s13251_s12 + $0x88] sm:$0xff] }
 0x1a2   : > { %v2966_v26 = vshll.u32 %v14064_v4, 16 }
 0x1a3   : > { %v14039_v17 = vadd.f32 %v2023_v58, %v1810_v40  ;;  %v1579_v18 = vadd.f32 %v1553_v6, %v1409_v35  ;;  %v2961_v19 = vsel %vm566_vm0, %v2956_v27, %v2960_v56  ;;  %v2962_v40 = vshrl.u32 %v14028_v25, 16  ;;  %v4574_v6 = vld [vmem:[%s16932_s0 + $0xc8] sm:$0xff]  ;;  %v4579_v35 = vld [vmem:[%s16932_s0 + $0xf0] sm:$0xff] }
 0x1a4   : > { %4622 = vperm.xlu1 %13122, %v4574_v6   ;;  %v2968_v57 = vrot.slane %v2966_v26, 1  ;;  %v2837_v27 = vld [vmem:[%s13251_s12 + $0x90] sm:$0x1]  ;;  %v2095_v26 = vrot.slane %v13768_v52, 3  ;;  %v14155_v52 = vld [vmem:[%s13251_s12 + $0x58] sm:$0xff] }
 0x1a5   : > { %4647 = vperm.xlu0 %13121, %v4579_v35   ;;  %v2964_v45 = vor.u32 %v2962_v40, %v2960_v56  ;;  %v2891_v23 = vunpack.c.l.b16 %v2837_v27  ;;  %v3329_v40 = vunpack.c.l.b16 %v3275_v13 }
 0x1a8   : > { %v1785_v33 = vpop.f32.mrf.mxu2  ;;  %v1386_v54 = vpop.f32.mrf.mxu0 }
 0x1a9   : > { %v2025_v46 = vpop.f32.mrf.mxu3  ;;  %v1811_v63 = vadd.f32 %v1785_v33, %v1579_v18  ;;  %v1556_v12 = vpop.f32.mrf.mxu1  ;;  %v1410_v3 = vadd.f32 %v1386_v54, %v13758_v39  ;;  %v2255_v39 = vld [vmem:[%s16932_s0 + $0x58] sm:$0xff]  ;;  %v3142_v18 = vrot.slane %v14064_v4, 1 }
 0x1aa   : > { %2319 = vperm.xlu2 %13123, %v2255_v39  }
 0x1ab   : > { %v14058_v22 = vadd.f32 %v2025_v46, %v1811_v63  ;;  %v1580_v16 = vadd.f32 %v1556_v12, %v1410_v3  ;;  %2192 = vmatmul.bf16.gmra.mxu0 %v2092_v36  ;;  %v12742_v63 = vld [vmem:[%s16934_s2 + $0x100] sm:$0xff] }
 0x1ac   : > { %2785 = vmatmul.bf16.gmra.mxu1 %v12691_v55  ;;  %v12692_v55 = vld [vmem:[%s13251_s12 + $0x80] sm:$0xff]  ;;  %4637 = vperm.xlu1 %13122, %v4577_v8   ;;  %v14176_v8 = vld [vmem:[%s13251_s12 + $0x5c] sm:$0xf] }
 0x1ad   : > { %3073 = vmatmul.bf16.gmra.mxu2 %v2961_v19  ;;  %v2969_v19 = vsel %vm566_vm0, %v2964_v45, %v2968_v57  ;;  %3679 = vmatpush.bf16.msrb.mxu1 %v12742_v63  ;;  %v2265_v45 = vpop.permute.xlu0 %2264 }
 0x1ae   : > { %3241 = vmatmul.bf16.gmra.mxu3 %v3141_v10  ;;  %v3143_v10 = vsel %vm793_vm1, %v3140_v41, %v3142_v18  ;;  %v2901_v41 = vpack.c.b16 %v2891_v23, %v2891_v23 }
 0x1b0   : > { %v1788_v37 = vpop.f32.mrf.mxu2  ;;  %v1388_v42 = vpop.f32.mrf.mxu0  ;;  %v2974_v47 = vshll.u32 %v2901_v41, 16 }
 0x1b1   : > { %v2028_v34 = vpop.f32.mrf.mxu3  ;;  %v1812_v28 = vadd.f32 %v1788_v37, %v1580_v16  ;;  %v1558_v31 = vpop.f32.mrf.mxu1  ;;  %v1411_v58 = vadd.f32 %v1388_v42, %v13770_v0  ;;  %v2093_v0 = vrot.slane %v13736_v15, 3  ;;  %v4580_v42 = vld [vmem:[%s16932_s0 + $0xf8] sm:$0xff] }
 0x1b2   : > { %2334 = vperm.xlu2 %13123, %v2258_v20   ;;  %v2976_v35 = vrot.slane %v2974_v47, 1  ;;  %v3912_v20 = vld [vmem:[%s13251_s12 + $0x58] sm:$0xc] }
 0x1b3   : > { %v14097_v49 = vadd.f32 %v2028_v34, %v1812_v28  ;;  %v1581_v50 = vadd.f32 %v1558_v31, %v1411_v58  ;;  %v2094_v56 = vsel %vm2077_vm5, %v2091_v44, %v2093_v0  ;;  %v2970_v34 = vshrl.u32 %v14064_v4, 16  ;;  %v2261_v28 = vld [vmem:[%s16932_s0 + $0x88] sm:$0xff] }
 0x1b4   : > { %4652 = vperm.xlu1 %13122, %v4580_v42   ;;  %v3966_v13 = vunpack.c.l.b16 %v3912_v20 }
 0x1b5   : > { %v2972_v6 = vor.u32 %v2970_v34, %v2968_v57  ;;  %v12781_v57 = vld [vmem:[%s16934_s2 + $0x1f8] sm:$0xff] }
 0x1b6   : > { %4309 = vmatpush.bf16.msra.mxu0 %v12781_v57 }
 0x1b8   : > { %v1790_v33 = vpop.f32.mrf.mxu2  ;;  %v1391_v12 = vpop.f32.mrf.mxu0 }
 0x1b9   : > { %v2030_v46 = vpop.f32.mrf.mxu3  ;;  %v1813_v54 = vadd.f32 %v1790_v33, %v1581_v50  ;;  %v1561_v36 = vpop.f32.mrf.mxu1  ;;  %v1412_v3 = vadd.f32 %v1391_v12, %v13785_v9  ;;  %v4582_v9 = vld [vmem:[%s16932_s0 + $0x108] sm:$0xff]  ;;  %v3144_v50 = vrot.slane %v2901_v41, 1  ;;  %v14189_v41 = vld [vmem:[%s16935_s3] ss:$0 sm:$0xff] }
 0x1ba   : > { %4662 = vperm.xlu0 %13121, %v4582_v9   ;;  %2349 = vperm.xlu2 %13123, %v2261_v28  }
 0x1bb   : > { %v14124_v44 = vadd.f32 %v2030_v46, %v1813_v54  ;;  %v1582_v25 = vadd.f32 %v1561_v36, %v1412_v3  ;;  %2197 = vmatmul.bf16.gmra.mxu0 %v2094_v56  ;;  %v12693_v46 = vld [vmem:[%s13251_s12 + $0x88] sm:$0xff]  ;;  %v2096_v36 = vsel %vm2077_vm5, %v2093_v0, %v2095_v26  ;;  %v12822_v56 = vld [vmem:[%s16936_s4 + $0x78] sm:$0xff]  ;;  %v3145_v15 = vsel %vm793_vm1, %v3142_v18, %v3144_v50 }
 0x1bc   : > { %2790 = vmatmul.bf16.gmra.mxu1 %v12692_v55  ;;  %v12789_v0 = vld [vmem:[%s16934_s2 + $0x238] sm:$0xff]  ;;  %5491 = vmatpush.bf16.msra.mxu3 %v12822_v56 }
 0x1bd   : > { %3078 = vmatmul.bf16.gmra.mxu2 %v2969_v19  ;;  %v2977_v19 = vsel %vm566_vm0, %v2972_v6, %v2976_v35  ;;  %4477 = vmatpush.bf16.msra.mxu1 %v12789_v0  ;;  %v3765_v0 = vrot.slane %v14155_v52, 2 }
 0x1be   : > { %3246 = vmatmul.bf16.gmra.mxu3 %v3143_v10  ;;  %v3744_v10 = vld [vmem:[%s13251_s12 + $0x50] sm:$0xc] }
 0x1c0   : > { %v1793_v39 = vpop.f32.mrf.mxu2  ;;  %v1393_v30 = vpop.f32.mrf.mxu0 }
 0x1c1   : > { %v2033_v16 = vpop.f32.mrf.mxu3  ;;  %v1814_v61 = vadd.f32 %v1793_v39, %v1582_v25  ;;  %v1563_v5 = vpop.f32.mrf.mxu1  ;;  %v1413_v37 = vadd.f32 %v1393_v30, %v13797_v24  ;;  %v3330_v24 = vunpack.c.l.b16 %v14131_v48  ;;  %v4583_v25 = vld [vmem:[%s16932_s0 + $0x110] sm:$0xff]  ;;  %v3762_v30 = vunpack.c.l.b16 %v3744_v10 }
 0x1c2   : > { %v16940_v48 = vunpack.c.l.b16 %v14176_v8  ;;  %4667 = vperm.xlu1 %13122, %v4583_v25  }
 0x1c3   : > { %v14144_v31 = vadd.f32 %v2033_v16, %v1814_v61  ;;  %v1583_v58 = vadd.f32 %v1563_v5, %v1413_v37  ;;  %v14149_v55 = vpack.c.b16 %v3330_v24, %v3329_v40  ;;  %v3535_v16 = vshrl.u32 %v14155_v52, 16 }
 0x1c4   : > { %v3538_v61 = vshll.u32 %v14155_v52, 16  ;;  %v3763_v35 = vpack.c.b16 %v3330_v24, %v3762_v30 }
 0x1c5   : > { %v3527_v4 = vshrl.u32 %v14149_v55, 16  ;;  %v3530_v18 = vshll.u32 %v14149_v55, 16  ;;  %v3537_v26 = vrot.slane %v3535_v16, 1 }
 0x1c6   : > { %v3540_v6 = vrot.slane %v3538_v61, 2  ;;  %v3764_v10 = vrot.slane %v3763_v35, 2  ;;  %v12821_v35 = vld [vmem:[%s16936_s4 + $0x70] sm:$0xff] }
 0x1c7   : > { %v3529_v47 = vrot.slane %v3527_v4, 1  ;;  %v3532_v28 = vrot.slane %v3530_v18, 2  ;;  %v2275_v18 = vpop.permute.xlu1 %2274  ;;  %5492 = vmatpush.bf16.msra.mxu3 %v12821_v35 }
 0x1c8   : > { %v1795_v27 = vpop.f32.mrf.mxu2  ;;  %v2163_v54 = vpop.f32.mrf.mxu0 }
 0x1c9   : > { %v2035_v33 = vpop.f32.mrf.mxu3  ;;  %v1815_v63 = vadd.f32 %v1795_v27, %v1583_v58  ;;  %v2756_v12 = vpop.f32.mrf.mxu1  ;;  %v2208_v3 = vadd.f32 %v2163_v54, %v13814_v14  ;;  %v4569_v14 = vld [vmem:[%s16932_s0 + $0xa0] sm:$0xff] }
 0x1ca   : > { %v2801_v39 = vadd.f32 %v14189_v41, %v2756_v12  ;;  %4597 = vperm.xlu2 %13123, %v4569_v14   ;;  %v2270_v54 = vpop.permute.xlu0 %2269  ;;  %v3358_v12 = vrot.slane %v14149_v55, 1 }
 0x1cb   : > { %v14172_v23 = vadd.f32 %v2035_v33, %v1815_v63  ;;  %v2226_v9 = vmax.f32 %v2208_v3, 0.0  ;;  %2202 = vmatmul.bf16.gmra.mxu0 %v2096_v36  ;;  %v14197_v33 = vld [vmem:[%s13251_s12 + $0x60] sm:$0xff]  ;;  %v4572_v36 = vld [vmem:[%s16932_s0 + $0xb8] sm:$0xff]  ;;  %v2588_v3 = vld [vmem:[#allocation2 + $0x8] sm:$0xe] }
 0x1cc   : > { %2795 = vmatmul.bf16.gmra.mxu1 %v12693_v46  ;;  %v14201_v46 = vpack.c.b16 %v16940_v48, %v3966_v13 }
 0x1cd   : > { %3083 = vmatmul.bf16.gmra.mxu2 %v2977_v19  ;;  %v2352_v5 = vmul.f32 %v2265_v45, %v2226_v9  ;;  %v3533_v19 = vor.u32 %v3532_v28, %v3529_v47  ;;  %v3996_v9 = vrot.slane %v14197_v33, 2  ;;  %v14227_v47 = vld [vmem:[%s13251_s12 + $0x60] sm:$0xff]  ;;  %v12805_v28 = vld [vmem:[%s16936_s4 + $0x30] sm:$0xff] }
 0x1ce   : > { %3251 = vmatmul.bf16.gmra.mxu3 %v3145_v15  ;;  %v14210_v15 = vor.u32 %v3540_v6, %v3537_v26  ;;  %v3995_v55 = vrot.slane %v14201_v46, 2  ;;  %5129 = vmatpush.bf16.msra.mxu2 %v12805_v28  ;;  %v3767_v35 = vrot.slane %v14227_v47, 2  ;;  %v4581_v33 = vld [vmem:[%s16932_s0 + $0x100] sm:$0xff] }
 0x1cf   : > { %v2370_v60 = vpack.c.bf16 %v2352_v5, %v2352_v5 }
 0x1d0   : > { %v3044_v37 = vpop.f32.mrf.mxu2  ;;  %v2165_v58 = vpop.f32.mrf.mxu0  ;;  %v3997_v6 = vsel %vm1435_vm3, %v3995_v55, %v3996_v9 }
 0x1d1   : > { %v3212_v34 = vpop.f32.mrf.mxu3  ;;  %v3089_v42 = vadd.f32 %v3044_v37, %v2801_v39  ;;  %v2758_v40 = vpop.f32.mrf.mxu1  ;;  %v2391_v50 = vshrl.u32 %v2370_v60, 16  ;;  %v2394_v45 = vshll.u32 %v2370_v60, 16  ;;  %v2209_v27 = vadd.f32 %v2165_v58, %v13835_v59 }
 0x1d2   : > { %v3359_v59 = vrot.slane %v14155_v52, 1  ;;  %4612 = vperm.xlu2 %13123, %v4572_v36   ;;  %v2802_v4 = vadd.f32 %v14189_v41, %v2758_v40  ;;  %v3542_v37 = vsel %vm1195_vm2, %v3533_v19, %v14210_v15 }
 0x1d3   : > { %v14203_v63 = vadd.f32 %v3212_v34, %v3089_v42  ;;  %v2393_v24 = vrot.slane %v2391_v50, 6  ;;  %v2396_v57 = vrot.slane %v2394_v45, 7  ;;  %v2227_v56 = vmax.f32 %v2209_v27, 0.0  ;;  %v12780_v42 = vld [vmem:[%s16934_s2 + $0x1f0] sm:$0xff] }
 0x1d4   : > { %v3360_v60 = vsel %vm793_vm1, %v3358_v12, %v3359_v59  ;;  %v3766_v34 = vsel %vm1435_vm3, %v3764_v10, %v3765_v0  ;;  %v12788_v50 = vld [vmem:[%s16934_s2 + $0x230] sm:$0xff]  ;;  %4310 = vmatpush.bf16.msra.mxu0 %v12780_v42 }
 0x1d5   : > { %v2397_v20 = vor.u32 %v2396_v57, %v2393_v24  ;;  %v2353_v14 = vmul.f32 %v2270_v54, %v2227_v56  ;;  %v3544_v57 = vshrl.u32 %v14227_v47, 16  ;;  %v3547_v56 = vshll.u32 %v14227_v47, 16  ;;  %4478 = vmatpush.bf16.msra.mxu1 %v12788_v50 }
 0x1d7   : > { %v2589_v25 = vsel %vm14082_vm11, %v2397_v20, %v2588_v3  ;;  %v2371_v39 = vpack.c.bf16 %v2353_v14, %v2353_v14  ;;  %v2398_v3 = vrot.slane %v2397_v20, 4 }
 0x1d8   : > { %v3046_v16 = vpop.f32.mrf.mxu2  ;;  %2590 = vst [vmem:[#allocation2 + $0x8] sm:$0xe] %v2589_v25  ;;  %v2168_v5 = vpop.f32.mrf.mxu0 }
 0x1d9   : > { %v3214_v61 = vpop.f32.mrf.mxu3  ;;  %v3090_v30 = vadd.f32 %v3046_v16, %v2802_v4  ;;  %v2761_v13 = vpop.f32.mrf.mxu1  ;;  %v2400_v58 = vshrl.u32 %v2371_v39, 16  ;;  %v2403_v40 = vshll.u32 %v2371_v39, 16  ;;  %v2210_v26 = vadd.f32 %v2168_v5, %v13846_v43  ;;  %v4575_v43 = vld [vmem:[%s16932_s0 + $0xd0] sm:$0xff] }
 0x1da   : > { %v2803_v24 = vadd.f32 %v14189_v41, %v2761_v13  ;;  %4627 = vperm.xlu2 %13123, %v4575_v43   ;;  %v3549_v5 = vrot.slane %v3547_v56, 2  ;;  %v2285_v43 = vpop.permute.xlu2 %2284 }
 0x1db   : > { %v14245_v45 = vadd.f32 %v3214_v61, %v3090_v30  ;;  %v2402_v27 = vrot.slane %v2400_v58, 6  ;;  %v2405_v54 = vrot.slane %v2403_v40, 7  ;;  %v2228_v12 = vmax.f32 %v2210_v26, 0.0  ;;  %3442 = vmatmul.bf16.vlgmr.msrb.gmra.mxu0 %v3360_v60  ;;  %v14263_v60 = vld [vmem:[%s13251_s12 + $0x68] sm:$0xff] }
 0x1dc   : > { %3680 = vmatmul.bf16.vlgmr.msrb.gmra.mxu1 %v3542_v37  ;;  %v3546_v30 = vrot.slane %v3544_v57, 1  ;;  %v4578_v40 = vld [vmem:[%s16932_s0 + $0xe8] sm:$0xff]  ;;  %v3361_v26 = vrot.slane %v14227_v47, 1 }
 0x1dd   : > { %3848 = vmatmul.bf16.vlgmr.msrb.gmra.mxu2 %v3766_v34  ;;  %v2406_v19 = vor.u32 %v2405_v54, %v2402_v27  ;;  %v2354_v10 = vmul.f32 %v2275_v18, %v2228_v12  ;;  %v2280_v34 = vpop.permute.xlu1 %2279  ;;  %v3998_v54 = vrot.slane %v14263_v60, 2 }
 0x1de   : > { %4079 = vmatmul.bf16.vlgmr.msrb.gmra.mxu3 %v3997_v6  ;;  %v14271_v6 = vor.u32 %v3549_v5, %v3546_v30  ;;  %v12787_v5 = vld [vmem:[%s16934_s2 + $0x228] sm:$0xff] }
 0x1df   : > { %v2407_v14 = vsel %vm14252_vm13, %v2398_v3, %v2406_v19  ;;  %v2372_v55 = vpack.c.bf16 %v2354_v10, %v2354_v10  ;;  %v2408_v50 = vrot.slane %v2406_v19, 4  ;;  %v3362_v19 = vsel %vm793_vm1, %v3359_v59, %v3361_v26  ;;  %v12779_v59 = vld [vmem:[%s16934_s2 + $0x1e8] sm:$0xff]  ;;  %4479 = vmatpush.bf16.msra.mxu1 %v12787_v5 }
 0x1e0   : > { %v3049_v4 = vpop.f32.mrf.mxu2  ;;  %2591 = vst [vmem:[#allocation2 + $0xc] sm:$0xf] %v2407_v14  ;;  %v2170_v16 = vpop.f32.mrf.mxu0  ;;  %v3999_v52 = vsel %vm1435_vm3, %v3996_v9, %v3998_v54  ;;  %4311 = vmatpush.bf16.msra.mxu0 %v12779_v59 }
 0x1e1   : > { %v3217_v25 = vpop.f32.mrf.mxu3  ;;  %v3091_v39 = vadd.f32 %v3049_v4, %v2803_v24  ;;  %v2763_v61 = vpop.f32.mrf.mxu1  ;;  %v2410_v13 = vshrl.u32 %v2372_v55, 16  ;;  %v2413_v20 = vshll.u32 %v2372_v55, 16  ;;  %v2211_v18 = vadd.f32 %v2170_v16, %v13870_v38  ;;  %v12804_v16 = vld [vmem:[%s16936_s4 + $0x28] sm:$0xff] }
 0x1e2   : > { %v2804_v12 = vadd.f32 %v14189_v41, %v2763_v61  ;;  %4642 = vperm.xlu2 %13123, %v4578_v40   ;;  %v3551_v4 = vsel %vm1195_vm2, %v14210_v15, %v14271_v6  ;;  %5130 = vmatpush.bf16.msra.mxu2 %v12804_v16 }
 0x1e3   : > { %v14265_v37 = vadd.f32 %v3217_v25, %v3091_v39  ;;  %v2412_v28 = vrot.slane %v2410_v13, 6  ;;  %v2415_v42 = vrot.slane %v2413_v20, 7  ;;  %v2229_v58 = vmax.f32 %v2211_v18, 0.0  ;;  %v14292_v39 = vld [vmem:[%s13251_s12 + $0x68] sm:$0xff] }
 0x1e4   : > { %v3768_v25 = vsel %vm1435_vm3, %v3765_v0, %v3767_v35  ;;  %v12820_v0 = vld [vmem:[%s16936_s4 + $0x68] sm:$0xff] }
 0x1e5   : > { %v2416_v38 = vor.u32 %v2415_v42, %v2412_v28  ;;  %v2355_v27 = vmul.f32 %v2280_v34, %v2229_v58  ;;  %v3553_v34 = vshrl.u32 %v14292_v39, 16  ;;  %v3556_v28 = vshll.u32 %v14292_v39, 16  ;;  %5493 = vmatpush.bf16.msra.mxu3 %v12820_v0 }
 0x1e6   : > { %v3769_v0 = vrot.slane %v14292_v39, 2 }
 0x1e7   : > { %v2417_v24 = vsel %vm14252_vm13, %v2408_v50, %v2416_v38  ;;  %v2373_v57 = vpack.c.bf16 %v2355_v27, %v2355_v27  ;;  %v2418_v42 = vrot.slane %v2416_v38, 4 }
 0x1e8   : > { %v3051_v56 = vpop.f32.mrf.mxu2  ;;  %2592 = vst [vmem:[#allocation2 + $0x10] sm:$0xf] %v2417_v24  ;;  %v2173_v14 = vpop.f32.mrf.mxu0 }
 0x1e9   : > { %v3219_v3 = vpop.f32.mrf.mxu3  ;;  %v3092_v10 = vadd.f32 %v3051_v56, %v2804_v12  ;;  %v2766_v55 = vpop.f32.mrf.mxu1  ;;  %v2420_v61 = vshrl.u32 %v2373_v57, 16  ;;  %v2423_v30 = vshll.u32 %v2373_v57, 16  ;;  %v2212_v15 = vadd.f32 %v2173_v14, %v13878_v62 }
 0x1ea   : > { %v2805_v9 = vadd.f32 %v14189_v41, %v2766_v55  ;;  %4657 = vperm.xlu2 %13123, %v4581_v33   ;;  %v3558_v14 = vrot.slane %v3556_v28, 2 }
 0x1eb   : > { %v14312_v13 = vadd.f32 %v3219_v3, %v3092_v10  ;;  %v2422_v20 = vrot.slane %v2420_v61, 6  ;;  %v2425_v62 = vrot.slane %v2423_v30, 7  ;;  %v2230_v18 = vmax.f32 %v2212_v15, 0.0  ;;  %3447 = vmatmul.bf16.gmra.mxu0 %v3362_v19  ;;  %v14324_v19 = vld [vmem:[%s13251_s12 + $0x70] sm:$0xff]  ;;  %v4584_v30 = vld [vmem:[%s16932_s0 + $0x118] sm:$0xff] }
 0x1ec   : > { %3685 = vmatmul.bf16.gmra.mxu1 %v3551_v4  ;;  %v3555_v10 = vrot.slane %v3553_v34, 1  ;;  %v3363_v15 = vrot.slane %v14292_v39, 1 }
 0x1ed   : > { %3853 = vmatmul.bf16.gmra.mxu2 %v3768_v25  ;;  %v2426_v58 = vor.u32 %v2425_v62, %v2422_v20  ;;  %v2356_v40 = vmul.f32 %v2285_v43, %v2230_v18  ;;  %v2290_v25 = vpop.permute.xlu2 %2289  ;;  %v4000_v62 = vrot.slane %v14324_v19, 2 }
 0x1ee   : > { %4084 = vmatmul.bf16.gmra.mxu3 %v3999_v52  ;;  %v14332_v52 = vor.u32 %v3558_v14, %v3555_v10  ;;  %v2295_v14 = vpop.permute.xlu0 %2294 }
 0x1ef   : > { %v2427_v50 = vsel %vm14252_vm13, %v2418_v42, %v2426_v58  ;;  %v2374_v27 = vpack.c.bf16 %v2356_v40, %v2356_v40  ;;  %v14340_v42 = vld [vmem:[%s13251_s12 + $0x70] sm:$0xff] }
 0x1f0   : > { %v3054_v12 = vpop.f32.mrf.mxu2  ;;  %2593 = vst [vmem:[#allocation2 + $0x14] sm:$0xf] %v2427_v50  ;;  %v2175_v56 = vpop.f32.mrf.mxu0  ;;  %v3562_v47 = vshrl.u32 %v14340_v42, 16 }
 0x1f1   : > { %v3222_v24 = vpop.f32.mrf.mxu3  ;;  %v3093_v57 = vadd.f32 %v3054_v12, %v2805_v9  ;;  %v2768_v3 = vpop.f32.mrf.mxu1  ;;  %v2430_v55 = vshrl.u32 %v2374_v27, 16  ;;  %v2433_v38 = vshll.u32 %v2374_v27, 16  ;;  %v2213_v43 = vadd.f32 %v2175_v56, %v13899_v11 }
 0x1f2   : > { %v2428_v11 = vrot.slane %v2426_v58, 4  ;;  %v2806_v18 = vadd.f32 %v14189_v41, %v2768_v3  ;;  %4672 = vperm.xlu2 %13123, %v4584_v30   ;;  %v3364_v58 = vsel %vm793_vm1, %v3361_v26, %v3363_v15  ;;  %v3560_v12 = vsel %vm1195_vm2, %v14271_v6, %v14332_v52 }
 0x1f3   : > { %v14326_v4 = vadd.f32 %v3222_v24, %v3093_v57  ;;  %v2432_v16 = vrot.slane %v2430_v55, 6  ;;  %v2435_v59 = vrot.slane %v2433_v38, 7  ;;  %v2231_v61 = vmax.f32 %v2213_v43, 0.0 }
 0x1f4   : > { %v3770_v24 = vsel %vm1435_vm3, %v3767_v35, %v3769_v0  ;;  %v4001_v26 = vsel %vm1435_vm3, %v3998_v54, %v4000_v62  ;;  %v3564_v30 = vrot.slane %v3562_v47, 1 }
 0x1f5   : > { %v2436_v5 = vor.u32 %v2435_v59, %v2432_v16  ;;  %v2357_v20 = vmul.f32 %v2290_v25, %v2231_v61 }
 0x1f7   : > { %v2437_v33 = vsel %vm14252_vm13, %v2428_v11, %v2436_v5  ;;  %v2375_v9 = vpack.c.bf16 %v2357_v20, %v2357_v20  ;;  %v2438_v43 = vrot.slane %v2436_v5, 4  ;;  %v14368_v11 = vld [vmem:[#allocation2 + $0x8] sm:$0xff]  ;;  %v14370_v20 = vld [vmem:[#allocation2 + $0x10] sm:$0xff]  ;;  %v12803_v5 = vld [vmem:[%s16936_s4 + $0x20] sm:$0xff] }
 0x1f8   : > { %v3056_v34 = vpop.f32.mrf.mxu2  ;;  %2594 = vst [vmem:[#allocation2 + $0x18] sm:$0xf] %v2437_v33  ;;  %v2178_v50 = vpop.f32.mrf.mxu0  ;;  %5131 = vmatpush.bf16.msra.mxu2 %v12803_v5  ;;  %v16939_v47 = vrot.slane %v14368_v11, 1 }
 0x1f9   : > { %v3224_v28 = vpop.f32.mrf.mxu3  ;;  %v3094_v40 = vadd.f32 %v3056_v34, %v2806_v18  ;;  %v2771_v27 = vpop.f32.mrf.mxu1  ;;  %v2440_v57 = vshrl.u32 %v2375_v9, 16  ;;  %v2443_v56 = vshll.u32 %v2375_v9, 16  ;;  %v2214_v3 = vadd.f32 %v2178_v50, %v13910_v1 }
 0x1fa   : > { %v2807_v35 = vadd.f32 %v14189_v41, %v2771_v27  ;;  %v3565_v1 = vshll.u32 %v14340_v42, 16 }
 0x1fb   : > { %v14361_v10 = vadd.f32 %v3224_v28, %v3094_v40  ;;  %v2442_v6 = vrot.slane %v2440_v57, 6  ;;  %v2445_v55 = vrot.slane %v2443_v56, 7  ;;  %v2232_v38 = vmax.f32 %v2214_v3, 0.0  ;;  %3452 = vmatmul.bf16.gmra.mxu0 %v3364_v58  ;;  %v12778_v28 = vld [vmem:[%s16934_s2 + $0x1e0] sm:$0xff]  ;;  %v2300_v56 = vpop.permute.xlu1 %2299 }
 0x1fc   : > { %3690 = vmatmul.bf16.gmra.mxu1 %v3560_v12  ;;  %v3567_v34 = vrot.slane %v3565_v1, 2  ;;  %v12819_v40 = vld [vmem:[%s16936_s4 + $0x60] sm:$0xff]  ;;  %v14383_v12 = vld [vmem:[%s13251_s12 + $0x78] sm:$0xff]  ;;  %4312 = vmatpush.bf16.msra.mxu0 %v12778_v28 }
 0x1fd   : > { %3858 = vmatmul.bf16.gmra.mxu2 %v3770_v24  ;;  %v2446_v60 = vor.u32 %v2445_v55, %v2442_v6  ;;  %v2358_v25 = vmul.f32 %v2295_v14, %v2232_v38  ;;  %v12786_v24 = vld [vmem:[%s16934_s2 + $0x220] sm:$0xff]  ;;  %5494 = vmatpush.bf16.msra.mxu3 %v12819_v40  ;;  %v5660_v6 = vrot.slane %v14370_v20, 1  ;;  %v3771_v38 = vrot.slane %v14340_v42, 2 }
 0x1fe   : > { %4089 = vmatmul.bf16.gmra.mxu3 %v4001_v26  ;;  %4480 = vmatpush.bf16.msra.mxu1 %v12786_v24  ;;  %v14392_v55 = vor.u32 %v3567_v34, %v3564_v30 }
 0x1ff   : > { %v2447_v54 = vsel %vm14252_vm13, %v2438_v43, %v2446_v60  ;;  %v2376_v16 = vpack.c.bf16 %v2358_v25, %v2358_v25  ;;  %v4002_v25 = vrot.slane %v14383_v12, 2  ;;  %v3772_v40 = vsel %vm1435_vm3, %v3769_v0, %v3771_v38 }
 0x200   : > { %v3059_v59 = vpop.f32.mrf.mxu2  ;;  %2595 = vst [vmem:[#allocation2 + $0x1c] sm:$0xf] %v2447_v54  ;;  %v2180_v33 = vpop.f32.mrf.mxu0  ;;  %v3569_v28 = vsel %vm1195_vm2, %v14332_v52, %v14392_v55 }
 0x201   : > { %v3227_v61 = vpop.f32.mrf.mxu3  ;;  %v3095_v18 = vadd.f32 %v3059_v59, %v2807_v35  ;;  %v2773_v9 = vpop.f32.mrf.mxu1  ;;  %v2450_v50 = vshrl.u32 %v2376_v16, 16  ;;  %v2453_v27 = vshll.u32 %v2376_v16, 16  ;;  %v2215_v58 = vadd.f32 %v2180_v33, %v13937_v53 }
 0x202   : > { %v3365_v53 = vrot.slane %v14340_v42, 1  ;;  %v2448_v35 = vrot.slane %v2446_v60, 4  ;;  %v2808_v54 = vadd.f32 %v14189_v41, %v2773_v9  ;;  %v14403_v16 = vsel %vm793_vm1, %v16939_v47, %v5660_v6  ;;  %v14408_v60 = vld [vmem:[%s13251_s12 + $0x78] sm:$0xff] }
 0x203   : > { %v14388_v57 = vadd.f32 %v3227_v61, %v3095_v18  ;;  %v2452_v3 = vrot.slane %v2450_v50, 6  ;;  %v2455_v26 = vrot.slane %v2453_v27, 7  ;;  %v2233_v14 = vmax.f32 %v2215_v58, 0.0  ;;  %v12802_v50 = vld [vmem:[%s16936_s4 + $0x18] sm:$0xff] }
 0x204   : > { %v3366_v9 = vsel %vm793_vm1, %v3363_v15, %v3365_v53  ;;  %v4003_v15 = vsel %vm1435_vm3, %v4000_v62, %v4002_v25  ;;  %5132 = vmatpush.bf16.msra.mxu2 %v12802_v50 }
 0x205   : > { %v2456_v1 = vor.u32 %v2455_v26, %v2452_v3  ;;  %v2359_v43 = vmul.f32 %v2300_v56, %v2233_v14  ;;  %v2305_v56 = vpop.permute.xlu2 %2304  ;;  %v3571_v26 = vshrl.u32 %v14408_v60, 16 }
 0x207   : > { %v2457_v59 = vsel %vm14252_vm13, %v2448_v35, %v2456_v1  ;;  %v2377_v61 = vpack.c.bf16 %v2359_v43, %v2359_v43  ;;  %v2458_v19 = vrot.slane %v2456_v1, 4  ;;  %v12777_v1 = vld [vmem:[%s16934_s2 + $0x1d8] sm:$0xff] }
 0x208   : > { %v3061_v30 = vpop.f32.mrf.mxu2  ;;  %2596 = vst [vmem:[#allocation2 + $0x20] sm:$0xf] %v2457_v59  ;;  %v2183_v34 = vpop.f32.mrf.mxu0  ;;  %4313 = vmatpush.bf16.msra.mxu0 %v12777_v1 }
 0x209   : > { %v3229_v18 = vpop.f32.mrf.mxu3  ;;  %v3096_v33 = vadd.f32 %v3061_v30, %v2808_v54  ;;  %v2776_v5 = vpop.f32.mrf.mxu1  ;;  %v2460_v27 = vshrl.u32 %v2377_v61, 16  ;;  %v2463_v58 = vshll.u32 %v2377_v61, 16  ;;  %v2216_v24 = vadd.f32 %v2183_v34, %v13954_v2 }
 0x20a   : > { %v2809_v14 = vadd.f32 %v14189_v41, %v2776_v5  ;;  %v3574_v2 = vshll.u32 %v14408_v60, 16  ;;  %v3573_v30 = vrot.slane %v3571_v26, 1  ;;  %v2310_v26 = vpop.permute.xlu0 %2309 }
 0x20b   : > { %v14432_v52 = vadd.f32 %v3229_v18, %v3096_v33  ;;  %v2462_v39 = vrot.slane %v2460_v27, 6  ;;  %v2465_v0 = vrot.slane %v2463_v58, 7  ;;  %v2234_v3 = vmax.f32 %v2216_v24, 0.0  ;;  %3457 = vmatmul.bf16.gmra.mxu0 %v3366_v9  ;;  %v14439_v18 = vld [vmem:[#allocation2 + $0x18] sm:$0xff]  ;;  %v14452_v24 = vld [vmem:[%s13251_s12 + $0x80] sm:$0xff] }
 0x20c   : > { %3695 = vmatmul.bf16.gmra.mxu1 %v3569_v28  ;;  %v3576_v9 = vrot.slane %v3574_v2, 2  ;;  %v12818_v28 = vld [vmem:[%s16936_s4 + $0x58] sm:$0xff] }
 0x20d   : > { %3863 = vmatmul.bf16.gmra.mxu2 %v3772_v40  ;;  %v2466_v35 = vor.u32 %v2465_v0, %v2462_v39  ;;  %v2360_v62 = vmul.f32 %v2305_v56, %v2234_v3  ;;  %v12785_v40 = vld [vmem:[%s16934_s2 + $0x218] sm:$0xff]  ;;  %5495 = vmatpush.bf16.msra.mxu3 %v12818_v28  ;;  %v5662_v3 = vrot.slane %v14439_v18, 1 }
 0x20e   : > { %4094 = vmatmul.bf16.gmra.mxu3 %v4003_v15  ;;  %4481 = vmatpush.bf16.msra.mxu1 %v12785_v40  ;;  %v14458_v2 = vor.u32 %v3576_v9, %v3573_v30 }
 0x20f   : > { %v2467_v43 = vsel %vm14252_vm13, %v2458_v19, %v2466_v35  ;;  %v2378_v54 = vpack.c.bf16 %v2360_v62, %v2360_v62  ;;  %v2468_v19 = vrot.slane %v2466_v35, 4  ;;  %v14473_v35 = vld [vmem:[%s13251_s12 + $0x80] sm:$0xff] }
 0x210   : > { %v3064_v59 = vpop.f32.mrf.mxu2  ;;  %2597 = vst [vmem:[#allocation2 + $0x24] sm:$0xf] %v2467_v43  ;;  %v2185_v34 = vpop.f32.mrf.mxu0  ;;  %v3580_v42 = vshrl.u32 %v14473_v35, 16 }
 0x211   : > { %v3232_v61 = vpop.f32.mrf.mxu3  ;;  %v3097_v33 = vadd.f32 %v3064_v59, %v2809_v14  ;;  %v2778_v5 = vpop.f32.mrf.mxu1  ;;  %v2470_v50 = vshrl.u32 %v2378_v54, 16  ;;  %v2473_v27 = vshll.u32 %v2378_v54, 16  ;;  %v2217_v58 = vadd.f32 %v2185_v34, %v13972_v32 }
 0x212   : > { %v3367_v14 = vrot.slane %v14408_v60, 1  ;;  %v3773_v32 = vrot.slane %v14408_v60, 2  ;;  %v4004_v54 = vrot.slane %v14452_v24, 2  ;;  %v2810_v59 = vadd.f32 %v14189_v41, %v2778_v5 }
 0x213   : > { %v14454_v15 = vadd.f32 %v3232_v61, %v3097_v33  ;;  %v2472_v56 = vrot.slane %v2470_v50, 6  ;;  %v2475_v39 = vrot.slane %v2473_v27, 7  ;;  %v2235_v0 = vmax.f32 %v2217_v58, 0.0 }
 0x214   : > { %v14468_v61 = vsel %vm793_vm1, %v5660_v6, %v5662_v3  ;;  %v3368_v5 = vsel %vm793_vm1, %v3365_v53, %v3367_v14  ;;  %v3578_v6 = vsel %vm1195_vm2, %v14392_v55, %v14458_v2  ;;  %v3774_v50 = vsel %vm1435_vm3, %v3771_v38, %v3773_v32 }
 0x215   : > { %v2476_v62 = vor.u32 %v2475_v39, %v2472_v56  ;;  %v2361_v43 = vmul.f32 %v2310_v26, %v2235_v0  ;;  %v4005_v53 = vsel %vm1435_vm3, %v4002_v25, %v4004_v54  ;;  %v2315_v0 = vpop.permute.xlu1 %2314 }
 0x217   : > { %v2477_v30 = vsel %vm14252_vm13, %v2468_v19, %v2476_v62  ;;  %v2379_v33 = vpack.c.bf16 %v2361_v43, %v2361_v43  ;;  %v2478_v43 = vrot.slane %v2476_v62, 4  ;;  %v12801_v62 = vld [vmem:[%s16936_s4 + $0x10] sm:$0xff] }
 0x218   : > { %v3066_v34 = vpop.f32.mrf.mxu2  ;;  %2598 = vst [vmem:[#allocation2 + $0x28] sm:$0xf] %v2477_v30  ;;  %v2188_v28 = vpop.f32.mrf.mxu0  ;;  %5133 = vmatpush.bf16.msra.mxu2 %v12801_v62 }
 0x219   : > { %v3234_v9 = vpop.f32.mrf.mxu3  ;;  %v3098_v1 = vadd.f32 %v3066_v34, %v2810_v59  ;;  %v2781_v40 = vpop.f32.mrf.mxu1  ;;  %v2480_v27 = vshrl.u32 %v2379_v33, 16  ;;  %v2483_v58 = vshll.u32 %v2379_v33, 16  ;;  %v2218_v56 = vadd.f32 %v2188_v28, %v13995_v7 }
 0x21a   : > { %v2811_v38 = vadd.f32 %v14189_v41, %v2781_v40  ;;  %v3583_v7 = vshll.u32 %v14473_v35, 16 }
 0x21b   : > { %v14494_v39 = vadd.f32 %v3234_v9, %v3098_v1  ;;  %v2482_v55 = vrot.slane %v2480_v27, 6  ;;  %v2485_v26 = vrot.slane %v2483_v58, 7  ;;  %v2236_v19 = vmax.f32 %v2218_v56, 0.0  ;;  %3462 = vmatmul.bf16.gmra.mxu0 %v3368_v5  ;;  %v14501_v1 = vld [vmem:[#allocation2 + $0x20] sm:$0xff]  ;;  %v12817_v27 = vld [vmem:[%s16936_s4 + $0x50] sm:$0xff] }
 0x21c   : > { %3700 = vmatmul.bf16.gmra.mxu1 %v3578_v6  ;;  %v3582_v9 = vrot.slane %v3580_v42, 1  ;;  %v3585_v6 = vrot.slane %v3583_v7, 2  ;;  %5496 = vmatpush.bf16.msra.mxu3 %v12817_v27  ;;  %v5664_v7 = vrot.slane %v14501_v1, 1 }
 0x21d   : > { %3868 = vmatmul.bf16.gmra.mxu2 %v3774_v50  ;;  %v2486_v12 = vor.u32 %v2485_v26, %v2482_v55  ;;  %v2362_v59 = vmul.f32 %v2315_v0, %v2236_v19  ;;  %v12776_v50 = vld [vmem:[%s16934_s2 + $0x1d0] sm:$0xff]  ;;  %v14514_v0 = vld [vmem:[%s13251_s12 + $0x88] sm:$0xff]  ;;  %v2320_v26 = vpop.permute.xlu2 %2319 }
 0x21e   : > { %4099 = vmatmul.bf16.gmra.mxu3 %v4005_v53  ;;  %4314 = vmatpush.bf16.msra.mxu0 %v12776_v50 }
 0x21f   : > { %v2487_v25 = vsel %vm14252_vm13, %v2478_v43, %v2486_v12  ;;  %v2380_v30 = vpack.c.bf16 %v2362_v59, %v2362_v59  ;;  %v3369_v43 = vrot.slane %v14473_v35, 1  ;;  %v14520_v59 = vor.u32 %v3585_v6, %v3582_v9 }
 0x220   : > { %v3069_v33 = vpop.f32.mrf.mxu2  ;;  %2599 = vst [vmem:[#allocation2 + $0x2c] sm:$0xf] %v2487_v25  ;;  %v2190_v40 = vpop.f32.mrf.mxu0  ;;  %v3775_v25 = vrot.slane %v14473_v35, 2 }
 0x221   : > { %v3237_v34 = vpop.f32.mrf.mxu3  ;;  %v3099_v28 = vadd.f32 %v3069_v33, %v2811_v38  ;;  %v2783_v5 = vpop.f32.mrf.mxu1  ;;  %v2490_v58 = vshrl.u32 %v2380_v30, 16  ;;  %v2493_v56 = vshll.u32 %v2380_v30, 16  ;;  %v2219_v53 = vadd.f32 %v2190_v40, %v14013_v51 }
 0x222   : > { %v2488_v51 = vrot.slane %v2486_v12, 4  ;;  %v14530_v40 = vsel %vm793_vm1, %v5662_v3, %v5664_v7  ;;  %v3587_v3 = vsel %vm1195_vm2, %v14458_v2, %v14520_v59 }
 0x223   : > { %v14516_v55 = vadd.f32 %v3237_v34, %v3099_v28  ;;  %v2492_v19 = vrot.slane %v2490_v58, 6  ;;  %v2495_v42 = vrot.slane %v2493_v56, 7  ;;  %v2237_v38 = vmax.f32 %v2219_v53, 0.0  ;;  %v12784_v53 = vld [vmem:[%s16934_s2 + $0x210] sm:$0xff] }
 0x224   : > { %v4006_v34 = vrot.slane %v14514_v0, 2  ;;  %v2812_v28 = vadd.f32 %v14189_v41, %v2783_v5  ;;  %v3370_v5 = vsel %vm793_vm1, %v3367_v14, %v3369_v43  ;;  %v3776_v56 = vsel %vm1435_vm3, %v3773_v32, %v3775_v25  ;;  %4482 = vmatpush.bf16.msra.mxu1 %v12784_v53 }
 0x225   : > { %v2496_v30 = vor.u32 %v2495_v42, %v2492_v19  ;;  %v2363_v33 = vmul.f32 %v2320_v26, %v2237_v38  ;;  %v14551_v26 = vld [vmem:[%s13251_s12 + $0x88] sm:$0xff] }
 0x226   : > { %v4007_v2 = vsel %vm1435_vm3, %v4004_v54, %v4006_v34 }
 0x227   : > { %v2497_v9 = vsel %vm14252_vm13, %v2488_v51, %v2496_v30  ;;  %v2381_v6 = vpack.c.bf16 %v2363_v33, %v2363_v33  ;;  %v2325_v33 = vpop.permute.xlu0 %2324  ;;  %v2498_v24 = vrot.slane %v2496_v30, 4  ;;  %v14569_v30 = vld [vmem:[#allocation2 + $0x28] sm:$0xff] }
 0x228   : > { %v3071_v62 = vpop.f32.mrf.mxu2  ;;  %2600 = vst [vmem:[#allocation2 + $0x30] sm:$0xf] %v2497_v9  ;;  %v2193_v27 = vpop.f32.mrf.mxu0  ;;  %v3592_v9 = vshll.u32 %v14551_v26, 16 }
 0x229   : > { %v3239_v12 = vpop.f32.mrf.mxu3  ;;  %v3100_v50 = vadd.f32 %v3071_v62, %v2812_v28  ;;  %v2786_v58 = vpop.f32.mrf.mxu1  ;;  %v2500_v19 = vshrl.u32 %v2381_v6, 16  ;;  %v2503_v42 = vshll.u32 %v2381_v6, 16  ;;  %v2220_v14 = vadd.f32 %v2193_v27, %v14039_v17 }
 0x22a   : > { %v2813_v28 = vadd.f32 %v14189_v41, %v2786_v58  ;;  %v3589_v17 = vshrl.u32 %v14551_v26, 16  ;;  %v3594_v53 = vrot.slane %v3592_v9, 2  ;;  %v3371_v9 = vrot.slane %v14551_v26, 1 }
 0x22b   : > { %v14559_v38 = vadd.f32 %v3239_v12, %v3100_v50  ;;  %v2502_v60 = vrot.slane %v2500_v19, 6  ;;  %v2505_v32 = vrot.slane %v2503_v42, 7  ;;  %v2238_v51 = vmax.f32 %v2220_v14, 0.0  ;;  %3467 = vmatmul.bf16.gmra.mxu0 %v3370_v5  ;;  %v12800_v19 = vld [vmem:[%s16936_s4 + $0x8] sm:$0xff] }
 0x22c   : > { %3705 = vmatmul.bf16.gmra.mxu1 %v3587_v3  ;;  %5134 = vmatpush.bf16.msra.mxu2 %v12800_v19 }
 0x22d   : > { %3873 = vmatmul.bf16.gmra.mxu2 %v3776_v56  ;;  %v2506_v6 = vor.u32 %v2505_v32, %v2502_v60  ;;  %v2364_v54 = vmul.f32 %v2325_v33, %v2238_v51  ;;  %v3591_v56 = vrot.slane %v3589_v17, 1  ;;  %v14573_v60 = vld [vmem:[%s13251_s12 + $0x90] sm:$0xff]  ;;  %v2330_v17 = vpop.permute.xlu1 %2329 }
 0x22e   : > { %4104 = vmatmul.bf16.gmra.mxu3 %v4007_v2 }
 0x22f   : > { %v2507_v62 = vsel %vm14252_vm13, %v2498_v24, %v2506_v6  ;;  %v2382_v12 = vpack.c.bf16 %v2364_v54, %v2364_v54  ;;  %v14578_v24 = vor.u32 %v3594_v53, %v3591_v56  ;;  %v3777_v54 = vrot.slane %v14551_v26, 2 }
 0x230   : > { %v3074_v50 = vpop.f32.mrf.mxu2  ;;  %2601 = vst [vmem:[#allocation2 + $0x34] sm:$0xf] %v2507_v62  ;;  %v2195_v3 = vpop.f32.mrf.mxu0  ;;  %v16941_v62 = vrot.slane %v14569_v30, 1 }
 0x231   : > { %v3242_v27 = vpop.f32.mrf.mxu3  ;;  %v3101_v5 = vadd.f32 %v3074_v50, %v2813_v28  ;;  %v2788_v58 = vpop.f32.mrf.mxu1  ;;  %v2510_v42 = vshrl.u32 %v2382_v12, 16  ;;  %v2513_v14 = vshll.u32 %v2382_v12, 16  ;;  %v2221_v2 = vadd.f32 %v2195_v3, %v14058_v22 }
 0x232   : > { %v2508_v12 = vrot.slane %v2506_v6, 4  ;;  %v4008_v3 = vrot.slane %v14573_v60, 2  ;;  %v14592_v56 = vsel %vm793_vm1, %v5664_v7, %v16941_v62  ;;  %v3596_v7 = vsel %vm1195_vm2, %v14520_v59, %v14578_v24  ;;  %v12783_v59 = vld [vmem:[%s16934_s2 + $0x208] sm:$0xff] }
 0x233   : > { %v14575_v32 = vadd.f32 %v3242_v27, %v3101_v5  ;;  %v2512_v51 = vrot.slane %v2510_v42, 6  ;;  %v2515_v33 = vrot.slane %v2513_v14, 7  ;;  %v2239_v28 = vmax.f32 %v2221_v2, 0.0  ;;  %v14585_v5 = vld [vmem:[%s13251_s12 + $0x90] sm:$0xff]  ;;  %16953 = vst [vmem:[#allocation3_spill] sm:$0xff] %v14592_v56  ;;  %4483 = vmatpush.bf16.msra.mxu1 %v12783_v59 }
 0x234   : > { %v2814_v27 = vadd.f32 %v14189_v41, %v2788_v58  ;;  %v3372_v58 = vsel %vm793_vm1, %v3369_v43, %v3371_v9  ;;  %v4009_v35 = vsel %vm1435_vm3, %v4006_v34, %v4008_v3 }
 0x235   : > { %v2516_v22 = vor.u32 %v2515_v33, %v2512_v51  ;;  %v2365_v50 = vmul.f32 %v2330_v17, %v2239_v28  ;;  %v3778_v33 = vsel %vm1435_vm3, %v3775_v25, %v3777_v54  ;;  %v12775_v28 = vld [vmem:[%s16934_s2 + $0x1c8] sm:$0xff] }
 0x236   : > { %v12816_v17 = vld [vmem:[%s16936_s4 + $0x48] sm:$0xff]  ;;  %4315 = vmatpush.bf16.msra.mxu0 %v12775_v28 }
 0x237   : > { %v2517_v53 = vsel %vm14252_vm13, %v2508_v12, %v2516_v22  ;;  %v2383_v19 = vpack.c.bf16 %v2365_v50, %v2365_v50  ;;  %5497 = vmatpush.bf16.msra.mxu3 %v12816_v17  ;;  %v2518_v47 = vrot.slane %v2516_v22, 4 }
 0x238   : > { %v3076_v6 = vpop.f32.mrf.mxu2  ;;  %2602 = vst [vmem:[#allocation2 + $0x38] sm:$0xf] %v2517_v53  ;;  %v2198_v2 = vpop.f32.mrf.mxu0 }
 0x239   : > { %v3244_v42 = vpop.f32.mrf.mxu3  ;;  %v3102_v14 = vadd.f32 %v3076_v6, %v2814_v27  ;;  %v2791_v51 = vpop.f32.mrf.mxu1  ;;  %v2520_v12 = vshrl.u32 %v2383_v19, 16  ;;  %v2523_v43 = vshll.u32 %v2383_v19, 16  ;;  %v2222_v50 = vadd.f32 %v2198_v2, %v14097_v49 }
 0x23a   : > { %v3598_v27 = vshrl.u32 %v14585_v5, 16  ;;  %v3601_v49 = vshll.u32 %v14585_v5, 16  ;;  %v2335_v2 = vpop.permute.xlu2 %2334  ;;  %v2815_v34 = vadd.f32 %v14189_v41, %v2791_v51  ;;  %v14632_v51 = vld [vmem:[%s13251_s12 + $0x98] sm:$0xff] }
 0x23b   : > { %v14624_v25 = vadd.f32 %v3244_v42, %v3102_v14  ;;  %v2522_v53 = vrot.slane %v2520_v12, 6  ;;  %v2525_v19 = vrot.slane %v2523_v43, 7  ;;  %v2240_v6 = vmax.f32 %v2222_v50, 0.0  ;;  %3472 = vmatmul.bf16.gmra.mxu0 %v3372_v58 }
 0x23c   : > { %3710 = vmatmul.bf16.gmra.mxu1 %v3596_v7  ;;  %v3600_v7 = vrot.slane %v3598_v27, 1  ;;  %v3603_v43 = vrot.slane %v3601_v49, 2  ;;  %v12799_v27 = vld [vmem:[%s16936_s4] sm:$0xff] }
 0x23d   : > { %3878 = vmatmul.bf16.gmra.mxu2 %v3778_v33  ;;  %v2526_v42 = vor.u32 %v2525_v19, %v2522_v53  ;;  %v2366_v14 = vmul.f32 %v2335_v2, %v2240_v6  ;;  %v3506_v53 = vld [vmem:[%s13251_s12 + $0x98] sm:$0x3]  ;;  %v12774_v19 = vld [vmem:[%s16934_s2 + $0x1c0] sm:$0xff] }
 0x23e   : > { %4109 = vmatmul.bf16.gmra.mxu3 %v4009_v35  ;;  %v12815_v6 = vld [vmem:[%s16936_s4 + $0x40] sm:$0xff]  ;;  %5135 = vmatpush.bf16.msra.mxu2 %v12799_v27 }
 0x23f   : > { %v2527_v28 = vsel %vm14252_vm13, %v2518_v47, %v2526_v42  ;;  %v2384_v17 = vpack.c.bf16 %v2366_v14, %v2366_v14  ;;  %v16943_v47 = vrot.slane %v14585_v5, 1  ;;  %v2340_v14 = vpop.permute.xlu0 %2339  ;;  %4316 = vmatpush.bf16.msra.mxu0 %v12774_v19  ;;  %5498 = vmatpush.bf16.msra.mxu3 %v12815_v6 }
 0x240   : > { %v3079_v12 = vpop.f32.mrf.mxu2  ;;  %2603 = vst [vmem:[#allocation2 + $0x3c] sm:$0xf] %v2527_v28  ;;  %v2200_v48 = vpop.f32.mrf.mxu0  ;;  %v16942_v28 = vrot.slane %v14585_v5, 2 }
 0x241   : > { %v3247_v58 = vpop.f32.mrf.mxu3  ;;  %v3103_v50 = vadd.f32 %v3079_v12, %v2815_v34  ;;  %v2793_v41 = vpop.f32.mrf.mxu1  ;;  %v2530_v33 = vshrl.u32 %v2384_v17, 16  ;;  %v2533_v22 = vshll.u32 %v2384_v17, 16  ;;  %v2223_v35 = vadd.f32 %v2200_v48, %v14124_v44  ;;  %v12782_v34 = vld [vmem:[%s16934_s2 + $0x200] sm:$0xff] }
 0x242   : > { %v14648_v48 = vor.u32 %v3603_v43, %v3600_v7  ;;  %v16944_v17 = vrot.slane %v14632_v51, 2  ;;  %v3524_v12 = vunpack.c.l.b16 %v3506_v53  ;;  %4484 = vmatpush.bf16.msra.mxu1 %v12782_v34  ;;  %v14655_v7 = vld [vmem:[#allocation2 + $0x30] sm:$0xff]  ;;  %v14660_v43 = vld [vmem:[%s16935_s3] ss:$0 sm:$0xff]  ;;  %v3374_v27 = vsel %vm793_vm1, %v3371_v9, %v16943_v47  ;;  %v2345_v47 = vpop.permute.xlu1 %2344 }
 0x243   : > { %v14636_v59 = vadd.f32 %v3247_v58, %v3103_v50  ;;  %v2532_v49 = vrot.slane %v2530_v33, 6  ;;  %v2535_v2 = vrot.slane %v2533_v22, 7  ;;  %v2241_v44 = vmax.f32 %v2223_v35, 0.0 }
 0x244   : > { %v2528_v58 = vrot.slane %v2526_v42, 4  ;;  %v2816_v33 = vadd.f32 %v14660_v43, %v2793_v41  ;;  %v3605_v19 = vsel %vm1195_vm2, %v14578_v24, %v14648_v48  ;;  %v4011_v9 = vsel %vm1435_vm3, %v4008_v3, %v16944_v17 }
 0x245   : > { %v2536_v50 = vor.u32 %v2535_v2, %v2532_v49  ;;  %v2367_v62 = vmul.f32 %v2340_v14, %v2241_v44  ;;  %v3293_v2 = vld [vmem:[%s13251_s12 + $0x98] sm:$0x1]  ;;  %v14684_v44 = vpack.c.b16 %v3524_v12, %v3524_v12 }
 0x247   : > { %v2537_v22 = vsel %vm14252_vm13, %v2528_v58, %v2536_v50  ;;  %v2385_v35 = vpack.c.bf16 %v2367_v62, %v2367_v62  ;;  %v3780_v62 = vsel %vm1435_vm3, %v3777_v54, %v16942_v28  ;;  %v3930_v58 = vld [vmem:[%s13251_s12 + $0xa0] sm:$0x3]  ;;  %v3347_v28 = vunpack.c.l.b16 %v3293_v2  ;;  %v14708_v2 = vld [vmem:[#allocation2 + $0x38] sm:$0xff] }
 0x248   : > { %v3081_v42 = vpop.f32.mrf.mxu2  ;;  %2604 = vst [vmem:[#allocation2 + $0x40] sm:$0xf] %v2537_v22  ;;  %v2203_v41 = vpop.f32.mrf.mxu0  ;;  %v3607_v12 = vshrl.u32 %v14684_v44, 16 }
 0x249   : > { %v3249_v53 = vpop.f32.mrf.mxu3  ;;  %v3104_v6 = vadd.f32 %v3081_v42, %v2816_v33  ;;  %v2796_v49 = vpop.f32.mrf.mxu1  ;;  %v2540_v24 = vshrl.u32 %v2385_v35, 16  ;;  %v2543_v34 = vshll.u32 %v2385_v35, 16  ;;  %v2224_v14 = vadd.f32 %v2203_v41, %v14144_v31 }
 0x24a   : > { %v5668_v33 = vrot.slane %v14655_v7, 1  ;;  %v2817_v3 = vadd.f32 %v14660_v43, %v2796_v49  ;;  %v3610_v31 = vshll.u32 %v14684_v44, 16  ;;  %v3984_v35 = vunpack.c.l.b16 %v3930_v58 }
 0x24b   : > { %v14689_v22 = vadd.f32 %v3249_v53, %v3104_v6  ;;  %v2542_v26 = vrot.slane %v2540_v24, 6  ;;  %v2545_v54 = vrot.slane %v2543_v34, 7  ;;  %v2242_v42 = vmax.f32 %v2224_v14, 0.0  ;;  %3477 = vmatmul.bf16.gmra.mxu0 %v3374_v27  ;;  %v12854_v53 = vld [vmem:[%s16936_s4 + $0x138] sm:$0xff] }
 0x24c   : > { %3715 = vmatmul.bf16.gmra.mxu1 %v3605_v19  ;;  %v12830_v27 = vld [vmem:[%s16936_s4 + $0xb8] sm:$0xff]  ;;  %v2538_v6 = vrot.slane %v2536_v50, 4  ;;  %6350 = vmatpush.bf16.msrb.mxu2 %v12854_v53  ;;  %v3612_v17 = vrot.slane %v3610_v31, 2  ;;  %v3781_v31 = vrot.slane %v14684_v44, 2 }
 0x24d   : > { %3883 = vmatmul.bf16.gmra.mxu2 %v3780_v62  ;;  %v12862_v19 = vld [vmem:[%s16936_s4 + $0x178] sm:$0xff]  ;;  %v2546_v41 = vor.u32 %v2545_v54, %v2542_v26  ;;  %v2368_v49 = vmul.f32 %v2345_v47, %v2242_v42  ;;  %v16954_v62 = vrot.slane %v14569_v30, 1  ;;  %5733 = vmatpush.bf16.msrb.mxu0 %v12830_v27  ;;  %v3357_v54 = vpack.c.b16 %v3347_v28, %v3347_v28 }
 0x24e   : > { %4114 = vmatmul.bf16.gmra.mxu3 %v4011_v9  ;;  %v3609_v42 = vrot.slane %v3607_v12, 1  ;;  %v3994_v27 = vpack.c.b16 %v3984_v35, %v3984_v35 }
 0x24f   : > { %v14706_v9 = vsel %vm793_vm1, %v16954_v62, %v5668_v33  ;;  %v2547_v24 = vsel %vm14252_vm13, %v2538_v6, %v2546_v41  ;;  %v2386_v34 = vpack.c.bf16 %v2368_v49, %v2368_v49  ;;  %6592 = vmatpush.bf16.msrb.mxu3 %v12862_v19  ;;  %v12846_v6 = vld [vmem:[%s16936_s4 + $0xf8] sm:$0xff]  ;;  %v16945_v19 = vrot.slane %v14708_v2, 1 }
 0x250   : > { %16955 = vst [vmem:[#allocation4_spill] sm:$0xff] %v14706_v9  ;;  %v3084_v14 = vpop.f32.mrf.mxu2  ;;  %v2205_v26 = vpop.f32.mrf.mxu0  ;;  %v3375_v28 = vrot.slane %v3357_v54, 1  ;;  %v3613_v12 = vor.u32 %v3612_v17, %v3609_v42  ;;  %6038 = vmatpush.bf16.msrb.mxu1 %v12846_v6  ;;  %v2548_v35 = vrot.slane %v2546_v41, 4 }
 0x251   : > { %v3252_v58 = vpop.f32.mrf.mxu3  ;;  %2605 = vst [vmem:[#allocation2 + $0x44] sm:$0xf] %v2547_v24  ;;  %v3105_v50 = vadd.f32 %v3084_v14, %v2817_v3  ;;  %v2798_v47 = vpop.f32.mrf.mxu1  ;;  %v2550_v62 = vshrl.u32 %v2386_v34, 16  ;;  %v2553_v9 = vshll.u32 %v2386_v34, 16  ;;  %v2225_v53 = vadd.f32 %v2205_v26, %v14172_v23 }
 0x252   : > { %v2350_v14 = vpop.permute.xlu2 %2349  ;;  %v14723_v23 = vsel %vm793_vm1, %v5668_v33, %v16945_v19  ;;  %v2818_v26 = vadd.f32 %v14660_v43, %v2798_v47  ;;  %v16956_v33 = vrot.slane %v14585_v5, 1  ;;  %v16957_v43 = vrot.slane %v14585_v5, 2 }
 0x253   : > { %v14713_v56 = vadd.f32 %v3252_v58, %v3105_v50  ;;  %v2552_v49 = vrot.slane %v2550_v62, 6  ;;  %v2555_v3 = vrot.slane %v2553_v9, 7  ;;  %v2243_v24 = vmax.f32 %v2225_v53, 0.0 }
 0x254   : > { %v4012_v50 = vrot.slane %v3994_v27, 2  ;;  %v3376_v41 = vsel %vm793_vm1, %v16956_v33, %v3375_v28  ;;  %v3614_v27 = vsel %vm1195_vm2, %v14648_v48, %v3613_v12  ;;  %v3782_v47 = vsel %vm1435_vm3, %v16957_v43, %v3781_v31  ;;  %v14746_v48 = vld [vmem:[%s13251_s12 + $0x60] sm:$0xff] }
 0x255   : > { %v2556_v34 = vor.u32 %v2555_v3, %v2552_v49  ;;  %v2369_v58 = vmul.f32 %v2350_v14, %v2243_v24  ;;  %v16958_v24 = vrot.slane %v14632_v51, 2  ;;  %v4164_v28 = vshrl.u32 %v14201_v46, 16 }
 0x256   : > { %v4172_v5 = vshrl.u32 %v14746_v48, 16 }
 0x257   : > { %v2557_v9 = vsel %vm14252_vm13, %v2548_v35, %v2556_v34  ;;  %v2387_v54 = vpack.c.bf16 %v2369_v58, %v2369_v58  ;;  %v4013_v14 = vsel %vm1435_vm3, %v16958_v24, %v4012_v50  ;;  %v4381_v35 = vld [vmem:[%s13251_s12 + $0x58] sm:$0x8]  ;;  %v4166_v33 = vrot.slane %v4164_v28, 2 }
 0x258   : > { %v3086_v17 = vpop.f32.mrf.mxu2  ;;  %2606 = vst [vmem:[#allocation2 + $0x48] sm:$0xf] %v2557_v9  ;;  %v3443_v62 = vpop.f32.mrf.mxu0  ;;  %v4399_v50 = vunpack.c.l.b16 %v4381_v35 }
 0x259   : > { %v3254_v42 = vpop.f32.mrf.mxu3  ;;  %v3106_v44 = vadd.f32 %v3086_v17, %v2818_v26  ;;  %v3681_v53 = vpop.f32.mrf.mxu1  ;;  %v2560_v6 = vshrl.u32 %v2387_v54, 16  ;;  %v2563_v49 = vshll.u32 %v2387_v54, 16  ;;  %v3488_v3 = vadd.f32 %v3443_v62, %v14203_v63  ;;  %v13041_v54 = vld [vmem:[#allocation2] sm:$0xff]   ;;  %v12853_v17 = vld [vmem:[%s16936_s4 + $0x130] sm:$0xff] }
 0x25a   : > { %v4167_v26 = vshll.u32 %v14201_v46, 16  ;;  %v4175_v63 = vshll.u32 %v14746_v48, 16  ;;  %v14753_v46 = vld [vmem:[#allocation2 + $0x40] sm:$0xff]  ;;  %v2608_v62 = vld [vmem:[#allocation2 + $0x50] sm:$0x3]  ;;  %6351 = vmatpush.bf16.msrb.mxu2 %v12853_v17 }
 0x25b   : > { %v14741_v58 = vadd.f32 %v3254_v42, %v3106_v44  ;;  %v2562_v12 = vrot.slane %v2560_v6, 6  ;;  %v2565_v31 = vrot.slane %v2563_v49, 7  ;;  %v3726_v9 = vadd.f32 %v3681_v53, %v3488_v3  ;;  %3482 = vmatmul.bf16.gmra.mxu0 %v3376_v41 }
 0x25c   : > { %3720 = vmatmul.bf16.gmra.mxu1 %v3614_v27  ;;  %v2558_v42 = vrot.slane %v2556_v34, 4  ;;  %v4169_v43 = vrot.slane %v4167_v26, 3  ;;  %v5361_v53 = vshll.u32 %v13041_v54, 16  ;;  %v4174_v49 = vrot.slane %v4172_v5, 2 }
 0x25d   : > { %3888 = vmatmul.bf16.gmra.mxu2 %v3782_v47  ;;  %v2566_v44 = vor.u32 %v2565_v31, %v2562_v12  ;;  %v4177_v3 = vrot.slane %v4175_v63, 3  ;;  %v16959_v34 = vunpack.c.l.b16 %v14176_v8  ;;  %v5672_v26 = vrot.slane %v14753_v46, 1  ;;  %v12861_v8 = vld [vmem:[%s16936_s4 + $0x170] sm:$0xff] }
 0x25e   : > { %4119 = vmatmul.bf16.gmra.mxu3 %v4013_v14  ;;  %v5359_v5 = vshrl.u32 %v13041_v54, 16  ;;  %v5366_v54 = vshll.u32 %v14368_v11, 16 }
 0x25f   : > { %v2567_v41 = vsel %vm14252_vm13, %v2558_v42, %v2566_v44  ;;  %v2568_v27 = vrot.slane %v2566_v44, 4  ;;  %v5292_v24 = vld [vmem:[#allocation2 + $0x48] sm:$0x1]  ;;  %v4400_v12 = vpack.c.b16 %v16959_v34, %v4399_v50  ;;  %v16960_v50 = vrot.slane %v14708_v2, 1  ;;  %6593 = vmatpush.bf16.msrb.mxu3 %v12861_v8 }
 0x260   : > { %v3849_v47 = vpop.f32.mrf.mxu2  ;;  %2607 = vst [vmem:[#allocation2 + $0x4c] sm:$0xf] %v2567_v41  ;;  %v3445_v35 = vpop.f32.mrf.mxu0  ;;  %v5347_v28 = vunpack.c.l.b16 %v5292_v24  ;;  %v5363_v41 = vrot.slane %v5361_v53, 1  ;;  %v4402_v24 = vrot.slane %v14746_v48, 3  ;;  %v5368_v53 = vrot.slane %v5366_v54, 1 }
 0x261   : > { %v4080_v6 = vpop.f32.mrf.mxu3  ;;  %v3894_v14 = vadd.f32 %v3849_v47, %v3726_v9  ;;  %v3683_v19 = vpop.f32.mrf.mxu1  ;;  %v2609_v31 = vsel %vm14076_vm9, %v2568_v27, %v2608_v62  ;;  %v3489_v17 = vadd.f32 %v3445_v35, %v14245_v45  ;;  %v12829_v9 = vld [vmem:[%s16936_s4 + $0xb0] sm:$0xff]  ;;  %v14776_v44 = vsel %vm793_vm1, %v16960_v50, %v5672_v26 }
 0x262   : > { %2610 = vst [vmem:[#allocation2 + $0x50] sm:$0x3] %v2609_v31  ;;  %v14771_v63 = vpack.c.b16 %v5347_v28, %v5347_v28  ;;  %v4170_v62 = vor.u32 %v4169_v43, %v4166_v33  ;;  %v12845_v27 = vld [vmem:[%s16936_s4 + $0xf0] sm:$0xff]  ;;  %v4178_v47 = vor.u32 %v4177_v3, %v4174_v49  ;;  %5734 = vmatpush.bf16.msrb.mxu0 %v12829_v9  ;;  %v12790_v3 = vld [vmem:[#allocation2] sm:$0xff] }
 0x263   : > { %v14763_v42 = vadd.f32 %v4080_v6, %v3894_v14  ;;  %v3727_v45 = vadd.f32 %v3683_v19, %v3489_v17  ;;  %v4401_v6 = vrot.slane %v4400_v12, 3  ;;  %6039 = vmatpush.bf16.msrb.mxu1 %v12845_v27  ;;  %v5364_v43 = vor.u32 %v5363_v41, %v5359_v5  ;;  %v14794_v5 = vld [vmem:[%s13251_s12 + $0x68] sm:$0xff] }
 0x264   : > { %v5674_v14 = vrot.slane %v14771_v63, 1  ;;  %v4179_v49 = vsel %vm1837_vm4, %v4170_v62, %v4178_v47  ;;  %v4181_v8 = vshrl.u32 %v14794_v5, 16  ;;  %v4184_v50 = vshll.u32 %v14794_v5, 16 }
 0x265   : > { %v4403_v48 = vsel %vm2077_vm5, %v4401_v6, %v4402_v24 }
 0x266   : > { %v14785_v35 = vsel %vm793_vm1, %v5672_v26, %v5674_v14  ;;  %v5369_v26 = vsel %vm566_vm0, %v5364_v43, %v5368_v53  ;;  %v4183_v27 = vrot.slane %v4181_v8, 2  ;;  %v4186_v6 = vrot.slane %v4184_v50, 3 }
 0x268   : > { %v3851_v19 = vpop.f32.mrf.mxu2  ;;  %v3448_v28 = vpop.f32.mrf.mxu0 }
 0x269   : > { %v4082_v33 = vpop.f32.mrf.mxu3  ;;  %v3895_v34 = vadd.f32 %v3851_v19, %v3727_v45  ;;  %v3686_v31 = vpop.f32.mrf.mxu1  ;;  %v3490_v12 = vadd.f32 %v3448_v28, %v14265_v37  ;;  %v12828_v28 = vld [vmem:[%s16936_s4 + $0xa8] sm:$0xff] }
 0x26a   : > { %5735 = vmatpush.bf16.msrb.mxu0 %v12828_v28 }
 0x26b   : > { %v14790_v17 = vadd.f32 %v4082_v33, %v3895_v34  ;;  %v3728_v9 = vadd.f32 %v3686_v31, %v3490_v12  ;;  %4317 = vmatmul.bf16.vlgmr.msra.gmra.mxu0 %v4179_v49  ;;  %v12852_v33 = vld [vmem:[%s16936_s4 + $0x128] sm:$0xff]  ;;  %v5374_v34 = vshll.u32 %v14370_v20, 16  ;;  %v4187_v49 = vor.u32 %v4186_v6, %v4183_v27 }
 0x26c   : > { %4485 = vmatmul.bf16.vlgmr.msra.gmra.mxu1 %v4403_v48  ;;  %v12860_v31 = vld [vmem:[%s16936_s4 + $0x168] sm:$0xff]  ;;  %v4404_v48 = vrot.slane %v14794_v5, 3  ;;  %6352 = vmatpush.bf16.msrb.mxu2 %v12852_v33  ;;  %v5370_v12 = vshrl.u32 %v14368_v11, 16 }
 0x26d   : > { %5136 = vmatmul.bf16.vlgmr.msra.gmra.mxu2 %v12790_v3  ;;  %6594 = vmatpush.bf16.msrb.mxu3 %v12860_v31 }
 0x26e   : > { %5499 = vmatmul.bf16.vlgmr.msra.gmra.mxu3 %v5369_v26  ;;  %v5372_v5 = vor.u32 %v5370_v12, %v5368_v53  ;;  %v5382_v12 = vshll.u32 %v14439_v18, 16 }
 0x270   : > { %v3854_v45 = vpop.f32.mrf.mxu2  ;;  %v3450_v54 = vpop.f32.mrf.mxu0 }
 0x271   : > { %v4085_v62 = vpop.f32.mrf.mxu3  ;;  %v3896_v41 = vadd.f32 %v3854_v45, %v3728_v9  ;;  %v3688_v37 = vpop.f32.mrf.mxu1  ;;  %v3491_v14 = vadd.f32 %v3450_v54, %v14312_v13  ;;  %v12844_v13 = vld [vmem:[%s16936_s4 + $0xe8] sm:$0xff]  ;;  %v5376_v9 = vrot.slane %v5374_v34, 1  ;;  %v4188_v45 = vsel %vm1837_vm4, %v4178_v47, %v4187_v49 }
 0x272   : > { %6040 = vmatpush.bf16.msrb.mxu1 %v12844_v13 }
 0x273   : > { %v14799_v19 = vadd.f32 %v4085_v62, %v3896_v41  ;;  %v3729_v43 = vadd.f32 %v3688_v37, %v3491_v14  ;;  %v4405_v62 = vsel %vm2077_vm5, %v4402_v24, %v4404_v48  ;;  %v12791_v37 = vld [vmem:[#allocation2 + $0x8] sm:$0xff]  ;;  %v5377_v6 = vsel %vm566_vm0, %v5372_v5, %v5376_v9  ;;  %v14823_v14 = vld [vmem:[%s13251_s12 + $0x70] sm:$0xff] }
 0x274   : > { %v4190_v33 = vshrl.u32 %v14823_v14, 16  ;;  %v4193_v47 = vshll.u32 %v14823_v14, 16  ;;  %v13131_v5 = vld [vmem:[#allocation2 + $0x10] sm:$0xff] }
 0x276   : > { %v4192_v28 = vrot.slane %v4190_v33, 2  ;;  %v4195_v31 = vrot.slane %v4193_v47, 3 }
 0x278   : > { %v3856_v20 = vpop.f32.mrf.mxu2  ;;  %v3453_v8 = vpop.f32.mrf.mxu0 }
 0x279   : > { %v4087_v3 = vpop.f32.mrf.mxu3  ;;  %v3897_v26 = vadd.f32 %v3856_v20, %v3729_v43  ;;  %v3691_v50 = vpop.f32.mrf.mxu1  ;;  %v3492_v41 = vadd.f32 %v3453_v8, %v14326_v4  ;;  %v12827_v8 = vld [vmem:[%s16936_s4 + $0xa0] sm:$0xff] }
 0x27a   : > { %5736 = vmatpush.bf16.msrb.mxu0 %v12827_v8 }
 0x27b   : > { %v14819_v54 = vadd.f32 %v4087_v3, %v3897_v26  ;;  %v3730_v27 = vadd.f32 %v3691_v50, %v3492_v41  ;;  %4322 = vmatmul.bf16.gmra.mxu0 %v4188_v45  ;;  %v12851_v26 = vld [vmem:[%s16936_s4 + $0x120] sm:$0xff]  ;;  %v4196_v45 = vor.u32 %v4195_v31, %v4192_v28 }
 0x27c   : > { %4490 = vmatmul.bf16.gmra.mxu1 %v4405_v62  ;;  %v12859_v50 = vld [vmem:[%s16936_s4 + $0x160] sm:$0xff]  ;;  %6353 = vmatpush.bf16.msrb.mxu2 %v12851_v26 }
 0x27d   : > { %5141 = vmatmul.bf16.gmra.mxu2 %v12791_v37  ;;  %v12843_v62 = vld [vmem:[%s16936_s4 + $0xe0] sm:$0xff]  ;;  %6595 = vmatpush.bf16.msrb.mxu3 %v12859_v50  ;;  %v5378_v37 = vshrl.u32 %v13131_v5, 16  ;;  %v5390_v5 = vshll.u32 %v14501_v1, 16 }
 0x27e   : > { %5504 = vmatmul.bf16.gmra.mxu3 %v5377_v6  ;;  %6041 = vmatpush.bf16.msrb.mxu1 %v12843_v62 }
 0x280   : > { %v3859_v24 = vpop.f32.mrf.mxu2  ;;  %v3455_v53 = vpop.f32.mrf.mxu0 }
 0x281   : > { %v4090_v43 = vpop.f32.mrf.mxu3  ;;  %v3898_v4 = vadd.f32 %v3859_v24, %v3730_v27  ;;  %v3693_v34 = vpop.f32.mrf.mxu1  ;;  %v3493_v13 = vadd.f32 %v3455_v53, %v14361_v10  ;;  %v4406_v10 = vrot.slane %v14823_v14, 3  ;;  %v5384_v27 = vrot.slane %v5382_v12, 1 }
 0x282   : > { %v4197_v24 = vsel %vm1837_vm4, %v4187_v49, %v4196_v45 }
 0x283   : > { %v14828_v20 = vadd.f32 %v4090_v43, %v3898_v4  ;;  %v3731_v3 = vadd.f32 %v3693_v34, %v3493_v13  ;;  %v4407_v14 = vsel %vm2077_vm5, %v4404_v48, %v4406_v10  ;;  %v5380_v4 = vor.u32 %v5378_v37, %v5376_v9  ;;  %v12792_v34 = vld [vmem:[#allocation2 + $0x10] sm:$0xff]  ;;  %v14851_v13 = vld [vmem:[%s13251_s12 + $0x78] sm:$0xff] }
 0x284   : > { %v4202_v49 = vshll.u32 %v14851_v13, 16  ;;  %v12850_v37 = vld [vmem:[%s16936_s4 + $0x118] sm:$0xff] }
 0x285   : > { %v5385_v31 = vsel %vm566_vm0, %v5380_v4, %v5384_v27  ;;  %6354 = vmatpush.bf16.msrb.mxu2 %v12850_v37 }
 0x286   : > { %v4204_v50 = vrot.slane %v4202_v49, 3 }
 0x288   : > { %v3861_v18 = vpop.f32.mrf.mxu2  ;;  %v3458_v33 = vpop.f32.mrf.mxu0 }
 0x289   : > { %v4092_v41 = vpop.f32.mrf.mxu3  ;;  %v3899_v6 = vadd.f32 %v3861_v18, %v3731_v3  ;;  %v3696_v47 = vpop.f32.mrf.mxu1  ;;  %v3494_v43 = vadd.f32 %v3458_v33, %v14388_v57  ;;  %v4199_v3 = vshrl.u32 %v14851_v13, 16  ;;  %v12858_v33 = vld [vmem:[%s16936_s4 + $0x158] sm:$0xff] }
 0x28a   : > { %6596 = vmatpush.bf16.msrb.mxu3 %v12858_v33 }
 0x28b   : > { %v14847_v53 = vadd.f32 %v4092_v41, %v3899_v6  ;;  %v3732_v28 = vadd.f32 %v3696_v47, %v3494_v43  ;;  %4327 = vmatmul.bf16.gmra.mxu0 %v4197_v24  ;;  %v4201_v8 = vrot.slane %v4199_v3, 2  ;;  %v12826_v6 = vld [vmem:[%s16936_s4 + $0x98] sm:$0xff] }
 0x28c   : > { %4495 = vmatmul.bf16.gmra.mxu1 %v4407_v14  ;;  %5737 = vmatpush.bf16.msrb.mxu0 %v12826_v6  ;;  %v13133_v43 = vld [vmem:[#allocation2 + $0x18] sm:$0xff] }
 0x28d   : > { %5146 = vmatmul.bf16.gmra.mxu2 %v12792_v34  ;;  %v4205_v47 = vor.u32 %v4204_v50, %v4201_v8  ;;  %v5386_v4 = vshrl.u32 %v13133_v43, 16  ;;  %v5392_v34 = vrot.slane %v5390_v5, 1 }
 0x28e   : > { %5509 = vmatmul.bf16.gmra.mxu3 %v5385_v31 }
 0x28f   : > { %v4206_v49 = vsel %vm1837_vm4, %v4196_v45, %v4205_v47  ;;  %v14879_v45 = vld [vmem:[%s13251_s12 + $0x80] sm:$0xff] }
 0x290   : > { %v3864_v48 = vpop.f32.mrf.mxu2  ;;  %v3460_v9 = vpop.f32.mrf.mxu0 }
 0x291   : > { %v4095_v12 = vpop.f32.mrf.mxu3  ;;  %v3900_v57 = vadd.f32 %v3864_v48, %v3732_v28  ;;  %v3698_v26 = vpop.f32.mrf.mxu1  ;;  %v3495_v62 = vadd.f32 %v3460_v9, %v14432_v52  ;;  %v4408_v52 = vrot.slane %v14851_v13, 3  ;;  %v12793_v9 = vld [vmem:[#allocation2 + $0x18] sm:$0xff] }
 0x293   : > { %v14856_v18 = vadd.f32 %v4095_v12, %v3900_v57  ;;  %v3733_v41 = vadd.f32 %v3698_v26, %v3495_v62  ;;  %v4409_v48 = vsel %vm2077_vm5, %v4406_v10, %v4408_v52  ;;  %v5388_v57 = vor.u32 %v5386_v4, %v5384_v27  ;;  %v12842_v26 = vld [vmem:[%s16936_s4 + $0xd8] sm:$0xff] }
 0x294   : > { %v4208_v10 = vshrl.u32 %v14879_v45, 16  ;;  %6042 = vmatpush.bf16.msrb.mxu1 %v12842_v26  ;;  %v5398_v4 = vshll.u32 %v14569_v30, 16 }
 0x295   : > { %v5393_v50 = vsel %vm566_vm0, %v5388_v57, %v5392_v34 }
 0x296   : > { %v4210_v6 = vrot.slane %v4208_v10, 2  ;;  %v5400_v57 = vrot.slane %v5398_v4, 1 }
 0x298   : > { %v3866_v24 = vpop.f32.mrf.mxu2  ;;  %v3463_v31 = vpop.f32.mrf.mxu0 }
 0x299   : > { %v4097_v14 = vpop.f32.mrf.mxu3  ;;  %v3901_v28 = vadd.f32 %v3866_v24, %v3733_v41  ;;  %v3701_v3 = vpop.f32.mrf.mxu1  ;;  %v3496_v12 = vadd.f32 %v3463_v31, %v14454_v15  ;;  %v4211_v15 = vshll.u32 %v14879_v45, 16 }
 0x29b   : > { %v14872_v13 = vadd.f32 %v4097_v14, %v3901_v28  ;;  %v3734_v8 = vadd.f32 %v3701_v3, %v3496_v12  ;;  %4332 = vmatmul.bf16.gmra.mxu0 %v4206_v49  ;;  %v4213_v33 = vrot.slane %v4211_v15, 3  ;;  %v12849_v28 = vld [vmem:[%s16936_s4 + $0x110] sm:$0xff]  ;;  %v4410_v3 = vrot.slane %v14879_v45, 3 }
 0x29c   : > { %4500 = vmatmul.bf16.gmra.mxu1 %v4409_v48  ;;  %6355 = vmatpush.bf16.msrb.mxu2 %v12849_v28  ;;  %v5394_v12 = vshrl.u32 %v14501_v1, 16  ;;  %v12825_v45 = vld [vmem:[%s16936_s4 + $0x90] sm:$0xff] }
 0x29d   : > { %5151 = vmatmul.bf16.gmra.mxu2 %v12793_v9  ;;  %v4214_v31 = vor.u32 %v4213_v33, %v4210_v6  ;;  %v12857_v1 = vld [vmem:[%s16936_s4 + $0x150] sm:$0xff]  ;;  %5738 = vmatpush.bf16.msrb.mxu0 %v12825_v45 }
 0x29e   : > { %5514 = vmatmul.bf16.gmra.mxu3 %v5393_v50  ;;  %v4411_v50 = vsel %vm2077_vm5, %v4408_v52, %v4410_v3  ;;  %v5396_v15 = vor.u32 %v5394_v12, %v5392_v34  ;;  %v4217_v52 = vshrl.u32 %v14514_v0, 16  ;;  %v4220_v34 = vshll.u32 %v14514_v0, 16 }
 0x29f   : > { %6597 = vmatpush.bf16.msrb.mxu3 %v12857_v1  ;;  %v5406_v12 = vshll.u32 %v14655_v7, 16 }
 0x2a0   : > { %v3869_v27 = vpop.f32.mrf.mxu2  ;;  %v3465_v5 = vpop.f32.mrf.mxu0  ;;  %v4222_v4 = vrot.slane %v4220_v34, 3 }
 0x2a1   : > { %v4100_v62 = vpop.f32.mrf.mxu3  ;;  %v3902_v41 = vadd.f32 %v3869_v27, %v3734_v8  ;;  %v3703_v37 = vpop.f32.mrf.mxu1  ;;  %v3497_v24 = vadd.f32 %v3465_v5, %v14494_v39  ;;  %v4215_v8 = vsel %vm1837_vm4, %v4205_v47, %v4214_v31  ;;  %v5401_v47 = vsel %vm566_vm0, %v5396_v15, %v5400_v57 }
 0x2a3   : > { %v14884_v14 = vadd.f32 %v4100_v62, %v3902_v41  ;;  %v3735_v43 = vadd.f32 %v3703_v37, %v3497_v24  ;;  %v12794_v62 = vld [vmem:[#allocation2 + $0x20] sm:$0xff] }
 0x2a8   : > { %v3871_v49 = vpop.f32.mrf.mxu2  ;;  %v3468_v39 = vpop.f32.mrf.mxu0 }
 0x2a9   : > { %v4102_v48 = vpop.f32.mrf.mxu3  ;;  %v3903_v9 = vadd.f32 %v3871_v49, %v3735_v43  ;;  %v3706_v26 = vpop.f32.mrf.mxu1  ;;  %v3498_v10 = vadd.f32 %v3468_v39, %v14516_v55  ;;  %v12841_v55 = vld [vmem:[%s16936_s4 + $0xd0] sm:$0xff]  ;;  %v4219_v43 = vrot.slane %v4217_v52, 2  ;;  %v4412_v39 = vrot.slane %v14514_v0, 3  ;;  %v12795_v52 = vld [vmem:[#allocation2 + $0x28] sm:$0xff] }
 0x2aa   : > { %6043 = vmatpush.bf16.msrb.mxu1 %v12841_v55  ;;  %v12848_v0 = vld [vmem:[%s16936_s4 + $0x108] sm:$0xff] }
 0x2ab   : > { %v14895_v27 = vadd.f32 %v4102_v48, %v3903_v9  ;;  %v3736_v41 = vadd.f32 %v3706_v26, %v3498_v10  ;;  %4337 = vmatmul.bf16.gmra.mxu0 %v4215_v8  ;;  %v4223_v9 = vor.u32 %v4222_v4, %v4219_v43  ;;  %v5408_v10 = vrot.slane %v5406_v12, 1  ;;  %6356 = vmatpush.bf16.msrb.mxu2 %v12848_v0 }
 0x2ac   : > { %4505 = vmatmul.bf16.gmra.mxu1 %v4411_v50  ;;  %v5402_v50 = vshrl.u32 %v14569_v30, 16 }
 0x2ad   : > { %5156 = vmatmul.bf16.gmra.mxu2 %v12794_v62  ;;  %v4224_v1 = vsel %vm1837_vm4, %v4214_v31, %v4223_v9  ;;  %v12824_v31 = vld [vmem:[%s16936_s4 + $0x88] sm:$0xff] }
 0x2ae   : > { %5519 = vmatmul.bf16.gmra.mxu3 %v5401_v47  ;;  %v5404_v47 = vor.u32 %v5402_v50, %v5400_v57  ;;  %v4229_v57 = vshll.u32 %v14573_v60, 16  ;;  %5739 = vmatpush.bf16.msrb.mxu0 %v12824_v31 }
 0x2b0   : > { %v3874_v5 = vpop.f32.mrf.mxu2  ;;  %v3470_v33 = vpop.f32.mrf.mxu0  ;;  %v5409_v30 = vsel %vm566_vm0, %v5404_v47, %v5408_v10 }
 0x2b1   : > { %v4105_v37 = vpop.f32.mrf.mxu3  ;;  %v3904_v6 = vadd.f32 %v3874_v5, %v3736_v41  ;;  %v3708_v24 = vpop.f32.mrf.mxu1  ;;  %v3499_v28 = vadd.f32 %v3470_v33, %v14559_v38  ;;  %v4413_v38 = vsel %vm2077_vm5, %v4410_v3, %v4412_v39  ;;  %v4226_v3 = vshrl.u32 %v14573_v60, 16  ;;  %v12840_v5 = vld [vmem:[%s16936_s4 + $0xc8] sm:$0xff] }
 0x2b2   : > { %6044 = vmatpush.bf16.msrb.mxu1 %v12840_v5 }
 0x2b3   : > { %v14910_v49 = vadd.f32 %v4105_v37, %v3904_v6  ;;  %v3737_v48 = vadd.f32 %v3708_v24, %v3499_v28  ;;  %v4228_v4 = vrot.slane %v4226_v3, 2  ;;  %v4231_v28 = vrot.slane %v4229_v57, 3 }
 0x2b5   : > { %v4232_v50 = vor.u32 %v4231_v28, %v4228_v4  ;;  %v5422_v28 = vshll.u32 %v14753_v46, 16 }
 0x2b7   : > { %v4233_v0 = vsel %vm1837_vm4, %v4223_v9, %v4232_v50  ;;  %v4238_v9 = vshll.u32 %v14632_v51, 16 }
 0x2b8   : > { %v3876_v26 = vpop.f32.mrf.mxu2  ;;  %v3473_v62 = vpop.f32.mrf.mxu0 }
 0x2b9   : > { %v4107_v8 = vpop.f32.mrf.mxu3  ;;  %v3905_v15 = vadd.f32 %v3876_v26, %v3737_v48  ;;  %v3711_v45 = vpop.f32.mrf.mxu1  ;;  %v3500_v41 = vadd.f32 %v3473_v62, %v14575_v32  ;;  %v12856_v32 = vld [vmem:[%s16936_s4 + $0x148] sm:$0xff] }
 0x2ba   : > { %6598 = vmatpush.bf16.msrb.mxu3 %v12856_v32  ;;  %v12796_v32 = vld [vmem:[#allocation2 + $0x30] sm:$0xff] }
 0x2bb   : > { %v14918_v55 = vadd.f32 %v4107_v8, %v3905_v15  ;;  %v3738_v34 = vadd.f32 %v3711_v45, %v3500_v41  ;;  %4342 = vmatmul.bf16.gmra.mxu0 %v4224_v1  ;;  %v5414_v8 = vshll.u32 %v14708_v2, 16  ;;  %v4414_v15 = vrot.slane %v14573_v60, 3 }
 0x2bc   : > { %4510 = vmatmul.bf16.gmra.mxu1 %v4413_v38  ;;  %v5410_v1 = vshrl.u32 %v14655_v7, 16  ;;  %v4235_v7 = vshrl.u32 %v14632_v51, 16 }
 0x2bd   : > { %5161 = vmatmul.bf16.gmra.mxu2 %v12795_v52  ;;  %v5416_v38 = vrot.slane %v5414_v8, 1 }
 0x2be   : > { %5524 = vmatmul.bf16.gmra.mxu3 %v5409_v30  ;;  %v5412_v30 = vor.u32 %v5410_v1, %v5408_v10  ;;  %v5418_v1 = vshrl.u32 %v14708_v2, 16  ;;  %v12823_v2 = vld [vmem:[%s16936_s4 + $0x80] sm:$0xff] }
 0x2bf   : > { %5740 = vmatpush.bf16.msrb.mxu0 %v12823_v2  ;;  %v13095_v2 = vld [vmem:[#allocation2] sm:$0xf0] }
 0x2c0   : > { %v3879_v37 = vpop.f32.mrf.mxu2  ;;  %v3475_v24 = vpop.f32.mrf.mxu0  ;;  %v5417_v60 = vsel %vm566_vm0, %v5412_v30, %v5416_v38 }
 0x2c1   : > { %v4110_v6 = vpop.f32.mrf.mxu3  ;;  %v3906_v33 = vadd.f32 %v3879_v37, %v3738_v34  ;;  %v3713_v43 = vpop.f32.mrf.mxu1  ;;  %v3501_v48 = vadd.f32 %v3475_v24, %v14624_v25  ;;  %v4415_v25 = vsel %vm2077_vm5, %v4412_v39, %v4414_v15  ;;  %v4237_v37 = vrot.slane %v4235_v7, 2  ;;  %v4143_v24 = vld [vmem:[%s13251_s12 + $0xa0] sm:$0x7] }
 0x2c2   : > { %v4161_v8 = vunpack.c.l.b16 %v4143_v24 }
 0x2c3   : > { %v14936_v12 = vadd.f32 %v4110_v6, %v3906_v33  ;;  %v3739_v26 = vadd.f32 %v3713_v43, %v3501_v48  ;;  %v4240_v6 = vrot.slane %v4238_v9, 3 }
 0x2c5   : > { %v4241_v48 = vor.u32 %v4240_v6, %v4237_v37 }
 0x2c8   : > { %v3881_v62 = vpop.f32.mrf.mxu2  ;;  %v3478_v47 = vpop.f32.mrf.mxu0 }
 0x2c9   : > { %v4112_v45 = vpop.f32.mrf.mxu3  ;;  %v3907_v41 = vadd.f32 %v3881_v62, %v3739_v26  ;;  %v3716_v52 = vpop.f32.mrf.mxu1  ;;  %v3502_v34 = vadd.f32 %v3478_v47, %v14636_v59  ;;  %v4416_v26 = vrot.slane %v14632_v51, 3  ;;  %v12847_v51 = vld [vmem:[%s16936_s4 + $0x100] sm:$0xff] }
 0x2ca   : > { %6357 = vmatpush.bf16.msrb.mxu2 %v12847_v51 }
 0x2cb   : > { %v14944_v31 = vadd.f32 %v4112_v45, %v3907_v41  ;;  %v3740_v3 = vadd.f32 %v3716_v52, %v3502_v34  ;;  %4347 = vmatmul.bf16.gmra.mxu0 %v4233_v0  ;;  %v5424_v41 = vrot.slane %v5422_v28, 1  ;;  %v4162_v34 = vpack.c.b16 %v4161_v8, %v4161_v8 }
 0x2cc   : > { %4515 = vmatmul.bf16.gmra.mxu1 %v4415_v25  ;;  %v4417_v25 = vsel %vm2077_vm5, %v4414_v15, %v4416_v26  ;;  %v5430_v28 = vshll.u32 %v14771_v63, 16 }
 0x2cd   : > { %5166 = vmatmul.bf16.gmra.mxu2 %v12796_v32  ;;  %v12797_v32 = vld [vmem:[#allocation2 + $0x38] sm:$0xff]  ;;  %v4244_v7 = vshrl.u32 %v4162_v34, 16  ;;  %v4247_v9 = vshll.u32 %v4162_v34, 16 }
 0x2ce   : > { %5529 = vmatmul.bf16.gmra.mxu3 %v5417_v60 }
 0x2cf   : > { %v4246_v37 = vrot.slane %v4244_v7, 2  ;;  %v4249_v6 = vrot.slane %v4247_v9, 3 }
 0x2d0   : > { %v3884_v57 = vpop.f32.mrf.mxu2  ;;  %v3480_v59 = vpop.f32.mrf.mxu0 }
 0x2d1   : > { %v4115_v39 = vpop.f32.mrf.mxu3  ;;  %v3908_v5 = vadd.f32 %v3884_v57, %v3740_v3  ;;  %v3718_v10 = vpop.f32.mrf.mxu1  ;;  %v3503_v33 = vadd.f32 %v3480_v59, %v14689_v22  ;;  %v4242_v22 = vsel %vm1837_vm4, %v4232_v50, %v4241_v48  ;;  %v5420_v3 = vor.u32 %v5418_v1, %v5416_v38  ;;  %v12855_v50 = vld [vmem:[%s16936_s4 + $0x140] sm:$0xff] }
 0x2d2   : > { %v12839_v38 = vld [vmem:[%s16936_s4 + $0xc0] sm:$0xff]  ;;  %6599 = vmatpush.bf16.msrb.mxu3 %v12855_v50  ;;  %v4250_v8 = vor.u32 %v4249_v6, %v4246_v37 }
 0x2d3   : > { %v14951_v43 = vadd.f32 %v4115_v39, %v3908_v5  ;;  %v3741_v4 = vadd.f32 %v3718_v10, %v3503_v33  ;;  %6045 = vmatpush.bf16.msrb.mxu1 %v12839_v38  ;;  %v13096_v50 = vld [vmem:[#allocation2] sm:$0xe]  ;;  %v14988_v38 = vld [vmem:[#allocation2 + $0x10] sm:$0xff] }
 0x2d4   : > { %v13097_v6 = vor.u32 %v13096_v50, %v13095_v2 }
 0x2d8   : > { %v3886_v62 = vpop.f32.mrf.mxu2  ;;  %v3483_v52 = vpop.f32.mrf.mxu0 }
 0x2d9   : > { %v4117_v45 = vpop.f32.mrf.mxu3  ;;  %v3909_v47 = vadd.f32 %v3886_v62, %v3741_v4  ;;  %v3721_v0 = vpop.f32.mrf.mxu1  ;;  %v3504_v30 = vadd.f32 %v3483_v52, %v14713_v56  ;;  %v5425_v56 = vsel %vm566_vm0, %v5420_v3, %v5424_v41  ;;  %v4418_v62 = vrot.slane %v4162_v34, 3 }
 0x2da   : > { %v5426_v52 = vshrl.u32 %v14753_v46, 16  ;;  %v14986_v46 = vld [vmem:[%s16937_s5] ss:$0 sm:$0xff] }
 0x2db   : > { %v14959_v60 = vadd.f32 %v4117_v45, %v3909_v47  ;;  %v3742_v15 = vadd.f32 %v3721_v0, %v3504_v30  ;;  %4352 = vmatmul.bf16.gmra.mxu0 %v4242_v22  ;;  %v5879_v45 = vld [vmem:[#allocation2 + $0xc] sm:$0xf]  ;;  %v5432_v0 = vrot.slane %v5430_v28, 1  ;;  %v4932_v22 = vld [vmem:[%s13251_s12 + $0x8] sm:$0xe]  ;;  %v4419_v51 = vsel %vm2077_vm5, %v4416_v26, %v4418_v62  ;;  %v12894_v26 = vld [vmem:[%s16936_s4 + $0x238] sm:$0xff] }
 0x2dc   : > { %4520 = vmatmul.bf16.gmra.mxu1 %v4417_v25  ;;  %v5878_v25 = vld [vmem:[#allocation2 + $0x8] sm:$0xe]  ;;  %v5934_v63 = vunpack.c.l.b16 %v5879_v45  ;;  %v4951_v9 = vunpack.c.l.bf16 %v4932_v22  ;;  %7451 = vmatpush.bf16.msra.mxu2 %v12894_v26  ;;  %v6213_v28 = vshrl.u32 %v14988_v38, 16 }
 0x2dd   : > { %5171 = vmatmul.bf16.gmra.mxu2 %v12797_v32 }
 0x2de   : > { %5534 = vmatmul.bf16.gmra.mxu3 %v5425_v56  ;;  %v5428_v56 = vor.u32 %v5426_v52, %v5424_v41  ;;  %v12911_v41 = vld [vmem:[%s16936_s4 + $0x38] sm:$0xff] }
 0x2df   : > { %7827 = vmatpush.bf16.msra.mxu3 %v12911_v41 }
 0x2e0   : > { %v3889_v57 = vpop.f32.mrf.mxu2  ;;  %v3485_v59 = vpop.f32.mrf.mxu0  ;;  %7452 = vmatpush.bf16.msra.mxu2 %v12893_v29 }
 0x2e1   : > { %v4120_v39 = vpop.f32.mrf.mxu3  ;;  %v3910_v5 = vadd.f32 %v3889_v57, %v3742_v15  ;;  %v3723_v10 = vpop.f32.mrf.mxu1  ;;  %v3505_v33 = vadd.f32 %v3485_v59, %v14741_v58  ;;  %v4251_v58 = vsel %vm1837_vm4, %v4241_v48, %v4250_v8  ;;  %v12798_v15 = vld [vmem:[#allocation2 + $0x40] sm:$0xff]  ;;  %v5933_v48 = vunpack.c.l.b16 %v5878_v25  ;;  %v4933_v25 = vld [vmem:[%s13251_s12 + $0xc] sm:$0xf] }
 0x2e2   : > { %v6216_v8 = vshll.u32 %v14988_v38, 16 }
 0x2e3   : > { %v14975_v24 = vadd.f32 %v4120_v39, %v3910_v5  ;;  %v3743_v4 = vadd.f32 %v3723_v10, %v3505_v33  ;;  %v5433_v39 = vsel %vm566_vm0, %v5428_v56, %v5432_v0  ;;  %v12886_v5 = vld [vmem:[%s16936_s4 + $0x1f8] sm:$0xff]  ;;  %v5952_v59 = vpack.c.b16 %v5934_v63, %v5933_v48  ;;  %v6495_v10 = vld [vmem:[#allocation2 + $0x8] sm:$0xc]  ;;  %v4588_v33 = vpop.permute.xlu0 %4587 }
 0x2e4   : > { %7209 = vmatpush.bf16.msra.mxu1 %v12886_v5  ;;  %v6218_v56 = vrot.slane %v6216_v8, 2 }
 0x2e8   : > { %v3891_v1 = vpop.f32.mrf.mxu2  ;;  %v4318_v32 = vpop.f32.mrf.mxu0 }
 0x2e9   : > { %v4122_v47 = vpop.f32.mrf.mxu3  ;;  %v3911_v30 = vadd.f32 %v3891_v1, %v3743_v4  ;;  %v4486_v3 = vpop.f32.mrf.mxu1  ;;  %v4363_v34 = vadd.f32 %v4318_v32, %v14763_v42  ;;  %v12878_v42 = vld [vmem:[%s16936_s4 + $0x1b8] sm:$0xff]  ;;  %v4973_v4 = vadd.f32 %v14986_v46, %v4951_v9  ;;  %v6208_v32 = vshll.u32 %v5952_v59, 16 }
 0x2ea   : > { %6897 = vmatpush.bf16.msra.mxu0 %v12878_v42  ;;  %v4952_v42 = vunpack.c.l.bf16 %v4933_v25  ;;  %v15021_v25 = vld [vmem:[%s13251_s12 + $0x10] sm:$0xff]  }
 0x2eb   : > { %v14990_v7 = vadd.f32 %v4122_v47, %v3911_v30  ;;  %v4531_v57 = vadd.f32 %v4486_v3, %v4363_v34  ;;  %4357 = vmatmul.bf16.gmra.mxu0 %v4251_v58  ;;  %v6514_v47 = vunpack.c.l.b16 %v6495_v10  ;;  %v6205_v30 = vshrl.u32 %v5952_v59, 16 }
 0x2ec   : > { %4525 = vmatmul.bf16.gmra.mxu1 %v4419_v51  ;;  %v5657_v51 = vrot.slane %v13097_v6, 1  ;;  %v6210_v5 = vrot.slane %v6208_v32, 2  ;;  %v4593_v6 = vpop.permute.xlu1 %4592 }
 0x2ed   : > { %5176 = vmatmul.bf16.gmra.mxu2 %v12798_v15  ;;  %v4549_v37 = vmax.f32 %v4531_v57, 0.0  ;;  %v6515_v2 = vpack.c.b16 %v5934_v63, %v6514_v47  ;;  %v6215_v15 = vrot.slane %v6213_v28, 1  ;;  %v5963_v57 = vrot.slane %v14988_v38, 1 }
 0x2ee   : > { %5539 = vmatmul.bf16.gmra.mxu3 %v5433_v39  ;;  %v6207_v39 = vrot.slane %v6205_v30, 1  ;;  %v6517_v63 = vrot.slane %v14988_v38, 2  ;;  %v5962_v28 = vrot.slane %v5952_v59, 1  ;;  %v4974_v47 = vadd.f32 %v14986_v46, %v4952_v42  ;;  %v4909_v30 = vld [vmem:[#allocation2 + $0x50] sm:$0xe] }
 0x2ef   : > { %v4675_v62 = vmul.f32 %v4588_v33, %v4549_v37  ;;  %v16961_v33 = vrot.slane %v14368_v11, 1  ;;  %v15017_v8 = vor.u32 %v6218_v56, %v6215_v15 }
 0x2f0   : > { %v5137_v45 = vpop.f32.mrf.mxu2  ;;  %v4320_v0 = vpop.f32.mrf.mxu0  ;;  %v5964_v59 = vsel %vm793_vm1, %v5962_v28, %v5963_v57 }
 0x2f1   : > { %v5500_v1 = vpop.f32.mrf.mxu3  ;;  %v5201_v52 = vrot.slane %v5137_v45, 5  ;;  %v4488_v22 = vpop.f32.mrf.mxu1  ;;  %v4693_v3 = vpack.c.bf16 %v4675_v62, %v4675_v62  ;;  %v4364_v58 = vadd.f32 %v4320_v0, %v14790_v17  ;;  %v6516_v62 = vrot.slane %v6515_v2, 2  ;;  %v15026_v2 = vld [vmem:[#allocation2 + $0x18] sm:$0xff] }
 0x2f2   : > { %v5563_v34 = vrot.slane %v5500_v1, 5 }
 0x2f3   : > { %v5255_v50 = vadd.f32 %v5201_v52, %v4973_v4  ;;  %v4712_v9 = vshrl.u32 %v4693_v3, 16  ;;  %v4715_v48 = vshll.u32 %v4693_v3, 16  ;;  %v4532_v26 = vadd.f32 %v4488_v22, %v4364_v58 }
 0x2f4   : > { %v5659_v4 = vsel %vm793_vm1, %v5657_v51, %v16961_v33  ;;  %v6211_v51 = vor.u32 %v6210_v5, %v6207_v39  ;;  %v13010_v39 = vunpack.c.l.bf16 %v15021_v25  ;;  %v12910_v5 = vld [vmem:[%s16936_s4 + $0x30] sm:$0xff] }
 0x2f5   : > { %v15010_v41 = vadd.f32 %v5563_v34, %v5255_v50  ;;  %v4714_v10 = vrot.slane %v4712_v9, 6  ;;  %v4717_v37 = vrot.slane %v4715_v48, 7  ;;  %v4550_v17 = vmax.f32 %v4532_v26, 0.0  ;;  %7828 = vmatpush.bf16.msra.mxu3 %v12910_v5 }
 0x2f6   : > { %v6518_v9 = vsel %vm1435_vm3, %v6516_v62, %v6517_v63  ;;  %v6220_v42 = vsel %vm1195_vm2, %v6211_v51, %v15017_v8 }
 0x2f7   : > { %v4718_v45 = vor.u32 %v4717_v37, %v4714_v10  ;;  %v4676_v1 = vmul.f32 %v4593_v6, %v4550_v17  ;;  %v6222_v17 = vshrl.u32 %v15026_v2, 16 }
 0x2f8   : > { %v5139_v0 = vpop.f32.mrf.mxu2  ;;  %v4323_v58 = vpop.f32.mrf.mxu0 }
 0x2f9   : > { %v5502_v22 = vpop.f32.mrf.mxu3  ;;  %v5202_v32 = vrot.slane %v5139_v0, 5  ;;  %v4491_v11 = vpop.f32.mrf.mxu1  ;;  %v4910_v50 = vsel %vm14082_vm11, %v4718_v45, %v4909_v30  ;;  %v4694_v15 = vpack.c.bf16 %v4676_v1, %v4676_v1  ;;  %v4365_v56 = vadd.f32 %v4323_v58, %v14799_v19  ;;  %v12877_v19 = vld [vmem:[%s16936_s4 + $0x1b0] sm:$0xff] }
 0x2fa   : > { %v5564_v3 = vrot.slane %v5502_v22, 5  ;;  %4911 = vst [vmem:[#allocation2 + $0x50] sm:$0xe] %v4910_v50  ;;  %6898 = vmatpush.bf16.msra.mxu0 %v12877_v19  ;;  %v4598_v1 = vpop.permute.xlu2 %4597  ;;  %v6225_v0 = vshll.u32 %v15026_v2, 16  ;;  %v4719_v22 = vrot.slane %v4718_v45, 4  ;;  %v12885_v19 = vld [vmem:[%s16936_s4 + $0x1f0] sm:$0xff] }
 0x2fb   : > { %v5203_v48 = vsel %vm5200_vm14, %v5201_v52, %v5202_v32  ;;  %v4721_v52 = vshrl.u32 %v4694_v15, 16  ;;  %v4724_v10 = vshll.u32 %v4694_v15, 16  ;;  %v4533_v37 = vadd.f32 %v4491_v11, %v4365_v56  ;;  %5741 = vmatmul.bf16.vlgmr.msrb.gmra.mxu0 %v5659_v4  ;;  %7210 = vmatpush.bf16.msra.mxu1 %v12885_v19 }
 0x2fc   : > { %v5565_v26 = vsel %vm5200_vm14, %v5563_v34, %v5564_v3  ;;  %v5256_v34 = vadd.f32 %v5203_v48, %v4974_v47  ;;  %6046 = vmatmul.bf16.vlgmr.msrb.gmra.mxu1 %v5964_v59  ;;  %v4975_v4 = vadd.f32 %v14986_v46, %v13010_v39  ;;  %v13011_v39 = vunpack.c.h.bf16 %v15021_v25 }
 0x2fd   : > { %6358 = vmatmul.bf16.vlgmr.msrb.gmra.mxu2 %v6220_v42  ;;  %v4723_v6 = vrot.slane %v4721_v52, 6  ;;  %v4726_v33 = vrot.slane %v4724_v10, 7  ;;  %v4551_v62 = vmax.f32 %v4533_v37, 0.0  ;;  %v6227_v29 = vrot.slane %v6225_v0, 2 }
 0x2fe   : > { %6600 = vmatmul.bf16.vlgmr.msrb.gmra.mxu3 %v6518_v9  ;;  %v15049_v28 = vadd.f32 %v5565_v26, %v5256_v34  ;;  %v6224_v26 = vrot.slane %v6222_v17, 1  ;;  %v6519_v37 = vrot.slane %v15026_v2, 2 }
 0x2ff   : > { %v4727_v47 = vor.u32 %v4726_v33, %v4723_v6  ;;  %v4677_v30 = vmul.f32 %v4598_v1, %v4551_v62  ;;  %v4603_v6 = vpop.permute.xlu0 %4602 }
 0x300   : > { %v5142_v58 = vpop.f32.mrf.mxu2  ;;  %v4325_v50 = vpop.f32.mrf.mxu0  ;;  %v15066_v33 = vor.u32 %v6227_v29, %v6224_v26 }
 0x301   : > { %v5505_v11 = vpop.f32.mrf.mxu3  ;;  %v5204_v59 = vrot.slane %v5142_v58, 5  ;;  %v4493_v15 = vpop.f32.mrf.mxu1  ;;  %v4728_v56 = vsel %vm14252_vm13, %v4719_v22, %v4727_v47  ;;  %v4695_v9 = vpack.c.bf16 %v4677_v30, %v4677_v30  ;;  %v4366_v48 = vadd.f32 %v4325_v50, %v14819_v54  ;;  %v15070_v58 = vld [vmem:[%s13251_s12 + $0x18] sm:$0xff]  }
 0x302   : > { %v5566_v51 = vrot.slane %v5505_v11, 5  ;;  %4912 = vst [vmem:[#allocation2 + $0x54] sm:$0xf] %v4728_v56  ;;  %v5965_v54 = vrot.slane %v15026_v2, 1  ;;  %v4729_v62 = vrot.slane %v4727_v47, 4  ;;  %v4976_v22 = vadd.f32 %v14986_v46, %v13011_v39 }
 0x303   : > { %v5205_v45 = vsel %vm5200_vm14, %v5202_v32, %v5204_v59  ;;  %v4731_v5 = vshrl.u32 %v4695_v9, 16  ;;  %v4734_v52 = vshll.u32 %v4695_v9, 16  ;;  %v4534_v34 = vadd.f32 %v4493_v15, %v4366_v48  ;;  %v15077_v48 = vld [vmem:[#allocation2 + $0x20] sm:$0xff] }
 0x304   : > { %v5567_v42 = vsel %vm5200_vm14, %v5564_v3, %v5566_v51  ;;  %v5257_v10 = vadd.f32 %v5205_v45, %v4975_v4  ;;  %v5966_v9 = vsel %vm793_vm1, %v5963_v57, %v5965_v54  ;;  %v6229_v57 = vsel %vm1195_vm2, %v15017_v8, %v15066_v33 }
 0x305   : > { %v4733_v32 = vrot.slane %v4731_v5, 6  ;;  %v4736_v17 = vrot.slane %v4734_v52, 7  ;;  %v4552_v25 = vmax.f32 %v4534_v34, 0.0  ;;  %v13014_v19 = vunpack.c.l.bf16 %v15070_v58 }
 0x306   : > { %v15064_v3 = vadd.f32 %v5567_v42, %v5257_v10  ;;  %v6520_v42 = vsel %vm1435_vm3, %v6517_v63, %v6519_v37  ;;  %v6231_v63 = vshrl.u32 %v15077_v48, 16 }
 0x307   : > { %v4737_v1 = vor.u32 %v4736_v17, %v4733_v32  ;;  %v4678_v0 = vmul.f32 %v4603_v6, %v4552_v25  ;;  %v4608_v32 = vpop.permute.xlu1 %4607  ;;  %v6234_v17 = vshll.u32 %v15077_v48, 16 }
 0x308   : > { %v5144_v30 = vpop.f32.mrf.mxu2  ;;  %v4328_v15 = vpop.f32.mrf.mxu0 }
 0x309   : > { %v5507_v4 = vpop.f32.mrf.mxu3  ;;  %v5206_v11 = vrot.slane %v5144_v30, 5  ;;  %v4496_v56 = vpop.f32.mrf.mxu1  ;;  %v4738_v47 = vsel %vm14252_vm13, %v4729_v62, %v4737_v1  ;;  %v4696_v26 = vpack.c.bf16 %v4678_v0, %v4678_v0  ;;  %v4367_v45 = vadd.f32 %v4328_v15, %v14828_v20  ;;  %v12892_v20 = vld [vmem:[%s16936_s4 + $0x228] sm:$0xff] }
 0x30a   : > { %v5568_v50 = vrot.slane %v5507_v4, 5  ;;  %4913 = vst [vmem:[#allocation2 + $0x58] sm:$0xf] %v4738_v47  ;;  %7453 = vmatpush.bf16.msra.mxu2 %v12892_v20  ;;  %v4739_v25 = vrot.slane %v4737_v1, 4  ;;  %v4977_v0 = vadd.f32 %v14986_v46, %v13014_v19  ;;  %v12909_v19 = vld [vmem:[%s16936_s4 + $0x28] sm:$0xff] }
 0x30b   : > { %v5207_v39 = vsel %vm5200_vm14, %v5204_v59, %v5206_v11  ;;  %v4741_v5 = vshrl.u32 %v4696_v26, 16  ;;  %v4744_v52 = vshll.u32 %v4696_v26, 16  ;;  %v4535_v10 = vadd.f32 %v4496_v56, %v4367_v45  ;;  %5746 = vmatmul.bf16.gmra.mxu0 %v14403_v16  ;;  %7829 = vmatpush.bf16.msra.mxu3 %v12909_v19 }
 0x30c   : > { %v5569_v29 = vsel %vm5200_vm14, %v5566_v51, %v5568_v50  ;;  %v5258_v38 = vadd.f32 %v5207_v39, %v4976_v22  ;;  %6051 = vmatmul.bf16.gmra.mxu1 %v5966_v9  ;;  %v6233_v45 = vrot.slane %v6231_v63, 1  ;;  %v13015_v39 = vunpack.c.h.bf16 %v15070_v58 }
 0x30d   : > { %6363 = vmatmul.bf16.gmra.mxu2 %v6229_v57  ;;  %v4743_v59 = vrot.slane %v4741_v5, 6  ;;  %v4746_v51 = vrot.slane %v4744_v52, 7  ;;  %v4553_v34 = vmax.f32 %v4535_v10, 0.0  ;;  %v12876_v57 = vld [vmem:[%s16936_s4 + $0x1a8] sm:$0xff]  ;;  %v6521_v58 = vrot.slane %v15077_v48, 2 }
 0x30e   : > { %6605 = vmatmul.bf16.gmra.mxu3 %v6520_v42  ;;  %v15098_v8 = vadd.f32 %v5569_v29, %v5258_v38  ;;  %v6236_v29 = vrot.slane %v6234_v17, 2  ;;  %6899 = vmatpush.bf16.msra.mxu0 %v12876_v57 }
 0x30f   : > { %v4747_v6 = vor.u32 %v4746_v51, %v4743_v59  ;;  %v4679_v62 = vmul.f32 %v4608_v32, %v4553_v34  ;;  %v4613_v51 = vpop.permute.xlu2 %4612 }
 0x310   : > { %v5147_v16 = vpop.f32.mrf.mxu2  ;;  %v4330_v15 = vpop.f32.mrf.mxu0  ;;  %v15121_v34 = vor.u32 %v6236_v29, %v6233_v45  ;;  %v15132_v45 = vld [vmem:[#allocation2 + $0x28] sm:$0xff] }
 0x311   : > { %v5510_v22 = vpop.f32.mrf.mxu3  ;;  %v5208_v30 = vrot.slane %v5147_v16, 5  ;;  %v4498_v56 = vpop.f32.mrf.mxu1  ;;  %v4748_v9 = vsel %vm14252_vm13, %v4739_v25, %v4747_v6  ;;  %v4697_v47 = vpack.c.bf16 %v4679_v62, %v4679_v62  ;;  %v4368_v26 = vadd.f32 %v4330_v15, %v14847_v53  ;;  %v12884_v53 = vld [vmem:[%s16936_s4 + $0x1e8] sm:$0xff] }
 0x312   : > { %v5570_v4 = vrot.slane %v5510_v22, 5  ;;  %4914 = vst [vmem:[#allocation2 + $0x5c] sm:$0xf] %v4748_v9  ;;  %7211 = vmatpush.bf16.msra.mxu1 %v12884_v53  ;;  %v4749_v32 = vrot.slane %v4747_v6, 4  ;;  %v4978_v62 = vadd.f32 %v14986_v46, %v13015_v39  ;;  %v15125_v22 = vld [vmem:[%s13251_s12 + $0x20] sm:$0xff]   ;;  %v6522_v39 = vsel %vm1435_vm3, %v6519_v37, %v6521_v58 }
 0x313   : > { %v5209_v1 = vsel %vm5200_vm14, %v5206_v11, %v5208_v30  ;;  %v4751_v20 = vshrl.u32 %v4697_v47, 16  ;;  %v4754_v5 = vshll.u32 %v4697_v47, 16  ;;  %v4536_v52 = vadd.f32 %v4498_v56, %v4368_v26 }
 0x314   : > { %v5571_v42 = vsel %vm5200_vm14, %v5568_v50, %v5570_v4  ;;  %v5259_v11 = vadd.f32 %v5209_v1, %v4977_v0  ;;  %v5967_v50 = vrot.slane %v15077_v48, 1  ;;  %v13018_v19 = vunpack.c.l.bf16 %v15125_v22 }
 0x315   : > { %v4753_v38 = vrot.slane %v4751_v20, 6  ;;  %v4756_v10 = vrot.slane %v4754_v5, 7  ;;  %v4554_v59 = vmax.f32 %v4536_v52, 0.0  ;;  %v6240_v2 = vshrl.u32 %v15132_v45, 16  ;;  %v4618_v52 = vpop.permute.xlu0 %4617 }
 0x316   : > { %v15119_v63 = vadd.f32 %v5571_v42, %v5259_v11  ;;  %v5968_v26 = vsel %vm793_vm1, %v5965_v54, %v5967_v50  ;;  %v6238_v54 = vsel %vm1195_vm2, %v15066_v33, %v15121_v34  ;;  %v6243_v33 = vshll.u32 %v15132_v45, 16 }
 0x317   : > { %v4757_v17 = vor.u32 %v4756_v10, %v4753_v38  ;;  %v4680_v25 = vmul.f32 %v4613_v51, %v4554_v59  ;;  %v4979_v51 = vadd.f32 %v14986_v46, %v13018_v19 }
 0x318   : > { %v5149_v0 = vpop.f32.mrf.mxu2  ;;  %v4333_v9 = vpop.f32.mrf.mxu0 }
 0x319   : > { %v5512_v16 = vpop.f32.mrf.mxu3  ;;  %v5210_v15 = vrot.slane %v5149_v0, 5  ;;  %v4501_v47 = vpop.f32.mrf.mxu1  ;;  %v4758_v6 = vsel %vm14252_vm13, %v4749_v32, %v4757_v17  ;;  %v4698_v1 = vpack.c.bf16 %v4680_v25, %v4680_v25  ;;  %v4369_v42 = vadd.f32 %v4333_v9, %v14856_v18 }
 0x31a   : > { %v5572_v56 = vrot.slane %v5512_v16, 5  ;;  %4915 = vst [vmem:[#allocation2 + $0x60] sm:$0xf] %v4758_v6  ;;  %v4759_v38 = vrot.slane %v4757_v17, 4  ;;  %v6242_v6 = vrot.slane %v6240_v2, 1 }
 0x31b   : > { %v5211_v29 = vsel %vm5200_vm14, %v5208_v30, %v5210_v15  ;;  %v4761_v53 = vshrl.u32 %v4698_v1, 16  ;;  %v4764_v20 = vshll.u32 %v4698_v1, 16  ;;  %v4537_v5 = vadd.f32 %v4501_v47, %v4369_v42  ;;  %5751 = vmatmul.bf16.gmra.mxu0 %v14468_v61 }
 0x31c   : > { %v5573_v57 = vsel %vm5200_vm14, %v5570_v4, %v5572_v56  ;;  %v5260_v18 = vadd.f32 %v5211_v29, %v4978_v62  ;;  %6056 = vmatmul.bf16.gmra.mxu1 %v5968_v26  ;;  %v13019_v42 = vunpack.c.h.bf16 %v15125_v22  ;;  %v12891_v29 = vld [vmem:[%s16936_s4 + $0x220] sm:$0xff] }
 0x31d   : > { %6368 = vmatmul.bf16.gmra.mxu2 %v6238_v54  ;;  %v4763_v37 = vrot.slane %v4761_v53, 6  ;;  %v4766_v30 = vrot.slane %v4764_v20, 7  ;;  %v4555_v11 = vmax.f32 %v4537_v5, 0.0  ;;  %v12883_v22 = vld [vmem:[%s16936_s4 + $0x1e0] sm:$0xff]  ;;  %v6523_v20 = vrot.slane %v15132_v45, 2 }
 0x31e   : > { %6610 = vmatmul.bf16.gmra.mxu3 %v6522_v39  ;;  %v15150_v4 = vadd.f32 %v5573_v57, %v5260_v18  ;;  %v6245_v39 = vrot.slane %v6243_v33, 2  ;;  %v12875_v57 = vld [vmem:[%s16936_s4 + $0x1a0] sm:$0xff]  ;;  %7454 = vmatpush.bf16.msra.mxu2 %v12891_v29 }
 0x31f   : > { %v4767_v10 = vor.u32 %v4766_v30, %v4763_v37  ;;  %v4681_v59 = vmul.f32 %v4618_v52, %v4555_v11  ;;  %6900 = vmatpush.bf16.msra.mxu0 %v12875_v57  ;;  %7212 = vmatpush.bf16.msra.mxu1 %v12883_v22  ;;  %v4623_v30 = vpop.permute.xlu1 %4622 }
 0x320   : > { %v5152_v32 = vpop.f32.mrf.mxu2  ;;  %v4335_v0 = vpop.f32.mrf.mxu0  ;;  %v15176_v11 = vor.u32 %v6245_v39, %v6242_v6  ;;  %v15187_v6 = vld [vmem:[#allocation2 + $0x30] sm:$0xff] }
 0x321   : > { %v5515_v61 = vpop.f32.mrf.mxu3  ;;  %v5212_v25 = vrot.slane %v5152_v32, 5  ;;  %v4503_v16 = vpop.f32.mrf.mxu1  ;;  %v4768_v9 = vsel %vm14252_vm13, %v4759_v38, %v4767_v10  ;;  %v4699_v47 = vpack.c.bf16 %v4681_v59, %v4681_v59  ;;  %v4370_v26 = vadd.f32 %v4335_v0, %v14872_v13  ;;  %v12908_v13 = vld [vmem:[%s16936_s4 + $0x20] sm:$0xff] }
 0x322   : > { %v5574_v62 = vrot.slane %v5515_v61, 5  ;;  %4916 = vst [vmem:[#allocation2 + $0x64] sm:$0xf] %v4768_v9  ;;  %7830 = vmatpush.bf16.msra.mxu3 %v12908_v13  ;;  %v4769_v52 = vrot.slane %v4767_v10, 4  ;;  %v4980_v59 = vadd.f32 %v14986_v46, %v13019_v42  ;;  %v15180_v61 = vld [vmem:[%s13251_s12 + $0x28] sm:$0xff]   ;;  %v6524_v42 = vsel %vm1435_vm3, %v6521_v58, %v6523_v20 }
 0x323   : > { %v5213_v17 = vsel %vm5200_vm14, %v5210_v15, %v5212_v25  ;;  %v4771_v54 = vshrl.u32 %v4699_v47, 16  ;;  %v4774_v19 = vshll.u32 %v4699_v47, 16  ;;  %v4538_v53 = vadd.f32 %v4503_v16, %v4370_v26 }
 0x324   : > { %v5575_v1 = vsel %vm5200_vm14, %v5572_v56, %v5574_v62  ;;  %v5261_v15 = vadd.f32 %v5213_v17, %v4979_v51  ;;  %v5969_v56 = vrot.slane %v15132_v45, 1  ;;  %v13022_v57 = vunpack.c.l.bf16 %v15180_v61 }
 0x325   : > { %v4773_v18 = vrot.slane %v4771_v54, 6  ;;  %v4776_v5 = vrot.slane %v4774_v19, 7  ;;  %v4556_v37 = vmax.f32 %v4538_v53, 0.0  ;;  %v6249_v48 = vshrl.u32 %v15187_v6, 16  ;;  %v4628_v53 = vpop.permute.xlu2 %4627 }
 0x326   : > { %v15174_v2 = vadd.f32 %v5575_v1, %v5261_v15  ;;  %v5970_v26 = vsel %vm793_vm1, %v5967_v50, %v5969_v56  ;;  %v6247_v50 = vsel %vm1195_vm2, %v15121_v34, %v15176_v11  ;;  %v6252_v34 = vshll.u32 %v15187_v6, 16 }
 0x327   : > { %v4777_v33 = vor.u32 %v4776_v5, %v4773_v18  ;;  %v4682_v38 = vmul.f32 %v4623_v30, %v4556_v37  ;;  %v4981_v37 = vadd.f32 %v14986_v46, %v13022_v57 }
 0x328   : > { %v5154_v51 = vpop.f32.mrf.mxu2  ;;  %v4338_v9 = vpop.f32.mrf.mxu0 }
 0x329   : > { %v5517_v32 = vpop.f32.mrf.mxu3  ;;  %v5214_v0 = vrot.slane %v5154_v51, 5  ;;  %v4506_v47 = vpop.f32.mrf.mxu1  ;;  %v4778_v10 = vsel %vm14252_vm13, %v4769_v52, %v4777_v33  ;;  %v4700_v17 = vpack.c.bf16 %v4682_v38, %v4682_v38  ;;  %v4371_v1 = vadd.f32 %v4338_v9, %v14884_v14 }
 0x32a   : > { %v5576_v16 = vrot.slane %v5517_v32, 5  ;;  %4917 = vst [vmem:[#allocation2 + $0x68] sm:$0xf] %v4778_v10  ;;  %v4779_v22 = vrot.slane %v4777_v33, 4 }
 0x32b   : > { %v5215_v39 = vsel %vm5200_vm14, %v5212_v25, %v5214_v0  ;;  %v4781_v13 = vshrl.u32 %v4700_v17, 16  ;;  %v4784_v54 = vshll.u32 %v4700_v17, 16  ;;  %v4539_v19 = vadd.f32 %v4506_v47, %v4371_v1  ;;  %5756 = vmatmul.bf16.gmra.mxu0 %v14530_v40 }
 0x32c   : > { %v5577_v29 = vsel %vm5200_vm14, %v5574_v62, %v5576_v16  ;;  %v5262_v14 = vadd.f32 %v5215_v39, %v4980_v59  ;;  %6061 = vmatmul.bf16.gmra.mxu1 %v5970_v26  ;;  %v6251_v26 = vrot.slane %v6249_v48, 1  ;;  %v13023_v17 = vunpack.c.h.bf16 %v15180_v61  ;;  %v12874_v39 = vld [vmem:[%s16936_s4 + $0x198] sm:$0xff] }
 0x32d   : > { %6373 = vmatmul.bf16.gmra.mxu2 %v6247_v50  ;;  %v4783_v58 = vrot.slane %v4781_v13, 6  ;;  %v4786_v25 = vrot.slane %v4784_v54, 7  ;;  %v4557_v15 = vmax.f32 %v4539_v19, 0.0  ;;  %v6254_v1 = vrot.slane %v6252_v34, 2  ;;  %v12882_v61 = vld [vmem:[%s16936_s4 + $0x1d8] sm:$0xff]  ;;  %6901 = vmatpush.bf16.msra.mxu0 %v12874_v39 }
 0x32e   : > { %6615 = vmatmul.bf16.gmra.mxu3 %v6524_v42  ;;  %v15205_v62 = vadd.f32 %v5577_v29, %v5262_v14  ;;  %v12890_v42 = vld [vmem:[%s16936_s4 + $0x218] sm:$0xff]  ;;  %v6525_v13 = vrot.slane %v15187_v6, 2  ;;  %7213 = vmatpush.bf16.msra.mxu1 %v12882_v61 }
 0x32f   : > { %v4787_v18 = vor.u32 %v4786_v25, %v4783_v58  ;;  %v4683_v5 = vmul.f32 %v4628_v53, %v4557_v15  ;;  %7455 = vmatpush.bf16.msra.mxu2 %v12890_v42  ;;  %v4633_v58 = vpop.permute.xlu0 %4632  ;;  %v15231_v25 = vor.u32 %v6254_v1, %v6251_v26 }
 0x330   : > { %v5157_v30 = vpop.f32.mrf.mxu2  ;;  %v4340_v59 = vpop.f32.mrf.mxu0 }
 0x331   : > { %v5520_v40 = vpop.f32.mrf.mxu3  ;;  %v5216_v52 = vrot.slane %v5157_v30, 5  ;;  %v4508_v51 = vpop.f32.mrf.mxu1  ;;  %v4788_v32 = vsel %vm14252_vm13, %v4779_v22, %v4787_v18  ;;  %v4701_v9 = vpack.c.bf16 %v4683_v5, %v4683_v5  ;;  %v4372_v47 = vadd.f32 %v4340_v59, %v14895_v27  ;;  %v12907_v27 = vld [vmem:[%s16936_s4 + $0x18] sm:$0xff]  ;;  %v15235_v30 = vld [vmem:[%s13251_s12 + $0x30] sm:$0xff]  }
 0x332   : > { %v5578_v38 = vrot.slane %v5520_v40, 5  ;;  %4918 = vst [vmem:[#allocation2 + $0x6c] sm:$0xf] %v4788_v32  ;;  %7831 = vmatpush.bf16.msra.mxu3 %v12907_v27  ;;  %v4789_v15 = vrot.slane %v4787_v18, 4  ;;  %v4982_v22 = vadd.f32 %v14986_v46, %v13023_v17  ;;  %v13026_v42 = vunpack.c.l.bf16 %v15235_v30 }
 0x333   : > { %v5217_v33 = vsel %vm5200_vm14, %v5214_v0, %v5216_v52  ;;  %v4791_v29 = vshrl.u32 %v4701_v9, 16  ;;  %v4794_v50 = vshll.u32 %v4701_v9, 16  ;;  %v4540_v57 = vadd.f32 %v4508_v51, %v4372_v47  ;;  %v15242_v47 = vld [vmem:[#allocation2 + $0x38] sm:$0xff] }
 0x334   : > { %v5579_v10 = vsel %vm5200_vm14, %v5576_v16, %v5578_v38  ;;  %v5263_v0 = vadd.f32 %v5217_v33, %v4981_v37  ;;  %v5971_v16 = vrot.slane %v15187_v6, 1  ;;  %v6258_v45 = vshrl.u32 %v15242_v47, 16 }
 0x335   : > { %v4793_v54 = vrot.slane %v4791_v29, 6  ;;  %v4796_v14 = vrot.slane %v4794_v50, 7  ;;  %v4558_v48 = vmax.f32 %v4540_v57, 0.0  ;;  %v16962_v50 = vld [vmem:[#allocation3_spill] sm:$0xff]  ;;  %v4638_v57 = vpop.permute.xlu1 %4637 }
 0x336   : > { %v15229_v19 = vadd.f32 %v5579_v10, %v5263_v0  ;;  %v5972_v9 = vsel %vm793_vm1, %v5969_v56, %v5971_v16  ;;  %v6526_v10 = vsel %vm1435_vm3, %v6523_v20, %v6525_v13  ;;  %v6256_v56 = vsel %vm1195_vm2, %v15176_v11, %v15231_v25 }
 0x337   : > { %v4797_v53 = vor.u32 %v4796_v14, %v4793_v54  ;;  %v4684_v34 = vmul.f32 %v4633_v58, %v4558_v48  ;;  %v6261_v11 = vshll.u32 %v15242_v47, 16  ;;  %v4983_v48 = vadd.f32 %v14986_v46, %v13026_v42 }
 0x338   : > { %v5159_v5 = vpop.f32.mrf.mxu2  ;;  %v4343_v51 = vpop.f32.mrf.mxu0 }
 0x339   : > { %v5522_v37 = vpop.f32.mrf.mxu3  ;;  %v5218_v40 = vrot.slane %v5159_v5, 5  ;;  %v4511_v32 = vpop.f32.mrf.mxu1  ;;  %v4798_v18 = vsel %vm14252_vm13, %v4789_v15, %v4797_v53  ;;  %v4702_v26 = vpack.c.bf16 %v4684_v34, %v4684_v34  ;;  %v4373_v33 = vadd.f32 %v4343_v51, %v14910_v49 }
 0x33a   : > { %v5580_v59 = vrot.slane %v5522_v37, 5  ;;  %4919 = vst [vmem:[#allocation2 + $0x70] sm:$0xf] %v4798_v18  ;;  %v4799_v61 = vrot.slane %v4797_v53, 4  ;;  %v6260_v18 = vrot.slane %v6258_v45, 1  ;;  %v4643_v45 = vpop.permute.xlu2 %4642 }
 0x33b   : > { %v5219_v17 = vsel %vm5200_vm14, %v5216_v52, %v5218_v40  ;;  %v4801_v39 = vshrl.u32 %v4702_v26, 16  ;;  %v4804_v27 = vshll.u32 %v4702_v26, 16  ;;  %v4541_v29 = vadd.f32 %v4511_v32, %v4373_v33  ;;  %5761 = vmatmul.bf16.gmra.mxu0 %v16962_v50 }
 0x33c   : > { %v5581_v1 = vsel %vm5200_vm14, %v5578_v38, %v5580_v59  ;;  %v5264_v49 = vadd.f32 %v5219_v17, %v4982_v22  ;;  %6066 = vmatmul.bf16.gmra.mxu1 %v5972_v9  ;;  %v13027_v33 = vunpack.c.h.bf16 %v15235_v30  ;;  %v12889_v17 = vld [vmem:[%s16936_s4 + $0x210] sm:$0xff]  ;;  %v6527_v30 = vrot.slane %v15242_v47, 2 }
 0x33d   : > { %6378 = vmatmul.bf16.gmra.mxu2 %v6256_v56  ;;  %v4803_v20 = vrot.slane %v4801_v39, 6  ;;  %v4806_v52 = vrot.slane %v4804_v27, 7  ;;  %v4559_v0 = vmax.f32 %v4541_v29, 0.0 }
 0x33e   : > { %6620 = vmatmul.bf16.gmra.mxu3 %v6526_v10  ;;  %v15260_v38 = vadd.f32 %v5581_v1, %v5264_v49  ;;  %v6263_v10 = vrot.slane %v6261_v11, 2  ;;  %v12873_v1 = vld [vmem:[%s16936_s4 + $0x190] sm:$0xff]  ;;  %7456 = vmatpush.bf16.msra.mxu2 %v12889_v17  ;;  %v4984_v11 = vadd.f32 %v14986_v46, %v13027_v33 }
 0x33f   : > { %v4807_v54 = vor.u32 %v4806_v52, %v4803_v20  ;;  %v4685_v14 = vmul.f32 %v4638_v57, %v4559_v0  ;;  %6902 = vmatpush.bf16.msra.mxu0 %v12873_v1 }
 0x340   : > { %v5162_v58 = vpop.f32.mrf.mxu2  ;;  %v4345_v5 = vpop.f32.mrf.mxu0  ;;  %v15283_v20 = vor.u32 %v6263_v10, %v6260_v18 }
 0x341   : > { %v5525_v15 = vpop.f32.mrf.mxu3  ;;  %v5220_v34 = vrot.slane %v5162_v58, 5  ;;  %v4513_v37 = vpop.f32.mrf.mxu1  ;;  %v4808_v51 = vsel %vm14252_vm13, %v4799_v61, %v4807_v54  ;;  %v4703_v32 = vpack.c.bf16 %v4685_v14, %v4685_v14  ;;  %v4374_v9 = vadd.f32 %v4345_v5, %v14918_v55  ;;  %v12906_v55 = vld [vmem:[%s16936_s4 + $0x10] sm:$0xff] }
 0x342   : > { %v5582_v22 = vrot.slane %v5525_v15, 5  ;;  %4920 = vst [vmem:[#allocation2 + $0x74] sm:$0xf] %v4808_v51  ;;  %7832 = vmatpush.bf16.msra.mxu3 %v12906_v55  ;;  %v4809_v52 = vrot.slane %v4807_v54, 4 }
 0x343   : > { %v5221_v53 = vsel %vm5200_vm14, %v5218_v40, %v5220_v34  ;;  %v4811_v56 = vshrl.u32 %v4703_v32, 16  ;;  %v4814_v42 = vshll.u32 %v4703_v32, 16  ;;  %v4542_v39 = vadd.f32 %v4513_v37, %v4374_v9  ;;  %v15294_v32 = vld [vmem:[#allocation2 + $0x40] sm:$0xff] }
 0x344   : > { %v5583_v26 = vsel %vm5200_vm14, %v5580_v59, %v5582_v22  ;;  %v5265_v40 = vadd.f32 %v5221_v53, %v4983_v48  ;;  %v5973_v59 = vrot.slane %v15242_v47, 1  ;;  %v15287_v48 = vld [vmem:[%s13251_s12 + $0x38] sm:$0xff]   ;;  %v6528_v53 = vsel %vm1435_vm3, %v6525_v13, %v6527_v30  ;;  %v16963_v13 = vld [vmem:[#allocation4_spill] sm:$0xff] }
 0x345   : > { %v4813_v27 = vrot.slane %v4811_v56, 6  ;;  %v4816_v49 = vrot.slane %v4814_v42, 7  ;;  %v4560_v50 = vmax.f32 %v4542_v39, 0.0  ;;  %v13030_v10 = vunpack.c.l.bf16 %v15287_v48  ;;  %v4648_v39 = vpop.permute.xlu0 %4647 }
 0x346   : > { %v15281_v29 = vadd.f32 %v5583_v26, %v5265_v40  ;;  %v5974_v51 = vsel %vm793_vm1, %v5971_v16, %v5973_v59  ;;  %v6265_v16 = vsel %vm1195_vm2, %v15231_v25, %v15283_v20 }
 0x347   : > { %v4817_v0 = vor.u32 %v4816_v49, %v4813_v27  ;;  %v4686_v57 = vmul.f32 %v4643_v45, %v4560_v50  ;;  %v4985_v45 = vadd.f32 %v14986_v46, %v13030_v10  ;;  %v13031_v46 = vunpack.c.h.bf16 %v15287_v48 }
 0x348   : > { %v5164_v61 = vpop.f32.mrf.mxu2  ;;  %v4348_v5 = vpop.f32.mrf.mxu0 }
 0x349   : > { %v5527_v14 = vpop.f32.mrf.mxu3  ;;  %v5222_v58 = vrot.slane %v5164_v61, 5  ;;  %v4516_v37 = vpop.f32.mrf.mxu1  ;;  %v4818_v54 = vsel %vm14252_vm13, %v4809_v52, %v4817_v0  ;;  %v4704_v9 = vpack.c.bf16 %v4686_v57, %v4686_v57  ;;  %v4375_v18 = vadd.f32 %v4348_v5, %v14936_v12  ;;  %v12881_v12 = vld [vmem:[%s16936_s4 + $0x1d0] sm:$0xff] }
 0x34a   : > { %v5584_v15 = vrot.slane %v5527_v14, 5  ;;  %4921 = vst [vmem:[#allocation2 + $0x78] sm:$0xf] %v4818_v54  ;;  %7214 = vmatpush.bf16.msra.mxu1 %v12881_v12  ;;  %v4819_v27 = vrot.slane %v4817_v0, 4 }
 0x34b   : > { %v5223_v26 = vsel %vm5200_vm14, %v5220_v34, %v5222_v58  ;;  %v4821_v17 = vshrl.u32 %v4704_v9, 16  ;;  %v4824_v1 = vshll.u32 %v4704_v9, 16  ;;  %v4543_v55 = vadd.f32 %v4516_v37, %v4375_v18  ;;  %5766 = vmatmul.bf16.gmra.mxu0 %v16963_v13 }
 0x34c   : > { %v5585_v33 = vsel %vm5200_vm14, %v5582_v22, %v5584_v15  ;;  %v5266_v6 = vadd.f32 %v5223_v26, %v4984_v11  ;;  %6071 = vmatmul.bf16.gmra.mxu1 %v5974_v51  ;;  %v6267_v34 = vshrl.u32 %v15294_v32, 16  ;;  %v6270_v22 = vshll.u32 %v15294_v32, 16  ;;  %v12888_v26 = vld [vmem:[%s16936_s4 + $0x208] sm:$0xff] }
 0x34d   : > { %6383 = vmatmul.bf16.gmra.mxu2 %v6265_v16  ;;  %v4823_v25 = vrot.slane %v4821_v17, 6  ;;  %v4826_v56 = vrot.slane %v4824_v1, 7  ;;  %v4561_v40 = vmax.f32 %v4543_v55, 0.0  ;;  %v5975_v17 = vrot.slane %v15294_v32, 1  ;;  %v4653_v55 = vpop.permute.xlu1 %4652 }
 0x34e   : > { %6625 = vmatmul.bf16.gmra.mxu3 %v6528_v53  ;;  %v15316_v42 = vadd.f32 %v5585_v33, %v5266_v6  ;;  %v6269_v37 = vrot.slane %v6267_v34, 1  ;;  %v6272_v51 = vrot.slane %v6270_v22, 2  ;;  %7457 = vmatpush.bf16.msra.mxu2 %v12888_v26 }
 0x34f   : > { %v4827_v49 = vor.u32 %v4826_v56, %v4823_v25  ;;  %v4687_v50 = vmul.f32 %v4648_v39, %v4561_v40  ;;  %v15339_v25 = vld [vmem:[%s16937_s5] ss:$0 sm:$0xff] }
 0x350   : > { %v5167_v52 = vpop.f32.mrf.mxu2  ;;  %v4350_v14 = vpop.f32.mrf.mxu0  ;;  %v15329_v1 = vor.u32 %v6272_v51, %v6269_v37  ;;  %v4986_v56 = vadd.f32 %v15339_v25, %v13031_v46  ;;  %v15363_v37 = vld [vmem:[#allocation2 + $0x48] sm:$0xff] }
 0x351   : > { %v5530_v57 = vpop.f32.mrf.mxu3  ;;  %v5224_v11 = vrot.slane %v5167_v52, 5  ;;  %v4518_v5 = vpop.f32.mrf.mxu1  ;;  %v4828_v54 = vsel %vm14252_vm13, %v4819_v27, %v4827_v49  ;;  %v4705_v9 = vpack.c.bf16 %v4687_v50, %v4687_v50  ;;  %v4376_v18 = vadd.f32 %v4350_v14, %v14944_v31  ;;  %v15347_v27 = vld [vmem:[%s13251_s12 + $0x40] sm:$0xff]   ;;  %v15349_v50 = vld [vmem:[#allocation2 + $0x54] sm:$0xf] }
 0x352   : > { %v5586_v61 = vrot.slane %v5530_v57, 5  ;;  %4922 = vst [vmem:[#allocation2 + $0x7c] sm:$0xf] %v4828_v54  ;;  %v6529_v31 = vrot.slane %v15294_v32, 2  ;;  %v4829_v13 = vrot.slane %v4827_v49, 4  ;;  %v5976_v14 = vsel %vm793_vm1, %v5973_v59, %v5975_v17 }
 0x353   : > { %v5225_v0 = vsel %vm5200_vm14, %v5222_v58, %v5224_v11  ;;  %v4831_v33 = vshrl.u32 %v4705_v9, 16  ;;  %v4834_v16 = vshll.u32 %v4705_v9, 16  ;;  %v4544_v12 = vadd.f32 %v4518_v5, %v4376_v18  ;;  %v9189_v59 = vld [vmem:[#allocation2 + $0x50] sm:$0xc] }
 0x354   : > { %v5587_v53 = vsel %vm5200_vm14, %v5584_v15, %v5586_v61  ;;  %v5267_v10 = vadd.f32 %v5225_v0, %v4985_v45  ;;  %v6530_v5 = vsel %vm1435_vm3, %v6527_v30, %v6529_v31  ;;  %v6274_v18 = vsel %vm1195_vm2, %v15283_v20, %v15329_v1  ;;  %v12880_v20 = vld [vmem:[%s16936_s4 + $0x1c8] sm:$0xff] }
 0x355   : > { %v4833_v58 = vrot.slane %v4831_v33, 6  ;;  %v4836_v15 = vrot.slane %v4834_v16, 7  ;;  %v4562_v48 = vmax.f32 %v4544_v12, 0.0  ;;  %v13034_v30 = vunpack.c.l.bf16 %v15347_v27  ;;  %v15388_v12 = vld [vmem:[#allocation2 + $0x58] sm:$0xff]  ;;  %7215 = vmatpush.bf16.msra.mxu1 %v12880_v20 }
 0x356   : > { %v15332_v6 = vadd.f32 %v5587_v53, %v5267_v10  ;;  %v12872_v53 = vld [vmem:[%s16936_s4 + $0x188] sm:$0xff]  ;;  %v8629_v46 = vunpack.c.l.b16 %v15349_v50  ;;  %v6276_v16 = vshrl.u32 %v15363_v37, 16  ;;  %v6279_v10 = vshll.u32 %v15363_v37, 16 }
 0x357   : > { %v15334_v34 = vor.u32 %v4836_v15, %v4833_v58  ;;  %v4688_v22 = vmul.f32 %v4653_v55, %v4562_v48  ;;  %v9207_v58 = vunpack.c.l.b16 %v9189_v59  ;;  %6903 = vmatpush.bf16.msra.mxu0 %v12872_v53 }
 0x358   : > { %v15342_v40 = vpop.f32.mrf.mxu2  ;;  %v4353_v52 = vpop.f32.mrf.mxu0  ;;  %v6278_v59 = vrot.slane %v6276_v16, 1  ;;  %v6281_v53 = vrot.slane %v6279_v10, 2 }
 0x359   : > { %v15344_v39 = vpop.f32.mrf.mxu3  ;;  %v5226_v49 = vrot.slane %v15342_v40, 5  ;;  %v4521_v57 = vpop.f32.mrf.mxu1  ;;  %v4838_v51 = vsel %vm14252_vm13, %v4829_v13, %v15334_v34  ;;  %v4706_v54 = vpack.c.bf16 %v4688_v22, %v4688_v22  ;;  %v4377_v9 = vadd.f32 %v4353_v52, %v14951_v43  ;;  %v12905_v43 = vld [vmem:[%s16936_s4 + $0x8] sm:$0xff] }
 0x35a   : > { %v5588_v45 = vrot.slane %v15344_v39, 5  ;;  %4923 = vst [vmem:[#allocation2 + $0x80] sm:$0xf] %v4838_v51  ;;  %7833 = vmatpush.bf16.msra.mxu3 %v12905_v43  ;;  %v4658_v22 = vpop.permute.xlu2 %4657  ;;  %v4839_v40 = vrot.slane %v15334_v34, 4  ;;  %v6183_v43 = vld [vmem:[#allocation2 + $0x50] sm:$0x3] }
 0x35b   : > { %v5227_v0 = vsel %vm5200_vm14, %v5224_v11, %v5226_v49  ;;  %v4841_v26 = vshrl.u32 %v4706_v54, 16  ;;  %v4844_v11 = vshll.u32 %v4706_v54, 16  ;;  %5771 = vmatmul.bf16.gmra.mxu0 %v14723_v23  ;;  %v4987_v23 = vadd.f32 %v15339_v25, %v13034_v30 }
 0x35c   : > { %v5589_v47 = vsel %vm5200_vm14, %v5586_v61, %v5588_v45  ;;  %v5268_v33 = vadd.f32 %v5227_v0, %v4986_v56  ;;  %v4545_v61 = vadd.f32 %v4521_v57, %v4377_v9  ;;  %6076 = vmatmul.bf16.gmra.mxu1 %v5976_v14  ;;  %v5977_v56 = vrot.slane %v15363_v37, 1 }
 0x35d   : > { %6388 = vmatmul.bf16.gmra.mxu2 %v6274_v18  ;;  %v4843_v15 = vrot.slane %v4841_v26, 6  ;;  %v4846_v48 = vrot.slane %v4844_v11, 7  ;;  %v9210_v0 = vrot.slane %v15388_v12, 2  ;;  %v13035_v11 = vunpack.c.h.bf16 %v15347_v27 }
 0x35e   : > { %6630 = vmatmul.bf16.gmra.mxu3 %v6530_v5  ;;  %v15390_v55 = vadd.f32 %v5589_v47, %v5268_v33  ;;  %v4563_v13 = vmax.f32 %v4545_v61, 0.0  ;;  %v9208_v5 = vpack.c.b16 %v8629_v46, %v9207_v58  ;;  %v6202_v10 = vunpack.c.l.b16 %v6183_v43 }
 0x35f   : > { %v4847_v39 = vor.u32 %v4846_v48, %v4843_v15  ;;  %v6531_v48 = vrot.slane %v15363_v37, 2  ;;  %v7354_v37 = vld [vmem:[#allocation2 + $0x10] sm:$0x8] }
 0x360   : > { %v4689_v52 = vmul.f32 %v4658_v22, %v4563_v13  ;;  %v5172_v57 = vpop.f32.mrf.mxu2  ;;  %v4355_v9 = vpop.f32.mrf.mxu0  ;;  %v9209_v33 = vrot.slane %v9208_v5, 2  ;;  %v15429_v5 = vor.u32 %v6281_v53, %v6278_v59  ;;  %v15440_v59 = vpack.c.b16 %v6202_v10, %v6202_v10 }
 0x361   : > { %v5535_v14 = vpop.f32.mrf.mxu3  ;;  %v5228_v51 = vrot.slane %v5172_v57, 5  ;;  %v4523_v18 = vpop.f32.mrf.mxu1  ;;  %v4848_v47 = vsel %vm14252_vm13, %v4839_v40, %v4847_v39  ;;  %v4378_v34 = vadd.f32 %v4355_v9, %v14959_v60  ;;  %v12887_v60 = vld [vmem:[%s16936_s4 + $0x200] sm:$0xff]  ;;  %v5896_v9 = vld [vmem:[#allocation2 + $0x50] sm:$0x1] }
 0x362   : > { %v5590_v54 = vrot.slane %v5535_v14, 5  ;;  %v4707_v30 = vpack.c.bf16 %v4689_v52, %v4689_v52  ;;  %4924 = vst [vmem:[#allocation2 + $0x84] sm:$0xf] %v4848_v47  ;;  %v15414_v27 = vsel %vm1435_vm3, %v9209_v33, %v9210_v0  ;;  %v12904_v40 = vld [vmem:[%s16936_s4] sm:$0xff]  ;;  %v4663_v57 = vpop.permute.xlu0 %4662  ;;  %v5978_v14 = vsel %vm793_vm1, %v5975_v17, %v5977_v56  ;;  %7458 = vmatpush.bf16.msra.mxu2 %v12887_v60 }
 0x363   : > { %v5229_v20 = vsel %vm5200_vm14, %v5226_v49, %v5228_v51  ;;  %v4546_v15 = vadd.f32 %v4523_v18, %v4378_v34  ;;  %v12871_v49 = vld [vmem:[%s16936_s4 + $0x180] sm:$0xff]  ;;  %v4849_v18 = vrot.slane %v4847_v39, 4  ;;  %v4988_v34 = vadd.f32 %v15339_v25, %v13035_v11  ;;  %7834 = vmatpush.bf16.msra.mxu3 %v12904_v40 }
 0x364   : > { %v5591_v26 = vsel %vm5200_vm14, %v5588_v45, %v5590_v54  ;;  %v4851_v61 = vshrl.u32 %v4707_v30, 16  ;;  %v4854_v16 = vshll.u32 %v4707_v30, 16  ;;  %v5269_v58 = vadd.f32 %v5229_v20, %v4987_v23  ;;  %v12879_v52 = vld [vmem:[%s16936_s4 + $0x1c0] sm:$0xff]  ;;  %6904 = vmatpush.bf16.msra.mxu0 %v12871_v49 }
 0x365   : > { %v4564_v23 = vmax.f32 %v4546_v15, 0.0  ;;  %7216 = vmatpush.bf16.msra.mxu1 %v12879_v52  ;;  %v6532_v39 = vsel %vm1435_vm3, %v6529_v31, %v6531_v48  ;;  %v5951_v15 = vunpack.c.l.b16 %v5896_v9  ;;  %v6283_v32 = vsel %vm1195_vm2, %v15329_v1, %v15429_v5 }
 0x366   : > { %v4853_v45 = vrot.slane %v4851_v61, 6  ;;  %v4856_v13 = vrot.slane %v4854_v16, 7  ;;  %v15416_v22 = vadd.f32 %v5591_v26, %v5269_v58  ;;  %v15433_v26 = vld [vmem:[%s13251_s12 + $0x48] sm:$0xff]  }
 0x367   : > { %v4690_v30 = vmul.f32 %v4663_v57, %v4564_v23  ;;  %v13038_v31 = vunpack.c.l.bf16 %v15433_v26  ;;  %v4668_v57 = vpop.permute.xlu1 %4667  ;;  %v5961_v9 = vpack.c.b16 %v5951_v15, %v5951_v15 }
 0x368   : > { %v4857_v47 = vor.u32 %v4856_v13, %v4853_v45  ;;  %v5174_v43 = vpop.f32.mrf.mxu2  ;;  %v4358_v16 = vpop.f32.mrf.mxu0 }
 0x369   : > { %v5537_v20 = vpop.f32.mrf.mxu3  ;;  %v5230_v33 = vrot.slane %v5174_v43, 5  ;;  %v4526_v17 = vpop.f32.mrf.mxu1  ;;  %v4708_v11 = vpack.c.bf16 %v4690_v30, %v4690_v30  ;;  %v4379_v58 = vadd.f32 %v4358_v16, %v14975_v24  ;;  %v6285_v24 = vshrl.u32 %v15440_v59, 16 }
 0x36a   : > { %v5592_v61 = vrot.slane %v5537_v20, 5  ;;  %v4858_v53 = vsel %vm14252_vm13, %v4849_v18, %v4857_v47  ;;  %v12951_v18 = vld [vmem:[%s16936_s4 + $0xf8] sm:$0xff]  ;;  %v4859_v30 = vrot.slane %v4857_v47, 4  ;;  %v4989_v20 = vadd.f32 %v15339_v25, %v13038_v31 }
 0x36b   : > { %4925 = vst [vmem:[#allocation2 + $0x88] sm:$0xf] %v4858_v53  ;;  %v5231_v60 = vsel %vm5200_vm14, %v5228_v51, %v5230_v33  ;;  %v4861_v10 = vshrl.u32 %v4708_v11, 16  ;;  %v4864_v45 = vshll.u32 %v4708_v11, 16  ;;  %v4547_v23 = vadd.f32 %v4526_v17, %v4379_v58  ;;  %5776 = vmatmul.bf16.gmra.mxu0 %v14776_v44  ;;  %v12927_v44 = vld [vmem:[%s16936_s4 + $0x78] sm:$0xff]  ;;  %8733 = vmatpush.bf16.msrb.mxu2 %v12951_v18 }
 0x36c   : > { %v5593_v49 = vsel %vm5200_vm14, %v5590_v54, %v5592_v61  ;;  %v5270_v13 = vadd.f32 %v5231_v60, %v4988_v34  ;;  %6081 = vmatmul.bf16.gmra.mxu1 %v5978_v14  ;;  %v6288_v51 = vshll.u32 %v15440_v59, 16  ;;  %v12959_v14 = vld [vmem:[%s16936_s4 + $0x138] sm:$0xff]  ;;  %v6287_v60 = vrot.slane %v6285_v24, 1  ;;  %8188 = vmatpush.bf16.msrb.mxu0 %v12927_v44 }
 0x36d   : > { %6393 = vmatmul.bf16.gmra.mxu2 %v6283_v32  ;;  %v4863_v54 = vrot.slane %v4861_v10, 6  ;;  %v4866_v40 = vrot.slane %v4864_v45, 7  ;;  %v4565_v1 = vmax.f32 %v4547_v23, 0.0  ;;  %9044 = vmatpush.bf16.msrb.mxu3 %v12959_v14  ;;  %v5979_v18 = vrot.slane %v5961_v9, 1 }
 0x36e   : > { %6635 = vmatmul.bf16.gmra.mxu3 %v6532_v39  ;;  %v15454_v52 = vadd.f32 %v5593_v49, %v5270_v13  ;;  %v4950_v39 = vld [vmem:[%s13251_s12 + $0x50] sm:$0x3]  ;;  %v6290_v49 = vrot.slane %v6288_v51, 2  ;;  %v13039_v13 = vunpack.c.h.bf16 %v15433_v26  ;;  %v12935_v26 = vld [vmem:[%s16936_s4 + $0xb8] sm:$0xff] }
 0x36f   : > { %v4867_v34 = vor.u32 %v4866_v40, %v4863_v54  ;;  %v4691_v43 = vmul.f32 %v4668_v57, %v4565_v1  ;;  %v4969_v23 = vunpack.c.l.bf16 %v4950_v39  ;;  %v6737_v1 = vld [vmem:[#allocation2 + $0x10] sm:$0xc]  ;;  %v15473_v57 = vld [vmem:[#allocation2 + $0x14] sm:$0xf]  ;;  %8429 = vmatpush.bf16.msrb.mxu1 %v12935_v26 }
 0x370   : > { %v5177_v16 = vpop.f32.mrf.mxu2  ;;  %v4360_v58 = vpop.f32.mrf.mxu0  ;;  %v6291_v44 = vor.u32 %v6290_v49, %v6287_v60  ;;  %8189 = vmatpush.bf16.msrb.mxu0 %v12926_v21 }
 0x371   : > { %v5540_v17 = vpop.f32.mrf.mxu3  ;;  %v5232_v53 = vrot.slane %v5177_v16, 5  ;;  %v4528_v15 = vpop.f32.mrf.mxu1  ;;  %v4868_v32 = vsel %vm14252_vm13, %v4859_v30, %v4867_v34  ;;  %v4709_v10 = vpack.c.bf16 %v4691_v43, %v4691_v43  ;;  %v4380_v47 = vadd.f32 %v4360_v58, %v14990_v7 }
 0x372   : > { %v5594_v11 = vrot.slane %v5540_v17, 5  ;;  %4926 = vst [vmem:[#allocation2 + $0x8c] sm:$0xf] %v4868_v32  ;;  %v6533_v7 = vrot.slane %v15440_v59, 2  ;;  %v6792_v16 = vunpack.c.l.b16 %v6737_v1  ;;  %v6793_v17 = vunpack.c.l.b16 %v15473_v57 }
 0x373   : > { %v5233_v31 = vsel %vm5200_vm14, %v5230_v33, %v5232_v53  ;;  %v4871_v54 = vshrl.u32 %v4709_v10, 16  ;;  %v4874_v24 = vshll.u32 %v4709_v10, 16  ;;  %v4548_v40 = vadd.f32 %v4528_v15, %v4380_v47 }
 0x374   : > { %v5595_v45 = vsel %vm5200_vm14, %v5592_v61, %v5594_v11  ;;  %v5271_v51 = vadd.f32 %v5233_v31, %v4989_v20  ;;  %v4673_v61 = vpop.permute.xlu2 %4672  ;;  %v4991_v20 = vadd.f32 %v15339_v25, %v4969_v23  ;;  %v4869_v39 = vrot.slane %v4867_v34, 4 }
 0x375   : > { %v4873_v14 = vrot.slane %v4871_v54, 6  ;;  %v4876_v30 = vrot.slane %v4874_v24, 7  ;;  %v4566_v33 = vmax.f32 %v4548_v40, 0.0  ;;  %v4990_v59 = vadd.f32 %v15339_v25, %v13039_v13 }
 0x376   : > { %v15476_v43 = vadd.f32 %v5595_v45, %v5271_v51  ;;  %v5980_v31 = vsel %vm793_vm1, %v5977_v56, %v5979_v18  ;;  %v6292_v45 = vsel %vm1195_vm2, %v15429_v5, %v6291_v44  ;;  %v6534_v25 = vsel %vm1435_vm3, %v6531_v48, %v6533_v7  ;;  %v15496_v56 = vld [vmem:[#allocation2 + $0x18] sm:$0xff] }
 0x377   : > { %v4877_v9 = vor.u32 %v4876_v30, %v4873_v14  ;;  %v4692_v58 = vmul.f32 %v4673_v61, %v4566_v33  ;;  %v15502_v48 = vpack.c.b16 %v6793_v17, %v6792_v16  ;;  %v7072_v30 = vshrl.u32 %v15496_v56, 16  ;;  %v15511_v16 = vld [vmem:[#allocation2 + $0x60] sm:$0xff] }
 0x378   : > { %v5179_v15 = vpop.f32.mrf.mxu2  ;;  %v5742_v10 = vpop.f32.mrf.mxu0  ;;  %v7075_v33 = vshll.u32 %v15496_v56, 16 }
 0x379   : > { %v5542_v60 = vpop.f32.mrf.mxu3  ;;  %v5234_v49 = vrot.slane %v5179_v15, 5  ;;  %v6047_v47 = vpop.f32.mrf.mxu1  ;;  %v4878_v34 = vsel %vm14252_vm13, %v4869_v39, %v4877_v9  ;;  %v4710_v23 = vpack.c.bf16 %v4692_v58, %v4692_v58  ;;  %v5805_v54 = vrot.slane %v5742_v10, 5  ;;  %v4929_v58 = vld [vmem:[#allocation2 + $0x98] sm:$0x3] }
 0x37a   : > { %v5596_v32 = vrot.slane %v5542_v60, 5  ;;  %4927 = vst [vmem:[#allocation2 + $0x90] sm:$0xf] %v4878_v34  ;;  %v6110_v40 = vrot.slane %v6047_v47, 5  ;;  %v4879_v26 = vrot.slane %v4877_v9, 4 }
 0x37b   : > { %v5235_v13 = vsel %vm5200_vm14, %v5232_v53, %v5234_v49  ;;  %v5273_v24 = vadd.f32 %v5234_v49, %v4991_v20  ;;  %v4881_v1 = vshrl.u32 %v4710_v23, 16  ;;  %v4884_v5 = vshll.u32 %v4710_v23, 16  ;;  %5781 = vmatmul.bf16.gmra.mxu0 %v14785_v35  ;;  %v12950_v35 = vld [vmem:[%s16936_s4 + $0xf0] sm:$0xff] }
 0x37c   : > { %v5597_v51 = vsel %vm5200_vm14, %v5594_v11, %v5596_v32  ;;  %v5272_v57 = vadd.f32 %v5235_v13, %v4990_v59  ;;  %v5859_v18 = vadd.f32 %v5805_v54, %v15010_v41  ;;  %6086 = vmatmul.bf16.gmra.mxu1 %v5980_v31  ;;  %v7373_v41 = vunpack.c.l.b16 %v7354_v37  ;;  %8734 = vmatpush.bf16.msrb.mxu2 %v12950_v35 }
 0x37d   : > { %v15500_v44 = vadd.f32 %v5596_v32, %v5273_v24  ;;  %6398 = vmatmul.bf16.gmra.mxu2 %v6292_v45  ;;  %v4883_v53 = vrot.slane %v4881_v1, 6  ;;  %v4886_v11 = vrot.slane %v4884_v5, 7  ;;  %v7064_v49 = vshrl.u32 %v15502_v48, 16 }
 0x37e   : > { %6640 = vmatmul.bf16.gmra.mxu3 %v6534_v25  ;;  %v15504_v7 = vadd.f32 %v5597_v51, %v5272_v57  ;;  %v6164_v14 = vadd.f32 %v6110_v40, %v5859_v18  ;;  %v7067_v32 = vshll.u32 %v15502_v48, 16  ;;  %v7374_v10 = vpack.c.b16 %v6793_v17, %v7373_v41 }
 0x37f   : > { %v4887_v61 = vor.u32 %v4886_v11, %v4883_v53  ;;  %v7074_v25 = vrot.slane %v7072_v30, 2  ;;  %v7077_v13 = vrot.slane %v7075_v33, 3  ;;  %v9212_v17 = vrot.slane %v15511_v16, 2 }
 0x380   : > { %v6359_v20 = vpop.f32.mrf.mxu2  ;;  %v5744_v15 = vpop.f32.mrf.mxu0  ;;  %v7066_v57 = vrot.slane %v7064_v49, 2  ;;  %v7069_v18 = vrot.slane %v7067_v32, 3  ;;  %v6822_v37 = vrot.slane %v15496_v56, 2  ;;  %v7376_v11 = vrot.slane %v15496_v56, 3 }
 0x381   : > { %v6601_v39 = vpop.f32.mrf.mxu3  ;;  %v6422_v59 = vrot.slane %v6359_v20, 5  ;;  %v6049_v60 = vpop.f32.mrf.mxu1  ;;  %v4888_v47 = vsel %vm14252_vm13, %v4879_v26, %v4887_v61  ;;  %v4889_v31 = vrot.slane %v4887_v61, 4  ;;  %v5806_v9 = vrot.slane %v5744_v15, 5 }
 0x382   : > { %v6111_v45 = vrot.slane %v6049_v60, 5  ;;  %4928 = vst [vmem:[#allocation2 + $0x94] sm:$0xf] %v4888_v47  ;;  %v6664_v23 = vrot.slane %v6601_v39, 5  ;;  %v15532_v53 = vor.u32 %v7077_v13, %v7074_v25  ;;  %v6821_v33 = vrot.slane %v15502_v48, 2  ;;  %v15554_v47 = vld [vmem:[#allocation2 + $0x20] sm:$0xff] }
 0x383   : > { %v6476_v34 = vadd.f32 %v6422_v59, %v6164_v14  ;;  %v4930_v24 = vsel %vm14076_vm9, %v4889_v31, %v4929_v58  ;;  %v5807_v51 = vsel %vm5200_vm14, %v5805_v54, %v5806_v9  ;;  %v12958_v54 = vld [vmem:[%s16936_s4 + $0x130] sm:$0xff]  ;;  %v15542_v41 = vsel %vm1435_vm3, %v9210_v0, %v9212_v17  ;;  %v12938_v58 = vld [vmem:[#allocation2 + $0x68] sm:$0xff] }
 0x384   : > { %v6112_v1 = vsel %vm5200_vm14, %v6110_v40, %v6111_v45  ;;  %4931 = vst [vmem:[#allocation2 + $0x98] sm:$0x3] %v4930_v24  ;;  %v5860_v5 = vadd.f32 %v5807_v51, %v15049_v28  ;;  %v12934_v28 = vld [vmem:[%s16936_s4 + $0xb0] sm:$0xff]  ;;  %9045 = vmatpush.bf16.msrb.mxu3 %v12958_v54  ;;  %v7070_v39 = vor.u32 %v7069_v18, %v7066_v57  ;;  %v7375_v16 = vrot.slane %v7374_v10, 3  ;;  %v12895_v10 = vld [vmem:[#allocation2 + $0x48] sm:$0xff] }
 0x385   : > { %v15522_v36 = vadd.f32 %v6664_v23, %v6476_v34  ;;  %8430 = vmatpush.bf16.msrb.mxu1 %v12934_v28  ;;  %v6823_v48 = vsel %vm1435_vm3, %v6821_v33, %v6822_v37  ;;  %v7081_v51 = vshrl.u32 %v15554_v47, 16 }
 0x386   : > { %v6165_v40 = vadd.f32 %v6112_v1, %v5860_v5  ;;  %v7079_v0 = vsel %vm1837_vm4, %v7070_v39, %v15532_v53  ;;  %v7377_v32 = vsel %vm2077_vm5, %v7375_v16, %v7376_v11  ;;  %v7084_v1 = vshll.u32 %v15554_v47, 16 }
 0x387   : > { %v7083_v33 = vrot.slane %v7081_v51, 2 }
 0x388   : > { %v6361_v14 = vpop.f32.mrf.mxu2  ;;  %v5747_v61 = vpop.f32.mrf.mxu0 }
 0x389   : > { %v6603_v30 = vpop.f32.mrf.mxu3  ;;  %v6423_v35 = vrot.slane %v6361_v14, 5  ;;  %v6052_v20 = vpop.f32.mrf.mxu1  ;;  %v5808_v15 = vrot.slane %v5747_v61, 5  ;;  %v7086_v61 = vrot.slane %v7084_v1, 3 }
 0x38a   : > { %v6665_v26 = vrot.slane %v6603_v30, 5  ;;  %v6113_v60 = vrot.slane %v6052_v20, 5 }
 0x38b   : > { %v6424_v49 = vsel %vm5200_vm14, %v6422_v59, %v6423_v35  ;;  %v5809_v34 = vsel %vm5200_vm14, %v5806_v9, %v5808_v15  ;;  %6905 = vmatmul.bf16.vlgmr.msra.gmra.mxu0 %v6823_v48 }
 0x38c   : > { %v6666_v12 = vsel %vm5200_vm14, %v6664_v23, %v6665_v26  ;;  %v6477_v31 = vadd.f32 %v6424_v49, %v6165_v40  ;;  %v6114_v25 = vsel %vm5200_vm14, %v6111_v45, %v6113_v60  ;;  %7217 = vmatmul.bf16.vlgmr.msra.gmra.mxu1 %v7079_v0  ;;  %v5861_v59 = vadd.f32 %v5809_v34, %v15064_v3  ;;  %v15566_v45 = vld [vmem:[#allocation2 + $0x70] sm:$0xff] }
 0x38d   : > { %7459 = vmatmul.bf16.vlgmr.msra.gmra.mxu2 %v7377_v32  ;;  %v9214_v23 = vrot.slane %v12938_v58, 2  ;;  %v9216_v16 = vrot.slane %v15566_v45, 2  ;;  %v6824_v49 = vrot.slane %v15554_v47, 2  ;;  %v7378_v0 = vrot.slane %v15554_v47, 3 }
 0x38e   : > { %7835 = vmatmul.bf16.vlgmr.msra.gmra.mxu3 %v12895_v10  ;;  %v15559_v13 = vadd.f32 %v6666_v12, %v6477_v31  ;;  %v6166_v24 = vadd.f32 %v6114_v25, %v5861_v59  ;;  %v15580_v12 = vor.u32 %v7086_v61, %v7083_v33 }
 0x38f   : > { %v15564_v5 = vsel %vm1435_vm3, %v9212_v17, %v9214_v23  ;;  %v15595_v31 = vsel %vm1435_vm3, %v9214_v23, %v9216_v16 }
 0x390   : > { %v6364_v9 = vpop.f32.mrf.mxu2  ;;  %v5749_v3 = vpop.f32.mrf.mxu0 }
 0x391   : > { %v6606_v57 = vpop.f32.mrf.mxu3  ;;  %v6425_v18 = vrot.slane %v6364_v9, 5  ;;  %v6054_v54 = vpop.f32.mrf.mxu1  ;;  %v5810_v40 = vrot.slane %v5749_v3, 5  ;;  %v6825_v9 = vsel %vm1435_vm3, %v6822_v37, %v6824_v49  ;;  %v7088_v3 = vsel %vm1837_vm4, %v15532_v53, %v15580_v12 }
 0x392   : > { %v6667_v21 = vrot.slane %v6606_v57, 5  ;;  %v6115_v28 = vrot.slane %v6054_v54, 5  ;;  %v7379_v54 = vsel %vm2077_vm5, %v7376_v11, %v7378_v0 }
 0x393   : > { %v6426_v14 = vsel %vm5200_vm14, %v6423_v35, %v6425_v18  ;;  %v5811_v17 = vsel %vm5200_vm14, %v5808_v15, %v5810_v40  ;;  %v12949_v35 = vld [vmem:[%s16936_s4 + $0xe8] sm:$0xff] }
 0x394   : > { %v6668_v30 = vsel %vm5200_vm14, %v6665_v26, %v6667_v21  ;;  %v6478_v20 = vadd.f32 %v6426_v14, %v6166_v24  ;;  %v6116_v39 = vsel %vm5200_vm14, %v6113_v60, %v6115_v28  ;;  %v5862_v58 = vadd.f32 %v5811_v17, %v15098_v8  ;;  %v12925_v15 = vld [vmem:[%s16936_s4 + $0x68] sm:$0xff]  ;;  %8735 = vmatpush.bf16.msrb.mxu2 %v12949_v35  ;;  %v12896_v14 = vld [vmem:[#allocation2 + $0x50] sm:$0xff] }
 0x395   : > { %v12957_v8 = vld [vmem:[%s16936_s4 + $0x128] sm:$0xff]  ;;  %8190 = vmatpush.bf16.msrb.mxu0 %v12925_v15 }
 0x396   : > { %v15574_v48 = vadd.f32 %v6668_v30, %v6478_v20  ;;  %v6167_v26 = vadd.f32 %v6116_v39, %v5862_v58  ;;  %v12933_v60 = vld [vmem:[%s16936_s4 + $0xa8] sm:$0xff]  ;;  %9046 = vmatpush.bf16.msrb.mxu3 %v12957_v8  ;;  %v15621_v39 = vld [vmem:[#allocation2 + $0x78] sm:$0xff] }
 0x397   : > { %8431 = vmatpush.bf16.msrb.mxu1 %v12933_v60  ;;  %v15612_v30 = vld [vmem:[#allocation2 + $0x28] sm:$0xff] }
 0x398   : > { %v6366_v32 = vpop.f32.mrf.mxu2  ;;  %v5752_v59 = vpop.f32.mrf.mxu0  ;;  %v7090_v56 = vshrl.u32 %v15612_v30, 16  ;;  %v7093_v11 = vshll.u32 %v15612_v30, 16 }
 0x399   : > { %v6608_v10 = vpop.f32.mrf.mxu3  ;;  %v6427_v34 = vrot.slane %v6366_v32, 5  ;;  %v6057_v24 = vpop.f32.mrf.mxu1  ;;  %v5812_v51 = vrot.slane %v5752_v59, 5 }
 0x39a   : > { %v6669_v25 = vrot.slane %v6608_v10, 5  ;;  %v6117_v1 = vrot.slane %v6057_v24, 5  ;;  %v7092_v60 = vrot.slane %v7090_v56, 2  ;;  %v7095_v32 = vrot.slane %v7093_v11, 3 }
 0x39b   : > { %v6428_v57 = vsel %vm5200_vm14, %v6425_v18, %v6427_v34  ;;  %v5813_v37 = vsel %vm5200_vm14, %v5810_v40, %v5812_v51  ;;  %6910 = vmatmul.bf16.gmra.mxu0 %v6825_v9  ;;  %v9218_v9 = vrot.slane %v15621_v39, 2 }
 0x39c   : > { %v6670_v23 = vsel %vm5200_vm14, %v6667_v21, %v6669_v25  ;;  %v6479_v33 = vadd.f32 %v6428_v57, %v6167_v26  ;;  %v6118_v18 = vsel %vm5200_vm14, %v6115_v28, %v6117_v1  ;;  %7222 = vmatmul.bf16.gmra.mxu1 %v7088_v3  ;;  %v5863_v21 = vadd.f32 %v5813_v37, %v15119_v63  ;;  %v12932_v37 = vld [vmem:[%s16936_s4 + $0xa0] sm:$0xff] }
 0x39d   : > { %7464 = vmatmul.bf16.gmra.mxu2 %v7379_v54  ;;  %v6826_v3 = vrot.slane %v15612_v30, 2  ;;  %8432 = vmatpush.bf16.msrb.mxu1 %v12932_v37 }
 0x39e   : > { %7840 = vmatmul.bf16.gmra.mxu3 %v12896_v14  ;;  %v15617_v53 = vadd.f32 %v6670_v23, %v6479_v33  ;;  %v6168_v61 = vadd.f32 %v6118_v18, %v5863_v21  ;;  %v15632_v14 = vor.u32 %v7095_v32, %v7092_v60  ;;  %v15652_v18 = vsel %vm1435_vm3, %v9216_v16, %v9218_v9  ;;  %v15669_v60 = vld [vmem:[#allocation2 + $0x30] sm:$0xff] }
 0x39f   : > { %v7099_v47 = vshrl.u32 %v15669_v60, 16 }
 0x3a0   : > { %v6369_v20 = vpop.f32.mrf.mxu2  ;;  %v5754_v28 = vpop.f32.mrf.mxu0 }
 0x3a1   : > { %v6611_v17 = vpop.f32.mrf.mxu3  ;;  %v6429_v40 = vrot.slane %v6369_v20, 5  ;;  %v6059_v35 = vpop.f32.mrf.mxu1  ;;  %v5814_v26 = vrot.slane %v5754_v28, 5  ;;  %v6827_v28 = vsel %vm1435_vm3, %v6824_v49, %v6826_v3 }
 0x3a2   : > { %v6671_v58 = vrot.slane %v6611_v17, 5  ;;  %v6119_v15 = vrot.slane %v6059_v35, 5  ;;  %v7097_v35 = vsel %vm1837_vm4, %v15580_v12, %v15632_v14 }
 0x3a3   : > { %v6430_v63 = vsel %vm5200_vm14, %v6427_v34, %v6429_v40  ;;  %v5815_v59 = vsel %vm5200_vm14, %v5812_v51, %v5814_v26  ;;  %v7380_v34 = vrot.slane %v15612_v30, 3  ;;  %v12924_v51 = vld [vmem:[%s16936_s4 + $0x60] sm:$0xff] }
 0x3a4   : > { %v6672_v8 = vsel %vm5200_vm14, %v6669_v25, %v6671_v58  ;;  %v6480_v10 = vadd.f32 %v6430_v63, %v6168_v61  ;;  %v6120_v24 = vsel %vm5200_vm14, %v6117_v1, %v6119_v15  ;;  %v5864_v57 = vadd.f32 %v5815_v59, %v15150_v4  ;;  %v12948_v25 = vld [vmem:[%s16936_s4 + $0xe0] sm:$0xff]  ;;  %8191 = vmatpush.bf16.msrb.mxu0 %v12924_v51 }
 0x3a5   : > { %v12956_v4 = vld [vmem:[%s16936_s4 + $0x120] sm:$0xff]  ;;  %8736 = vmatpush.bf16.msrb.mxu2 %v12948_v25  ;;  %v7381_v63 = vsel %vm2077_vm5, %v7378_v0, %v7380_v34  ;;  %v7102_v0 = vshll.u32 %v15669_v60, 16 }
 0x3a6   : > { %v15629_v23 = vadd.f32 %v6672_v8, %v6480_v10  ;;  %v6169_v54 = vadd.f32 %v6120_v24, %v5864_v57  ;;  %9047 = vmatpush.bf16.msrb.mxu3 %v12956_v4  ;;  %v12897_v8 = vld [vmem:[#allocation2 + $0x58] sm:$0xff] }
 0x3a8   : > { %v6371_v1 = vpop.f32.mrf.mxu2  ;;  %v5757_v56 = vpop.f32.mrf.mxu0 }
 0x3a9   : > { %v6613_v33 = vpop.f32.mrf.mxu3  ;;  %v6431_v21 = vrot.slane %v6371_v1, 5  ;;  %v6062_v11 = vpop.f32.mrf.mxu1  ;;  %v5816_v20 = vrot.slane %v5757_v56, 5  ;;  %v7101_v1 = vrot.slane %v7099_v47, 2 }
 0x3aa   : > { %v6673_v61 = vrot.slane %v6613_v33, 5  ;;  %v6121_v17 = vrot.slane %v6062_v11, 5  ;;  %v7104_v33 = vrot.slane %v7102_v0, 3 }
 0x3ab   : > { %v6432_v45 = vsel %vm5200_vm14, %v6429_v40, %v6431_v21  ;;  %v5817_v32 = vsel %vm5200_vm14, %v5814_v26, %v5816_v20  ;;  %6915 = vmatmul.bf16.gmra.mxu0 %v6827_v28 }
 0x3ac   : > { %v6674_v16 = vsel %vm5200_vm14, %v6671_v58, %v6673_v61  ;;  %v6481_v49 = vadd.f32 %v6432_v45, %v6169_v54  ;;  %v6122_v40 = vsel %vm5200_vm14, %v6119_v15, %v6121_v17  ;;  %7227 = vmatmul.bf16.gmra.mxu1 %v7097_v35  ;;  %v5865_v58 = vadd.f32 %v5817_v32, %v15174_v2  ;;  %v12941_v45 = vld [vmem:[#allocation2 + $0x80] sm:$0xff] }
 0x3ad   : > { %7469 = vmatmul.bf16.gmra.mxu2 %v7381_v63  ;;  %v6828_v35 = vrot.slane %v15669_v60, 2  ;;  %v9220_v47 = vrot.slane %v12941_v45, 2 }
 0x3ae   : > { %7845 = vmatmul.bf16.gmra.mxu3 %v12897_v8  ;;  %v15674_v12 = vadd.f32 %v6674_v16, %v6481_v49  ;;  %v6170_v10 = vadd.f32 %v6122_v40, %v5865_v58  ;;  %v15686_v8 = vor.u32 %v7104_v33, %v7101_v1  ;;  %v12898_v1 = vld [vmem:[#allocation2 + $0x60] sm:$0xff]  ;;  %v15713_v33 = vld [vmem:[#allocation2 + $0x38] sm:$0xff] }
 0x3af   : > { %v15723_v30 = vsel %vm1435_vm3, %v9218_v9, %v9220_v47 }
 0x3b0   : > { %v6374_v59 = vpop.f32.mrf.mxu2  ;;  %v5759_v26 = vpop.f32.mrf.mxu0 }
 0x3b1   : > { %v6616_v24 = vpop.f32.mrf.mxu3  ;;  %v6433_v57 = vrot.slane %v6374_v59, 5  ;;  %v6064_v25 = vpop.f32.mrf.mxu1  ;;  %v5818_v15 = vrot.slane %v5759_v26, 5 }
 0x3b2   : > { %v6675_v54 = vrot.slane %v6616_v24, 5  ;;  %v6123_v51 = vrot.slane %v6064_v25, 5  ;;  %v6829_v24 = vsel %vm1435_vm3, %v6826_v3, %v6828_v35 }
 0x3b3   : > { %v6434_v4 = vsel %vm5200_vm14, %v6431_v21, %v6433_v57  ;;  %v5819_v56 = vsel %vm5200_vm14, %v5816_v20, %v5818_v15  ;;  %v7382_v21 = vrot.slane %v15669_v60, 3  ;;  %v12923_v20 = vld [vmem:[%s16936_s4 + $0x58] sm:$0xff]  ;;  %v12922_v60 = vld [vmem:[%s16936_s4 + $0x50] sm:$0xff] }
 0x3b4   : > { %v6676_v2 = vsel %vm5200_vm14, %v6673_v61, %v6675_v54  ;;  %v6482_v37 = vadd.f32 %v6434_v4, %v6170_v10  ;;  %v6124_v11 = vsel %vm5200_vm14, %v6121_v17, %v6123_v51  ;;  %v5866_v28 = vadd.f32 %v5819_v56, %v15205_v62  ;;  %v12947_v61 = vld [vmem:[%s16936_s4 + $0xd8] sm:$0xff]  ;;  %8192 = vmatpush.bf16.msrb.mxu0 %v12923_v20 }
 0x3b5   : > { %v12955_v62 = vld [vmem:[%s16936_s4 + $0x118] sm:$0xff]  ;;  %8737 = vmatpush.bf16.msrb.mxu2 %v12947_v61  ;;  %v7106_v4 = vsel %vm1837_vm4, %v15632_v14, %v15686_v8  ;;  %v15718_v14 = vld [vmem:[#allocation2 + $0x88] sm:$0xff]  ;;  %v7108_v56 = vshrl.u32 %v15713_v33, 16 }
 0x3b6   : > { %v15683_v16 = vadd.f32 %v6676_v2, %v6482_v37  ;;  %v6171_v63 = vadd.f32 %v6124_v11, %v5866_v28  ;;  %9048 = vmatpush.bf16.msrb.mxu3 %v12955_v62  ;;  %v7383_v2 = vsel %vm2077_vm5, %v7380_v34, %v7382_v21  ;;  %v9222_v9 = vrot.slane %v15718_v14, 2 }
 0x3b8   : > { %v6376_v17 = vpop.f32.mrf.mxu2  ;;  %v5762_v58 = vpop.f32.mrf.mxu0  ;;  %8193 = vmatpush.bf16.msrb.mxu0 %v12922_v60 }
 0x3b9   : > { %v6618_v49 = vpop.f32.mrf.mxu3  ;;  %v6435_v32 = vrot.slane %v6376_v17, 5  ;;  %v6067_v10 = vpop.f32.mrf.mxu1  ;;  %v5820_v0 = vrot.slane %v5762_v58, 5  ;;  %v7110_v58 = vrot.slane %v7108_v56, 2 }
 0x3ba   : > { %v6677_v40 = vrot.slane %v6618_v49, 5  ;;  %v6125_v59 = vrot.slane %v6067_v10, 5 }
 0x3bb   : > { %v6436_v26 = vsel %vm5200_vm14, %v6433_v57, %v6435_v32  ;;  %v5821_v3 = vsel %vm5200_vm14, %v5818_v15, %v5820_v0  ;;  %6920 = vmatmul.bf16.gmra.mxu0 %v6829_v24  ;;  %v12931_v15 = vld [vmem:[%s16936_s4 + $0x98] sm:$0xff] }
 0x3bc   : > { %v6678_v25 = vsel %vm5200_vm14, %v6675_v54, %v6677_v40  ;;  %v6483_v37 = vadd.f32 %v6436_v26, %v6171_v63  ;;  %v6126_v57 = vsel %vm5200_vm14, %v6123_v51, %v6125_v59  ;;  %7232 = vmatmul.bf16.gmra.mxu1 %v7106_v4  ;;  %v5867_v54 = vadd.f32 %v5821_v3, %v15229_v19 }
 0x3bd   : > { %7474 = vmatmul.bf16.gmra.mxu2 %v7383_v2  ;;  %v7111_v19 = vshll.u32 %v15713_v33, 16  ;;  %8433 = vmatpush.bf16.msrb.mxu1 %v12931_v15  ;;  %v15740_v4 = vsel %vm1435_vm3, %v9220_v47, %v9222_v9  ;;  %v7384_v3 = vrot.slane %v15713_v33, 3 }
 0x3be   : > { %7850 = vmatmul.bf16.gmra.mxu3 %v12898_v1  ;;  %v15725_v34 = vadd.f32 %v6678_v25, %v6483_v37  ;;  %v6172_v51 = vadd.f32 %v6126_v57, %v5867_v54 }
 0x3bf   : > { %v7113_v10 = vrot.slane %v7111_v19, 3 }
 0x3c0   : > { %v6379_v11 = vpop.f32.mrf.mxu2  ;;  %v5764_v39 = vpop.f32.mrf.mxu0 }
 0x3c1   : > { %v6621_v28 = vpop.f32.mrf.mxu3  ;;  %v6437_v45 = vrot.slane %v6379_v11, 5  ;;  %v6069_v61 = vpop.f32.mrf.mxu1  ;;  %v5822_v20 = vrot.slane %v5764_v39, 5 }
 0x3c2   : > { %v6679_v63 = vrot.slane %v6621_v28, 5  ;;  %v6127_v62 = vrot.slane %v6069_v61, 5  ;;  %v7385_v61 = vsel %vm2077_vm5, %v7382_v21, %v7384_v3  ;;  %v12954_v21 = vld [vmem:[%s16936_s4 + $0x110] sm:$0xff] }
 0x3c3   : > { %v6438_v17 = vsel %vm5200_vm14, %v6435_v32, %v6437_v45  ;;  %v5823_v26 = vsel %vm5200_vm14, %v5820_v0, %v5822_v20  ;;  %v6830_v32 = vrot.slane %v15713_v33, 2  ;;  %v12946_v0 = vld [vmem:[%s16936_s4 + $0xd0] sm:$0xff]  ;;  %9049 = vmatpush.bf16.msrb.mxu3 %v12954_v21  ;;  %v12945_v33 = vld [vmem:[%s16936_s4 + $0xc8] sm:$0xff] }
 0x3c4   : > { %v6680_v49 = vsel %vm5200_vm14, %v6677_v40, %v6679_v63  ;;  %v6484_v24 = vadd.f32 %v6438_v17, %v6172_v51  ;;  %v6128_v25 = vsel %vm5200_vm14, %v6125_v59, %v6127_v62  ;;  %v5868_v2 = vadd.f32 %v5823_v26, %v15260_v38  ;;  %8738 = vmatpush.bf16.msrb.mxu2 %v12946_v0  ;;  %v12899_v17 = vld [vmem:[#allocation2 + $0x68] sm:$0xff] }
 0x3c5   : > { %v15746_v40 = vor.u32 %v7113_v10, %v7110_v58  ;;  %v6831_v19 = vsel %vm1435_vm3, %v6828_v35, %v6830_v32  ;;  %v8878_v58 = vld [vmem:[#allocation2 + $0x98] sm:$0x3] }
 0x3c6   : > { %v15743_v1 = vadd.f32 %v6680_v49, %v6484_v24  ;;  %v6173_v37 = vadd.f32 %v6128_v25, %v5868_v2  ;;  %v15767_v49 = vld [vmem:[#allocation2 + $0x40] sm:$0xff] }
 0x3c7   : > { %v7115_v39 = vsel %vm1837_vm4, %v15686_v8, %v15746_v40  ;;  %v12943_v8 = vld [vmem:[#allocation2 + $0x90] sm:$0xff]  ;;  %v7120_v25 = vshll.u32 %v15767_v49, 16 }
 0x3c8   : > { %v6381_v59 = vpop.f32.mrf.mxu2  ;;  %v5767_v15 = vpop.f32.mrf.mxu0  ;;  %8739 = vmatpush.bf16.msrb.mxu2 %v12945_v33 }
 0x3c9   : > { %v6623_v57 = vpop.f32.mrf.mxu3  ;;  %v6439_v54 = vrot.slane %v6381_v59, 5  ;;  %v6072_v51 = vpop.f32.mrf.mxu1  ;;  %v5824_v38 = vrot.slane %v5767_v15, 5 }
 0x3ca   : > { %v6681_v47 = vrot.slane %v6623_v57, 5  ;;  %v6129_v56 = vrot.slane %v6072_v51, 5  ;;  %v9224_v51 = vrot.slane %v12943_v8, 2 }
 0x3cb   : > { %v6440_v11 = vsel %vm5200_vm14, %v6437_v45, %v6439_v54  ;;  %v5825_v35 = vsel %vm5200_vm14, %v5822_v20, %v5824_v38  ;;  %6925 = vmatmul.bf16.gmra.mxu0 %v6831_v19  ;;  %v8896_v20 = vunpack.c.l.b16 %v8878_v58  ;;  %v7122_v58 = vrot.slane %v7120_v25, 3 }
 0x3cc   : > { %v6682_v28 = vsel %vm5200_vm14, %v6679_v63, %v6681_v47  ;;  %v6485_v10 = vadd.f32 %v6440_v11, %v6173_v37  ;;  %v6130_v45 = vsel %vm5200_vm14, %v6127_v62, %v6129_v56  ;;  %7237 = vmatmul.bf16.gmra.mxu1 %v7115_v39  ;;  %v5869_v63 = vadd.f32 %v5825_v35, %v15281_v29  ;;  %v12930_v29 = vld [vmem:[%s16936_s4 + $0x90] sm:$0xff] }
 0x3cd   : > { %7479 = vmatmul.bf16.gmra.mxu2 %v7385_v61  ;;  %v7117_v62 = vshrl.u32 %v15767_v49, 16  ;;  %8434 = vmatpush.bf16.msrb.mxu1 %v12930_v29 }
 0x3ce   : > { %7855 = vmatmul.bf16.gmra.mxu3 %v12899_v17  ;;  %v15772_v24 = vadd.f32 %v6682_v28, %v6485_v10  ;;  %v6174_v26 = vadd.f32 %v6130_v45, %v5869_v63  ;;  %v15785_v28 = vpack.c.b16 %v8896_v20, %v8896_v20  ;;  %v15794_v63 = vsel %vm1435_vm3, %v9222_v9, %v9224_v51 }
 0x3cf   : > { %v7119_v17 = vrot.slane %v7117_v62, 2 }
 0x3d0   : > { %v6384_v2 = vpop.f32.mrf.mxu2  ;;  %v5769_v57 = vpop.f32.mrf.mxu0 }
 0x3d1   : > { %v6626_v37 = vpop.f32.mrf.mxu3  ;;  %v6441_v0 = vrot.slane %v6384_v2, 5  ;;  %v6074_v15 = vpop.f32.mrf.mxu1  ;;  %v5826_v19 = vrot.slane %v5769_v57, 5  ;;  %v15801_v20 = vor.u32 %v7122_v58, %v7119_v17  ;;  %v15822_v17 = vld [vmem:[#allocation2 + $0x48] sm:$0xff] }
 0x3d2   : > { %v6683_v59 = vrot.slane %v6626_v37, 5  ;;  %v6131_v11 = vrot.slane %v6074_v15, 5 }
 0x3d3   : > { %v6442_v39 = vsel %vm5200_vm14, %v6439_v54, %v6441_v0  ;;  %v5827_v35 = vsel %vm5200_vm14, %v5824_v38, %v5826_v19  ;;  %v6832_v54 = vrot.slane %v15767_v49, 2  ;;  %v7386_v38 = vrot.slane %v15767_v49, 3  ;;  %v12944_v49 = vld [vmem:[%s16936_s4 + $0xc0] sm:$0xff] }
 0x3d4   : > { %v6684_v61 = vsel %vm5200_vm14, %v6681_v47, %v6683_v59  ;;  %v6486_v10 = vadd.f32 %v6442_v39, %v6174_v26  ;;  %v6132_v45 = vsel %vm5200_vm14, %v6129_v56, %v6131_v11  ;;  %v5870_v8 = vadd.f32 %v5827_v35, %v15316_v42  ;;  %8740 = vmatpush.bf16.msrb.mxu2 %v12944_v49 }
 0x3d5   : > { %v9226_v47 = vrot.slane %v15785_v28, 2  ;;  %v6833_v37 = vsel %vm1435_vm3, %v6830_v32, %v6832_v54  ;;  %v7387_v39 = vsel %vm2077_vm5, %v7384_v3, %v7386_v38  ;;  %v7129_v35 = vshll.u32 %v15822_v17, 16 }
 0x3d6   : > { %v15797_v60 = vadd.f32 %v6684_v61, %v6486_v10  ;;  %v6175_v21 = vadd.f32 %v6132_v45, %v5870_v8  ;;  %v12900_v61 = vld [vmem:[#allocation2 + $0x70] sm:$0xff]  ;;  %v7126_v10 = vshrl.u32 %v15822_v17, 16 }
 0x3d7   : > { %v15805_v14 = vsel %vm1435_vm3, %v9224_v51, %v9226_v47  ;;  %v7124_v51 = vsel %vm1837_vm4, %v15746_v40, %v15801_v20 }
 0x3d8   : > { %v6386_v26 = vpop.f32.mrf.mxu2  ;;  %v5772_v25 = vpop.f32.mrf.mxu0 }
 0x3d9   : > { %v6628_v56 = vpop.f32.mrf.mxu3  ;;  %v6443_v9 = vrot.slane %v6386_v26, 5  ;;  %v6077_v42 = vpop.f32.mrf.mxu1  ;;  %v5828_v29 = vrot.slane %v5772_v25, 5 }
 0x3da   : > { %v6685_v62 = vrot.slane %v6628_v56, 5  ;;  %v6133_v2 = vrot.slane %v6077_v42, 5 }
 0x3db   : > { %v6444_v57 = vsel %vm5200_vm14, %v6441_v0, %v6443_v9  ;;  %v5829_v32 = vsel %vm5200_vm14, %v5826_v19, %v5828_v29  ;;  %6930 = vmatmul.bf16.gmra.mxu0 %v6833_v37  ;;  %v12921_v19 = vld [vmem:[%s16936_s4 + $0x48] sm:$0xff] }
 0x3dc   : > { %v6686_v15 = vsel %vm5200_vm14, %v6683_v59, %v6685_v62  ;;  %v6487_v58 = vadd.f32 %v6444_v57, %v6175_v21  ;;  %v6134_v0 = vsel %vm5200_vm14, %v6131_v11, %v6133_v2  ;;  %7242 = vmatmul.bf16.gmra.mxu1 %v7124_v51  ;;  %v5871_v59 = vadd.f32 %v5829_v32, %v15332_v6  ;;  %v12953_v6 = vld [vmem:[%s16936_s4 + $0x108] sm:$0xff] }
 0x3dd   : > { %7484 = vmatmul.bf16.gmra.mxu2 %v7387_v39  ;;  %v12929_v11 = vld [vmem:[%s16936_s4 + $0x88] sm:$0xff]  ;;  %8194 = vmatpush.bf16.msrb.mxu0 %v12921_v19  ;;  %v7131_v51 = vrot.slane %v7129_v35, 3 }
 0x3de   : > { %7860 = vmatmul.bf16.gmra.mxu3 %v12900_v61  ;;  %v15827_v40 = vadd.f32 %v6686_v15, %v6487_v58  ;;  %v6176_v3 = vadd.f32 %v6134_v0, %v5871_v59  ;;  %8435 = vmatpush.bf16.msrb.mxu1 %v12929_v11  ;;  %v7128_v15 = vrot.slane %v7126_v10, 2  ;;  %v6834_v59 = vrot.slane %v15822_v17, 2 }
 0x3df   : > { %9050 = vmatpush.bf16.msrb.mxu3 %v12953_v6 }
 0x3e0   : > { %v6389_v45 = vpop.f32.mrf.mxu2  ;;  %v5774_v26 = vpop.f32.mrf.mxu0  ;;  %v15851_v19 = vor.u32 %v7131_v51, %v7128_v15 }
 0x3e1   : > { %v6631_v8 = vpop.f32.mrf.mxu3  ;;  %v6445_v47 = vrot.slane %v6389_v45, 5  ;;  %v6079_v56 = vpop.f32.mrf.mxu1  ;;  %v5830_v25 = vrot.slane %v5774_v26, 5 }
 0x3e2   : > { %v6687_v21 = vrot.slane %v6631_v8, 5  ;;  %v6135_v42 = vrot.slane %v6079_v56, 5  ;;  %v7133_v26 = vsel %vm1837_vm4, %v15801_v20, %v15851_v19 }
 0x3e3   : > { %v6446_v37 = vsel %vm5200_vm14, %v6443_v9, %v6445_v47  ;;  %v5831_v61 = vsel %vm5200_vm14, %v5828_v29, %v5830_v25  ;;  %v7388_v9 = vrot.slane %v15822_v17, 3 }
 0x3e4   : > { %v6688_v57 = vsel %vm5200_vm14, %v6685_v62, %v6687_v21  ;;  %v6488_v39 = vadd.f32 %v6446_v37, %v6176_v3  ;;  %v6136_v58 = vsel %vm5200_vm14, %v6133_v2, %v6135_v42  ;;  %v5872_v32 = vadd.f32 %v5831_v61, %v15390_v55  ;;  %v12901_v37 = vld [vmem:[#allocation2 + $0x78] sm:$0xff] }
 0x3e5   : > { %v6835_v55 = vsel %vm1435_vm3, %v6832_v54, %v6834_v59  ;;  %v7389_v56 = vsel %vm2077_vm5, %v7386_v38, %v7388_v9  ;;  %v12920_v38 = vld [vmem:[%s16936_s4 + $0x40] sm:$0xff] }
 0x3e6   : > { %v15848_v0 = vadd.f32 %v6688_v57, %v6488_v39  ;;  %v6177_v33 = vadd.f32 %v6136_v58, %v5872_v32  ;;  %v15869_v57 = vld [vmem:[#allocation2 + $0x50] sm:$0xff]  ;;  %v12928_v39 = vld [vmem:[%s16936_s4 + $0x80] sm:$0xff]  ;;  %8195 = vmatpush.bf16.msrb.mxu0 %v12920_v38 }
 0x3e7   : > { %v7135_v51 = vshrl.u32 %v15869_v57, 16  ;;  %8436 = vmatpush.bf16.msrb.mxu1 %v12928_v39  ;;  %v6836_v49 = vrot.slane %v15869_v57, 2  ;;  %v7390_v38 = vrot.slane %v15869_v57, 3 }
 0x3e8   : > { %v6391_v6 = vpop.f32.mrf.mxu2  ;;  %v5777_v3 = vpop.f32.mrf.mxu0 }
 0x3e9   : > { %v6633_v62 = vpop.f32.mrf.mxu3  ;;  %v6447_v10 = vrot.slane %v6391_v6, 5  ;;  %v6082_v11 = vpop.f32.mrf.mxu1  ;;  %v5832_v29 = vrot.slane %v5777_v3, 5 }
 0x3ea   : > { %v6689_v35 = vrot.slane %v6633_v62, 5  ;;  %v6137_v45 = vrot.slane %v6082_v11, 5 }
 0x3eb   : > { %v6448_v2 = vsel %vm5200_vm14, %v6445_v47, %v6447_v10  ;;  %v5833_v54 = vsel %vm5200_vm14, %v5830_v25, %v5832_v29  ;;  %6935 = vmatmul.bf16.gmra.mxu0 %v6835_v55  ;;  %v12952_v25 = vld [vmem:[%s16936_s4 + $0x100] sm:$0xff] }
 0x3ec   : > { %v6690_v8 = vsel %vm5200_vm14, %v6687_v21, %v6689_v35  ;;  %v6489_v15 = vadd.f32 %v6448_v2, %v6177_v33  ;;  %v6138_v47 = vsel %vm5200_vm14, %v6135_v42, %v6137_v45  ;;  %7247 = vmatmul.bf16.gmra.mxu1 %v7133_v26  ;;  %v5873_v21 = vadd.f32 %v5833_v54, %v15416_v22  ;;  %v7042_v54 = vld [vmem:[#allocation2 + $0x58] sm:$0x7] }
 0x3ed   : > { %7489 = vmatmul.bf16.gmra.mxu2 %v7389_v56  ;;  %v7138_v22 = vshll.u32 %v15869_v57, 16  ;;  %9051 = vmatpush.bf16.msrb.mxu3 %v12952_v25 }
 0x3ee   : > { %7865 = vmatmul.bf16.gmra.mxu3 %v12901_v37  ;;  %v15874_v20 = vadd.f32 %v6690_v8, %v6489_v15  ;;  %v6178_v42 = vadd.f32 %v6138_v47, %v5873_v21  ;;  %v7137_v8 = vrot.slane %v7135_v51, 2 }
 0x3ef   : > { %v7140_v26 = vrot.slane %v7138_v22, 3 }
 0x3f0   : > { %v6394_v61 = vpop.f32.mrf.mxu2  ;;  %v5779_v6 = vpop.f32.mrf.mxu0 }
 0x3f1   : > { %v6636_v58 = vpop.f32.mrf.mxu3  ;;  %v6449_v32 = vrot.slane %v6394_v61, 5  ;;  %v6084_v62 = vpop.f32.mrf.mxu1  ;;  %v5834_v3 = vrot.slane %v5779_v6, 5  ;;  %v7391_v6 = vsel %vm2077_vm5, %v7388_v9, %v7390_v38 }
 0x3f2   : > { %v6691_v33 = vrot.slane %v6636_v58, 5  ;;  %v6139_v11 = vrot.slane %v6084_v62, 5 }
 0x3f3   : > { %v6450_v55 = vsel %vm5200_vm14, %v6447_v10, %v6449_v32  ;;  %v5835_v37 = vsel %vm5200_vm14, %v5832_v29, %v5834_v3  ;;  %v15899_v10 = vor.u32 %v7140_v26, %v7137_v8  ;;  %v12902_v8 = vld [vmem:[#allocation2 + $0x80] sm:$0xff]  ;;  %v6755_v26 = vld [vmem:[#allocation2 + $0x58] sm:$0x3] }
 0x3f4   : > { %v6692_v2 = vsel %vm5200_vm14, %v6689_v35, %v6691_v33  ;;  %v6490_v56 = vadd.f32 %v6450_v55, %v6178_v42  ;;  %v6140_v15 = vsel %vm5200_vm14, %v6137_v45, %v6139_v11  ;;  %v5874_v47 = vadd.f32 %v5835_v37, %v15454_v52 }
 0x3f5   : > { %v7061_v35 = vunpack.c.l.b16 %v7042_v54  ;;  %v6837_v52 = vsel %vm1435_vm3, %v6834_v59, %v6836_v49 }
 0x3f6   : > { %v15895_v21 = vadd.f32 %v6692_v2, %v6490_v56  ;;  %v6179_v25 = vadd.f32 %v6140_v15, %v5874_v47  ;;  %v7142_v2 = vsel %vm1837_vm4, %v15851_v19, %v15899_v10 }
 0x3f7   : > { %v15916_v56 = vpack.c.b16 %v7061_v35, %v7061_v35 }
 0x3f8   : > { %v6396_v51 = vpop.f32.mrf.mxu2  ;;  %v5782_v29 = vpop.f32.mrf.mxu0 }
 0x3f9   : > { %v6638_v22 = vpop.f32.mrf.mxu3  ;;  %v6451_v42 = vrot.slane %v6396_v51, 5  ;;  %v6087_v61 = vpop.f32.mrf.mxu1  ;;  %v5836_v45 = vrot.slane %v5782_v29, 5  ;;  %v7144_v19 = vshrl.u32 %v15916_v56, 16  ;;  %v7147_v54 = vshll.u32 %v15916_v56, 16  ;;  %v12999_v29 = vld [vmem:[%s16936_s4 + $0x238] sm:$0xff] }
 0x3fa   : > { %v6693_v39 = vrot.slane %v6638_v22, 5  ;;  %v6141_v58 = vrot.slane %v6087_v61, 5  ;;  %10141 = vmatpush.bf16.msra.mxu3 %v12999_v29 }
 0x3fb   : > { %v6452_v62 = vsel %vm5200_vm14, %v6449_v32, %v6451_v42  ;;  %v5837_v59 = vsel %vm5200_vm14, %v5834_v3, %v5836_v45  ;;  %6940 = vmatmul.bf16.gmra.mxu0 %v6837_v52  ;;  %v6810_v32 = vunpack.c.l.b16 %v6755_v26  ;;  %v12991_v3 = vld [vmem:[%s16936_s4 + $0x1f8] sm:$0xff] }
 0x3fc   : > { %v6694_v55 = vsel %vm5200_vm14, %v6691_v33, %v6693_v39  ;;  %v6491_v37 = vadd.f32 %v6452_v62, %v6179_v25  ;;  %v6142_v15 = vsel %vm5200_vm14, %v6139_v11, %v6141_v58  ;;  %7252 = vmatmul.bf16.gmra.mxu1 %v7142_v2  ;;  %v5875_v17 = vadd.f32 %v5837_v59, %v15476_v43  ;;  %v12967_v43 = vld [vmem:[%s16936_s4 + $0x178] sm:$0xff] }
 0x3fd   : > { %7494 = vmatmul.bf16.gmra.mxu2 %v7391_v6  ;;  %v6820_v6 = vpack.c.b16 %v6810_v32, %v6810_v32  ;;  %9285 = vmatpush.bf16.msra.mxu0 %v12967_v43  ;;  %v7146_v2 = vrot.slane %v7144_v19, 2  ;;  %v7392_v19 = vrot.slane %v15916_v56, 3 }
 0x3fe   : > { %7870 = vmatmul.bf16.gmra.mxu3 %v12902_v8  ;;  %v15921_v9 = vadd.f32 %v6694_v55, %v6491_v37  ;;  %v6180_v33 = vadd.f32 %v6142_v15, %v5875_v17  ;;  %9900 = vmatpush.bf16.msra.mxu2 %v12991_v3  ;;  %v7149_v8 = vrot.slane %v7147_v54, 3 }
 0x400   : > { %v6399_v47 = vpop.f32.mrf.mxu2  ;;  %v5784_v51 = vpop.f32.mrf.mxu0 }
 0x401   : > { %v6641_v25 = vpop.f32.mrf.mxu3  ;;  %v6453_v11 = vrot.slane %v6399_v47, 5  ;;  %v6089_v22 = vpop.f32.mrf.mxu1  ;;  %v5838_v61 = vrot.slane %v5784_v51, 5 }
 0x402   : > { %v6695_v35 = vrot.slane %v6641_v25, 5  ;;  %v6143_v52 = vrot.slane %v6089_v22, 5  ;;  %v6838_v25 = vrot.slane %v6820_v6, 2  ;;  %v8574_v22 = vld [vmem:[#allocation2 + $0x50] sm:$0xe]  ;;  %v12903_v6 = vld [vmem:[#allocation2 + $0x88] sm:$0xff] }
 0x403   : > { %v6454_v62 = vsel %vm5200_vm14, %v6451_v42, %v6453_v11  ;;  %v5839_v37 = vsel %vm5200_vm14, %v5836_v45, %v5838_v61  ;;  %v5877_v59 = vadd.f32 %v5838_v61, %v15500_v44  ;;  %v7150_v42 = vor.u32 %v7149_v8, %v7146_v2  ;;  %v12983_v45 = vld [vmem:[%s16936_s4 + $0x1b8] sm:$0xff] }
 0x404   : > { %v6696_v55 = vsel %vm5200_vm14, %v6693_v39, %v6695_v35  ;;  %v6492_v26 = vadd.f32 %v6454_v62, %v6180_v33  ;;  %v6144_v15 = vsel %vm5200_vm14, %v6141_v58, %v6143_v52  ;;  %v5876_v17 = vadd.f32 %v5839_v37, %v15504_v7  ;;  %9589 = vmatpush.bf16.msra.mxu1 %v12983_v45 }
 0x405   : > { %v6182_v32 = vadd.f32 %v6143_v52, %v5877_v59  ;;  %v6839_v51 = vsel %vm1435_vm3, %v6836_v49, %v6838_v25  ;;  %v7151_v52 = vsel %vm1837_vm4, %v15899_v10, %v7150_v42 }
 0x406   : > { %v15940_v47 = vadd.f32 %v6696_v55, %v6492_v26  ;;  %v6181_v3 = vadd.f32 %v6144_v15, %v5876_v17  ;;  %v7393_v55 = vsel %vm2077_vm5, %v7390_v38, %v7392_v19  ;;  %v15964_v26 = vld [vmem:[#allocation2 + $0x50] sm:$0xff]  ;;  %v13107_v19 = vld [vmem:[#allocation2 + $0x48] sm:$0xf0] }
 0x408   : > { %v6401_v43 = vpop.f32.mrf.mxu2  ;;  %v6906_v54 = vpop.f32.mrf.mxu0 }
 0x409   : > { %v6643_v39 = vpop.f32.mrf.mxu3  ;;  %v6455_v33 = vrot.slane %v6401_v43, 5  ;;  %v15946_v58 = vpop.f32.mrf.mxu1  ;;  %v6969_v7 = vrot.slane %v6906_v54, 5 }
 0x40a   : > { %v6697_v44 = vrot.slane %v6643_v39, 5  ;;  %v7281_v10 = vrot.slane %v15946_v58, 5  ;;  %v8063_v39 = vshll.u32 %v15964_v26, 16 }
 0x40b   : > { %v6456_v29 = vsel %vm5200_vm14, %v6453_v11, %v6455_v33  ;;  %v6494_v61 = vadd.f32 %v6455_v33, %v6182_v32  ;;  %6945 = vmatmul.bf16.gmra.mxu0 %v6839_v51  ;;  %v7023_v2 = vadd.f32 %v6969_v7, %v15522_v36  ;;  %v13106_v11 = vld [vmem:[#allocation2 + $0x48] sm:$0xff]   ;;  %v15973_v36 = vld [vmem:[#allocation2 + $0x58] sm:$0xff]  ;;  %v12990_v32 = vld [vmem:[%s16936_s4 + $0x1f0] sm:$0xff] }
 0x40c   : > { %v6698_v56 = vsel %vm5200_vm14, %v6695_v35, %v6697_v44  ;;  %v6493_v62 = vadd.f32 %v6456_v29, %v6181_v3  ;;  %7257 = vmatmul.bf16.gmra.mxu1 %v7151_v52  ;;  %v8628_v35 = vunpack.c.l.b16 %v8574_v22  ;;  %v8058_v59 = vshll.u32 %v13106_v11, 16  ;;  %9901 = vmatpush.bf16.msra.mxu2 %v12990_v32 }
 0x40d   : > { %v15958_v49 = vadd.f32 %v6697_v44, %v6494_v61  ;;  %7499 = vmatmul.bf16.gmra.mxu2 %v7393_v55  ;;  %v8907_v15 = vshrl.u32 %v15973_v36, 16  ;;  %v8910_v17 = vshll.u32 %v15973_v36, 16  ;;  %v7335_v25 = vadd.f32 %v7281_v10, %v7023_v2  ;;  %v13108_v61 = vld [vmem:[#allocation2 + $0x48] sm:$0xe] }
 0x40e   : > { %7875 = vmatmul.bf16.gmra.mxu3 %v12903_v6  ;;  %v15961_v8 = vadd.f32 %v6698_v56, %v6493_v62  ;;  %v15968_v37 = vpack.c.b16 %v8629_v46, %v8628_v35  ;;  %v8060_v54 = vrot.slane %v8058_v59, 1  ;;  %v8056_v52 = vshrl.u32 %v13106_v11, 16  ;;  %v12998_v11 = vld [vmem:[%s16936_s4 + $0x230] sm:$0xff] }
 0x40f   : > { %v8909_v58 = vrot.slane %v8907_v15, 1  ;;  %v8912_v51 = vrot.slane %v8910_v17, 2  ;;  %v13109_v6 = vor.u32 %v13108_v61, %v13107_v19  ;;  %v15994_v62 = vrot.slane %v8063_v39, 1  ;;  %v12982_v19 = vld [vmem:[%s16936_s4 + $0x1b0] sm:$0xff]  ;;  %10142 = vmatpush.bf16.msra.mxu3 %v12998_v11 }
 0x410   : > { %v7460_v57 = vpop.f32.mrf.mxu2  ;;  %v6908_v50 = vpop.f32.mrf.mxu0  ;;  %v8899_v45 = vshrl.u32 %v15968_v37, 16  ;;  %v8902_v33 = vshll.u32 %v15968_v37, 16  ;;  %v8061_v32 = vor.u32 %v8060_v54, %v8056_v52  ;;  %v8658_v59 = vrot.slane %v15973_v36, 1  ;;  %9590 = vmatpush.bf16.msra.mxu1 %v12982_v19 }
 0x411   : > { %v15971_v38 = vpop.f32.mrf.mxu3  ;;  %v7523_v3 = vrot.slane %v7460_v57, 5  ;;  %v15980_v46 = vpop.f32.mrf.mxu1  ;;  %v6970_v42 = vrot.slane %v6908_v50, 5  ;;  %v15998_v15 = vor.u32 %v8912_v51, %v8909_v58  ;;  %v8657_v54 = vrot.slane %v15968_v37, 1 }
 0x412   : > { %v7282_v29 = vrot.slane %v15980_v46, 5  ;;  %v8901_v55 = vrot.slane %v8899_v45, 1  ;;  %v8904_v2 = vrot.slane %v8902_v33, 2  ;;  %v7899_v17 = vrot.slane %v15971_v38, 5 }
 0x413   : > { %v7577_v43 = vadd.f32 %v7523_v3, %v7335_v25  ;;  %v6971_v44 = vsel %vm5200_vm14, %v6969_v7, %v6970_v42  ;;  %v8354_v7 = vrot.slane %v15964_v26, 1  ;;  %v8066_v51 = vsel %vm566_vm0, %v8061_v32, %v15994_v62  ;;  %v16033_v32 = vld [vmem:[#allocation2 + $0x60] sm:$0xff] }
 0x414   : > { %v7024_v56 = vadd.f32 %v6971_v44, %v15559_v13  ;;  %v12966_v13 = vld [vmem:[%s16936_s4 + $0x170] sm:$0xff]  ;;  %v7283_v25 = vsel %vm5200_vm14, %v7281_v10, %v7282_v29  ;;  %v8353_v44 = vrot.slane %v13109_v6, 1 }
 0x415   : > { %v7596_v22 = vmax.f32 %v7577_v43, 0.0  ;;  %9286 = vmatpush.bf16.msra.mxu0 %v12966_v13  ;;  %v8916_v13 = vshrl.u32 %v16033_v32, 16 }
 0x416   : > { %v7336_v45 = vadd.f32 %v7283_v25, %v7024_v56  ;;  %v8355_v37 = vsel %vm793_vm1, %v8353_v44, %v8354_v7 }
 0x417   : > { %7615 = vst [vmem:[%s15988_s20 - $0x3] sm:$0xf8] %v7596_v22  ;;  %v8905_v22 = vor.u32 %v8904_v2, %v8901_v55 }
 0x418   : > { %v7462_v35 = vpop.f32.mrf.mxu2  ;;  %v6911_v43 = vpop.f32.mrf.mxu0 }
 0x419   : > { %v7838_v57 = vpop.f32.mrf.mxu3  ;;  %v7524_v50 = vrot.slane %v7462_v35, 5  ;;  %v7223_v39 = vpop.f32.mrf.mxu1  ;;  %v6972_v33 = vrot.slane %v6911_v43, 5  ;;  %v8914_v6 = vsel %vm1195_vm2, %v8905_v22, %v15998_v15 }
 0x41a   : > { %v7900_v46 = vrot.slane %v7838_v57, 5  ;;  %v7284_v52 = vrot.slane %v7223_v39, 5 }
 0x41b   : > { %v7525_v58 = vsel %vm5200_vm14, %v7523_v3, %v7524_v50  ;;  %v6973_v56 = vsel %vm5200_vm14, %v6970_v42, %v6972_v33  ;;  %8196 = vmatmul.bf16.vlgmr.msrb.gmra.mxu0 %v8066_v51  ;;  %v8659_v3 = vsel %vm793_vm1, %v8657_v54, %v8658_v59  ;;  %v16030_v42 = vld [vmem:[#allocation2 + $0x58] sm:$0xff] }
 0x41c   : > { %v16016_v10 = vsel %vm5200_vm14, %v7899_v17, %v7900_v46  ;;  %v7578_v61 = vadd.f32 %v7525_v58, %v7336_v45  ;;  %8437 = vmatmul.bf16.vlgmr.msrb.gmra.mxu1 %v8355_v37  ;;  %v7025_v2 = vadd.f32 %v6973_v56, %v15574_v48  ;;  %v7285_v11 = vsel %vm5200_vm14, %v7282_v29, %v7284_v52 }
 0x41d   : > { %8741 = vmatmul.bf16.vlgmr.msrb.gmra.mxu2 %v8659_v3  ;;  %v8919_v45 = vshll.u32 %v16033_v32, 16  ;;  %v8071_v51 = vshll.u32 %v16030_v42, 16  ;;  %v8918_v56 = vrot.slane %v8916_v13, 1 }
 0x41e   : > { %v7597_v55 = vmax.f32 %v7578_v61, 0.0  ;;  %9052 = vmatmul.bf16.vlgmr.msrb.gmra.mxu3 %v8914_v6  ;;  %v7337_v48 = vadd.f32 %v7285_v11, %v7025_v2  ;;  %v8660_v11 = vrot.slane %v16033_v32, 1 }
 0x41f   : > { %v8921_v37 = vrot.slane %v8919_v45, 2  ;;  %v16046_v2 = vrot.slane %v8071_v51, 1  ;;  %v12981_v51 = vld [vmem:[%s16936_s4 + $0x1a8] sm:$0xff] }
 0x420   : > { %7616 = vst [vmem:[%s15988_s20 + $0x5] sm:$0xff] %v7597_v55  ;;  %v7465_v35 = vpop.f32.mrf.mxu2  ;;  %v6913_v39 = vpop.f32.mrf.mxu0  ;;  %v8067_v55 = vshrl.u32 %v15964_v26, 16  ;;  %9591 = vmatpush.bf16.msra.mxu1 %v12981_v51  ;;  %v16088_v26 = vld [vmem:[#allocation2 + $0x60] sm:$0xff] }
 0x421   : > { %v7841_v57 = vpop.f32.mrf.mxu3  ;;  %v7526_v25 = vrot.slane %v7465_v35, 5  ;;  %v7225_v19 = vpop.f32.mrf.mxu1  ;;  %v6974_v44 = vrot.slane %v6913_v39, 5 }
 0x422   : > { %v7902_v43 = vrot.slane %v7841_v57, 5  ;;  %v7286_v29 = vrot.slane %v7225_v19, 5  ;;  %v8356_v57 = vrot.slane %v16030_v42, 1 }
 0x423   : > { %v7527_v54 = vsel %vm5200_vm14, %v7524_v50, %v7526_v25  ;;  %v6975_v61 = vsel %vm5200_vm14, %v6972_v33, %v6974_v44  ;;  %v12989_v33 = vld [vmem:[%s16936_s4 + $0x1e8] sm:$0xff] }
 0x424   : > { %v16040_v58 = vsel %vm5200_vm14, %v7900_v46, %v7902_v43  ;;  %v7579_v22 = vadd.f32 %v7527_v54, %v7337_v48  ;;  %v7026_v6 = vadd.f32 %v6975_v61, %v15617_v53  ;;  %v8069_v46 = vor.u32 %v8067_v55, %v15994_v62  ;;  %v12965_v53 = vld [vmem:[%s16936_s4 + $0x168] sm:$0xff]  ;;  %9902 = vmatpush.bf16.msra.mxu2 %v12989_v33 }
 0x425   : > { %v7287_v13 = vsel %vm5200_vm14, %v7284_v52, %v7286_v29  ;;  %v16059_v54 = vor.u32 %v8921_v37, %v8918_v56  ;;  %v12997_v62 = vld [vmem:[%s16936_s4 + $0x228] sm:$0xff]  ;;  %9287 = vmatpush.bf16.msra.mxu0 %v12965_v53 }
 0x426   : > { %v7598_v3 = vmax.f32 %v7579_v22, 0.0  ;;  %v7338_v22 = vadd.f32 %v7287_v13, %v7026_v6  ;;  %v8074_v56 = vsel %vm566_vm0, %v8069_v46, %v16046_v2  ;;  %10143 = vmatpush.bf16.msra.mxu3 %v12997_v62  ;;  %v8357_v6 = vsel %vm793_vm1, %v8354_v7, %v8356_v57  ;;  %v16091_v33 = vld [vmem:[#allocation2 + $0x68] sm:$0xff] }
 0x427   : > { %v8925_v36 = vshrl.u32 %v16091_v33, 16 }
 0x428   : > { %7617 = vst [vmem:[%s15988_s20 + $0xd] sm:$0xff] %v7598_v3  ;;  %v7467_v50 = vpop.f32.mrf.mxu2  ;;  %v6916_v45 = vpop.f32.mrf.mxu0 }
 0x429   : > { %v7843_v35 = vpop.f32.mrf.mxu3  ;;  %v7528_v39 = vrot.slane %v7467_v50, 5  ;;  %v7228_v48 = vpop.f32.mrf.mxu1  ;;  %v6976_v61 = vrot.slane %v6916_v45, 5 }
 0x42a   : > { %v7904_v19 = vrot.slane %v7843_v35, 5 }
 0x42b   : > { %v7529_v52 = vsel %vm5200_vm14, %v7526_v25, %v7528_v39  ;;  %v6977_v55 = vsel %vm5200_vm14, %v6974_v44, %v6976_v61  ;;  %8201 = vmatmul.bf16.gmra.mxu0 %v8074_v56  ;;  %v8661_v25 = vsel %vm793_vm1, %v8658_v59, %v8660_v11  ;;  %v8923_v44 = vsel %vm1195_vm2, %v15998_v15, %v16059_v54 }
 0x42c   : > { %v16069_v3 = vsel %vm5200_vm14, %v7902_v43, %v7904_v19  ;;  %v7580_v37 = vadd.f32 %v7529_v52, %v7338_v22  ;;  %v7288_v43 = vrot.slane %v7228_v48, 5  ;;  %8442 = vmatmul.bf16.gmra.mxu1 %v8357_v6  ;;  %v7027_v35 = vadd.f32 %v6977_v55, %v15629_v23 }
 0x42d   : > { %8746 = vmatmul.bf16.gmra.mxu2 %v8661_v25  ;;  %v8928_v15 = vshll.u32 %v16091_v33, 16  ;;  %v8079_v52 = vshll.u32 %v16088_v26, 16  ;;  %v8927_v55 = vrot.slane %v8925_v36, 1 }
 0x42e   : > { %v7599_v50 = vmax.f32 %v7580_v37, 0.0  ;;  %9057 = vmatmul.bf16.gmra.mxu3 %v8923_v44  ;;  %v7289_v59 = vsel %vm5200_vm14, %v7286_v29, %v7288_v43 }
 0x42f   : > { %v7339_v23 = vadd.f32 %v7289_v59, %v7027_v35  ;;  %v8930_v6 = vrot.slane %v8928_v15, 2  ;;  %v16104_v35 = vrot.slane %v8079_v52, 1  ;;  %v8662_v59 = vrot.slane %v16091_v33, 1  ;;  %v12980_v52 = vld [vmem:[%s16936_s4 + $0x1a0] sm:$0xff] }
 0x430   : > { %7618 = vst [vmem:[%s15988_s20 + $0x15] sm:$0xff] %v7599_v50  ;;  %v7470_v7 = vpop.f32.mrf.mxu2  ;;  %v6918_v45 = vpop.f32.mrf.mxu0  ;;  %v8075_v50 = vshrl.u32 %v16030_v42, 16  ;;  %9592 = vmatpush.bf16.msra.mxu1 %v12980_v52  ;;  %v16146_v42 = vld [vmem:[#allocation2 + $0x68] sm:$0xff] }
 0x431   : > { %v7846_v46 = vpop.f32.mrf.mxu3  ;;  %v7530_v53 = vrot.slane %v7470_v7, 5  ;;  %v7230_v48 = vpop.f32.mrf.mxu1  ;;  %v6978_v62 = vrot.slane %v6918_v45, 5 }
 0x432   : > { %v7906_v13 = vrot.slane %v7846_v46, 5  ;;  %v7290_v29 = vrot.slane %v7230_v48, 5  ;;  %v8358_v46 = vrot.slane %v16088_v26, 1 }
 0x433   : > { %v7531_v51 = vsel %vm5200_vm14, %v7528_v39, %v7530_v53  ;;  %v6979_v37 = vsel %vm5200_vm14, %v6976_v61, %v6978_v62  ;;  %v12988_v61 = vld [vmem:[%s16936_s4 + $0x1e0] sm:$0xff] }
 0x434   : > { %v16098_v22 = vsel %vm5200_vm14, %v7904_v19, %v7906_v13  ;;  %v7581_v56 = vadd.f32 %v7531_v51, %v7339_v23  ;;  %v7028_v44 = vadd.f32 %v6979_v37, %v15674_v12  ;;  %v8077_v19 = vor.u32 %v8075_v50, %v16046_v2  ;;  %v12964_v12 = vld [vmem:[%s16936_s4 + $0x160] sm:$0xff]  ;;  %9903 = vmatpush.bf16.msra.mxu2 %v12988_v61  ;;  %v16149_v61 = vld [vmem:[#allocation2 + $0x70] sm:$0xff] }
 0x435   : > { %v7291_v36 = vsel %vm5200_vm14, %v7288_v43, %v7290_v29  ;;  %v16117_v51 = vor.u32 %v8930_v6, %v8927_v55  ;;  %v12996_v2 = vld [vmem:[%s16936_s4 + $0x220] sm:$0xff]  ;;  %9288 = vmatpush.bf16.msra.mxu0 %v12964_v12  ;;  %v8934_v32 = vshrl.u32 %v16149_v61, 16 }
 0x436   : > { %v7600_v25 = vmax.f32 %v7581_v56, 0.0  ;;  %v7340_v56 = vadd.f32 %v7291_v36, %v7028_v44  ;;  %v8082_v55 = vsel %vm566_vm0, %v8077_v19, %v16104_v35  ;;  %10144 = vmatpush.bf16.msra.mxu3 %v12996_v2  ;;  %v8359_v44 = vsel %vm793_vm1, %v8356_v57, %v8358_v46 }
 0x438   : > { %7619 = vst [vmem:[%s15988_s20 + $0x1d] sm:$0xff] %v7600_v25  ;;  %v7472_v39 = vpop.f32.mrf.mxu2  ;;  %v6921_v15 = vpop.f32.mrf.mxu0 }
 0x439   : > { %v7848_v7 = vpop.f32.mrf.mxu3  ;;  %v7532_v45 = vrot.slane %v7472_v39, 5  ;;  %v7233_v23 = vpop.f32.mrf.mxu1  ;;  %v6980_v37 = vrot.slane %v6921_v15, 5 }
 0x43a   : > { %v7908_v48 = vrot.slane %v7848_v7, 5 }
 0x43b   : > { %v7533_v43 = vsel %vm5200_vm14, %v7530_v53, %v7532_v45  ;;  %v6981_v50 = vsel %vm5200_vm14, %v6978_v62, %v6980_v37  ;;  %8206 = vmatmul.bf16.gmra.mxu0 %v8082_v55  ;;  %v8663_v53 = vsel %vm793_vm1, %v8660_v11, %v8662_v59  ;;  %v8932_v62 = vsel %vm1195_vm2, %v16059_v54, %v16117_v51 }
 0x43c   : > { %v16127_v25 = vsel %vm5200_vm14, %v7906_v13, %v7908_v48  ;;  %v7582_v6 = vadd.f32 %v7533_v43, %v7340_v56  ;;  %v7292_v13 = vrot.slane %v7233_v23, 5  ;;  %8447 = vmatmul.bf16.gmra.mxu1 %v8359_v44  ;;  %v7029_v7 = vadd.f32 %v6981_v50, %v15683_v16 }
 0x43d   : > { %8751 = vmatmul.bf16.gmra.mxu2 %v8663_v53  ;;  %v8937_v54 = vshll.u32 %v16149_v61, 16  ;;  %v8087_v43 = vshll.u32 %v16146_v42, 16  ;;  %v8936_v50 = vrot.slane %v8934_v32, 1 }
 0x43e   : > { %v7601_v39 = vmax.f32 %v7582_v6, 0.0  ;;  %9062 = vmatmul.bf16.gmra.mxu3 %v8932_v62  ;;  %v7293_v11 = vsel %vm5200_vm14, %v7290_v29, %v7292_v13 }
 0x43f   : > { %v7341_v16 = vadd.f32 %v7293_v11, %v7029_v7  ;;  %v8939_v44 = vrot.slane %v8937_v54, 2  ;;  %v16162_v7 = vrot.slane %v8087_v43, 1  ;;  %v8664_v11 = vrot.slane %v16149_v61, 1 }
 0x440   : > { %7620 = vst [vmem:[%s15988_s20 + $0x25] sm:$0xff] %v7601_v39  ;;  %v7475_v57 = vpop.f32.mrf.mxu2  ;;  %v6923_v15 = vpop.f32.mrf.mxu0  ;;  %v8083_v39 = vshrl.u32 %v16088_v26, 16  ;;  %v16201_v26 = vld [vmem:[#allocation2 + $0x70] sm:$0xff] }
 0x441   : > { %v7851_v19 = vpop.f32.mrf.mxu3  ;;  %v7534_v12 = vrot.slane %v7475_v57, 5  ;;  %v7235_v23 = vpop.f32.mrf.mxu1  ;;  %v6982_v2 = vrot.slane %v6923_v15, 5 }
 0x442   : > { %v7910_v36 = vrot.slane %v7851_v19, 5  ;;  %v7294_v29 = vrot.slane %v7235_v23, 5  ;;  %v8360_v19 = vrot.slane %v16146_v42, 1 }
 0x443   : > { %v7535_v52 = vsel %vm5200_vm14, %v7532_v45, %v7534_v12  ;;  %v6983_v6 = vsel %vm5200_vm14, %v6980_v37, %v6982_v2  ;;  %v12987_v37 = vld [vmem:[%s16936_s4 + $0x1d8] sm:$0xff] }
 0x444   : > { %v16156_v56 = vsel %vm5200_vm14, %v7908_v48, %v7910_v36  ;;  %v7583_v55 = vadd.f32 %v7535_v52, %v7341_v16  ;;  %v7030_v62 = vadd.f32 %v6983_v6, %v15725_v34  ;;  %v8085_v48 = vor.u32 %v8083_v39, %v16104_v35  ;;  %v12963_v34 = vld [vmem:[%s16936_s4 + $0x158] sm:$0xff]  ;;  %9904 = vmatpush.bf16.msra.mxu2 %v12987_v37 }
 0x445   : > { %v7295_v32 = vsel %vm5200_vm14, %v7292_v13, %v7294_v29  ;;  %v16175_v52 = vor.u32 %v8939_v44, %v8936_v50  ;;  %v12995_v35 = vld [vmem:[%s16936_s4 + $0x218] sm:$0xff]  ;;  %9289 = vmatpush.bf16.msra.mxu0 %v12963_v34 }
 0x446   : > { %v7602_v53 = vmax.f32 %v7583_v55, 0.0  ;;  %v7342_v43 = vadd.f32 %v7295_v32, %v7030_v62  ;;  %v8090_v13 = vsel %vm566_vm0, %v8085_v48, %v16162_v7  ;;  %10145 = vmatpush.bf16.msra.mxu3 %v12995_v35  ;;  %v8361_v62 = vsel %vm793_vm1, %v8358_v46, %v8360_v19  ;;  %v16204_v48 = vld [vmem:[#allocation2 + $0x78] sm:$0xff] }
 0x447   : > { %v8943_v33 = vshrl.u32 %v16204_v48, 16 }
 0x448   : > { %7621 = vst [vmem:[%s15988_s20 + $0x2d] sm:$0xff] %v7602_v53  ;;  %v7477_v45 = vpop.f32.mrf.mxu2  ;;  %v6926_v54 = vpop.f32.mrf.mxu0 }
 0x449   : > { %v7853_v57 = vpop.f32.mrf.mxu3  ;;  %v7536_v15 = vrot.slane %v7477_v45, 5  ;;  %v7238_v16 = vpop.f32.mrf.mxu1  ;;  %v6984_v55 = vrot.slane %v6926_v54, 5  ;;  %v8946_v54 = vshll.u32 %v16204_v48, 16 }
 0x44a   : > { %v7912_v23 = vrot.slane %v7853_v57, 5 }
 0x44b   : > { %v7537_v6 = vsel %vm5200_vm14, %v7534_v12, %v7536_v15  ;;  %v6985_v44 = vsel %vm5200_vm14, %v6982_v2, %v6984_v55  ;;  %8211 = vmatmul.bf16.gmra.mxu0 %v8090_v13  ;;  %v8665_v12 = vsel %vm793_vm1, %v8662_v59, %v8664_v11  ;;  %v8941_v2 = vsel %vm1195_vm2, %v16117_v51, %v16175_v52  ;;  %v12979_v59 = vld [vmem:[%s16936_s4 + $0x198] sm:$0xff] }
 0x44c   : > { %v16182_v53 = vsel %vm5200_vm14, %v7910_v36, %v7912_v23  ;;  %v7584_v50 = vadd.f32 %v7537_v6, %v7342_v43  ;;  %v7296_v36 = vrot.slane %v7238_v16, 5  ;;  %8452 = vmatmul.bf16.gmra.mxu1 %v8361_v62  ;;  %v7031_v45 = vadd.f32 %v6985_v44, %v15743_v1 }
 0x44d   : > { %8756 = vmatmul.bf16.gmra.mxu2 %v8665_v12  ;;  %9593 = vmatpush.bf16.msra.mxu1 %v12979_v59  ;;  %v8095_v13 = vshll.u32 %v16201_v26, 16  ;;  %v8945_v62 = vrot.slane %v8943_v33, 1  ;;  %v8948_v12 = vrot.slane %v8946_v54, 2  ;;  %v8362_v59 = vrot.slane %v16201_v26, 1 }
 0x44e   : > { %v7603_v39 = vmax.f32 %v7584_v50, 0.0  ;;  %9067 = vmatmul.bf16.gmra.mxu3 %v8941_v2  ;;  %v7297_v37 = vsel %vm5200_vm14, %v7294_v29, %v7296_v36 }
 0x44f   : > { %v7343_v16 = vadd.f32 %v7297_v37, %v7031_v45  ;;  %v8091_v45 = vshrl.u32 %v16146_v42, 16  ;;  %v8666_v37 = vrot.slane %v16204_v48, 1  ;;  %v16253_v42 = vld [vmem:[#allocation2 + $0x78] sm:$0xff] }
 0x450   : > { %7622 = vst [vmem:[%s15988_s20 + $0x35] sm:$0xff] %v7603_v39  ;;  %v7480_v46 = vpop.f32.mrf.mxu2  ;;  %v6928_v32 = vpop.f32.mrf.mxu0 }
 0x451   : > { %v7856_v57 = vpop.f32.mrf.mxu3  ;;  %v7538_v51 = vrot.slane %v7480_v46, 5  ;;  %v7240_v1 = vpop.f32.mrf.mxu1  ;;  %v6986_v35 = vrot.slane %v6928_v32, 5  ;;  %v16220_v46 = vrot.slane %v8095_v13, 1 }
 0x452   : > { %v7914_v34 = vrot.slane %v7856_v57, 5  ;;  %v7298_v44 = vrot.slane %v7240_v1, 5 }
 0x453   : > { %v7539_v43 = vsel %vm5200_vm14, %v7536_v15, %v7538_v51  ;;  %v6987_v29 = vsel %vm5200_vm14, %v6984_v55, %v6986_v35  ;;  %v12986_v55 = vld [vmem:[%s16936_s4 + $0x1d0] sm:$0xff] }
 0x454   : > { %v16214_v6 = vsel %vm5200_vm14, %v7912_v23, %v7914_v34  ;;  %v7585_v50 = vadd.f32 %v7539_v43, %v7343_v16  ;;  %v7032_v39 = vadd.f32 %v6987_v29, %v15772_v24  ;;  %v8093_v23 = vor.u32 %v8091_v45, %v16162_v7  ;;  %9905 = vmatpush.bf16.msra.mxu2 %v12986_v55 }
 0x455   : > { %v7299_v33 = vsel %vm5200_vm14, %v7296_v36, %v7298_v44  ;;  %v16230_v16 = vor.u32 %v8948_v12, %v8945_v62  ;;  %v8363_v62 = vsel %vm793_vm1, %v8360_v19, %v8362_v59 }
 0x456   : > { %v7604_v2 = vmax.f32 %v7585_v50, 0.0  ;;  %v7344_v43 = vadd.f32 %v7299_v33, %v7032_v39  ;;  %v8098_v29 = vsel %vm566_vm0, %v8093_v23, %v16220_v46 }
 0x458   : > { %7623 = vst [vmem:[%s15988_s20 + $0x3d] sm:$0xff] %v7604_v2  ;;  %v7482_v15 = vpop.f32.mrf.mxu2  ;;  %v6931_v1 = vpop.f32.mrf.mxu0 }
 0x459   : > { %v7858_v57 = vpop.f32.mrf.mxu3  ;;  %v7540_v24 = vrot.slane %v7482_v15, 5  ;;  %v7243_v54 = vpop.f32.mrf.mxu1  ;;  %v6988_v13 = vrot.slane %v6931_v1, 5  ;;  %v16256_v15 = vld [vmem:[#allocation2 + $0x80] sm:$0xff] }
 0x45a   : > { %v7916_v32 = vrot.slane %v7858_v57, 5  ;;  %v8952_v61 = vshrl.u32 %v16256_v15, 16 }
 0x45b   : > { %v7541_v7 = vsel %vm5200_vm14, %v7538_v51, %v7540_v24  ;;  %v6989_v36 = vsel %vm5200_vm14, %v6986_v35, %v6988_v13  ;;  %8216 = vmatmul.bf16.gmra.mxu0 %v8098_v29  ;;  %v8667_v51 = vsel %vm793_vm1, %v8664_v11, %v8666_v37  ;;  %v8950_v35 = vsel %vm1195_vm2, %v16175_v52, %v16230_v16  ;;  %v12962_v11 = vld [vmem:[%s16936_s4 + $0x150] sm:$0xff] }
 0x45c   : > { %v16234_v50 = vsel %vm5200_vm14, %v7914_v34, %v7916_v32  ;;  %v7586_v2 = vadd.f32 %v7541_v7, %v7344_v43  ;;  %v7300_v34 = vrot.slane %v7243_v54, 5  ;;  %8457 = vmatmul.bf16.gmra.mxu1 %v8363_v62  ;;  %v7033_v39 = vadd.f32 %v6989_v36, %v15797_v60  ;;  %v12994_v52 = vld [vmem:[%s16936_s4 + $0x210] sm:$0xff]  ;;  %9290 = vmatpush.bf16.msra.mxu0 %v12962_v11 }
 0x45d   : > { %8761 = vmatmul.bf16.gmra.mxu2 %v8667_v51  ;;  %v12978_v60 = vld [vmem:[%s16936_s4 + $0x190] sm:$0xff]  ;;  %v8955_v54 = vshll.u32 %v16256_v15, 16  ;;  %10146 = vmatpush.bf16.msra.mxu3 %v12994_v52  ;;  %v8103_v36 = vshll.u32 %v16253_v42, 16 }
 0x45e   : > { %v7605_v12 = vmax.f32 %v7586_v2, 0.0  ;;  %9072 = vmatmul.bf16.gmra.mxu3 %v8950_v35  ;;  %v7301_v57 = vsel %vm5200_vm14, %v7298_v44, %v7300_v34  ;;  %9594 = vmatpush.bf16.msra.mxu1 %v12978_v60  ;;  %v8954_v35 = vrot.slane %v8952_v61, 1  ;;  %v8364_v60 = vrot.slane %v16253_v42, 1 }
 0x45f   : > { %v7345_v43 = vadd.f32 %v7301_v57, %v7033_v39  ;;  %v16278_v11 = vrot.slane %v8103_v36, 1  ;;  %v8668_v57 = vrot.slane %v16256_v15, 1 }
 0x460   : > { %7624 = vst [vmem:[%s15988_s20 + $0x45] sm:$0xff] %v7605_v12  ;;  %v7485_v19 = vpop.f32.mrf.mxu2  ;;  %v6933_v33 = vpop.f32.mrf.mxu0  ;;  %v8957_v12 = vrot.slane %v8955_v54, 2 }
 0x461   : > { %v7861_v45 = vpop.f32.mrf.mxu3  ;;  %v7542_v23 = vrot.slane %v7485_v19, 5  ;;  %v7245_v1 = vpop.f32.mrf.mxu1  ;;  %v6990_v7 = vrot.slane %v6933_v33, 5 }
 0x462   : > { %v7918_v55 = vrot.slane %v7861_v45, 5  ;;  %v7302_v51 = vrot.slane %v7245_v1, 5  ;;  %v8099_v45 = vshrl.u32 %v16201_v26, 16  ;;  %v16308_v26 = vld [vmem:[#allocation2 + $0x80] sm:$0xff] }
 0x463   : > { %v7543_v29 = vsel %vm5200_vm14, %v7540_v24, %v7542_v23  ;;  %v6991_v62 = vsel %vm5200_vm14, %v6988_v13, %v6990_v7 }
 0x464   : > { %v16272_v2 = vsel %vm5200_vm14, %v7916_v32, %v7918_v55  ;;  %v7587_v44 = vadd.f32 %v7543_v29, %v7345_v43  ;;  %v7034_v39 = vadd.f32 %v6991_v62, %v15827_v40  ;;  %v8101_v52 = vor.u32 %v8099_v45, %v16220_v46  ;;  %v16311_v45 = vld [vmem:[#allocation2 + $0x88] sm:$0xff] }
 0x465   : > { %v7303_v13 = vsel %vm5200_vm14, %v7300_v34, %v7302_v51  ;;  %v16285_v40 = vor.u32 %v8957_v12, %v8954_v35  ;;  %v8365_v35 = vsel %vm793_vm1, %v8362_v59, %v8364_v60  ;;  %v8961_v48 = vshrl.u32 %v16311_v45, 16 }
 0x466   : > { %v7606_v19 = vmax.f32 %v7587_v44, 0.0  ;;  %v7346_v43 = vadd.f32 %v7303_v13, %v7034_v39  ;;  %v8106_v46 = vsel %vm566_vm0, %v8101_v52, %v16278_v11 }
 0x468   : > { %7625 = vst [vmem:[%s15988_s20 + $0x4d] sm:$0xff] %v7606_v19  ;;  %v7487_v24 = vpop.f32.mrf.mxu2  ;;  %v6936_v1 = vpop.f32.mrf.mxu0 }
 0x469   : > { %v7863_v32 = vpop.f32.mrf.mxu3  ;;  %v7544_v61 = vrot.slane %v7487_v24, 5  ;;  %v7248_v54 = vpop.f32.mrf.mxu1  ;;  %v6992_v29 = vrot.slane %v6936_v1, 5 }
 0x46a   : > { %v7920_v33 = vrot.slane %v7863_v32, 5 }
 0x46b   : > { %v7545_v36 = vsel %vm5200_vm14, %v7542_v23, %v7544_v61  ;;  %v6993_v34 = vsel %vm5200_vm14, %v6990_v7, %v6992_v29  ;;  %8221 = vmatmul.bf16.gmra.mxu0 %v8106_v46  ;;  %v8669_v23 = vsel %vm793_vm1, %v8666_v37, %v8668_v57  ;;  %v8959_v7 = vsel %vm1195_vm2, %v16230_v16, %v16285_v40  ;;  %v12985_v37 = vld [vmem:[%s16936_s4 + $0x1c8] sm:$0xff] }
 0x46c   : > { %v16289_v44 = vsel %vm5200_vm14, %v7918_v55, %v7920_v33  ;;  %v7588_v62 = vadd.f32 %v7545_v36, %v7346_v43  ;;  %v7304_v55 = vrot.slane %v7248_v54, 5  ;;  %8462 = vmatmul.bf16.gmra.mxu1 %v8365_v35  ;;  %v7035_v19 = vadd.f32 %v6993_v34, %v15848_v0  ;;  %v12961_v16 = vld [vmem:[%s16936_s4 + $0x148] sm:$0xff]  ;;  %9906 = vmatpush.bf16.msra.mxu2 %v12985_v37 }
 0x46d   : > { %8766 = vmatmul.bf16.gmra.mxu2 %v8669_v23  ;;  %v12993_v0 = vld [vmem:[%s16936_s4 + $0x208] sm:$0xff]  ;;  %v8964_v54 = vshll.u32 %v16311_v45, 16  ;;  %9291 = vmatpush.bf16.msra.mxu0 %v12961_v16  ;;  %v8107_v37 = vshrl.u32 %v16253_v42, 16 }
 0x46e   : > { %v7607_v12 = vmax.f32 %v7588_v62, 0.0  ;;  %9077 = vmatmul.bf16.gmra.mxu3 %v8959_v7  ;;  %v7305_v24 = vsel %vm5200_vm14, %v7302_v51, %v7304_v55  ;;  %v12977_v43 = vld [vmem:[%s16936_s4 + $0x188] sm:$0xff]  ;;  %v8111_v51 = vshll.u32 %v16308_v26, 16 }
 0x46f   : > { %v7347_v36 = vadd.f32 %v7305_v24, %v7035_v19  ;;  %10147 = vmatpush.bf16.msra.mxu3 %v12993_v0  ;;  %9595 = vmatpush.bf16.msra.mxu1 %v12977_v43  ;;  %v8109_v24 = vor.u32 %v8107_v37, %v16278_v11  ;;  %v8366_v0 = vrot.slane %v16308_v26, 1  ;;  %v16366_v42 = vld [vmem:[#allocation2 + $0x88] sm:$0xff]  ;;  %v16369_v37 = vld [vmem:[#allocation2 + $0x90] sm:$0xff] }
 0x470   : > { %7626 = vst [vmem:[%s15988_s20 + $0x55] sm:$0xff] %v7607_v12  ;;  %v7490_v59 = vpop.f32.mrf.mxu2  ;;  %v6938_v13 = vpop.f32.mrf.mxu0  ;;  %v8963_v12 = vrot.slane %v8961_v48, 1  ;;  %v16336_v16 = vrot.slane %v8111_v51, 1  ;;  %v8970_v15 = vshrl.u32 %v16369_v37, 16 }
 0x471   : > { %v7866_v39 = vpop.f32.mrf.mxu3  ;;  %v7546_v32 = vrot.slane %v7490_v59, 5  ;;  %v7250_v1 = vpop.f32.mrf.mxu1  ;;  %v6994_v46 = vrot.slane %v6938_v13, 5  ;;  %v8966_v59 = vrot.slane %v8964_v54, 2  ;;  %v8670_v13 = vrot.slane %v16311_v45, 1 }
 0x472   : > { %v7922_v52 = vrot.slane %v7866_v39, 5  ;;  %v7306_v7 = vrot.slane %v7250_v1, 5  ;;  %v8114_v11 = vsel %vm566_vm0, %v8109_v24, %v16336_v16 }
 0x473   : > { %v7547_v62 = vsel %vm5200_vm14, %v7544_v61, %v7546_v32  ;;  %v6995_v23 = vsel %vm5200_vm14, %v6992_v29, %v6994_v46 }
 0x474   : > { %v16330_v34 = vsel %vm5200_vm14, %v7920_v33, %v7922_v52  ;;  %v7589_v35 = vadd.f32 %v7547_v62, %v7347_v36  ;;  %v7036_v39 = vadd.f32 %v6995_v23, %v15874_v20  ;;  %v7307_v29 = vsel %vm5200_vm14, %v7304_v55, %v7306_v7 }
 0x475   : > { %v16343_v20 = vor.u32 %v8966_v59, %v8963_v12  ;;  %v8367_v12 = vsel %vm793_vm1, %v8364_v60, %v8366_v0 }
 0x476   : > { %v7608_v19 = vmax.f32 %v7589_v35, 0.0  ;;  %v7348_v36 = vadd.f32 %v7307_v29, %v7036_v39 }
 0x478   : > { %7627 = vst [vmem:[%s15988_s20 + $0x5d] sm:$0xff] %v7608_v19  ;;  %v7492_v61 = vpop.f32.mrf.mxu2  ;;  %v6941_v54 = vpop.f32.mrf.mxu0 }
 0x479   : > { %v7868_v33 = vpop.f32.mrf.mxu3  ;;  %v7548_v48 = vrot.slane %v7492_v61, 5  ;;  %v7253_v43 = vpop.f32.mrf.mxu1  ;;  %v6996_v62 = vrot.slane %v6941_v54, 5  ;;  %v8973_v54 = vshll.u32 %v16369_v37, 16 }
 0x47a   : > { %v7924_v1 = vrot.slane %v7868_v33, 5 }
 0x47b   : > { %v7549_v51 = vsel %vm5200_vm14, %v7546_v32, %v7548_v48  ;;  %v6997_v55 = vsel %vm5200_vm14, %v6994_v46, %v6996_v62  ;;  %8226 = vmatmul.bf16.gmra.mxu0 %v8114_v11  ;;  %v8671_v32 = vsel %vm793_vm1, %v8668_v57, %v8670_v13  ;;  %v8968_v46 = vsel %vm1195_vm2, %v16285_v40, %v16343_v20  ;;  %v12984_v57 = vld [vmem:[%s16936_s4 + $0x1c0] sm:$0xff] }
 0x47c   : > { %v16347_v35 = vsel %vm5200_vm14, %v7922_v52, %v7924_v1  ;;  %v7590_v23 = vadd.f32 %v7549_v51, %v7348_v36  ;;  %v7308_v52 = vrot.slane %v7253_v43, 5  ;;  %8467 = vmatmul.bf16.gmra.mxu1 %v8367_v12  ;;  %v7037_v19 = vadd.f32 %v6997_v55, %v15895_v21  ;;  %v12960_v40 = vld [vmem:[%s16936_s4 + $0x140] sm:$0xff]  ;;  %9907 = vmatpush.bf16.msra.mxu2 %v12984_v57 }
 0x47d   : > { %8771 = vmatmul.bf16.gmra.mxu2 %v8671_v32  ;;  %v12992_v43 = vld [vmem:[%s16936_s4 + $0x200] sm:$0xff]  ;;  %9292 = vmatpush.bf16.msra.mxu0 %v12960_v40  ;;  %v8119_v55 = vshll.u32 %v16366_v42, 16  ;;  %v8115_v57 = vshrl.u32 %v16308_v26, 16 }
 0x47e   : > { %v7609_v59 = vmax.f32 %v7590_v23, 0.0  ;;  %9082 = vmatmul.bf16.gmra.mxu3 %v8968_v46  ;;  %v7309_v21 = vsel %vm5200_vm14, %v7306_v7, %v7308_v52  ;;  %v12976_v36 = vld [vmem:[%s16936_s4 + $0x180] sm:$0xff] }
 0x47f   : > { %v7349_v51 = vadd.f32 %v7309_v21, %v7037_v19  ;;  %10148 = vmatpush.bf16.msra.mxu3 %v12992_v43  ;;  %9596 = vmatpush.bf16.msra.mxu1 %v12976_v36  ;;  %v8975_v19 = vrot.slane %v8973_v54, 2  ;;  %v8368_v43 = vrot.slane %v16366_v42, 1 }
 0x480   : > { %7628 = vst [vmem:[%s15988_s20 + $0x65] sm:$0xff] %v7609_v59  ;;  %v7495_v60 = vpop.f32.mrf.mxu2  ;;  %v6943_v24 = vpop.f32.mrf.mxu0  ;;  %v8972_v59 = vrot.slane %v8970_v15, 1 }
 0x481   : > { %v7871_v39 = vpop.f32.mrf.mxu3  ;;  %v7550_v61 = vrot.slane %v7495_v60, 5  ;;  %v16379_v29 = vpop.f32.mrf.mxu1  ;;  %v6998_v11 = vrot.slane %v6943_v24, 5  ;;  %v8117_v24 = vor.u32 %v8115_v57, %v16336_v16 }
 0x482   : > { %v7926_v33 = vrot.slane %v7871_v39, 5  ;;  %v7310_v46 = vrot.slane %v16379_v29, 5 }
 0x483   : > { %v7551_v7 = vsel %vm5200_vm14, %v7548_v48, %v7550_v61  ;;  %v6999_v32 = vsel %vm5200_vm14, %v6996_v62, %v6998_v11  ;;  %v16397_v48 = vrot.slane %v8119_v55, 1  ;;  %v16946_v62 = vrot.slane %v16369_v37, 1 }
 0x484   : > { %v16390_v23 = vsel %vm5200_vm14, %v7924_v1, %v7926_v33  ;;  %v7591_v12 = vadd.f32 %v7551_v7, %v7349_v51  ;;  %v7038_v39 = vadd.f32 %v6999_v32, %v15921_v9  ;;  %v7990_v1 = vld [vmem:[#allocation2 + $0x90] sm:$0x1]  ;;  %v7311_v15 = vsel %vm5200_vm14, %v7308_v52, %v7310_v46 }
 0x485   : > { %v16406_v51 = vor.u32 %v8975_v19, %v8972_v59  ;;  %v8369_v59 = vsel %vm793_vm1, %v8366_v0, %v8368_v43 }
 0x486   : > { %v7610_v60 = vmax.f32 %v7591_v12, 0.0  ;;  %v7350_v7 = vadd.f32 %v7311_v15, %v7038_v39  ;;  %v8044_v12 = vunpack.c.l.b16 %v7990_v1  ;;  %v7634_v1 = vld [vmem:[%s13251_s12 + $0x50] sm:$0xe] }
 0x488   : > { %7629 = vst [vmem:[%s15988_s20 + $0x6d] sm:$0xff] %v7610_v60  ;;  %v7497_v40 = vpop.f32.mrf.mxu2  ;;  %v6946_v36 = vpop.f32.mrf.mxu0  ;;  %v8122_v60 = vsel %vm566_vm0, %v8117_v24, %v16397_v48  ;;  %v8054_v0 = vpack.c.b16 %v8044_v12, %v8044_v12  ;;  %v8982_v24 = vshll.u32 %v15785_v28, 16 }
 0x489   : > { %v7873_v21 = vpop.f32.mrf.mxu3  ;;  %v7552_v29 = vrot.slane %v7497_v40, 5  ;;  %v16404_v9 = vpop.f32.mrf.mxu1  ;;  %v7000_v55 = vrot.slane %v6946_v36, 5 }
 0x48a   : > { %v7928_v54 = vrot.slane %v7873_v21, 5  ;;  %v7312_v19 = vrot.slane %v16404_v9, 5 }
 0x48b   : > { %v7553_v32 = vsel %vm5200_vm14, %v7550_v61, %v7552_v29  ;;  %v7001_v57 = vsel %vm5200_vm14, %v6998_v11, %v7000_v55  ;;  %8231 = vmatmul.bf16.gmra.mxu0 %v8122_v60  ;;  %v8673_v61 = vsel %vm793_vm1, %v8670_v13, %v16946_v62  ;;  %v8977_v11 = vsel %vm1195_vm2, %v16343_v20, %v16406_v51 }
 0x48c   : > { %v16410_v16 = vsel %vm5200_vm14, %v7926_v33, %v7928_v54  ;;  %v7592_v52 = vadd.f32 %v7553_v32, %v7350_v7  ;;  %v8592_v33 = vld [vmem:[#allocation2 + $0x98] sm:$0x1]  ;;  %8472 = vmatmul.bf16.gmra.mxu1 %v8369_v59  ;;  %v7039_v26 = vadd.f32 %v7001_v57, %v15940_v47  ;;  %v8979_v13 = vshrl.u32 %v15785_v28, 16 }
 0x48d   : > { %8776 = vmatmul.bf16.gmra.mxu2 %v8673_v61  ;;  %v8646_v40 = vunpack.c.l.b16 %v8592_v33  ;;  %v7313_v15 = vsel %vm5200_vm14, %v7310_v46, %v7312_v19  ;;  %v7653_v32 = vunpack.c.l.bf16 %v7634_v1  ;;  %v8370_v59 = vrot.slane %v8054_v0, 1 }
 0x48e   : > { %v7611_v39 = vmax.f32 %v7592_v52, 0.0  ;;  %9087 = vmatmul.bf16.gmra.mxu3 %v8977_v11  ;;  %v7351_v60 = vadd.f32 %v7313_v15, %v7039_v26  ;;  %v8127_v52 = vshll.u32 %v8054_v0, 16  ;;  %v8981_v46 = vrot.slane %v8979_v13, 1  ;;  %v7635_v15 = vld [vmem:[%s13251_s12 + $0x54] sm:$0xf] }
 0x48f   : > { %v8656_v61 = vpack.c.b16 %v8646_v40, %v8646_v40  ;;  %v8984_v11 = vrot.slane %v8982_v24, 2 }
 0x490   : > { %7630 = vst [vmem:[%s15988_s20 + $0x75] sm:$0xff] %v7611_v39  ;;  %v7500_v45 = vpop.f32.mrf.mxu2  ;;  %v6948_v7 = vpop.f32.mrf.mxu0  ;;  %v9430_v39 = vld [vmem:[#allocation2 + $0x58] sm:$0xc] }
 0x491   : > { %v7876_v21 = vpop.f32.mrf.mxu3  ;;  %v7554_v36 = vrot.slane %v7500_v45, 5  ;;  %v7260_v20 = vpop.f32.mrf.mxu1  ;;  %v7002_v47 = vrot.slane %v6948_v7, 5  ;;  %v16440_v45 = vld [vmem:[#allocation2 + $0x5c] sm:$0xf]  ;;  %v9484_v13 = vunpack.c.l.b16 %v9430_v39 }
 0x492   : > { %v7930_v9 = vrot.slane %v7876_v21, 5  ;;  %v7314_v1 = vrot.slane %v7260_v20, 5  ;;  %v8129_v21 = vrot.slane %v8127_v52, 1 }
 0x493   : > { %v7555_v12 = vsel %vm5200_vm14, %v7552_v29, %v7554_v36  ;;  %v7003_v28 = vsel %vm5200_vm14, %v7000_v55, %v7002_v47  ;;  %v7041_v26 = vadd.f32 %v7002_v47, %v15958_v49  ;;  %v8123_v29 = vshrl.u32 %v16366_v42, 16 }
 0x494   : > { %v16437_v57 = vsel %vm5200_vm14, %v7928_v54, %v7930_v9  ;;  %v7593_v33 = vadd.f32 %v7555_v12, %v7351_v60  ;;  %v16447_v54 = vld [vmem:[%s16937_s5] ss:$0 sm:$0xff]  ;;  %v7040_v55 = vadd.f32 %v7003_v28, %v15961_v8  ;;  %v8371_v60 = vsel %vm793_vm1, %v8368_v43, %v8370_v59 }
 0x495   : > { %v7672_v0 = vadd.f32 %v16447_v54, %v7653_v32  ;;  %v8125_v20 = vor.u32 %v8123_v29, %v16397_v48  ;;  %v8674_v47 = vrot.slane %v8656_v61, 1  ;;  %v8985_v32 = vor.u32 %v8984_v11, %v8981_v46 }
 0x496   : > { %v7612_v40 = vmax.f32 %v7593_v33, 0.0  ;;  %v7315_v12 = vsel %vm5200_vm14, %v7312_v19, %v7314_v1  ;;  %v7353_v8 = vadd.f32 %v7314_v1, %v7041_v26  ;;  %v7654_v42 = vunpack.c.l.bf16 %v7635_v15  ;;  %v16474_v26 = vld [vmem:[#allocation2 + $0x60] sm:$0xff] }
 0x497   : > { %v7953_v39 = vadd.f32 %v7899_v17, %v7672_v0  ;;  %v8130_v48 = vsel %vm566_vm0, %v8125_v20, %v8129_v21  ;;  %v16964_v17 = vrot.slane %v16369_v37, 1  ;;  %v16965_v0 = vunpack.c.l.b16 %v16440_v45  ;;  %v16482_v21 = vld [vmem:[%s13251_s12 + $0x58] sm:$0xff]  }
 0x498   : > { %7631 = vst [vmem:[%s15988_s20 + $0x7d] sm:$0xff] %v7612_v40  ;;  %v7502_v49 = vpop.f32.mrf.mxu2  ;;  %v8197_v28 = vpop.f32.mrf.mxu0  ;;  %v7352_v40 = vadd.f32 %v7315_v12, %v7040_v55  ;;  %v9763_v15 = vshrl.u32 %v16474_v26, 16 }
 0x499   : > { %v16454_v7 = vpop.f32.mrf.mxu3  ;;  %v7556_v52 = vrot.slane %v7502_v49, 5  ;;  %v8260_v24 = vrot.slane %v8197_v28, 5  ;;  %v8438_v62 = vpop.f32.mrf.mxu1  ;;  %v8675_v11 = vsel %vm793_vm1, %v16964_v17, %v8674_v47  ;;  %v9503_v55 = vpack.c.b16 %v16965_v0, %v9484_v13  ;;  %v10045_v47 = vld [vmem:[#allocation2 + $0x58] sm:$0x8] }
 0x49a   : > { %v7932_v33 = vrot.slane %v16454_v7, 5  ;;  %v8501_v38 = vrot.slane %v8438_v62, 5  ;;  %v7673_v62 = vadd.f32 %v16447_v54, %v7654_v42  ;;  %v9766_v49 = vshll.u32 %v16474_v26, 16 }
 0x49b   : > { %v7557_v43 = vsel %vm5200_vm14, %v7554_v36, %v7556_v52  ;;  %v7595_v59 = vadd.f32 %v7556_v52, %v7353_v8  ;;  %v8314_v46 = vadd.f32 %v8260_v24, %v7953_v39  ;;  %8236 = vmatmul.bf16.gmra.mxu0 %v8130_v48  ;;  %v9755_v13 = vshrl.u32 %v9503_v55, 16 }
 0x49c   : > { %v16469_v19 = vsel %vm5200_vm14, %v7930_v9, %v7932_v33  ;;  %v7594_v61 = vadd.f32 %v7557_v43, %v7352_v40  ;;  %8477 = vmatmul.bf16.gmra.mxu1 %v8371_v60  ;;  %v8986_v9 = vsel %vm1195_vm2, %v16406_v51, %v8985_v32  ;;  %v13046_v32 = vunpack.c.l.bf16 %v16482_v21 }
 0x49d   : > { %v7614_v36 = vmax.f32 %v7595_v59, 0.0  ;;  %8781 = vmatmul.bf16.gmra.mxu2 %v8675_v11  ;;  %v8555_v29 = vadd.f32 %v8501_v38, %v8314_v46  ;;  %v9758_v52 = vshll.u32 %v9503_v55, 16  ;;  %v7954_v28 = vadd.f32 %v16016_v10, %v7673_v62 }
 0x49e   : > { %v7613_v1 = vmax.f32 %v7594_v61, 0.0  ;;  %9092 = vmatmul.bf16.gmra.mxu3 %v8986_v9  ;;  %v9765_v43 = vrot.slane %v9763_v15, 2  ;;  %v9768_v59 = vrot.slane %v9766_v49, 3  ;;  %v10063_v61 = vunpack.c.l.b16 %v10045_v47 }
 0x49f   : > { %7633 = vst [vmem:[%s15988_s20 + $0x8d] sm:$0x7] %v7614_v36  ;;  %v9514_v36 = vrot.slane %v16474_v26, 2  ;;  %v9757_v9 = vrot.slane %v9755_v13, 2  ;;  %v10066_v47 = vrot.slane %v16474_v26, 3 }
 0x4a0   : > { %7632 = vst [vmem:[%s15988_s20 + $0x85] sm:$0xff] %v7613_v1  ;;  %v8742_v37 = vpop.f32.mrf.mxu2  ;;  %v8199_v51 = vpop.f32.mrf.mxu0  ;;  %v9760_v1 = vrot.slane %v9758_v52, 3  ;;  %v10064_v10 = vpack.c.b16 %v16965_v0, %v10063_v61  ;;  %v16498_v15 = vor.u32 %v9768_v59, %v9765_v43 }
 0x4a1   : > { %v8805_v20 = vrot.slane %v8742_v37, 5  ;;  %v9053_v60 = vpop.f32.mrf.mxu3  ;;  %v8261_v12 = vrot.slane %v8199_v51, 5  ;;  %v8440_v8 = vpop.f32.mrf.mxu1  ;;  %v9513_v37 = vrot.slane %v9503_v55, 2 }
 0x4a2   : > { %v9116_v40 = vrot.slane %v9053_v60, 5  ;;  %v8502_v48 = vrot.slane %v8440_v8, 5  ;;  %v9761_v52 = vor.u32 %v9760_v1, %v9757_v9 }
 0x4a3   : > { %v8859_v39 = vadd.f32 %v8805_v20, %v8555_v29  ;;  %v8262_v42 = vsel %vm5200_vm14, %v8260_v24, %v8261_v12  ;;  %v7674_v29 = vadd.f32 %v16447_v54, %v13046_v32  ;;  %v16504_v32 = vld [vmem:[#allocation2 + $0x68] sm:$0xff] }
 0x4a4   : > { %v8315_v17 = vadd.f32 %v8262_v42, %v7954_v28  ;;  %v8503_v11 = vsel %vm5200_vm14, %v8501_v38, %v8502_v48  ;;  %v9515_v38 = vsel %vm1435_vm3, %v9513_v37, %v9514_v36  ;;  %v10065_v28 = vrot.slane %v10064_v10, 3 }
 0x4a5   : > { %v16491_v46 = vadd.f32 %v9116_v40, %v8859_v39  ;;  %v7955_v55 = vadd.f32 %v16040_v58, %v7674_v29  ;;  %v13047_v39 = vunpack.c.h.bf16 %v16482_v21  ;;  %v9775_v10 = vshll.u32 %v16504_v32, 16 }
 0x4a6   : > { %v8556_v62 = vadd.f32 %v8503_v11, %v8315_v17  ;;  %v9770_v11 = vsel %vm1837_vm4, %v9761_v52, %v16498_v15  ;;  %v10067_v58 = vsel %vm2077_vm5, %v10065_v28, %v10066_v47 }
 0x4a8   : > { %v8744_v24 = vpop.f32.mrf.mxu2  ;;  %v8202_v51 = vpop.f32.mrf.mxu0 }
 0x4a9   : > { %v8806_v49 = vrot.slane %v8744_v24, 5  ;;  %v9055_v60 = vpop.f32.mrf.mxu3  ;;  %v8263_v13 = vrot.slane %v8202_v51, 5  ;;  %v8443_v45 = vpop.f32.mrf.mxu1 }
 0x4aa   : > { %v9117_v8 = vrot.slane %v9055_v60, 5  ;;  %v8504_v43 = vrot.slane %v8443_v45, 5 }
 0x4ab   : > { %v8807_v42 = vsel %vm5200_vm14, %v8805_v20, %v8806_v49  ;;  %v8264_v17 = vsel %vm5200_vm14, %v8261_v12, %v8263_v13  ;;  %9293 = vmatmul.bf16.vlgmr.msra.gmra.mxu0 %v15414_v27  ;;  %v9772_v20 = vshrl.u32 %v16504_v32, 16  ;;  %v7675_v12 = vadd.f32 %v16447_v54, %v13047_v39 }
 0x4ac   : > { %v8860_v59 = vadd.f32 %v8807_v42, %v8556_v62  ;;  %v9118_v61 = vsel %vm5200_vm14, %v9116_v40, %v9117_v8  ;;  %v8316_v9 = vadd.f32 %v8264_v17, %v7955_v55  ;;  %v8505_v1 = vsel %vm5200_vm14, %v8502_v48, %v8504_v43  ;;  %9597 = vmatmul.bf16.vlgmr.msra.gmra.mxu1 %v9515_v38  ;;  %v13099_v40 = vld [vmem:[%s13251_s12 + $0x60] sm:$0xff]  }
 0x4ad   : > { %9908 = vmatmul.bf16.vlgmr.msra.gmra.mxu2 %v9770_v11  ;;  %v9774_v51 = vrot.slane %v9772_v20, 2  ;;  %v7956_v38 = vadd.f32 %v16069_v3, %v7675_v12  ;;  %v13050_v45 = vunpack.c.l.bf16 %v13099_v40 }
 0x4ae   : > { %v16518_v21 = vadd.f32 %v9118_v61, %v8860_v59  ;;  %10149 = vmatmul.bf16.vlgmr.msra.gmra.mxu3 %v10067_v58  ;;  %v8557_v27 = vadd.f32 %v8505_v1, %v8316_v9  ;;  %v9777_v59 = vrot.slane %v9775_v10, 3  ;;  %v9516_v9 = vrot.slane %v16504_v32, 2 }
 0x4af   : > { %v7676_v1 = vadd.f32 %v16447_v54, %v13050_v45 }
 0x4b0   : > { %v8747_v0 = vpop.f32.mrf.mxu2  ;;  %v8204_v62 = vpop.f32.mrf.mxu0  ;;  %v16533_v20 = vor.u32 %v9777_v59, %v9774_v51 }
 0x4b1   : > { %v8808_v29 = vrot.slane %v8747_v0, 5  ;;  %v9058_v48 = vpop.f32.mrf.mxu3  ;;  %v8265_v24 = vrot.slane %v8204_v62, 5  ;;  %v8445_v60 = vpop.f32.mrf.mxu1  ;;  %v7957_v62 = vadd.f32 %v16098_v22, %v7676_v1 }
 0x4b2   : > { %v9119_v37 = vrot.slane %v9058_v48, 5  ;;  %v8506_v28 = vrot.slane %v8445_v60, 5  ;;  %v16541_v48 = vld [vmem:[#allocation2 + $0x70] sm:$0xff]  ;;  %v13051_v60 = vunpack.c.h.bf16 %v13099_v40 }
 0x4b3   : > { %v8809_v52 = vsel %vm5200_vm14, %v8806_v49, %v8808_v29  ;;  %v8266_v42 = vsel %vm5200_vm14, %v8263_v13, %v8265_v24 }
 0x4b4   : > { %v8861_v55 = vadd.f32 %v8809_v52, %v8557_v27  ;;  %v9120_v39 = vsel %vm5200_vm14, %v9117_v8, %v9119_v37  ;;  %v8317_v61 = vadd.f32 %v8266_v42, %v7956_v38  ;;  %v8507_v17 = vsel %vm5200_vm14, %v8504_v43, %v8506_v28 }
 0x4b5   : > { %v10068_v8 = vrot.slane %v16504_v32, 3  ;;  %v9517_v43 = vsel %vm1435_vm3, %v9514_v36, %v9516_v9  ;;  %v9779_v36 = vsel %vm1837_vm4, %v16498_v15, %v16533_v20  ;;  %v13100_v15 = vld [vmem:[%s13251_s12 + $0x68] sm:$0xff]  }
 0x4b6   : > { %v16529_v11 = vadd.f32 %v9120_v39, %v8861_v55  ;;  %v8558_v3 = vadd.f32 %v8507_v17, %v8317_v61 }
 0x4b7   : > { %v10069_v22 = vsel %vm2077_vm5, %v10066_v47, %v10068_v8 }
 0x4b8   : > { %v8749_v58 = vpop.f32.mrf.mxu2  ;;  %v8207_v27 = vpop.f32.mrf.mxu0 }
 0x4b9   : > { %v8810_v49 = vrot.slane %v8749_v58, 5  ;;  %v9060_v12 = vpop.f32.mrf.mxu3  ;;  %v8267_v0 = vrot.slane %v8207_v27, 5  ;;  %v8448_v10 = vpop.f32.mrf.mxu1 }
 0x4ba   : > { %v9121_v13 = vrot.slane %v9060_v12, 5  ;;  %v8508_v38 = vrot.slane %v8448_v10, 5  ;;  %v13054_v12 = vunpack.c.l.bf16 %v13100_v15 }
 0x4bb   : > { %v8811_v51 = vsel %vm5200_vm14, %v8808_v29, %v8810_v49  ;;  %v8268_v55 = vsel %vm5200_vm14, %v8265_v24, %v8267_v0  ;;  %9298 = vmatmul.bf16.gmra.mxu0 %v15542_v41  ;;  %v9781_v41 = vshrl.u32 %v16541_v48, 16  ;;  %v7677_v29 = vadd.f32 %v16447_v54, %v13051_v60 }
 0x4bc   : > { %v8862_v45 = vadd.f32 %v8811_v51, %v8558_v3  ;;  %v9122_v52 = vsel %vm5200_vm14, %v9119_v37, %v9121_v13  ;;  %v8318_v39 = vadd.f32 %v8268_v55, %v7957_v62  ;;  %v8509_v42 = vsel %vm5200_vm14, %v8506_v28, %v8508_v38  ;;  %9602 = vmatmul.bf16.gmra.mxu1 %v9517_v43 }
 0x4bd   : > { %9913 = vmatmul.bf16.gmra.mxu2 %v9779_v36  ;;  %v9784_v28 = vshll.u32 %v16541_v48, 16  ;;  %v9783_v58 = vrot.slane %v9781_v41, 2  ;;  %v7958_v47 = vadd.f32 %v16127_v25, %v7677_v29  ;;  %v9518_v36 = vrot.slane %v16541_v48, 2 }
 0x4be   : > { %v16557_v40 = vadd.f32 %v9122_v52, %v8862_v45  ;;  %10154 = vmatmul.bf16.gmra.mxu3 %v10069_v22  ;;  %v8559_v37 = vadd.f32 %v8509_v42, %v8318_v39  ;;  %v7678_v39 = vadd.f32 %v16447_v54, %v13054_v12 }
 0x4bf   : > { %v9786_v51 = vrot.slane %v9784_v28, 3  ;;  %v16580_v28 = vld [vmem:[#allocation2 + $0x78] sm:$0xff] }
 0x4c0   : > { %v8752_v24 = vpop.f32.mrf.mxu2  ;;  %v8209_v17 = vpop.f32.mrf.mxu0 }
 0x4c1   : > { %v8812_v59 = vrot.slane %v8752_v24, 5  ;;  %v9063_v61 = vpop.f32.mrf.mxu3  ;;  %v8269_v3 = vrot.slane %v8209_v17, 5  ;;  %v8450_v26 = vpop.f32.mrf.mxu1  ;;  %v16572_v22 = vor.u32 %v9786_v51, %v9783_v58  ;;  %v13055_v17 = vunpack.c.h.bf16 %v13100_v15 }
 0x4c2   : > { %v9123_v1 = vrot.slane %v9063_v61, 5  ;;  %v8510_v10 = vrot.slane %v8450_v26, 5  ;;  %v7959_v61 = vadd.f32 %v16156_v56, %v7678_v39 }
 0x4c3   : > { %v8813_v27 = vsel %vm5200_vm14, %v8810_v49, %v8812_v59  ;;  %v8270_v60 = vsel %vm5200_vm14, %v8267_v0, %v8269_v3 }
 0x4c4   : > { %v8863_v43 = vadd.f32 %v8813_v27, %v8559_v37  ;;  %v9124_v62 = vsel %vm5200_vm14, %v9121_v13, %v9123_v1  ;;  %v8319_v45 = vadd.f32 %v8270_v60, %v7958_v47  ;;  %v8511_v52 = vsel %vm5200_vm14, %v8508_v38, %v8510_v10 }
 0x4c5   : > { %v10070_v13 = vrot.slane %v16541_v48, 3  ;;  %v9519_v38 = vsel %vm1435_vm3, %v9516_v9, %v9518_v36  ;;  %v9788_v9 = vsel %vm1837_vm4, %v16533_v20, %v16572_v22  ;;  %v13101_v20 = vld [vmem:[%s13251_s12 + $0x70] sm:$0xff]  }
 0x4c6   : > { %v16568_v55 = vadd.f32 %v9124_v62, %v8863_v43  ;;  %v8560_v25 = vadd.f32 %v8511_v52, %v8319_v45 }
 0x4c7   : > { %v10071_v56 = vsel %vm2077_vm5, %v10068_v8, %v10070_v13 }
 0x4c8   : > { %v8754_v42 = vpop.f32.mrf.mxu2  ;;  %v8212_v29 = vpop.f32.mrf.mxu0 }
 0x4c9   : > { %v8814_v49 = vrot.slane %v8754_v42, 5  ;;  %v9065_v41 = vpop.f32.mrf.mxu3  ;;  %v8271_v37 = vrot.slane %v8212_v29, 5  ;;  %v8453_v24 = vpop.f32.mrf.mxu1  ;;  %v13058_v42 = vunpack.c.l.bf16 %v13101_v20 }
 0x4ca   : > { %v9125_v0 = vrot.slane %v9065_v41, 5  ;;  %v8512_v58 = vrot.slane %v8453_v24, 5 }
 0x4cb   : > { %v8815_v26 = vsel %vm5200_vm14, %v8812_v59, %v8814_v49  ;;  %v8272_v27 = vsel %vm5200_vm14, %v8269_v3, %v8271_v37  ;;  %9303 = vmatmul.bf16.gmra.mxu0 %v15564_v5  ;;  %v9790_v5 = vshrl.u32 %v16580_v28, 16  ;;  %v7679_v59 = vadd.f32 %v16447_v54, %v13055_v17 }
 0x4cc   : > { %v8864_v47 = vadd.f32 %v8815_v26, %v8560_v25  ;;  %v9126_v12 = vsel %vm5200_vm14, %v9123_v1, %v9125_v0  ;;  %v8320_v43 = vadd.f32 %v8272_v27, %v7959_v61  ;;  %v8513_v62 = vsel %vm5200_vm14, %v8510_v10, %v8512_v58  ;;  %9607 = vmatmul.bf16.gmra.mxu1 %v9519_v38 }
 0x4cd   : > { %9918 = vmatmul.bf16.gmra.mxu2 %v9788_v9  ;;  %v9793_v10 = vshll.u32 %v16580_v28, 16  ;;  %v9792_v25 = vrot.slane %v9790_v5, 2  ;;  %v7960_v8 = vadd.f32 %v16182_v53, %v7679_v59  ;;  %v9520_v27 = vrot.slane %v16580_v28, 2 }
 0x4ce   : > { %v16596_v15 = vadd.f32 %v9126_v12, %v8864_v47  ;;  %10159 = vmatmul.bf16.gmra.mxu3 %v10071_v56  ;;  %v8561_v1 = vadd.f32 %v8513_v62, %v8320_v43  ;;  %v7680_v9 = vadd.f32 %v16447_v54, %v13058_v42 }
 0x4cf   : > { %v9795_v17 = vrot.slane %v9793_v10, 3 }
 0x4d0   : > { %v8757_v3 = vpop.f32.mrf.mxu2  ;;  %v8214_v45 = vpop.f32.mrf.mxu0  ;;  %v7961_v10 = vadd.f32 %v16214_v6, %v7680_v9 }
 0x4d1   : > { %v8816_v60 = vrot.slane %v8757_v3, 5  ;;  %v9068_v51 = vpop.f32.mrf.mxu3  ;;  %v8273_v39 = vrot.slane %v8214_v45, 5  ;;  %v8455_v32 = vpop.f32.mrf.mxu1  ;;  %v16611_v62 = vor.u32 %v9795_v17, %v9792_v25  ;;  %v16619_v3 = vld [vmem:[#allocation2 + $0x80] sm:$0xff] }
 0x4d2   : > { %v9127_v52 = vrot.slane %v9068_v51, 5  ;;  %v8514_v29 = vrot.slane %v8455_v32, 5  ;;  %v13059_v51 = vunpack.c.h.bf16 %v13101_v20 }
 0x4d3   : > { %v8817_v41 = vsel %vm5200_vm14, %v8814_v49, %v8816_v60  ;;  %v8274_v61 = vsel %vm5200_vm14, %v8271_v37, %v8273_v39 }
 0x4d4   : > { %v8865_v24 = vadd.f32 %v8817_v41, %v8561_v1  ;;  %v9128_v38 = vsel %vm5200_vm14, %v9125_v0, %v9127_v52  ;;  %v8321_v26 = vadd.f32 %v8274_v61, %v7960_v8  ;;  %v8515_v47 = vsel %vm5200_vm14, %v8512_v58, %v8514_v29 }
 0x4d5   : > { %v10072_v0 = vrot.slane %v16580_v28, 3  ;;  %v9521_v58 = vsel %vm1435_vm3, %v9518_v36, %v9520_v27  ;;  %v9797_v36 = vsel %vm1837_vm4, %v16572_v22, %v16611_v62  ;;  %v13102_v22 = vld [vmem:[%s13251_s12 + $0x78] sm:$0xff]  }
 0x4d6   : > { %v16607_v12 = vadd.f32 %v9128_v38, %v8865_v24  ;;  %v8562_v53 = vadd.f32 %v8515_v47, %v8321_v26 }
 0x4d7   : > { %v10073_v6 = vsel %vm2077_vm5, %v10070_v13, %v10072_v0 }
 0x4d8   : > { %v8759_v43 = vpop.f32.mrf.mxu2  ;;  %v8217_v5 = vpop.f32.mrf.mxu0 }
 0x4d9   : > { %v8818_v49 = vrot.slane %v8759_v43, 5  ;;  %v9070_v56 = vpop.f32.mrf.mxu3  ;;  %v8275_v59 = vrot.slane %v8217_v5, 5  ;;  %v8458_v1 = vpop.f32.mrf.mxu1 }
 0x4da   : > { %v9129_v37 = vrot.slane %v9070_v56, 5  ;;  %v8516_v32 = vrot.slane %v8458_v1, 5 }
 0x4db   : > { %v8819_v45 = vsel %vm5200_vm14, %v8816_v60, %v8818_v49  ;;  %v8276_v42 = vsel %vm5200_vm14, %v8273_v39, %v8275_v59  ;;  %9308 = vmatmul.bf16.gmra.mxu0 %v15595_v31  ;;  %v9799_v31 = vshrl.u32 %v16619_v3, 16  ;;  %v7681_v60 = vadd.f32 %v16447_v54, %v13059_v51 }
 0x4dc   : > { %v8866_v25 = vadd.f32 %v8819_v45, %v8562_v53  ;;  %v9130_v8 = vsel %vm5200_vm14, %v9127_v52, %v9129_v37  ;;  %v8322_v41 = vadd.f32 %v8276_v42, %v7961_v10  ;;  %v8517_v24 = vsel %vm5200_vm14, %v8514_v29, %v8516_v32  ;;  %9612 = vmatmul.bf16.gmra.mxu1 %v9521_v58 }
 0x4dd   : > { %9923 = vmatmul.bf16.gmra.mxu2 %v9797_v36  ;;  %v9802_v29 = vshll.u32 %v16619_v3, 16  ;;  %v9801_v9 = vrot.slane %v9799_v31, 2  ;;  %v7962_v13 = vadd.f32 %v16234_v50, %v7681_v60  ;;  %v13062_v53 = vunpack.c.l.bf16 %v13102_v22 }
 0x4de   : > { %v16635_v20 = vadd.f32 %v9130_v8, %v8866_v25  ;;  %10164 = vmatmul.bf16.gmra.mxu3 %v10073_v6  ;;  %v8563_v52 = vadd.f32 %v8517_v24, %v8322_v41  ;;  %v9522_v8 = vrot.slane %v16619_v3, 2 }
 0x4df   : > { %v9804_v10 = vrot.slane %v9802_v29, 3  ;;  %v7682_v42 = vadd.f32 %v16447_v54, %v13062_v53  ;;  %v13063_v29 = vunpack.c.h.bf16 %v13102_v22 }
 0x4e0   : > { %v8762_v39 = vpop.f32.mrf.mxu2  ;;  %v8219_v17 = vpop.f32.mrf.mxu0 }
 0x4e1   : > { %v8820_v38 = vrot.slane %v8762_v39, 5  ;;  %v9073_v61 = vpop.f32.mrf.mxu3  ;;  %v8277_v47 = vrot.slane %v8219_v17, 5  ;;  %v8460_v48 = vpop.f32.mrf.mxu1  ;;  %v16650_v41 = vor.u32 %v9804_v10, %v9801_v9  ;;  %v7963_v39 = vadd.f32 %v16272_v2, %v7682_v42 }
 0x4e2   : > { %v9131_v26 = vrot.slane %v9073_v61, 5  ;;  %v8518_v56 = vrot.slane %v8460_v48, 5 }
 0x4e3   : > { %v8821_v43 = vsel %vm5200_vm14, %v8818_v49, %v8820_v38  ;;  %v8278_v58 = vsel %vm5200_vm14, %v8275_v59, %v8277_v47 }
 0x4e4   : > { %v8867_v5 = vadd.f32 %v8821_v43, %v8563_v52  ;;  %v9132_v1 = vsel %vm5200_vm14, %v9129_v37, %v9131_v26  ;;  %v8323_v51 = vadd.f32 %v8278_v58, %v7962_v13  ;;  %v8519_v45 = vsel %vm5200_vm14, %v8516_v32, %v8518_v56  ;;  %v16658_v52 = vld [vmem:[#allocation2 + $0x88] sm:$0xff] }
 0x4e5   : > { %v10074_v37 = vrot.slane %v16619_v3, 3  ;;  %v9523_v32 = vsel %vm1435_vm3, %v9520_v27, %v9522_v8  ;;  %v9806_v27 = vsel %vm1837_vm4, %v16611_v62, %v16650_v41  ;;  %v13103_v62 = vld [vmem:[%s13251_s12 + $0x80] sm:$0xff]  }
 0x4e6   : > { %v16646_v25 = vadd.f32 %v9132_v1, %v8867_v5  ;;  %v8564_v50 = vadd.f32 %v8519_v45, %v8323_v51  ;;  %v13066_v42 = vunpack.c.l.bf16 %v13103_v62 }
 0x4e7   : > { %v10075_v2 = vsel %vm2077_vm5, %v10072_v0, %v10074_v37 }
 0x4e8   : > { %v8764_v36 = vpop.f32.mrf.mxu2  ;;  %v8222_v6 = vpop.f32.mrf.mxu0 }
 0x4e9   : > { %v8822_v49 = vrot.slane %v8764_v36, 5  ;;  %v9075_v24 = vpop.f32.mrf.mxu3  ;;  %v8279_v31 = vrot.slane %v8222_v6, 5  ;;  %v8463_v60 = vpop.f32.mrf.mxu1 }
 0x4ea   : > { %v9133_v59 = vrot.slane %v9075_v24, 5  ;;  %v8520_v17 = vrot.slane %v8463_v60, 5 }
 0x4eb   : > { %v8823_v61 = vsel %vm5200_vm14, %v8820_v38, %v8822_v49  ;;  %v8280_v13 = vsel %vm5200_vm14, %v8277_v47, %v8279_v31  ;;  %9313 = vmatmul.bf16.gmra.mxu0 %v15652_v18  ;;  %v9808_v18 = vshrl.u32 %v16658_v52, 16  ;;  %v7683_v38 = vadd.f32 %v16447_v54, %v13063_v29 }
 0x4ec   : > { %v8868_v48 = vadd.f32 %v8823_v61, %v8564_v50  ;;  %v9134_v9 = vsel %vm5200_vm14, %v9131_v26, %v9133_v59  ;;  %v8324_v53 = vadd.f32 %v8280_v13, %v7963_v39  ;;  %v8521_v43 = vsel %vm5200_vm14, %v8518_v56, %v8520_v17  ;;  %9617 = vmatmul.bf16.gmra.mxu1 %v9523_v32 }
 0x4ed   : > { %9928 = vmatmul.bf16.gmra.mxu2 %v9806_v27  ;;  %v9811_v56 = vshll.u32 %v16658_v52, 16  ;;  %v9810_v45 = vrot.slane %v9808_v18, 2  ;;  %v7964_v0 = vadd.f32 %v16289_v44, %v7683_v38  ;;  %v16697_v38 = vld [vmem:[#allocation2 + $0x90] sm:$0xff] }
 0x4ee   : > { %v16674_v22 = vadd.f32 %v9134_v9, %v8868_v48  ;;  %10169 = vmatmul.bf16.gmra.mxu3 %v10075_v2  ;;  %v8565_v26 = vadd.f32 %v8521_v43, %v8324_v53  ;;  %v9524_v48 = vrot.slane %v16658_v52, 2  ;;  %v7684_v9 = vadd.f32 %v16447_v54, %v13066_v42 }
 0x4ef   : > { %v9813_v32 = vrot.slane %v9811_v56, 3 }
 0x4f0   : > { %v8767_v47 = vpop.f32.mrf.mxu2  ;;  %v8224_v58 = vpop.f32.mrf.mxu0 }
 0x4f1   : > { %v8824_v5 = vrot.slane %v8767_v47, 5  ;;  %v9078_v1 = vpop.f32.mrf.mxu3  ;;  %v8281_v51 = vrot.slane %v8224_v58, 5  ;;  %v8465_v28 = vpop.f32.mrf.mxu1  ;;  %v16689_v27 = vor.u32 %v9813_v32, %v9810_v45  ;;  %v13067_v47 = vunpack.c.h.bf16 %v13103_v62 }
 0x4f2   : > { %v9135_v10 = vrot.slane %v9078_v1, 5  ;;  %v8522_v36 = vrot.slane %v8465_v28, 5 }
 0x4f3   : > { %v8825_v50 = vsel %vm5200_vm14, %v8822_v49, %v8824_v5  ;;  %v8282_v60 = vsel %vm5200_vm14, %v8279_v31, %v8281_v51 }
 0x4f4   : > { %v8869_v24 = vadd.f32 %v8825_v50, %v8565_v26  ;;  %v9136_v6 = vsel %vm5200_vm14, %v9133_v59, %v9135_v10  ;;  %v8325_v39 = vadd.f32 %v8282_v60, %v7964_v0  ;;  %v8523_v29 = vsel %vm5200_vm14, %v8520_v17, %v8522_v36 }
 0x4f5   : > { %v10076_v59 = vrot.slane %v16658_v52, 3  ;;  %v9525_v17 = vsel %vm1435_vm3, %v9522_v8, %v9524_v48  ;;  %v7965_v26 = vadd.f32 %v16330_v34, %v7684_v9  ;;  %v9815_v8 = vsel %vm1837_vm4, %v16650_v41, %v16689_v27  ;;  %v13104_v41 = vld [vmem:[%s13251_s12 + $0x88] sm:$0xff]  }
 0x4f6   : > { %v16685_v61 = vadd.f32 %v9136_v6, %v8869_v24  ;;  %v8566_v44 = vadd.f32 %v8523_v29, %v8325_v39  ;;  %v9820_v50 = vshll.u32 %v16697_v38, 16  ;;  %v13070_v29 = vunpack.c.l.bf16 %v13104_v41 }
 0x4f7   : > { %v10077_v34 = vsel %vm2077_vm5, %v10074_v37, %v10076_v59 }
 0x4f8   : > { %v8769_v13 = vpop.f32.mrf.mxu2  ;;  %v8227_v43 = vpop.f32.mrf.mxu0 }
 0x4f9   : > { %v8826_v49 = vrot.slane %v8769_v13, 5  ;;  %v9080_v53 = vpop.f32.mrf.mxu3  ;;  %v8283_v2 = vrot.slane %v8227_v43, 5  ;;  %v8468_v18 = vpop.f32.mrf.mxu1 }
 0x4fa   : > { %v9137_v31 = vrot.slane %v9080_v53, 5  ;;  %v8524_v1 = vrot.slane %v8468_v18, 5  ;;  %v9822_v18 = vrot.slane %v9820_v50, 3 }
 0x4fb   : > { %v8827_v56 = vsel %vm5200_vm14, %v8824_v5, %v8826_v49  ;;  %v8284_v45 = vsel %vm5200_vm14, %v8281_v51, %v8283_v2  ;;  %9318 = vmatmul.bf16.gmra.mxu0 %v15723_v30  ;;  %v9817_v30 = vshrl.u32 %v16697_v38, 16  ;;  %v7685_v5 = vadd.f32 %v16447_v54, %v13067_v47 }
 0x4fc   : > { %v8870_v58 = vadd.f32 %v8827_v56, %v8566_v44  ;;  %v9138_v28 = vsel %vm5200_vm14, %v9135_v10, %v9137_v31  ;;  %v8326_v0 = vadd.f32 %v8284_v45, %v7965_v26  ;;  %v8525_v42 = vsel %vm5200_vm14, %v8522_v36, %v8524_v1  ;;  %9622 = vmatmul.bf16.gmra.mxu1 %v9525_v17 }
 0x4fd   : > { %9933 = vmatmul.bf16.gmra.mxu2 %v9815_v8  ;;  %v9819_v39 = vrot.slane %v9817_v30, 2  ;;  %v7966_v37 = vadd.f32 %v16347_v35, %v7685_v5  ;;  %v9526_v56 = vrot.slane %v16697_v38, 2  ;;  %v16736_v30 = vld [vmem:[#allocation2 + $0x98] sm:$0xff] }
 0x4fe   : > { %v16713_v62 = vadd.f32 %v9138_v28, %v8870_v58  ;;  %10174 = vmatmul.bf16.gmra.mxu3 %v10077_v34  ;;  %v8567_v10 = vadd.f32 %v8525_v42, %v8326_v0  ;;  %v7686_v58 = vadd.f32 %v16447_v54, %v13070_v29  ;;  %v9829_v29 = vshll.u32 %v16736_v30, 16 }
 0x4ff   : > { %v16728_v45 = vor.u32 %v9822_v18, %v9819_v39 }
 0x500   : > { %v8772_v51 = vpop.f32.mrf.mxu2  ;;  %v8229_v6 = vpop.f32.mrf.mxu0  ;;  %v7967_v5 = vadd.f32 %v16390_v23, %v7686_v58 }
 0x501   : > { %v8828_v36 = vrot.slane %v8772_v51, 5  ;;  %v9083_v24 = vpop.f32.mrf.mxu3  ;;  %v8285_v32 = vrot.slane %v8229_v6, 5  ;;  %v8470_v3 = vpop.f32.mrf.mxu1 }
 0x502   : > { %v9139_v60 = vrot.slane %v9083_v24, 5  ;;  %v8526_v44 = vrot.slane %v8470_v3, 5 }
 0x503   : > { %v8829_v9 = vsel %vm5200_vm14, %v8826_v49, %v8828_v36  ;;  %v8286_v43 = vsel %vm5200_vm14, %v8283_v2, %v8285_v32 }
 0x504   : > { %v8871_v13 = vadd.f32 %v8829_v9, %v8567_v10  ;;  %v9140_v53 = vsel %vm5200_vm14, %v9137_v31, %v9139_v60  ;;  %v8327_v17 = vadd.f32 %v8286_v43, %v7966_v37  ;;  %v8527_v26 = vsel %vm5200_vm14, %v8524_v1, %v8526_v44 }
 0x505   : > { %v10078_v31 = vrot.slane %v16697_v38, 3  ;;  %v9527_v1 = vsel %vm1435_vm3, %v9524_v48, %v9526_v56  ;;  %v13071_v10 = vunpack.c.h.bf16 %v13104_v41  ;;  %v9824_v48 = vsel %vm1837_vm4, %v16689_v27, %v16728_v45  ;;  %v13105_v27 = vld [vmem:[%s13251_s12 + $0x90] sm:$0xff]  }
 0x506   : > { %v16724_v47 = vadd.f32 %v9140_v53, %v8871_v13  ;;  %v8568_v35 = vadd.f32 %v8527_v26, %v8327_v17  ;;  %v13074_v17 = vunpack.c.l.bf16 %v13105_v27 }
 0x507   : > { %v10079_v23 = vsel %vm2077_vm5, %v10076_v59, %v10078_v31 }
 0x508   : > { %v8774_v28 = vpop.f32.mrf.mxu2  ;;  %v8232_v0 = vpop.f32.mrf.mxu0 }
 0x509   : > { %v8830_v49 = vrot.slane %v8774_v28, 5  ;;  %v9085_v8 = vpop.f32.mrf.mxu3  ;;  %v8287_v42 = vrot.slane %v8232_v0, 5  ;;  %v8473_v34 = vpop.f32.mrf.mxu1 }
 0x50a   : > { %v9141_v2 = vrot.slane %v9085_v8, 5  ;;  %v8528_v50 = vrot.slane %v8473_v34, 5  ;;  %v9831_v34 = vrot.slane %v9829_v29, 3 }
 0x50b   : > { %v8831_v51 = vsel %vm5200_vm14, %v8828_v36, %v8830_v49  ;;  %v8288_v3 = vsel %vm5200_vm14, %v8285_v32, %v8287_v42  ;;  %9323 = vmatmul.bf16.gmra.mxu0 %v15740_v4  ;;  %v9826_v4 = vshrl.u32 %v16736_v30, 16  ;;  %v7687_v36 = vadd.f32 %v16447_v54, %v13071_v10 }
 0x50c   : > { %v8872_v24 = vadd.f32 %v8831_v51, %v8568_v35  ;;  %v9142_v6 = vsel %vm5200_vm14, %v9139_v60, %v9141_v2  ;;  %v8328_v39 = vadd.f32 %v8288_v3, %v7967_v5  ;;  %v8529_v37 = vsel %vm5200_vm14, %v8526_v44, %v8528_v50  ;;  %9627 = vmatmul.bf16.gmra.mxu1 %v9527_v1  ;;  %v9734_v35 = vld [vmem:[#allocation2 + $0xa0] sm:$0x7] }
 0x50d   : > { %9938 = vmatmul.bf16.gmra.mxu2 %v9824_v48  ;;  %v9828_v18 = vrot.slane %v9826_v4, 2  ;;  %v7968_v59 = vadd.f32 %v16410_v16, %v7687_v36  ;;  %v9528_v10 = vrot.slane %v16736_v30, 2  ;;  %v7688_v16 = vadd.f32 %v16447_v54, %v13074_v17 }
 0x50e   : > { %v16752_v41 = vadd.f32 %v9142_v6, %v8872_v24  ;;  %10179 = vmatmul.bf16.gmra.mxu3 %v10079_v23  ;;  %v8569_v60 = vadd.f32 %v8529_v37, %v8328_v39  ;;  %v9752_v24 = vunpack.c.l.b16 %v9734_v35  ;;  %v7652_v6 = vld [vmem:[%s13251_s12 + $0x98] sm:$0x3] }
 0x50f   : > { %v16768_v48 = vor.u32 %v9831_v34, %v9828_v18  ;;  %v7671_v23 = vunpack.c.l.bf16 %v7652_v6 }
 0x510   : > { %v8777_v32 = vpop.f32.mrf.mxu2  ;;  %v8234_v13 = vpop.f32.mrf.mxu0  ;;  %v16776_v29 = vpack.c.b16 %v9752_v24, %v9752_v24 }
 0x511   : > { %v8832_v9 = vrot.slane %v8777_v32, 5  ;;  %v9088_v44 = vpop.f32.mrf.mxu3  ;;  %v8289_v43 = vrot.slane %v8234_v13, 5  ;;  %v8475_v52 = vpop.f32.mrf.mxu1  ;;  %v9448_v32 = vld [vmem:[#allocation2 + $0xa0] sm:$0x3]  ;;  %v13075_v13 = vunpack.c.h.bf16 %v13105_v27 }
 0x512   : > { %v9143_v53 = vrot.slane %v9088_v44, 5  ;;  %v8530_v58 = vrot.slane %v8475_v52, 5  ;;  %v7969_v44 = vadd.f32 %v16437_v57, %v7688_v16  ;;  %v9502_v27 = vunpack.c.l.b16 %v9448_v32 }
 0x513   : > { %v8833_v26 = vsel %vm5200_vm14, %v8830_v49, %v8832_v9  ;;  %v8290_v0 = vsel %vm5200_vm14, %v8287_v42, %v8289_v43  ;;  %v9529_v42 = vsel %vm1435_vm3, %v9526_v56, %v9528_v10 }
 0x514   : > { %v8873_v28 = vadd.f32 %v8833_v26, %v8569_v60  ;;  %v9144_v8 = vsel %vm5200_vm14, %v9141_v2, %v9143_v53  ;;  %v8329_v1 = vadd.f32 %v8290_v0, %v7968_v59  ;;  %v8531_v5 = vsel %vm5200_vm14, %v8528_v50, %v8530_v58 }
 0x515   : > { %v10080_v50 = vrot.slane %v16736_v30, 3  ;;  %v9833_v26 = vsel %vm1837_vm4, %v16728_v45, %v16768_v48  ;;  %v7689_v45 = vadd.f32 %v16447_v54, %v13075_v13  ;;  %v9512_v38 = vpack.c.b16 %v9502_v27, %v9502_v27 }
 0x516   : > { %v16764_v51 = vadd.f32 %v9144_v8, %v8873_v28  ;;  %v8570_v49 = vadd.f32 %v8531_v5, %v8329_v1 }
 0x517   : > { %v10081_v57 = vsel %vm2077_vm5, %v10078_v31, %v10080_v50 }
 0x518   : > { %v8779_v3 = vpop.f32.mrf.mxu2  ;;  %v8237_v37 = vpop.f32.mrf.mxu0 }
 0x519   : > { %v8834_v39 = vrot.slane %v8779_v3, 5  ;;  %v9090_v2 = vpop.f32.mrf.mxu3  ;;  %v8291_v36 = vrot.slane %v8237_v37, 5  ;;  %v8478_v60 = vpop.f32.mrf.mxu1 }
 0x51a   : > { %v9145_v4 = vrot.slane %v9090_v2, 5  ;;  %v8532_v18 = vrot.slane %v8478_v60, 5 }
 0x51b   : > { %v8835_v52 = vsel %vm5200_vm14, %v8832_v9, %v8834_v39  ;;  %v8292_v56 = vsel %vm5200_vm14, %v8289_v43, %v8291_v36  ;;  %9328 = vmatmul.bf16.gmra.mxu0 %v15794_v63  ;;  %v7690_v9 = vadd.f32 %v16447_v54, %v7671_v23  ;;  %v9835_v63 = vshrl.u32 %v16776_v29, 16 }
 0x51c   : > { %v8874_v59 = vadd.f32 %v8835_v52, %v8570_v49  ;;  %v9146_v17 = vsel %vm5200_vm14, %v9143_v53, %v9145_v4  ;;  %v8330_v35 = vadd.f32 %v8292_v56, %v7969_v44  ;;  %v8533_v28 = vsel %vm5200_vm14, %v8530_v58, %v8532_v18  ;;  %9632 = vmatmul.bf16.gmra.mxu1 %v9529_v42 }
 0x51d   : > { %9943 = vmatmul.bf16.gmra.mxu2 %v9833_v26  ;;  %v9838_v58 = vshll.u32 %v16776_v29, 16  ;;  %v7971_v31 = vadd.f32 %v7932_v33, %v7690_v9  ;;  %v9837_v6 = vrot.slane %v9835_v63, 2  ;;  %v7970_v49 = vadd.f32 %v16469_v19, %v7689_v45 }
 0x51e   : > { %v16793_v53 = vadd.f32 %v9146_v17, %v8874_v59  ;;  %10184 = vmatmul.bf16.gmra.mxu3 %v10081_v57  ;;  %v8571_v43 = vadd.f32 %v8533_v28, %v8330_v35  ;;  %v9530_v59 = vrot.slane %v9512_v38, 2  ;;  %v10082_v26 = vrot.slane %v16776_v29, 3 }
 0x51f   : > { %v9840_v2 = vrot.slane %v9838_v58, 3 }
 0x520   : > { %v8782_v8 = vpop.f32.mrf.mxu2  ;;  %v8239_v1 = vpop.f32.mrf.mxu0  ;;  %v9531_v9 = vsel %vm1435_vm3, %v9528_v10, %v9530_v59 }
 0x521   : > { %v8836_v0 = vrot.slane %v8782_v8, 5  ;;  %v9093_v34 = vpop.f32.mrf.mxu3  ;;  %v8293_v24 = vrot.slane %v8239_v1, 5  ;;  %v8480_v16 = vpop.f32.mrf.mxu1  ;;  %v9841_v19 = vor.u32 %v9840_v2, %v9837_v6 }
 0x522   : > { %v9147_v5 = vrot.slane %v9093_v34, 5  ;;  %v8534_v54 = vrot.slane %v8480_v16, 5 }
 0x523   : > { %v8837_v3 = vsel %vm5200_vm14, %v8834_v39, %v8836_v0  ;;  %v8294_v23 = vsel %vm5200_vm14, %v8291_v36, %v8293_v24  ;;  %v8332_v60 = vadd.f32 %v8293_v24, %v7971_v31  ;;  %v9842_v63 = vsel %vm1837_vm4, %v16768_v48, %v9841_v19 }
 0x524   : > { %v8875_v37 = vadd.f32 %v8837_v3, %v8571_v43  ;;  %v9148_v42 = vsel %vm5200_vm14, %v9145_v4, %v9147_v5  ;;  %v8331_v32 = vadd.f32 %v8294_v23, %v7970_v49  ;;  %v8535_v7 = vsel %vm5200_vm14, %v8532_v18, %v8534_v54 }
 0x525   : > { %v8573_v44 = vadd.f32 %v8534_v54, %v8332_v60  ;;  %v10083_v43 = vsel %vm2077_vm5, %v10080_v50, %v10082_v26 }
 0x526   : > { %v16805_v33 = vadd.f32 %v9148_v42, %v8875_v37  ;;  %v8572_v13 = vadd.f32 %v8535_v7, %v8331_v32 }
 0x528   : > { %v8784_v52 = vpop.f32.mrf.mxu2  ;;  %v9294_v56 = vpop.f32.mrf.mxu0 }
 0x529   : > { %v8838_v17 = vrot.slane %v8784_v52, 5  ;;  %v9095_v39 = vpop.f32.mrf.mxu3  ;;  %v9357_v4 = vrot.slane %v9294_v56, 5  ;;  %v9598_v28 = vpop.f32.mrf.mxu1 }
 0x52a   : > { %v9149_v35 = vrot.slane %v9095_v39, 5 }
 0x52b   : > { %v8839_v36 = vsel %vm5200_vm14, %v8836_v0, %v8838_v17  ;;  %v8877_v57 = vadd.f32 %v8838_v17, %v8573_v44  ;;  %9333 = vmatmul.bf16.gmra.mxu0 %v15805_v14  ;;  %v9411_v29 = vadd.f32 %v9357_v4, %v16491_v46  ;;  %v9661_v14 = vrot.slane %v9598_v28, 5 }
 0x52c   : > { %v8876_v27 = vadd.f32 %v8839_v36, %v8572_v13  ;;  %v9150_v18 = vsel %vm5200_vm14, %v9147_v5, %v9149_v35  ;;  %9637 = vmatmul.bf16.gmra.mxu1 %v9531_v9 }
 0x52d   : > { %v16816_v45 = vadd.f32 %v9149_v35, %v8877_v57  ;;  %9948 = vmatmul.bf16.gmra.mxu2 %v9842_v63  ;;  %v9715_v10 = vadd.f32 %v9661_v14, %v9411_v29 }
 0x52e   : > { %v16822_v58 = vadd.f32 %v9150_v18, %v8876_v27  ;;  %10189 = vmatmul.bf16.gmra.mxu3 %v10083_v43 }
 0x530   : > { %v9909_v8 = vpop.f32.mrf.mxu2  ;;  %v9296_v48 = vpop.f32.mrf.mxu0 }
 0x531   : > { %v9972_v0 = vrot.slane %v9909_v8, 5  ;;  %v10150_v34 = vpop.f32.mrf.mxu3  ;;  %v9358_v1 = vrot.slane %v9296_v48, 5  ;;  %v9600_v38 = vpop.f32.mrf.mxu1 }
 0x532   : > { %v10213_v46 = vrot.slane %v10150_v34, 5  ;;  %v9662_v30 = vrot.slane %v9600_v38, 5 }
 0x533   : > { %v10026_v31 = vadd.f32 %v9972_v0, %v9715_v10  ;;  %v9359_v5 = vsel %vm5200_vm14, %v9357_v4, %v9358_v1 }
 0x534   : > { %v9412_v50 = vadd.f32 %v9359_v5, %v16518_v21  ;;  %v9663_v49 = vsel %vm5200_vm14, %v9661_v14, %v9662_v30 }
 0x535   : > { %v10267_v24 = vadd.f32 %v10213_v46, %v10026_v31 }
 0x536   : > { %v9716_v37 = vadd.f32 %v9663_v49, %v9412_v50 }
 0x537   : > { %v10286_v16 = vmax.f32 %v10267_v24, 0.0 }
 0x538   : > { %v9911_v6 = vpop.f32.mrf.mxu2  ;;  %v9299_v2 = vpop.f32.mrf.mxu0 }
 0x539   : > { %10305 = vst [vmem:[%s15988_s20 + $0x8d] sm:$0xf8] %v10286_v16  ;;  %v9973_v3 = vrot.slane %v9911_v6, 5  ;;  %v10152_v54 = vpop.f32.mrf.mxu3  ;;  %v9360_v23 = vrot.slane %v9299_v2, 5  ;;  %v9603_v60 = vpop.f32.mrf.mxu1 }
 0x53a   : > { %v10214_v42 = vrot.slane %v10152_v54, 5  ;;  %v9664_v13 = vrot.slane %v9603_v60, 5 }
 0x53b   : > { %v9974_v32 = vsel %vm5200_vm14, %v9972_v0, %v9973_v3  ;;  %v9361_v44 = vsel %vm5200_vm14, %v9358_v1, %v9360_v23 }
 0x53c   : > { %v10027_v7 = vadd.f32 %v9974_v32, %v9716_v37  ;;  %v10215_v21 = vsel %vm5200_vm14, %v10213_v46, %v10214_v42  ;;  %v9413_v59 = vadd.f32 %v9361_v44, %v16529_v11  ;;  %v9665_v39 = vsel %vm5200_vm14, %v9662_v30, %v9664_v13 }
 0x53e   : > { %v10268_v52 = vadd.f32 %v10215_v21, %v10027_v7  ;;  %v9717_v4 = vadd.f32 %v9665_v39, %v9413_v59 }
 0x540   : > { %v10287_v19 = vmax.f32 %v10268_v52, 0.0  ;;  %v9914_v17 = vpop.f32.mrf.mxu2  ;;  %v9301_v35 = vpop.f32.mrf.mxu0 }
 0x541   : > { %v9975_v56 = vrot.slane %v9914_v17, 5  ;;  %v10155_v26 = vpop.f32.mrf.mxu3  ;;  %v9362_v36 = vrot.slane %v9301_v35, 5  ;;  %v9605_v57 = vpop.f32.mrf.mxu1 }
 0x542   : > { %10306 = vst [vmem:[%s15988_s20 + $0x95] sm:$0xff] %v10287_v19  ;;  %v10216_v28 = vrot.slane %v10155_v26, 5  ;;  %v9666_v63 = vrot.slane %v9605_v57, 5 }
 0x543   : > { %v9976_v27 = vsel %vm5200_vm14, %v9973_v3, %v9975_v56  ;;  %v9363_v9 = vsel %vm5200_vm14, %v9360_v23, %v9362_v36 }
 0x544   : > { %v10028_v18 = vadd.f32 %v9976_v27, %v9717_v4  ;;  %v10217_v11 = vsel %vm5200_vm14, %v10214_v42, %v10216_v28  ;;  %v9414_v43 = vadd.f32 %v9363_v9, %v16557_v40  ;;  %v9667_v10 = vsel %vm5200_vm14, %v9664_v13, %v9666_v63 }
 0x546   : > { %v10269_v29 = vadd.f32 %v10217_v11, %v10028_v18  ;;  %v9718_v1 = vadd.f32 %v9667_v10, %v9414_v43 }
 0x548   : > { %v10288_v14 = vmax.f32 %v10269_v29, 0.0  ;;  %v9916_v8 = vpop.f32.mrf.mxu2  ;;  %v9304_v48 = vpop.f32.mrf.mxu0 }
 0x549   : > { %v9977_v0 = vrot.slane %v9916_v8, 5  ;;  %v10157_v34 = vpop.f32.mrf.mxu3  ;;  %v9364_v31 = vrot.slane %v9304_v48, 5  ;;  %v9608_v46 = vpop.f32.mrf.mxu1 }
 0x54a   : > { %10307 = vst [vmem:[%s15988_s20 + $0x9d] sm:$0xff] %v10288_v14  ;;  %v10218_v38 = vrot.slane %v10157_v34, 5  ;;  %v9668_v50 = vrot.slane %v9608_v46, 5 }
 0x54b   : > { %v9978_v5 = vsel %vm5200_vm14, %v9975_v56, %v9977_v0  ;;  %v9365_v30 = vsel %vm5200_vm14, %v9362_v36, %v9364_v31 }
 0x54c   : > { %v10029_v24 = vadd.f32 %v9978_v5, %v9718_v1  ;;  %v10219_v40 = vsel %vm5200_vm14, %v10216_v28, %v10218_v38  ;;  %v9415_v6 = vadd.f32 %v9365_v30, %v16568_v55  ;;  %v9669_v54 = vsel %vm5200_vm14, %v9666_v63, %v9668_v50 }
 0x54e   : > { %v10270_v16 = vadd.f32 %v10219_v40, %v10029_v24  ;;  %v9719_v23 = vadd.f32 %v9669_v54, %v9415_v6 }
 0x550   : > { %v10289_v49 = vmax.f32 %v10270_v16, 0.0  ;;  %v9919_v3 = vpop.f32.mrf.mxu2  ;;  %v9306_v42 = vpop.f32.mrf.mxu0 }
 0x551   : > { %v9979_v2 = vrot.slane %v9919_v3, 5  ;;  %v10160_v37 = vpop.f32.mrf.mxu3  ;;  %v9366_v32 = vrot.slane %v9306_v42, 5  ;;  %v9610_v7 = vpop.f32.mrf.mxu1 }
 0x552   : > { %10308 = vst [vmem:[%s15988_s20 + $0xa5] sm:$0xff] %v10289_v49  ;;  %v10220_v60 = vrot.slane %v10160_v37, 5  ;;  %v9670_v52 = vrot.slane %v9610_v7, 5 }
 0x553   : > { %v9980_v44 = vsel %vm5200_vm14, %v9977_v0, %v9979_v2  ;;  %v9367_v13 = vsel %vm5200_vm14, %v9364_v31, %v9366_v32 }
 0x554   : > { %v10030_v21 = vadd.f32 %v9980_v44, %v9719_v23  ;;  %v10221_v55 = vsel %vm5200_vm14, %v10218_v38, %v10220_v60  ;;  %v9416_v19 = vadd.f32 %v9367_v13, %v16596_v15  ;;  %v9671_v56 = vsel %vm5200_vm14, %v9668_v50, %v9670_v52 }
 0x556   : > { %v10271_v59 = vadd.f32 %v10221_v55, %v10030_v21  ;;  %v9720_v28 = vadd.f32 %v9671_v56, %v9416_v19 }
 0x558   : > { %v10290_v17 = vmax.f32 %v10271_v59, 0.0  ;;  %v9921_v39 = vpop.f32.mrf.mxu2  ;;  %v9309_v4 = vpop.f32.mrf.mxu0 }
 0x559   : > { %v9981_v26 = vrot.slane %v9921_v39, 5  ;;  %v10162_v35 = vpop.f32.mrf.mxu3  ;;  %v9368_v57 = vrot.slane %v9309_v4, 5  ;;  %v9613_v27 = vpop.f32.mrf.mxu1 }
 0x55a   : > { %10309 = vst [vmem:[%s15988_s20 + $0xad] sm:$0xff] %v10290_v17  ;;  %v10222_v36 = vrot.slane %v10162_v35, 5  ;;  %v9672_v63 = vrot.slane %v9613_v27, 5 }
 0x55b   : > { %v9982_v18 = vsel %vm5200_vm14, %v9979_v2, %v9981_v26  ;;  %v9369_v11 = vsel %vm5200_vm14, %v9366_v32, %v9368_v57 }
 0x55c   : > { %v10031_v9 = vadd.f32 %v9982_v18, %v9720_v28  ;;  %v10223_v15 = vsel %vm5200_vm14, %v10220_v60, %v10222_v36  ;;  %v9417_v43 = vadd.f32 %v9369_v11, %v16607_v12  ;;  %v9673_v10 = vsel %vm5200_vm14, %v9670_v52, %v9672_v63 }
 0x55e   : > { %v10272_v29 = vadd.f32 %v10223_v15, %v10031_v9  ;;  %v9721_v1 = vadd.f32 %v9673_v10, %v9417_v43 }
 0x560   : > { %v10291_v14 = vmax.f32 %v10272_v29, 0.0  ;;  %v9924_v8 = vpop.f32.mrf.mxu2  ;;  %v9311_v48 = vpop.f32.mrf.mxu0 }
 0x561   : > { %v9983_v0 = vrot.slane %v9924_v8, 5  ;;  %v10165_v34 = vpop.f32.mrf.mxu3  ;;  %v9370_v31 = vrot.slane %v9311_v48, 5  ;;  %v9615_v46 = vpop.f32.mrf.mxu1 }
 0x562   : > { %10310 = vst [vmem:[%s15988_s20 + $0xb5] sm:$0xff] %v10291_v14  ;;  %v10224_v38 = vrot.slane %v10165_v34, 5  ;;  %v9674_v40 = vrot.slane %v9615_v46, 5 }
 0x563   : > { %v9984_v5 = vsel %vm5200_vm14, %v9981_v26, %v9983_v0  ;;  %v9371_v30 = vsel %vm5200_vm14, %v9368_v57, %v9370_v31 }
 0x564   : > { %v10032_v24 = vadd.f32 %v9984_v5, %v9721_v1  ;;  %v10225_v12 = vsel %vm5200_vm14, %v10222_v36, %v10224_v38  ;;  %v9418_v16 = vadd.f32 %v9371_v30, %v16635_v20  ;;  %v9675_v3 = vsel %vm5200_vm14, %v9672_v63, %v9674_v40 }
 0x566   : > { %v10273_v50 = vadd.f32 %v10225_v12, %v10032_v24  ;;  %v9722_v42 = vadd.f32 %v9675_v3, %v9418_v16 }
 0x568   : > { %v10292_v6 = vmax.f32 %v10273_v50, 0.0  ;;  %v9926_v49 = vpop.f32.mrf.mxu2  ;;  %v9314_v37 = vpop.f32.mrf.mxu0 }
 0x569   : > { %v9985_v54 = vrot.slane %v9926_v49, 5  ;;  %v10167_v2 = vpop.f32.mrf.mxu3  ;;  %v9372_v60 = vrot.slane %v9314_v37, 5  ;;  %v9618_v32 = vpop.f32.mrf.mxu1 }
 0x56a   : > { %10311 = vst [vmem:[%s15988_s20 + $0xbd] sm:$0xff] %v10292_v6  ;;  %v10226_v23 = vrot.slane %v10167_v2, 5  ;;  %v9676_v13 = vrot.slane %v9618_v32, 5 }
 0x56b   : > { %v9986_v7 = vsel %vm5200_vm14, %v9983_v0, %v9985_v54  ;;  %v9373_v21 = vsel %vm5200_vm14, %v9370_v31, %v9372_v60 }
 0x56c   : > { %v10033_v44 = vadd.f32 %v9986_v7, %v9722_v42  ;;  %v10227_v20 = vsel %vm5200_vm14, %v10224_v38, %v10226_v23  ;;  %v9419_v52 = vadd.f32 %v9373_v21, %v16646_v25  ;;  %v9677_v17 = vsel %vm5200_vm14, %v9674_v40, %v9676_v13 }
 0x56e   : > { %v10274_v55 = vadd.f32 %v10227_v20, %v10033_v44  ;;  %v9723_v35 = vadd.f32 %v9677_v17, %v9419_v52 }
 0x570   : > { %v10293_v59 = vmax.f32 %v10274_v55, 0.0  ;;  %v9929_v19 = vpop.f32.mrf.mxu2  ;;  %v9316_v26 = vpop.f32.mrf.mxu0 }
 0x571   : > { %v9987_v39 = vrot.slane %v9929_v19, 5  ;;  %v10170_v56 = vpop.f32.mrf.mxu3  ;;  %v9374_v28 = vrot.slane %v9316_v26, 5  ;;  %v9620_v36 = vpop.f32.mrf.mxu1 }
 0x572   : > { %10312 = vst [vmem:[%s15988_s20 + $0xc5] sm:$0xff] %v10293_v59  ;;  %v10228_v4 = vrot.slane %v10170_v56, 5  ;;  %v9678_v9 = vrot.slane %v9620_v36, 5 }
 0x573   : > { %v9988_v57 = vsel %vm5200_vm14, %v9985_v54, %v9987_v39  ;;  %v9375_v18 = vsel %vm5200_vm14, %v9372_v60, %v9374_v28 }
 0x574   : > { %v10034_v27 = vadd.f32 %v9988_v57, %v9723_v35  ;;  %v10229_v25 = vsel %vm5200_vm14, %v10226_v23, %v10228_v4  ;;  %v9420_v15 = vadd.f32 %v9375_v18, %v16674_v22  ;;  %v9679_v43 = vsel %vm5200_vm14, %v9676_v13, %v9678_v9 }
 0x576   : > { %v10275_v11 = vadd.f32 %v10229_v25, %v10034_v27  ;;  %v9724_v0 = vadd.f32 %v9679_v43, %v9420_v15 }
 0x578   : > { %v10294_v63 = vmax.f32 %v10275_v11, 0.0  ;;  %v9931_v29 = vpop.f32.mrf.mxu2  ;;  %v9319_v10 = vpop.f32.mrf.mxu0 }
 0x579   : > { %v9989_v14 = vrot.slane %v9931_v29, 5  ;;  %v10172_v8 = vpop.f32.mrf.mxu3  ;;  %v9376_v48 = vrot.slane %v9319_v10, 5  ;;  %v9623_v1 = vpop.f32.mrf.mxu1 }
 0x57a   : > { %10313 = vst [vmem:[%s15988_s20 + $0xcd] sm:$0xff] %v10294_v63  ;;  %v10230_v34 = vrot.slane %v10172_v8, 5  ;;  %v9680_v5 = vrot.slane %v9623_v1, 5 }
 0x57b   : > { %v9990_v38 = vsel %vm5200_vm14, %v9987_v39, %v9989_v14  ;;  %v9377_v46 = vsel %vm5200_vm14, %v9374_v28, %v9376_v48 }
 0x57c   : > { %v10035_v31 = vadd.f32 %v9990_v38, %v9724_v0  ;;  %v10231_v22 = vsel %vm5200_vm14, %v10228_v4, %v10230_v34  ;;  %v9421_v30 = vadd.f32 %v9377_v46, %v16685_v61  ;;  %v9681_v50 = vsel %vm5200_vm14, %v9678_v9, %v9680_v5 }
 0x57e   : > { %v10276_v24 = vadd.f32 %v10231_v22, %v10035_v31  ;;  %v9725_v3 = vadd.f32 %v9681_v50, %v9421_v30 }
 0x580   : > { %v10295_v12 = vmax.f32 %v10276_v24, 0.0  ;;  %v9934_v40 = vpop.f32.mrf.mxu2  ;;  %v9321_v49 = vpop.f32.mrf.mxu0 }
 0x581   : > { %v9991_v16 = vrot.slane %v9934_v40, 5  ;;  %v10175_v6 = vpop.f32.mrf.mxu3  ;;  %v9378_v2 = vrot.slane %v9321_v49, 5  ;;  %v9625_v37 = vpop.f32.mrf.mxu1 }
 0x582   : > { %10314 = vst [vmem:[%s15988_s20 + $0xd5] sm:$0xff] %v10295_v12  ;;  %v10232_v54 = vrot.slane %v10175_v6, 5  ;;  %v9682_v32 = vrot.slane %v9625_v37, 5 }
 0x583   : > { %v9992_v42 = vsel %vm5200_vm14, %v9989_v14, %v9991_v16  ;;  %v9379_v60 = vsel %vm5200_vm14, %v9376_v48, %v9378_v2 }
 0x584   : > { %v10036_v23 = vadd.f32 %v9992_v42, %v9725_v3  ;;  %v10233_v61 = vsel %vm5200_vm14, %v10230_v34, %v10232_v54  ;;  %v9422_v44 = vadd.f32 %v9379_v60, %v16713_v62  ;;  %v9683_v13 = vsel %vm5200_vm14, %v9680_v5, %v9682_v32 }
 0x586   : > { %v10277_v7 = vadd.f32 %v10233_v61, %v10036_v23  ;;  %v9726_v19 = vadd.f32 %v9683_v13, %v9422_v44 }
 0x588   : > { %v10296_v21 = vmax.f32 %v10277_v7, 0.0  ;;  %v9936_v20 = vpop.f32.mrf.mxu2  ;;  %v9324_v59 = vpop.f32.mrf.mxu0 }
 0x589   : > { %v9993_v55 = vrot.slane %v9936_v20, 5  ;;  %v10177_v52 = vpop.f32.mrf.mxu3  ;;  %v9380_v39 = vrot.slane %v9324_v59, 5  ;;  %v9628_v56 = vpop.f32.mrf.mxu1 }
 0x58a   : > { %10315 = vst [vmem:[%s15988_s20 + $0xdd] sm:$0xff] %v10296_v21  ;;  %v10234_v17 = vrot.slane %v10177_v52, 5  ;;  %v9684_v28 = vrot.slane %v9628_v56, 5 }
 0x58b   : > { %v9994_v26 = vsel %vm5200_vm14, %v9991_v16, %v9993_v55  ;;  %v9381_v4 = vsel %vm5200_vm14, %v9378_v2, %v9380_v39 }
 0x58c   : > { %v10037_v35 = vadd.f32 %v9994_v26, %v9726_v19  ;;  %v10235_v62 = vsel %vm5200_vm14, %v10232_v54, %v10234_v17  ;;  %v9423_v57 = vadd.f32 %v9381_v4, %v16724_v47  ;;  %v9685_v25 = vsel %vm5200_vm14, %v9682_v32, %v9684_v28 }
 0x58e   : > { %v10278_v36 = vadd.f32 %v10235_v62, %v10037_v35  ;;  %v9727_v63 = vadd.f32 %v9685_v25, %v9423_v57 }
 0x590   : > { %v10297_v27 = vmax.f32 %v10278_v36, 0.0  ;;  %v9939_v18 = vpop.f32.mrf.mxu2  ;;  %v9326_v15 = vpop.f32.mrf.mxu0 }
 0x591   : > { %v9995_v9 = vrot.slane %v9939_v18, 5  ;;  %v10180_v11 = vpop.f32.mrf.mxu3  ;;  %v9382_v43 = vrot.slane %v9326_v15, 5  ;;  %v9630_v14 = vpop.f32.mrf.mxu1 }
 0x592   : > { %10316 = vst [vmem:[%s15988_s20 + $0xe5] sm:$0xff] %v10297_v27  ;;  %v10236_v29 = vrot.slane %v10180_v11, 5  ;;  %v9686_v34 = vrot.slane %v9630_v14, 5 }
 0x593   : > { %v9996_v8 = vsel %vm5200_vm14, %v9993_v55, %v9995_v9  ;;  %v9383_v0 = vsel %vm5200_vm14, %v9380_v39, %v9382_v43 }
 0x594   : > { %v10038_v10 = vadd.f32 %v9996_v8, %v9727_v63  ;;  %v10237_v47 = vsel %vm5200_vm14, %v10234_v17, %v10236_v29  ;;  %v9424_v1 = vadd.f32 %v9383_v0, %v16752_v41  ;;  %v9687_v46 = vsel %vm5200_vm14, %v9684_v28, %v9686_v34 }
 0x596   : > { %v10279_v48 = vadd.f32 %v10237_v47, %v10038_v10  ;;  %v9728_v30 = vadd.f32 %v9687_v46, %v9424_v1 }
 0x598   : > { %v10298_v38 = vmax.f32 %v10279_v48, 0.0  ;;  %v9941_v31 = vpop.f32.mrf.mxu2  ;;  %v9329_v24 = vpop.f32.mrf.mxu0 }
 0x599   : > { %v9997_v22 = vrot.slane %v9941_v31, 5  ;;  %v10182_v5 = vpop.f32.mrf.mxu3  ;;  %v9384_v40 = vrot.slane %v9329_v24, 5  ;;  %v9633_v50 = vpop.f32.mrf.mxu1 }
 0x59a   : > { %10317 = vst [vmem:[%s15988_s20 + $0xed] sm:$0xff] %v10298_v38  ;;  %v10238_v12 = vrot.slane %v10182_v5, 5  ;;  %v9688_v3 = vrot.slane %v9633_v50, 5 }
 0x59b   : > { %v9998_v16 = vsel %vm5200_vm14, %v9995_v9, %v9997_v22  ;;  %v9385_v49 = vsel %vm5200_vm14, %v9382_v43, %v9384_v40 }
 0x59c   : > { %v10039_v6 = vadd.f32 %v9998_v16, %v9728_v30  ;;  %v10239_v41 = vsel %vm5200_vm14, %v10236_v29, %v10238_v12  ;;  %v9425_v2 = vadd.f32 %v9385_v49, %v16764_v51  ;;  %v9689_v23 = vsel %vm5200_vm14, %v9686_v34, %v9688_v3 }
 0x59e   : > { %v10280_v54 = vadd.f32 %v10239_v41, %v10039_v6  ;;  %v9729_v7 = vadd.f32 %v9689_v23, %v9425_v2 }
 0x5a0   : > { %v10299_v37 = vmax.f32 %v10280_v54, 0.0  ;;  %v9944_v42 = vpop.f32.mrf.mxu2  ;;  %v9331_v32 = vpop.f32.mrf.mxu0 }
 0x5a1   : > { %v9999_v60 = vrot.slane %v9944_v42, 5  ;;  %v10185_v61 = vpop.f32.mrf.mxu3  ;;  %v9386_v21 = vrot.slane %v9331_v32, 5  ;;  %v9635_v20 = vpop.f32.mrf.mxu1 }
 0x5a2   : > { %10318 = vst [vmem:[%s15988_s20 + $0xf5] sm:$0xff] %v10299_v37  ;;  %v10240_v44 = vrot.slane %v10185_v61, 5  ;;  %v9690_v59 = vrot.slane %v9635_v20, 5 }
 0x5a3   : > { %v10000_v13 = vsel %vm5200_vm14, %v9997_v22, %v9999_v60  ;;  %v9387_v52 = vsel %vm5200_vm14, %v9384_v40, %v9386_v21 }
 0x5a4   : > { %v10040_v55 = vadd.f32 %v10000_v13, %v9729_v7  ;;  %v10241_v51 = vsel %vm5200_vm14, %v10238_v12, %v10240_v44  ;;  %v9426_v17 = vadd.f32 %v9387_v52, %v16793_v53  ;;  %v9691_v26 = vsel %vm5200_vm14, %v9688_v3, %v9690_v59 }
 0x5a6   : > { %v10281_v19 = vadd.f32 %v10241_v51, %v10040_v55  ;;  %v9730_v28 = vadd.f32 %v9691_v26, %v9426_v17 }
 0x5a8   : > { %v10300_v39 = vmax.f32 %v10281_v19, 0.0  ;;  %v9946_v56 = vpop.f32.mrf.mxu2  ;;  %v9334_v62 = vpop.f32.mrf.mxu0 }
 0x5a9   : > { %v10001_v35 = vrot.slane %v9946_v56, 5  ;;  %v10187_v4 = vpop.f32.mrf.mxu3  ;;  %v9388_v57 = vrot.slane %v9334_v62, 5  ;;  %v9638_v27 = vpop.f32.mrf.mxu1 }
 0x5aa   : > { %10319 = vst [vmem:[%s15988_s20 + $0xfd] sm:$0xff] %v10300_v39  ;;  %v10242_v36 = vrot.slane %v10187_v4, 5  ;;  %v9692_v11 = vrot.slane %v9638_v27, 5 }
 0x5ab   : > { %v10002_v18 = vsel %vm5200_vm14, %v9999_v60, %v10001_v35  ;;  %v9389_v9 = vsel %vm5200_vm14, %v9386_v21, %v9388_v57 }
 0x5ac   : > { %v10041_v25 = vadd.f32 %v10002_v18, %v9730_v28  ;;  %v10243_v53 = vsel %vm5200_vm14, %v10240_v44, %v10242_v36  ;;  %v9427_v63 = vadd.f32 %v9389_v9, %v16805_v33  ;;  %v9693_v14 = vsel %vm5200_vm14, %v9690_v59, %v9692_v11 }
 0x5ae   : > { %v10282_v15 = vadd.f32 %v10243_v53, %v10041_v25  ;;  %v9731_v47 = vadd.f32 %v9693_v14, %v9427_v63 }
 0x5b0   : > { %v10301_v29 = vmax.f32 %v10282_v15, 0.0  ;;  %v9949_v43 = vpop.f32.mrf.mxu2  ;;  %v9336_v0 = vpop.f32.mrf.mxu0 }
 0x5b1   : > { %v10003_v8 = vrot.slane %v9949_v43, 5  ;;  %v10190_v10 = vpop.f32.mrf.mxu3  ;;  %v9390_v48 = vrot.slane %v9336_v0, 5  ;;  %v9640_v1 = vpop.f32.mrf.mxu1 }
 0x5b2   : > { %10320 = vst [vmem:[%s15988_s20 + $0x105] sm:$0xff] %v10301_v29  ;;  %v10244_v34 = vrot.slane %v10190_v10, 5  ;;  %v9694_v5 = vrot.slane %v9640_v1, 5 }
 0x5b3   : > { %v10004_v38 = vsel %vm5200_vm14, %v10001_v35, %v10003_v8  ;;  %v9391_v46 = vsel %vm5200_vm14, %v9388_v57, %v9390_v48  ;;  %v9429_v22 = vadd.f32 %v9390_v48, %v16816_v45 }
 0x5b4   : > { %v10042_v31 = vadd.f32 %v10004_v38, %v9731_v47  ;;  %v10245_v33 = vsel %vm5200_vm14, %v10242_v36, %v10244_v34  ;;  %v9428_v30 = vadd.f32 %v9391_v46, %v16822_v58  ;;  %v9695_v50 = vsel %vm5200_vm14, %v9692_v11, %v9694_v5 }
 0x5b5   : > { %v9733_v16 = vadd.f32 %v9694_v5, %v9429_v22 }
 0x5b6   : > { %v10283_v24 = vadd.f32 %v10245_v33, %v10042_v31  ;;  %v9732_v41 = vadd.f32 %v9695_v50, %v9428_v30 }
 0x5b8   : > { %v10302_v12 = vmax.f32 %v10283_v24, 0.0  ;;  %v9951_v40 = vpop.f32.mrf.mxu2 }
 0x5b9   : > { %v10005_v6 = vrot.slane %v9951_v40, 5  ;;  %v10192_v49 = vpop.f32.mrf.mxu3 }
 0x5ba   : > { %10321 = vst [vmem:[%s15988_s20 + $0x10d] sm:$0xff] %v10302_v12  ;;  %v10246_v3 = vrot.slane %v10192_v49, 5 }
 0x5bb   : > { %v10006_v54 = vsel %vm5200_vm14, %v10003_v8, %v10005_v6  ;;  %v10044_v2 = vadd.f32 %v10005_v6, %v9733_v16 }
 0x5bc   : > { %v10043_v45 = vadd.f32 %v10006_v54, %v9732_v41  ;;  %v10247_v37 = vsel %vm5200_vm14, %v10244_v34, %v10246_v3 }
 0x5bd   : > { %v10285_v42 = vadd.f32 %v10246_v3, %v10044_v2 }
 0x5be   : > { %v10284_v58 = vadd.f32 %v10247_v37, %v10043_v45 }
 0x5bf   : > { %v10304_v23 = vmax.f32 %v10285_v42, 0.0 }
 0x5c0   : > { %v10303_v60 = vmax.f32 %v10284_v58, 0.0 }
 0x5c1   : > { %10323 = vst [vmem:[%s15988_s20 + $0x11d] sm:$0x7] %v10304_v23 }
 0x5c2   : > { %10322 = vst [vmem:[%s15988_s20 + $0x115] sm:$0xff] %v10303_v60 }
 0x5c3 PF: > { %s16_s21 = sadd.s32 1, %s13151_s21  }
 0x5c4   : > { %p13_p4 = scmp.ge.s32.totalorder %s16_s21, 4  }
 0x5c6   :  { %15 = sbr.rel (!%p13_p4) target bundleno = 1 (0x1), region = 90 }

</bundles_post_ra>
